<compile_context>
chip_gen: v7x
topology: tpu7x:2x2x1
jax: 0.10.0
libtpu: 0.0.40
codegen_flags: <defaults>
</compile_context>

<pallas_src>
import functools

import jax
import jax.numpy as jnp
import numpy as np
from jax.experimental import pallas as pl
from jax.experimental.pallas import tpu as pltpu

_LANE = 128
_ROW_PAD = 256               # N padded to a multiple of this; row mask handles the rest
_H_RESIDENT_BYTES = 8 << 20  # keep H fully VMEM-resident in encode below this size


# ---------------------------------------------------------------------------
# small helpers
# ---------------------------------------------------------------------------
def _round_up(x, m):
    return (x + m - 1) // m * m


def _pad2(arr, shape):
    pads = [(0, t - s) for s, t in zip(arr.shape, shape)]
    if all(p == (0, 0) for p in pads):
        return arr
    return jnp.pad(arr, pads)


def _pick_tile(dim, preferred=(512, 256, 128)):
    """Largest preferred tile dividing `dim` (dims fed here are 128-multiples)."""
    for t in preferred:
        if dim % t == 0:
            return t
    return dim


def _row_tile(n_pad):
    # n_pad is a multiple of _ROW_PAD; prefer 512 tiles (~85% of HBM roofline).
    return 512 if n_pad % 512 == 0 else _ROW_PAD


def _vmem_limit(working_set_bytes):
    # 40 MiB cap leaves headroom under v7x's 64 MiB physical VMEM per TC
    # (v5e/v6e have 128 MiB, so this is safe on every generation).
    return int(min(max(2 * working_set_bytes, 8 << 20), 40 << 20))


def _softplus(x):
    # numerically stable softplus: log(1 + exp(-|x|)) + max(x, 0)
    return jnp.log1p(jnp.exp(-jnp.abs(x))) + jnp.maximum(x, 0.0)


# ---------------------------------------------------------------------------
# Kernel 1: shared projection  H = X @ W   (bf16 in, f32 accumulate, bf16 out)
# ---------------------------------------------------------------------------
def _matmul_kernel(x_ref, w_ref, h_ref, acc_ref):
    @pl.when(pl.program_id(2) == 0)
    def _init():
        acc_ref[...] = jnp.zeros_like(acc_ref)

    acc_ref[...] += jnp.dot(x_ref[...], w_ref[...],
                            preferred_element_type=jnp.float32)

    @pl.when(pl.program_id(2) == pl.num_programs(2) - 1)
    def _store():
        h_ref[...] = acc_ref[...].astype(h_ref.dtype)


def project(x, w):
    m, k = x.shape
    _, n = w.shape
    tm = _row_tile(m)                        # m is the padded node dim
    tn = n if n <= 512 else _pick_tile(n)    # full feature width when small
    tk = _pick_tile(k)
    working = 2 * (tm * tk + tk * tn) * 2 + 2 * tm * tn * 2 + tm * tn * 4
    return pl.pallas_call(
        _matmul_kernel,
        out_shape=jax.ShapeDtypeStruct((m, n), jnp.bfloat16),
        grid=(m // tm, n // tn, k // tk),
        in_specs=[
            pl.BlockSpec((tm, tk), lambda i, j, kk: (i, kk)),
            pl.BlockSpec((tk, tn), lambda i, j, kk: (kk, j)),
        ],
        out_specs=pl.BlockSpec((tm, tn), lambda i, j, kk: (i, j)),
        scratch_shapes=[pltpu.VMEM((tm, tn), jnp.float32)],
        compiler_params=pltpu.CompilerParams(
            dimension_semantics=("parallel", "parallel", "arbitrary"),
            vmem_limit_bytes=_vmem_limit(working)),
        cost_estimate=pl.CostEstimate(
            flops=2 * m * n * k, transcendentals=0,
            bytes_accessed=2 * (m * k + k * n + m * n)),
    )(x, w)


# ---------------------------------------------------------------------------
# Kernel 2: GCN propagation for both graphs  Z[g] = ReLU(A[g] @ H + b)
#   * single full-width output-feature tile  -> A streamed exactly once per graph
#   * H fully VMEM-resident (constant index_map) when it fits, K sliced via pl.ds
#   * z_pos column-sum fused into the k==last epilogue (per-row-tile partials)
# ---------------------------------------------------------------------------
def _encode_kernel(a_ref, h_ref, b_ref, z_ref, colsum_ref, acc_ref, *,
                   tm, tk, n_real, n_pad, h_resident):
    k = pl.program_id(2)

    @pl.when(k == 0)
    def _init():
        acc_ref[...] = jnp.zeros_like(acc_ref)

    if h_resident:
        start = pl.multiple_of(k * tk, tk)
        h_blk = h_ref[pl.ds(start, tk), :]
    else:
        h_blk = h_ref[...]
    acc_ref[...] += jnp.dot(a_ref[...], h_blk,
                            preferred_element_type=jnp.float32)

    @pl.when(k == pl.num_programs(2) - 1)
    def _store():
        z = jnp.maximum(acc_ref[...] + b_ref[...], 0.0)        # bias + ReLU in f32
        if n_pad != n_real:                                    # mask padded rows
            rows = (pl.program_id(1) * tm +
                    jax.lax.broadcasted_iota(jnp.int32, z.shape, 0))
            z = jnp.where(rows < n_real, z, 0.0)
        z_bf = z.astype(z_ref.dtype)
        z_ref[...] = z_bf
        colsum = jnp.sum(z_bf.astype(jnp.float32), axis=0, keepdims=True)
        colsum_ref[...] = jnp.broadcast_to(colsum, colsum_ref.shape)


def encode(a_stacked, h, bias, n_real):
    g, n_pad, _ = a_stacked.shape            # (2, N_pad, N_pad) bf16
    d = h.shape[1]
    tm = _row_tile(n_pad)
    tk = tm
    n_tiles = n_pad // tm
    h_resident = (n_pad * d * 2) <= _H_RESIDENT_BYTES
    if h_resident:
        h_spec = pl.BlockSpec((n_pad, d), lambda gg, i, kk: (0, 0))
        h_bytes = n_pad * d * 2
    else:
        h_spec = pl.BlockSpec((tk, d), lambda gg, i, kk: (kk, 0))
        h_bytes = 2 * tk * d * 2
    working = (2 * tm * tk * 2 + h_bytes + tm * d * 4
               + 2 * tm * d * 2 + 2 * 8 * d * 4 + d * 4)
    kernel = functools.partial(_encode_kernel, tm=tm, tk=tk, n_real=n_real,
                               n_pad=n_pad, h_resident=h_resident)
    return pl.pallas_call(
        kernel,
        out_shape=(jax.ShapeDtypeStruct((g, n_pad, d), jnp.bfloat16),
                   jax.ShapeDtypeStruct((g, n_tiles, 8, d), jnp.float32)),
        grid=(g, n_tiles, n_pad // tk),
        in_specs=[
            pl.BlockSpec((None, tm, tk), lambda gg, i, kk: (gg, i, kk)),
            h_spec,
            pl.BlockSpec((1, d), lambda gg, i, kk: (0, 0)),
        ],
        out_specs=(
            pl.BlockSpec((None, tm, d), lambda gg, i, kk: (gg, i, 0)),
            pl.BlockSpec((None, None, 8, d), lambda gg, i, kk: (gg, i, 0, 0)),
        ),
        scratch_shapes=[pltpu.VMEM((tm, d), jnp.float32)],
        compiler_params=pltpu.CompilerParams(
            dimension_semantics=("parallel", "parallel", "arbitrary"),
            vmem_limit_bytes=_vmem_limit(working)),
        cost_estimate=pl.CostEstimate(
            flops=2 * g * n_pad * n_pad * d, transcendentals=0,
            bytes_accessed=2 * (g * n_pad * n_pad + n_pad * d + g * n_pad * d)),
    )(a_stacked, h, bias)


# ---------------------------------------------------------------------------
# Kernel 3: BCE-with-logits DGI loss partials, tiled over N (parallel axis)
#   score_i = z_i . s_vec ; per-tile partial sum of softplus terms written to its
#   own (8,128) block; final scalar reduce happens in the wrapper.
# ---------------------------------------------------------------------------
def _loss_kernel(z_ref, svec_ref, part_ref, *, tm, n_real, n_pad):
    svec = svec_ref[...]                                        # [1, D] f32
    zp = z_ref[0].astype(jnp.float32)                           # [tm, D]
    zn = z_ref[1].astype(jnp.float32)
    pos_score = jnp.sum(zp * svec, axis=-1, keepdims=True)      # [tm, 1]
    neg_score = jnp.sum(zn * svec, axis=-1, keepdims=True)
    per_row = _softplus(-pos_score) + _softplus(neg_score)      # [tm, 1]
    if n_pad != n_real:                                         # mask padded rows
        rows = (pl.program_id(0) * tm +
                jax.lax.broadcasted_iota(jnp.int32, per_row.shape, 0))
        per_row = jnp.where(rows < n_real, per_row, 0.0)
    part = jnp.sum(per_row)
    part_ref[...] = jnp.broadcast_to(jnp.reshape(part, (1, 1)), part_ref.shape)


def dgi_loss_partials(z_stacked, svec, n_real):
    _, n_pad, d = z_stacked.shape
    tm = _row_tile(n_pad)
    n_tiles = n_pad // tm
    working = 2 * (2 * tm * d * 2) + d * 4 + 2 * 8 * _LANE * 4
    kernel = functools.partial(_loss_kernel, tm=tm, n_real=n_real, n_pad=n_pad)
    return pl.pallas_call(
        kernel,
        out_shape=jax.ShapeDtypeStruct((n_tiles, 8, _LANE), jnp.float32),
        grid=(n_tiles,),
        in_specs=[
            pl.BlockSpec((2, tm, d), lambda i: (0, i, 0)),      # [z_pos; z_neg] tile
            pl.BlockSpec((1, d), lambda i: (0, 0)),             # s_vec
        ],
        out_specs=pl.BlockSpec((None, 8, _LANE), lambda i: (i, 0, 0)),
        compiler_params=pltpu.CompilerParams(
            dimension_semantics=("parallel",),
            vmem_limit_bytes=_vmem_limit(working)),
    )(z_stacked, svec)


# ---------------------------------------------------------------------------
# Glue: adjacency construction + full forward
# ---------------------------------------------------------------------------
def normalized_adjacency(edge_index, num_nodes):
    """Dense symmetric-normalized adjacency with self loops (plain JAX glue)."""
    src, dst = edge_index[0], edge_index[1]
    a = jnp.zeros((num_nodes, num_nodes), jnp.float32)
    a = a.at[src, dst].set(1.0)
    a = a.at[dst, src].set(1.0)
    a = a + jnp.eye(num_nodes, dtype=jnp.float32)
    deg = jnp.sum(a, axis=1)
    dinv = jax.lax.rsqrt(deg)
    return a * dinv[:, None] * dinv[None, :]


@jax.jit
def embedding_method_forward(params, x, edge_index, pos_samples, neg_samples):
    """forward(x, edge_index, pos_samples, neg_samples) -> scalar loss.

    EuclideanInfomax branch: edge_index is unused (matches the PyTorch forward);
    pos_samples / neg_samples are edge-index tensors fed to the encoder.
    """
    del edge_index
    n, f = x.shape
    d = params["w"].shape[1]
    f_pad = _round_up(f, _LANE)
    d_pad = _round_up(d, _LANE)
    n_pad = _round_up(n, _ROW_PAD)

    # Lane-dense, zero-padded operands.  Feature-dim padding is neutral for this
    # loss (zero W/b columns -> zero z columns; zero Wd rows/cols -> zero svec
    # entries); padded rows are explicitly masked inside the kernels.
    x_p = _pad2(x, (n_pad, f_pad)).astype(jnp.bfloat16)
    w_p = _pad2(params["w"], (f_pad, d_pad)).astype(jnp.bfloat16)
    b_p = _pad2(params["b"].reshape(1, -1), (1, d_pad)).astype(jnp.float32)
    wd_p = _pad2(params["w_d"], (d_pad, d_pad)).astype(jnp.float32)

    a_pos = _pad2(normalized_adjacency(pos_samples, n), (n_pad, n_pad))
    a_neg = _pad2(normalized_adjacency(neg_samples, n), (n_pad, n_pad))
    a = jnp.stack([a_pos, a_neg]).astype(jnp.bfloat16)

    h = project(x_p, w_p)                         # [N_pad, D_pad] bf16, shared
    z, colsum_parts = encode(a, h, b_p, n)        # [2,N_pad,D_pad], [2,T,8,D_pad]

    # summary / s_vec: tiny ops, done in the wrapper (no extra HBM pass over z_pos)
    colsum = jnp.sum(colsum_parts[0, :, 0, :], axis=0)         # [D_pad] f32
    summary = jax.nn.sigmoid(colsum * (1.0 / float(n)))        # sigmoid(mean_n z_pos)
    svec = (wd_p @ summary).reshape(1, d_pad)                  # Wd @ summary

    parts = dgi_loss_partials(z, svec, n)                      # [T, 8, 128]
    loss = jnp.sum(parts[:, 0, 0]) * (1.0 / float(n))
    return loss


# ---------------------------------------------------------------------------
# Pure-JAX references for verification
# ---------------------------------------------------------------------------
def reference_forward_f32(params, x, pos_samples, neg_samples):
    n = x.shape[0]

    def enc(adj):
        return jnp.maximum(adj @ x @ params["w"] + params["b"], 0.0)

    zp = enc(normalized_adjacency(pos_samples, n))
    zn = enc(normalized_adjacency(neg_samples, n))
    summary = jax.nn.sigmoid(jnp.mean(zp, axis=0))
    pos_score = (zp @ params["w_d"]) @ summary
    neg_score = (zn @ params["w_d"]) @ summary
    return jnp.mean(jax.nn.softplus(-pos_score)) + jnp.mean(jax.nn.softplus(neg_score))


def reference_forward_bf16(params, x, pos_samples, neg_samples):
    """Reference mirroring the kernels' bf16-operand / f32-accumulate numerics."""
    n = x.shape[0]
    bf = jnp.bfloat16
    w = params["w"].astype(bf)
    b = params["b"].astype(jnp.float32)

    def enc(adj):
        h = jax.lax.dot(x.astype(bf), w, preferred_element_type=jnp.float32).astype(bf)
        z = jax.lax.dot(adj.astype(bf), h, preferred_element_type=jnp.float32) + b
        return jnp.maximum(z, 0.0).astype(bf)

    zp = enc(normalized_adjacency(pos_samples, n))
    zn = enc(normalized_adjacency(neg_samples, n))
    summary = jax.nn.sigmoid(jnp.mean(zp.astype(jnp.float32), axis=0))
    svec = params["w_d"] @ summary
    pos_score = zp.astype(jnp.float32) @ svec
    neg_score = zn.astype(jnp.float32) @ svec
    return jnp.mean(jax.nn.softplus(-pos_score)) + jnp.mean(jax.nn.softplus(neg_score))


if __name__ == "__main__":
    # nodes, in-features, hidden dim, num edges (F, D deliberately non-128-aligned
    # to exercise the lane-padding path).
    N, F, D, E = 512, 192, 96, 2048

    key = jax.random.PRNGKey(0)
    k_x, k_w, k_b, k_wd, k_pe, k_ne, k_e = jax.random.split(key, 7)

    x = jax.random.normal(k_x, (N, F), jnp.float32)
    params = {
        "w": jax.random.normal(k_w, (F, D), jnp.float32) * 0.1,
        "b": jax.random.normal(k_b, (1, D), jnp.float32) * 0.1,
        "w_d": jax.random.normal(k_wd, (D, D), jnp.float32) * 0.1,
    }
    edge_index = jax.random.randint(k_e, (2, E), 0, N)    # unused in Infomax branch
    pos_samples = jax.random.randint(k_pe, (2, E), 0, N)  # "positive" graph edges
    neg_samples = jax.random.randint(k_ne, (2, E), 0, N)  # "corrupted" graph edges

    loss = embedding_method_forward(params, x, edge_index, pos_samples, neg_samples)
    loss = jax.block_until_ready(loss)

    # tight check against a bf16-matmul-matched reference
    ref_bf16 = reference_forward_bf16(params, x, pos_samples, neg_samples)
    np.testing.assert_allclose(np.asarray(loss), np.asarray(ref_bf16),
                               rtol=5e-3, atol=5e-3)
    # loose semantic check against the full-f32 reference
    ref_f32 = reference_forward_f32(params, x, pos_samples, neg_samples)
    np.testing.assert_allclose(np.asarray(loss), np.asarray(ref_f32),
                               rtol=5e-2, atol=5e-2)

    print("KERNEL_OK")
</pallas_src>

<mosaic_0001>
module attributes {stable_mosaic.version = 11 : i64} {
  func.func @_matmul_kernel(%arg0: i32, %arg1: i32, %arg2: i32, %arg3: memref<512x256xbf16, #tpu.memory_space<vmem>>, %arg4: memref<256x128xbf16, #tpu.memory_space<vmem>>, %arg5: memref<512x128xbf16, #tpu.memory_space<vmem>>, %arg6: memref<512x128xf32, #tpu.memory_space<vmem>>) attributes {dimension_semantics = [#tpu.dimension_semantics<parallel>, #tpu.dimension_semantics<parallel>, #tpu.dimension_semantics<arbitrary>], iteration_bounds = array<i64: 1, 1, 1>, scalar_prefetch = 0 : i64, scratch_operands = 1 : i64, tpu.core_type = #tpu.core_type<tc>, window_params = [{transform_indices = @transform_0, window_bounds = array<i64: 512, 256>}, {transform_indices = @transform_1, window_bounds = array<i64: 256, 128>}, {transform_indices = @transform_2, window_bounds = array<i64: 512, 128>}]} {
    %c0_i32 = arith.constant 0 : i32
    %0 = arith.cmpi eq, %arg2, %c0_i32 : i32
    %1 = arith.extui %0 : i1 to i32
    %c0_i32_0 = arith.constant 0 : i32
    %2 = arith.cmpi ne, %1, %c0_i32_0 : i32
    scf.if %2 {
      %cst_10 = arith.constant 0.000000e+00 : f32
      %12 = vector.broadcast %cst_10 : f32 to vector<512x128xf32>
      %c0_11 = arith.constant 0 : index
      %c0_12 = arith.constant 0 : index
      %13 = vector.load %arg6[%c0_11, %c0_12] : memref<512x128xf32, #tpu.memory_space<vmem>>, vector<512x128xf32>
      tpu.vector_store %arg6[%c0_11, %c0_12], %12 {strides = array<i32>} : memref<512x128xf32, #tpu.memory_space<vmem>>, vector<512x128xf32>,
    } else {
    }
    %c0 = arith.constant 0 : index
    %c0_1 = arith.constant 0 : index
    %3 = vector.load %arg6[%c0, %c0_1] : memref<512x128xf32, #tpu.memory_space<vmem>>, vector<512x128xf32>
    %c0_2 = arith.constant 0 : index
    %c0_3 = arith.constant 0 : index
    %4 = vector.load %arg3[%c0_2, %c0_3] : memref<512x256xbf16, #tpu.memory_space<vmem>>, vector<512x256xbf16>
    %c0_4 = arith.constant 0 : index
    %c0_5 = arith.constant 0 : index
    %5 = vector.load %arg4[%c0_4, %c0_5] : memref<256x128xbf16, #tpu.memory_space<vmem>>, vector<256x128xbf16>
    %cst = arith.constant dense<0.000000e+00> : vector<512x128xf32>
    %6 = tpu.matmul %4, %5, %cst {dimension_numbers = #tpu.dot_dimension_numbers<[1], [0], [0], [1], [0, 0, 1, 1], [], []>} : vector<512x256xbf16>, vector<256x128xbf16>, vector<512x128xf32> -> vector<512x128xf32>
    %7 = arith.addf %3, %6 : vector<512x128xf32>
    %c0_6 = arith.constant 0 : index
    %c0_7 = arith.constant 0 : index
    %8 = vector.load %arg6[%c0_6, %c0_7] : memref<512x128xf32, #tpu.memory_space<vmem>>, vector<512x128xf32>
    tpu.vector_store %arg6[%c0_6, %c0_7], %7 {strides = array<i32>} : memref<512x128xf32, #tpu.memory_space<vmem>>, vector<512x128xf32>,
    %c0_i32_8 = arith.constant 0 : i32
    %9 = arith.cmpi eq, %arg2, %c0_i32_8 : i32
    %10 = arith.extui %9 : i1 to i32
    %c0_i32_9 = arith.constant 0 : i32
    %11 = arith.cmpi ne, %10, %c0_i32_9 : i32
    scf.if %11 {
      %c0_10 = arith.constant 0 : index
      %c0_11 = arith.constant 0 : index
      %12 = vector.load %arg6[%c0_10, %c0_11] : memref<512x128xf32, #tpu.memory_space<vmem>>, vector<512x128xf32>
      %13 = arith.truncf %12 : vector<512x128xf32> to vector<512x128xbf16>
      %c0_12 = arith.constant 0 : index
      %c0_13 = arith.constant 0 : index
      %14 = vector.load %arg5[%c0_12, %c0_13] : memref<512x128xbf16, #tpu.memory_space<vmem>>, vector<512x128xbf16>
      tpu.vector_store %arg5[%c0_12, %c0_13], %13 {strides = array<i32>} : memref<512x128xbf16, #tpu.memory_space<vmem>>, vector<512x128xbf16>,
    } else {
    }
    return
  }
  func.func @transform_0(%arg0: i32, %arg1: i32, %arg2: i32) -> (i32, i32) {
    %c0_i32 = arith.constant 0 : i32
    return %arg0, %arg2 : i32, i32
  }
  func.func @transform_1(%arg0: i32, %arg1: i32, %arg2: i32) -> (i32, i32) {
    %c0_i32 = arith.constant 0 : i32
    return %arg2, %arg1 : i32, i32
  }
  func.func @transform_2(%arg0: i32, %arg1: i32, %arg2: i32) -> (i32, i32) {
    %c0_i32 = arith.constant 0 : i32
    return %arg0, %arg1 : i32, i32
  }
}

module attributes {stable_mosaic.version = 11 : i64} {
  func.func @_loss_kernel(%arg0: i32, %arg1: memref<2x512x128xbf16, #tpu.memory_space<vmem>>, %arg2: memref<1x128xf32, #tpu.memory_space<vmem>>, %arg3: memref<1x8x128xf32, #tpu.memory_space<vmem>>) attributes {dimension_semantics = [#tpu.dimension_semantics<parallel>], iteration_bounds = array<i64: 1>, scalar_prefetch = 0 : i64, scratch_operands = 0 : i64, tpu.core_type = #tpu.core_type<tc>, window_params = [{transform_indices = @transform_0, window_bounds = array<i64: 2, 512, 128>}, {pipeline_mode = #tpu.pipeline_mode<synchronous>, transform_indices = @transform_1, window_bounds = array<i64: 1, 128>}, {transform_indices = @transform_2, window_bounds = array<i64: 1, 8, 128>}]} {
    %c0 = arith.constant 0 : index
    %c0_0 = arith.constant 0 : index
    %0 = vector.load %arg2[%c0, %c0_0] : memref<1x128xf32, #tpu.memory_space<vmem>>, vector<1x128xf32>
    %c0_1 = arith.constant 0 : index
    %c0_2 = arith.constant 0 : index
    %c0_3 = arith.constant 0 : index
    %1 = vector.load %arg1[%c0_1, %c0_2, %c0_3] : memref<2x512x128xbf16, #tpu.memory_space<vmem>>, vector<1x512x128xbf16>
    %2 = vector.shape_cast %1 : vector<1x512x128xbf16> to vector<512x128xbf16>
    %3 = arith.extf %2 : vector<512x128xbf16> to vector<512x128xf32>
    %c1 = arith.constant 1 : index
    %c0_4 = arith.constant 0 : index
    %c0_5 = arith.constant 0 : index
    %4 = vector.load %arg1[%c1, %c0_4, %c0_5] : memref<2x512x128xbf16, #tpu.memory_space<vmem>>, vector<1x512x128xbf16>
    %5 = vector.shape_cast %4 : vector<1x512x128xbf16> to vector<512x128xbf16>
    %6 = arith.extf %5 : vector<512x128xbf16> to vector<512x128xf32>
    %7 = vector.broadcast %0 : vector<1x128xf32> to vector<512x128xf32>
    %8 = arith.mulf %3, %7 : vector<512x128xf32>
    %cst = arith.constant dense<0.000000e+00> : vector<512xf32>
    %9 = vector.multi_reduction <add>, %8, %cst [1] : vector<512x128xf32> to vector<512xf32>
    %10 = vector.shape_cast %9 : vector<512xf32> to vector<512x1xf32>
    %11 = vector.broadcast %0 : vector<1x128xf32> to vector<512x128xf32>
    %12 = arith.mulf %6, %11 : vector<512x128xf32>
    %cst_6 = arith.constant dense<0.000000e+00> : vector<512xf32>
    %13 = vector.multi_reduction <add>, %12, %cst_6 [1] : vector<512x128xf32> to vector<512xf32>
    %14 = vector.shape_cast %13 : vector<512xf32> to vector<512x1xf32>
    %cst_7 = arith.constant 0.000000e+00 : f32
    %15 = vector.broadcast %cst_7 : f32 to vector<512x1xf32>
    %16 = arith.subf %15, %10 : vector<512x1xf32>
    %17 = math.absf %16 : vector<512x1xf32>
    %cst_8 = arith.constant 0.000000e+00 : f32
    %18 = vector.broadcast %cst_8 : f32 to vector<512x1xf32>
    %19 = arith.subf %18, %17 : vector<512x1xf32>
    %20 = math.exp %19 : vector<512x1xf32>
    %21 = math.log1p %20 : vector<512x1xf32>
    %cst_9 = arith.constant 0.000000e+00 : f32
    %22 = vector.broadcast %cst_9 : f32 to vector<512x1xf32>
    %23 = arith.maximumf %16, %22 : vector<512x1xf32>
    %24 = arith.addf %21, %23 : vector<512x1xf32>
    %25 = math.absf %14 : vector<512x1xf32>
    %cst_10 = arith.constant 0.000000e+00 : f32
    %26 = vector.broadcast %cst_10 : f32 to vector<512x1xf32>
    %27 = arith.subf %26, %25 : vector<512x1xf32>
    %28 = math.exp %27 : vector<512x1xf32>
    %29 = math.log1p %28 : vector<512x1xf32>
    %cst_11 = arith.constant 0.000000e+00 : f32
    %30 = vector.broadcast %cst_11 : f32 to vector<512x1xf32>
    %31 = arith.maximumf %14, %30 : vector<512x1xf32>
    %32 = arith.addf %29, %31 : vector<512x1xf32>
    %33 = arith.addf %24, %32 : vector<512x1xf32>
    %34 = vector.shape_cast %33 : vector<512x1xf32> to vector<1x512x1xf32>
    %cst_12 = arith.constant dense<0.000000e+00> : vector<1xf32>
    %35 = vector.multi_reduction <add>, %34, %cst_12 [1, 2] : vector<1x512x1xf32> to vector<1xf32>
    %36 = vector.shape_cast %35 : vector<1xf32> to vector<1x1x1xf32>
    %37 = vector.extract %36[0, 0, 0] : f32 from vector<1x1x1xf32>
    %38 = vector.broadcast %37 : f32 to vector<1x1xf32>
    %39 = vector.shape_cast %38 : vector<1x1xf32> to vector<1x1xf32>
    %40 = vector.broadcast %39 : vector<1x1xf32> to vector<8x128xf32>
    %c0_13 = arith.constant 0 : index
    %c0_14 = arith.constant 0 : index
    %c0_15 = arith.constant 0 : index
    %41 = vector.load %arg3[%c0_13, %c0_14, %c0_15] : memref<1x8x128xf32, #tpu.memory_space<vmem>>, vector<1x8x128xf32>
    %42 = vector.shape_cast %41 : vector<1x8x128xf32> to vector<8x128xf32>
    %43 = vector.shape_cast %40 : vector<8x128xf32> to vector<1x8x128xf32>
    tpu.vector_store %arg3[%c0_13, %c0_14, %c0_15], %43 {strides = array<i32>} : memref<1x8x128xf32, #tpu.memory_space<vmem>>, vector<1x8x128xf32>,
    return
  }
  func.func @transform_0(%arg0: i32) -> (i32, i32, i32) {
    %c0_i32 = arith.constant 0 : i32
    %c0_i32_0 = arith.constant 0 : i32
    %c0_i32_1 = arith.constant 0 : i32
    return %c0_i32, %arg0, %c0_i32_0 : i32, i32, i32
  }
  func.func @transform_1(%arg0: i32) -> (i32, i32) {
    %c0_i32 = arith.constant 0 : i32
    %c0_i32_0 = arith.constant 0 : i32
    %c0_i32_1 = arith.constant 0 : i32
    return %c0_i32, %c0_i32_0 : i32, i32
  }
  func.func @transform_2(%arg0: i32) -> (i32, i32, i32) {
    %c0_i32 = arith.constant 0 : i32
    %c0_i32_0 = arith.constant 0 : i32
    %c0_i32_1 = arith.constant 0 : i32
    return %arg0, %c0_i32, %c0_i32_0 : i32, i32, i32
  }
}

module attributes {stable_mosaic.version = 11 : i64} {
  func.func @_encode_kernel(%arg0: i32, %arg1: i32, %arg2: i32, %arg3: memref<1x512x512xbf16, #tpu.memory_space<vmem>>, %arg4: memref<512x128xbf16, #tpu.memory_space<vmem>>, %arg5: memref<1x128xf32, #tpu.memory_space<vmem>>, %arg6: memref<1x512x128xbf16, #tpu.memory_space<vmem>>, %arg7: memref<1x1x8x128xf32, #tpu.memory_space<vmem>>, %arg8: memref<512x128xf32, #tpu.memory_space<vmem>>) attributes {dimension_semantics = [#tpu.dimension_semantics<parallel>, #tpu.dimension_semantics<parallel>, #tpu.dimension_semantics<arbitrary>], iteration_bounds = array<i64: 2, 1, 1>, scalar_prefetch = 0 : i64, scratch_operands = 1 : i64, tpu.core_type = #tpu.core_type<tc>, window_params = [{transform_indices = @transform_0, window_bounds = array<i64: 1, 512, 512>}, {pipeline_mode = #tpu.pipeline_mode<synchronous>, transform_indices = @transform_1, window_bounds = array<i64: 512, 128>}, {pipeline_mode = #tpu.pipeline_mode<synchronous>, transform_indices = @transform_2, window_bounds = array<i64: 1, 128>}, {transform_indices = @transform_3, window_bounds = array<i64: 1, 512, 128>}, {transform_indices = @transform_4, window_bounds = array<i64: 1, 1, 8, 128>}]} {
    %c0_i32 = arith.constant 0 : i32
    %0 = arith.cmpi eq, %arg2, %c0_i32 : i32
    %1 = arith.extui %0 : i1 to i32
    %c0_i32_0 = arith.constant 0 : i32
    %2 = arith.cmpi ne, %1, %c0_i32_0 : i32
    scf.if %2 {
      %cst_10 = arith.constant 0.000000e+00 : f32
      %16 = vector.broadcast %cst_10 : f32 to vector<512x128xf32>
      %c0_11 = arith.constant 0 : index
      %c0_12 = arith.constant 0 : index
      %17 = vector.load %arg8[%c0_11, %c0_12] : memref<512x128xf32, #tpu.memory_space<vmem>>, vector<512x128xf32>
      tpu.vector_store %arg8[%c0_11, %c0_12], %16 {strides = array<i32>} : memref<512x128xf32, #tpu.memory_space<vmem>>, vector<512x128xf32>,
    } else {
    }
    %c512_i32 = arith.constant 512 : i32
    %3 = arith.muli %arg2, %c512_i32 : i32
    %4 = tpu.assume_multiple %3, 512 : i32
    %5 = arith.index_cast %4 : i32 to index
    %c0 = arith.constant 0 : index
    %6 = vector.load %arg4[%5, %c0] : memref<512x128xbf16, #tpu.memory_space<vmem>>, vector<512x128xbf16>
    %c0_1 = arith.constant 0 : index
    %c0_2 = arith.constant 0 : index
    %7 = vector.load %arg8[%c0_1, %c0_2] : memref<512x128xf32, #tpu.memory_space<vmem>>, vector<512x128xf32>
    %c0_3 = arith.constant 0 : index
    %c0_4 = arith.constant 0 : index
    %c0_5 = arith.constant 0 : index
    %8 = vector.load %arg3[%c0_3, %c0_4, %c0_5] : memref<1x512x512xbf16, #tpu.memory_space<vmem>>, vector<1x512x512xbf16>
    %9 = vector.shape_cast %8 : vector<1x512x512xbf16> to vector<512x512xbf16>
    %cst = arith.constant dense<0.000000e+00> : vector<512x128xf32>
    %10 = tpu.matmul %9, %6, %cst {dimension_numbers = #tpu.dot_dimension_numbers<[1], [0], [0], [1], [0, 0, 1, 1], [], []>} : vector<512x512xbf16>, vector<512x128xbf16>, vector<512x128xf32> -> vector<512x128xf32>
    %11 = arith.addf %7, %10 : vector<512x128xf32>
    %c0_6 = arith.constant 0 : index
    %c0_7 = arith.constant 0 : index
    %12 = vector.load %arg8[%c0_6, %c0_7] : memref<512x128xf32, #tpu.memory_space<vmem>>, vector<512x128xf32>
    tpu.vector_store %arg8[%c0_6, %c0_7], %11 {strides = array<i32>} : memref<512x128xf32, #tpu.memory_space<vmem>>, vector<512x128xf32>,
    %c0_i32_8 = arith.constant 0 : i32
    %13 = arith.cmpi eq, %arg2, %c0_i32_8 : i32
    %14 = arith.extui %13 : i1 to i32
    %c0_i32_9 = arith.constant 0 : i32
    %15 = arith.cmpi ne, %14, %c0_i32_9 : i32
    scf.if %15 {
      %c0_10 = arith.constant 0 : index
      %c0_11 = arith.constant 0 : index
      %16 = vector.load %arg8[%c0_10, %c0_11] : memref<512x128xf32, #tpu.memory_space<vmem>>, vector<512x128xf32>
      %c0_12 = arith.constant 0 : index
      %c0_13 = arith.constant 0 : index
      %17 = vector.load %arg5[%c0_12, %c0_13] : memref<1x128xf32, #tpu.memory_space<vmem>>, vector<1x128xf32>
      %18 = vector.broadcast %17 : vector<1x128xf32> to vector<512x128xf32>
      %19 = arith.addf %16, %18 : vector<512x128xf32>
      %cst_14 = arith.constant 0.000000e+00 : f32
      %20 = vector.broadcast %cst_14 : f32 to vector<512x128xf32>
      %21 = arith.maximumf %19, %20 : vector<512x128xf32>
      %22 = arith.truncf %21 : vector<512x128xf32> to vector<512x128xbf16>
      %c0_15 = arith.constant 0 : index
      %c0_16 = arith.constant 0 : index
      %c0_17 = arith.constant 0 : index
      %23 = vector.load %arg6[%c0_15, %c0_16, %c0_17] : memref<1x512x128xbf16, #tpu.memory_space<vmem>>, vector<1x512x128xbf16>
      %24 = vector.shape_cast %23 : vector<1x512x128xbf16> to vector<512x128xbf16>
      %25 = vector.shape_cast %22 : vector<512x128xbf16> to vector<1x512x128xbf16>
      tpu.vector_store %arg6[%c0_15, %c0_16, %c0_17], %25 {strides = array<i32>} : memref<1x512x128xbf16, #tpu.memory_space<vmem>>, vector<1x512x128xbf16>,
      %26 = arith.extf %22 : vector<512x128xbf16> to vector<512x128xf32>
      %cst_18 = arith.constant dense<0.000000e+00> : vector<128xf32>
      %27 = vector.multi_reduction <add>, %26, %cst_18 [0] : vector<512x128xf32> to vector<128xf32>
      %28 = vector.shape_cast %27 : vector<128xf32> to vector<1x128xf32>
      %29 = vector.shape_cast %28 : vector<1x128xf32> to vector<1x128xf32>
      %30 = vector.broadcast %29 : vector<1x128xf32> to vector<8x128xf32>
      %c0_19 = arith.constant 0 : index
      %c0_20 = arith.constant 0 : index
      %c0_21 = arith.constant 0 : index
      %c0_22 = arith.constant 0 : index
      %31 = vector.load %arg7[%c0_19, %c0_20, %c0_21, %c0_22] : memref<1x1x8x128xf32, #tpu.memory_space<vmem>>, vector<1x1x8x128xf32>
      %32 = vector.shape_cast %31 : vector<1x1x8x128xf32> to vector<8x128xf32>
      %33 = vector.shape_cast %30 : vector<8x128xf32> to vector<1x1x8x128xf32>
      tpu.vector_store %arg7[%c0_19, %c0_20, %c0_21, %c0_22], %33 {strides = array<i32>} : memref<1x1x8x128xf32, #tpu.memory_space<vmem>>, vector<1x1x8x128xf32>,
    } else {
    }
    return
  }
  func.func @transform_0(%arg0: i32, %arg1: i32, %arg2: i32) -> (i32, i32, i32) {
    %c0_i32 = arith.constant 0 : i32
    return %arg0, %arg1, %arg2 : i32, i32, i32
  }
  func.func @transform_1(%arg0: i32, %arg1: i32, %arg2: i32) -> (i32, i32) {
    %c0_i32 = arith.constant 0 : i32
    %c0_i32_0 = arith.constant 0 : i32
    %c0_i32_1 = arith.constant 0 : i32
    return %c0_i32, %c0_i32_0 : i32, i32
  }
  func.func @transform_2(%arg0: i32, %arg1: i32, %arg2: i32) -> (i32, i32) {
    %c0_i32 = arith.constant 0 : i32
    %c0_i32_0 = arith.constant 0 : i32
    %c0_i32_1 = arith.constant 0 : i32
    return %c0_i32, %c0_i32_0 : i32, i32
  }
  func.func @transform_3(%arg0: i32, %arg1: i32, %arg2: i32) -> (i32, i32, i32) {
    %c0_i32 = arith.constant 0 : i32
    %c0_i32_0 = arith.constant 0 : i32
    return %arg0, %arg1, %c0_i32 : i32, i32, i32
  }
  func.func @transform_4(%arg0: i32, %arg1: i32, %arg2: i32) -> (i32, i32, i32, i32) {
    %c0_i32 = arith.constant 0 : i32
    %c0_i32_0 = arith.constant 0 : i32
    %c0_i32_1 = arith.constant 0 : i32
    return %arg0, %arg1, %c0_i32, %c0_i32_0 : i32, i32, i32, i32
  }
}

</mosaic_0001>

<bundles_post_ra>
// kernel: embedding_method_forward.5
= control target key start
LH: loop header
LB: loop body
LE: loop exit
PB: predicated region body
PF: predicated region fallthrough
CT: control target
= control target key end

     0   :  { %vm2707_vm3 = vcmask 7168   ;;  %s6825_s0 = inlined_call_operand.vmem [shape: bf16[2,512,128], index: 0, kind: input, shape index: {}]   ;;  %s6826_s1 = inlined_call_operand.vmem [shape: f32[1,128], index: 1, kind: input, shape index: {}]   ;;  %s6827_s2 = inlined_call_operand.vmem [shape: f32[1,8,128], index: 2, kind: output, shape index: {}]  }
   0x1   :  { %v3768_v0 = vld [vmem:[%s6826_s1] ss:$0 sm:$0xff]  ;;  %v3171_v1 = vld [vmem:[%s6825_s0 + $0x8] sm:$0xff]   ;;  %v3172_v14 = vld [vmem:[%s6825_s0 + $0x10] sm:$0xff]  }
   0x2   :  { %v2916_v2 = vld [vmem:[%s6825_s0] sm:$0xff]   ;;  %v2921_v3 = vunpack.c.l.bf16 %v3171_v1  ;;  %v2922_v12 = vunpack.c.h.bf16 %v3171_v1  ;;  %v3203_v15 = vld [vmem:[%s6825_s0 + $0x108] sm:$0xff]   ;;  %v2925_v18 = vunpack.c.l.bf16 %v3172_v14  ;;  %v2926_v22 = vunpack.c.h.bf16 %v3172_v14  ;;  %v3173_v24 = vld [vmem:[%s6825_s0 + $0x18] sm:$0xff]  }
   0x3   :  { %v2917_v4 = vunpack.c.l.bf16 %v2916_v2  ;;  %v3202_v5 = vld [vmem:[%s6825_s0 + $0x100] sm:$0xff]   ;;  %v2918_v6 = vunpack.c.h.bf16 %v2916_v2  ;;  %v3049_v19 = vunpack.c.l.bf16 %v3203_v15  ;;  %v3050_v23 = vunpack.c.h.bf16 %v3203_v15  ;;  %v3204_v25 = vld [vmem:[%s6825_s0 + $0x110] sm:$0xff]   ;;  %v3205_v35 = vld [vmem:[%s6825_s0 + $0x118] sm:$0xff]  }
   0x4   :  { %v3045_v7 = vunpack.c.l.bf16 %v3202_v5  ;;  %v277_v8 = vmul.f32 %v2921_v3, %v3768_v0  ;;  %v3046_v13 = vunpack.c.h.bf16 %v3202_v5  ;;  %v278_v16 = vmul.f32 %v2922_v12, %v3768_v0  ;;  %v3174_v34 = vld [vmem:[%s6825_s0 + $0x20] sm:$0xff]   ;;  %v3175_v44 = vld [vmem:[%s6825_s0 + $0x28] sm:$0xff]   ;;  %v3176_v54 = vld [vmem:[%s6825_s0 + $0x30] sm:$0xff]  }
   0x5   :  { %v275_v9 = vmul.f32 %v2917_v4, %v3768_v0  ;;  %v276_v11 = vmul.f32 %v2918_v6, %v3768_v0  ;;  %v279_v20 = vmul.f32 %v2925_v18, %v3768_v0  ;;  %v469_v21 = vmul.f32 %v3049_v19, %v3768_v0  ;;  %v3206_v45 = vld [vmem:[%s6825_s0 + $0x120] sm:$0xff]   ;;  %v3207_v55 = vld [vmem:[%s6825_s0 + $0x128] sm:$0xff]   ;;  %v3177_v1 = vld [vmem:[%s6825_s0 + $0x38] sm:$0xff]  }
   0x6   :  { %343 = vadd.xlane.f32.xlu1 %v277_v8  ;;  %v467_v10 = vmul.f32 %v3045_v7, %v3768_v0  ;;  %v468_v17 = vmul.f32 %v3046_v13, %v3768_v0  ;;  %v280_v26 = vmul.f32 %v2926_v22, %v3768_v0  ;;  %v470_v27 = vmul.f32 %v3050_v23, %v3768_v0  ;;  %v3208_v2 = vld [vmem:[%s6825_s0 + $0x130] sm:$0xff]   ;;  %v3209_v12 = vld [vmem:[%s6825_s0 + $0x138] sm:$0xff]   ;;  %v3210_v22 = vld [vmem:[%s6825_s0 + $0x140] sm:$0xff]  }
   0x7   :  { %339 = vadd.xlane.f32.xlu0 %v275_v9  ;;  %v2929_v28 = vunpack.c.l.bf16 %v3173_v24  ;;  %v3053_v29 = vunpack.c.l.bf16 %v3204_v25  ;;  %v2930_v32 = vunpack.c.h.bf16 %v3173_v24  ;;  %v3054_v33 = vunpack.c.h.bf16 %v3204_v25 }
   0x8   :  { %v2933_v38 = vunpack.c.l.bf16 %v3174_v34  ;;  %v3057_v39 = vunpack.c.l.bf16 %v3205_v35  ;;  %v2934_v42 = vunpack.c.h.bf16 %v3174_v34  ;;  %v3058_v43 = vunpack.c.h.bf16 %v3205_v35 }
   0x9   :  { %v281_v30 = vmul.f32 %v2929_v28, %v3768_v0  ;;  %v471_v31 = vmul.f32 %v3053_v29, %v3768_v0  ;;  %v282_v36 = vmul.f32 %v2930_v32, %v3768_v0  ;;  %v472_v37 = vmul.f32 %v3054_v33, %v3768_v0  ;;  %v3211_v32 = vld [vmem:[%s6825_s0 + $0x148] sm:$0xff]  }
   0xa   :  { %531 = vadd.xlane.f32.xlu1 %v467_v10  ;;  %v283_v40 = vmul.f32 %v2933_v38, %v3768_v0  ;;  %v473_v41 = vmul.f32 %v3057_v39, %v3768_v0  ;;  %v284_v46 = vmul.f32 %v2934_v42, %v3768_v0  ;;  %v474_v47 = vmul.f32 %v3058_v43, %v3768_v0  ;;  %v3212_v42 = vld [vmem:[%s6825_s0 + $0x150] sm:$0xff]  }
   0xb   :  { %341 = vadd.xlane.f32.xlu0 %v276_v11  ;;  %v2937_v48 = vunpack.c.l.bf16 %v3175_v44  ;;  %v3061_v49 = vunpack.c.l.bf16 %v3206_v45  ;;  %v2938_v52 = vunpack.c.h.bf16 %v3175_v44  ;;  %v3062_v53 = vunpack.c.h.bf16 %v3206_v45  ;;  %v3178_v11 = vld [vmem:[%s6825_s0 + $0x40] sm:$0xff]  }
   0xc   :  { %v2941_v58 = vunpack.c.l.bf16 %v3176_v54  ;;  %v3065_v59 = vunpack.c.l.bf16 %v3207_v55  ;;  %v2942_v62 = vunpack.c.h.bf16 %v3176_v54  ;;  %v3066_v63 = vunpack.c.h.bf16 %v3207_v55 }
   0xd   :  { %v285_v50 = vmul.f32 %v2937_v48, %v3768_v0  ;;  %v475_v51 = vmul.f32 %v3061_v49, %v3768_v0  ;;  %v286_v56 = vmul.f32 %v2938_v52, %v3768_v0  ;;  %v476_v57 = vmul.f32 %v3062_v53, %v3768_v0  ;;  %v3213_v52 = vld [vmem:[%s6825_s0 + $0x158] sm:$0xff]  }
   0xe   :  { %345 = vadd.xlane.f32.xlu1 %v278_v16  ;;  %v287_v60 = vmul.f32 %v2941_v58, %v3768_v0  ;;  %v477_v61 = vmul.f32 %v3065_v59, %v3768_v0  ;;  %v288_v3 = vmul.f32 %v2942_v62, %v3768_v0  ;;  %v478_v4 = vmul.f32 %v3066_v63, %v3768_v0  ;;  %v3214_v62 = vld [vmem:[%s6825_s0 + $0x160] sm:$0xff]  }
   0xf   :  { %533 = vadd.xlane.f32.xlu0 %v468_v17  ;;  %v2945_v5 = vunpack.c.l.bf16 %v3177_v1  ;;  %v3069_v6 = vunpack.c.l.bf16 %v3208_v2  ;;  %v2946_v9 = vunpack.c.h.bf16 %v3177_v1  ;;  %v3070_v10 = vunpack.c.h.bf16 %v3208_v2 }
  0x10   :  { %v2949_v15 = vunpack.c.l.bf16 %v3178_v11  ;;  %v3073_v16 = vunpack.c.l.bf16 %v3209_v12  ;;  %v2950_v19 = vunpack.c.h.bf16 %v3178_v11 }
  0x11   :  { %v289_v7 = vmul.f32 %v2945_v5, %v3768_v0  ;;  %v479_v8 = vmul.f32 %v3069_v6, %v3768_v0  ;;  %v290_v13 = vmul.f32 %v2946_v9, %v3768_v0  ;;  %v480_v14 = vmul.f32 %v3070_v10, %v3768_v0  ;;  %v3215_v9 = vld [vmem:[%s6825_s0 + $0x168] sm:$0xff]  }
  0x12   :  { %347 = vadd.xlane.f32.xlu1 %v279_v20  ;;  %v291_v17 = vmul.f32 %v2949_v15, %v3768_v0  ;;  %v481_v18 = vmul.f32 %v3073_v16, %v3768_v0  ;;  %v3074_v20 = vunpack.c.h.bf16 %v3209_v12  ;;  %v292_v23 = vmul.f32 %v2950_v19, %v3768_v0  ;;  %v3216_v19 = vld [vmem:[%s6825_s0 + $0x170] sm:$0xff]  }
  0x13   :  { %535 = vadd.xlane.f32.xlu0 %v469_v21  ;;  %v3179_v21 = vld [vmem:[%s6825_s0 + $0x48] sm:$0xff]  }
  0x14   :  { %v482_v24 = vmul.f32 %v3074_v20, %v3768_v0  ;;  %v2953_v25 = vunpack.c.l.bf16 %v3179_v21  ;;  %v2954_v29 = vunpack.c.h.bf16 %v3179_v21 }
  0x16   :  { %349 = vadd.xlane.f32.xlu1 %v280_v26  ;;  %v3077_v26 = vunpack.c.l.bf16 %v3210_v22  ;;  %v294_v33 = vmul.f32 %v2954_v29, %v3768_v0  ;;  %v3217_v29 = vld [vmem:[%s6825_s0 + $0x178] sm:$0xff]  }
  0x17   :  { %537 = vadd.xlane.f32.xlu0 %v470_v27  ;;  %v293_v27 = vmul.f32 %v2953_v25, %v3768_v0 }
  0x18   :  { %v483_v28 = vmul.f32 %v3077_v26, %v3768_v0 }
  0x1a   :  { %351 = vadd.xlane.f32.xlu1 %v281_v30  ;;  %v3078_v30 = vunpack.c.h.bf16 %v3210_v22 }
  0x1b   :  { %539 = vadd.xlane.f32.xlu0 %v471_v31  ;;  %v3180_v31 = vld [vmem:[%s6825_s0 + $0x50] sm:$0xff]  }
  0x1c   :  { %v484_v34 = vmul.f32 %v3078_v30, %v3768_v0  ;;  %v2957_v35 = vunpack.c.l.bf16 %v3180_v31  ;;  %v2958_v39 = vunpack.c.h.bf16 %v3180_v31 }
  0x1e   :  { %353 = vadd.xlane.f32.xlu1 %v282_v36  ;;  %v3081_v36 = vunpack.c.l.bf16 %v3211_v32  ;;  %v296_v43 = vmul.f32 %v2958_v39, %v3768_v0  ;;  %v3218_v39 = vld [vmem:[%s6825_s0 + $0x180] sm:$0xff]  }
  0x1f   :  { %541 = vadd.xlane.f32.xlu0 %v472_v37  ;;  %v295_v37 = vmul.f32 %v2957_v35, %v3768_v0 }
  0x20   :  { %v485_v38 = vmul.f32 %v3081_v36, %v3768_v0 }
  0x22   :  { %355 = vadd.xlane.f32.xlu1 %v283_v40  ;;  %v3082_v40 = vunpack.c.h.bf16 %v3211_v32 }
  0x23   :  { %543 = vadd.xlane.f32.xlu0 %v473_v41  ;;  %v3181_v41 = vld [vmem:[%s6825_s0 + $0x58] sm:$0xff]  }
  0x24   :  { %v486_v44 = vmul.f32 %v3082_v40, %v3768_v0  ;;  %v2961_v45 = vunpack.c.l.bf16 %v3181_v41  ;;  %v2962_v49 = vunpack.c.h.bf16 %v3181_v41 }
  0x26   :  { %357 = vadd.xlane.f32.xlu1 %v284_v46  ;;  %v3085_v46 = vunpack.c.l.bf16 %v3212_v42  ;;  %v298_v53 = vmul.f32 %v2962_v49, %v3768_v0  ;;  %v3219_v49 = vld [vmem:[%s6825_s0 + $0x188] sm:$0xff]  }
  0x27   :  { %545 = vadd.xlane.f32.xlu0 %v474_v47  ;;  %v297_v47 = vmul.f32 %v2961_v45, %v3768_v0 }
  0x28   :  { %v487_v48 = vmul.f32 %v3085_v46, %v3768_v0 }
  0x2a   :  { %359 = vadd.xlane.f32.xlu1 %v285_v50  ;;  %v3086_v50 = vunpack.c.h.bf16 %v3212_v42 }
  0x2b   :  { %547 = vadd.xlane.f32.xlu0 %v475_v51  ;;  %v3182_v51 = vld [vmem:[%s6825_s0 + $0x60] sm:$0xff]  }
  0x2c   :  { %v488_v54 = vmul.f32 %v3086_v50, %v3768_v0  ;;  %v2965_v55 = vunpack.c.l.bf16 %v3182_v51  ;;  %v2966_v59 = vunpack.c.h.bf16 %v3182_v51 }
  0x2e   :  { %361 = vadd.xlane.f32.xlu1 %v286_v56  ;;  %v3089_v56 = vunpack.c.l.bf16 %v3213_v52  ;;  %v300_v63 = vmul.f32 %v2966_v59, %v3768_v0  ;;  %v3220_v59 = vld [vmem:[%s6825_s0 + $0x190] sm:$0xff]  }
  0x2f   :  { %549 = vadd.xlane.f32.xlu0 %v476_v57  ;;  %v299_v57 = vmul.f32 %v2965_v55, %v3768_v0 }
  0x30   :  { %v489_v58 = vmul.f32 %v3089_v56, %v3768_v0 }
  0x32   :  { %363 = vadd.xlane.f32.xlu1 %v287_v60  ;;  %v3090_v60 = vunpack.c.h.bf16 %v3213_v52 }
  0x33   :  { %551 = vadd.xlane.f32.xlu0 %v477_v61  ;;  %v3183_v61 = vld [vmem:[%s6825_s0 + $0x68] sm:$0xff]  }
  0x34   :  { %v490_v1 = vmul.f32 %v3090_v60, %v3768_v0  ;;  %v2969_v2 = vunpack.c.l.bf16 %v3183_v61  ;;  %v2970_v6 = vunpack.c.h.bf16 %v3183_v61  ;;  %v3117_v61 = vunpack.c.l.bf16 %v3220_v59 }
  0x36   :  { %365 = vadd.xlane.f32.xlu1 %v288_v3  ;;  %v3093_v3 = vunpack.c.l.bf16 %v3214_v62  ;;  %v302_v10 = vmul.f32 %v2970_v6, %v3768_v0  ;;  %v3118_v6 = vunpack.c.h.bf16 %v3220_v59 }
  0x37   :  { %553 = vadd.xlane.f32.xlu0 %v478_v4  ;;  %v301_v4 = vmul.f32 %v2969_v2, %v3768_v0 }
  0x38   :  { %v491_v5 = vmul.f32 %v3093_v3, %v3768_v0  ;;  %v3221_v3 = vld [vmem:[%s6825_s0 + $0x198] sm:$0xff]  }
  0x3a   :  { %367 = vadd.xlane.f32.xlu1 %v289_v7  ;;  %v3094_v7 = vunpack.c.h.bf16 %v3214_v62  ;;  %v3190_v62 = vld [vmem:[%s6825_s0 + $0xa0] sm:$0xff]  }
  0x3b   :  { %555 = vadd.xlane.f32.xlu0 %v479_v8  ;;  %v3184_v8 = vld [vmem:[%s6825_s0 + $0x70] sm:$0xff]  }
  0x3c   :  { %v492_v11 = vmul.f32 %v3094_v7, %v3768_v0  ;;  %v2973_v12 = vunpack.c.l.bf16 %v3184_v8  ;;  %v2974_v16 = vunpack.c.h.bf16 %v3184_v8 }
  0x3e   :  { %369 = vadd.xlane.f32.xlu1 %v290_v13  ;;  %v3097_v13 = vunpack.c.l.bf16 %v3215_v9  ;;  %v304_v20 = vmul.f32 %v2974_v16, %v3768_v0 }
  0x3f   :  { %557 = vadd.xlane.f32.xlu0 %v480_v14  ;;  %v303_v14 = vmul.f32 %v2973_v12, %v3768_v0 }
  0x40   :  { %v493_v15 = vmul.f32 %v3097_v13, %v3768_v0  ;;  %v503_v13 = vmul.f32 %v3117_v61, %v3768_v0 }
  0x42   :  { %371 = vadd.xlane.f32.xlu1 %v291_v17  ;;  %v3098_v17 = vunpack.c.h.bf16 %v3215_v9  ;;  %v2997_v9 = vunpack.c.l.bf16 %v3190_v62 }
  0x43   :  { %559 = vadd.xlane.f32.xlu0 %v481_v18  ;;  %v3185_v18 = vld [vmem:[%s6825_s0 + $0x78] sm:$0xff]  }
  0x44   :  { %v494_v21 = vmul.f32 %v3098_v17, %v3768_v0  ;;  %v2977_v22 = vunpack.c.l.bf16 %v3185_v18  ;;  %v2978_v26 = vunpack.c.h.bf16 %v3185_v18 }
  0x46   :  { %373 = vadd.xlane.f32.xlu1 %v292_v23  ;;  %v3101_v23 = vunpack.c.l.bf16 %v3216_v19  ;;  %v306_v30 = vmul.f32 %v2978_v26, %v3768_v0 }
  0x47   :  { %561 = vadd.xlane.f32.xlu0 %v482_v24  ;;  %v305_v24 = vmul.f32 %v2977_v22, %v3768_v0  ;;  %v504_v22 = vmul.f32 %v3118_v6, %v3768_v0 }
  0x48   :  { %v495_v25 = vmul.f32 %v3101_v23, %v3768_v0 }
  0x4a   :  { %375 = vadd.xlane.f32.xlu1 %v293_v27  ;;  %v3102_v27 = vunpack.c.h.bf16 %v3216_v19  ;;  %v3122_v19 = vunpack.c.h.bf16 %v3221_v3 }
  0x4b   :  { %563 = vadd.xlane.f32.xlu0 %v483_v28  ;;  %v3186_v28 = vld [vmem:[%s6825_s0 + $0x80] sm:$0xff]  }
  0x4c   :  { %v496_v31 = vmul.f32 %v3102_v27, %v3768_v0  ;;  %v2981_v32 = vunpack.c.l.bf16 %v3186_v28  ;;  %v2982_v36 = vunpack.c.h.bf16 %v3186_v28 }
  0x4e   :  { %377 = vadd.xlane.f32.xlu1 %v294_v33  ;;  %v3105_v33 = vunpack.c.l.bf16 %v3217_v29  ;;  %v308_v40 = vmul.f32 %v2982_v36, %v3768_v0 }
  0x4f   :  { %565 = vadd.xlane.f32.xlu0 %v484_v34  ;;  %v307_v34 = vmul.f32 %v2981_v32, %v3768_v0 }
  0x50   :  { %v497_v35 = vmul.f32 %v3105_v33, %v3768_v0 }
  0x52   :  { %379 = vadd.xlane.f32.xlu1 %v295_v37  ;;  %v3106_v37 = vunpack.c.h.bf16 %v3217_v29  ;;  %v315_v29 = vmul.f32 %v2997_v9, %v3768_v0  ;;  %v3225_v9 = vld [vmem:[%s6825_s0 + $0x1b8] sm:$0xff]  }
  0x53   :  { %567 = vadd.xlane.f32.xlu0 %v485_v38  ;;  %v3187_v38 = vld [vmem:[%s6825_s0 + $0x88] sm:$0xff]  }
  0x54   :  { %v498_v41 = vmul.f32 %v3106_v37, %v3768_v0  ;;  %v2985_v42 = vunpack.c.l.bf16 %v3187_v38  ;;  %v2986_v46 = vunpack.c.h.bf16 %v3187_v38  ;;  %v3999_v37 = vmul.f32 %v3122_v19, %v3768_v0  ;;  %v3192_v38 = vld [vmem:[%s6825_s0 + $0xb0] sm:$0xff]  }
  0x55   :  { %v3137_v19 = vunpack.c.l.bf16 %v3225_v9 }
  0x56   :  { %381 = vadd.xlane.f32.xlu1 %v296_v43  ;;  %v3109_v43 = vunpack.c.l.bf16 %v3218_v39  ;;  %v310_v50 = vmul.f32 %v2986_v46, %v3768_v0 }
  0x57   :  { %569 = vadd.xlane.f32.xlu0 %v486_v44  ;;  %v309_v44 = vmul.f32 %v2985_v42, %v3768_v0 }
  0x58   :  { %v499_v45 = vmul.f32 %v3109_v43, %v3768_v0 }
  0x5a   :  { %383 = vadd.xlane.f32.xlu1 %v297_v47  ;;  %v3110_v47 = vunpack.c.h.bf16 %v3218_v39 }
  0x5b   :  { %571 = vadd.xlane.f32.xlu0 %v487_v48  ;;  %v3188_v48 = vld [vmem:[%s6825_s0 + $0x90] sm:$0xff]  }
  0x5c   :  { %v500_v51 = vmul.f32 %v3110_v47, %v3768_v0  ;;  %v2989_v52 = vunpack.c.l.bf16 %v3188_v48  ;;  %v2990_v56 = vunpack.c.h.bf16 %v3188_v48 }
  0x5e   :  { %385 = vadd.xlane.f32.xlu1 %v298_v53  ;;  %v3113_v53 = vunpack.c.l.bf16 %v3219_v49 }
  0x5f   :  { %573 = vadd.xlane.f32.xlu0 %v488_v54  ;;  %v311_v54 = vmul.f32 %v2989_v52, %v3768_v0  ;;  %v3005_v52 = vunpack.c.l.bf16 %v3192_v38 }
  0x60   :  { %v501_v55 = vmul.f32 %v3113_v53, %v3768_v0  ;;  %v3224_v53 = vld [vmem:[%s6825_s0 + $0x1b0] sm:$0xff]  }
  0x62   :  { %387 = vadd.xlane.f32.xlu1 %v299_v57  ;;  %v3114_v57 = vunpack.c.h.bf16 %v3219_v49  ;;  %v3193_v49 = vld [vmem:[%s6825_s0 + $0xb8] sm:$0xff]  }
  0x63   :  { %575 = vadd.xlane.f32.xlu0 %v489_v58  ;;  %v3189_v58 = vld [vmem:[%s6825_s0 + $0x98] sm:$0xff]   ;;  %v3010_v6 = vunpack.c.h.bf16 %v3193_v49 }
  0x64   :  { %v2993_v60 = vunpack.c.l.bf16 %v3189_v58  ;;  %v2994_v2 = vunpack.c.h.bf16 %v3189_v58 }
  0x66   :  { %389 = vadd.xlane.f32.xlu1 %v300_v63  ;;  %v312_v63 = vmul.f32 %v2990_v56, %v3768_v0  ;;  %v313_v12 = vmul.f32 %v2993_v60, %v3768_v0  ;;  %v314_v18 = vmul.f32 %v2994_v2, %v3768_v0  ;;  %v3006_v60 = vunpack.c.h.bf16 %v3192_v38 }
  0x67   :  { %577 = vadd.xlane.f32.xlu0 %v490_v1  ;;  %v502_v1 = vmul.f32 %v3114_v57, %v3768_v0 }
  0x6a   :  { %391 = vadd.xlane.f32.xlu1 %v301_v4 }
  0x6b   :  { %579 = vadd.xlane.f32.xlu0 %v491_v5 }
  0x6e   :  { %393 = vadd.xlane.f32.xlu1 %v302_v10  ;;  %v3191_v10 = vld [vmem:[%s6825_s0 + $0xa8] sm:$0xff]  }
  0x6f   :  { %581 = vadd.xlane.f32.xlu0 %v492_v11  ;;  %v3222_v11 = vld [vmem:[%s6825_s0 + $0x1a0] sm:$0xff]   ;;  %v3001_v23 = vunpack.c.l.bf16 %v3191_v10 }
  0x70   :  { %v3126_v33 = vunpack.c.h.bf16 %v3222_v11 }
  0x71   :  { %v4011_v42 = vmul.f32 %v3001_v23, %v3768_v0  ;;  %v3226_v23 = vld [vmem:[%s6825_s0 + $0x1c0] sm:$0xff]  }
  0x72   :  { %395 = vadd.xlane.f32.xlu1 %v303_v14  ;;  %v3121_v14 = vunpack.c.l.bf16 %v3221_v3  ;;  %v3133_v3 = vunpack.c.l.bf16 %v3224_v53 }
  0x73   :  { %583 = vadd.xlane.f32.xlu0 %v493_v15  ;;  %v2998_v15 = vunpack.c.h.bf16 %v3190_v62  ;;  %v3009_v62 = vunpack.c.l.bf16 %v3193_v49  ;;  %v4096_v49 = vmul.f32 %v3137_v19, %v3768_v0 }
  0x75   :  { %v3996_v32 = vmul.f32 %v2998_v15, %v3768_v0 }
  0x76   :  { %397 = vadd.xlane.f32.xlu1 %v304_v20 }
  0x77   :  { %585 = vadd.xlane.f32.xlu0 %v494_v21 }
  0x7a   :  { %399 = vadd.xlane.f32.xlu1 %v305_v24  ;;  %v3125_v24 = vunpack.c.l.bf16 %v3222_v11  ;;  %v4047_v11 = vmul.f32 %v3005_v52, %v3768_v0  ;;  %v3142_v52 = vunpack.c.h.bf16 %v3226_v23 }
  0x7b   :  { %587 = vadd.xlane.f32.xlu0 %v495_v25  ;;  %v3002_v25 = vunpack.c.h.bf16 %v3191_v10 }
  0x7c   :  { %v4014_v43 = vmul.f32 %v3125_v24, %v3768_v0  ;;  %v4066_v24 = vmul.f32 %v3009_v62, %v3768_v0 }
  0x7e   :  { %401 = vadd.xlane.f32.xlu1 %v306_v30 }
  0x7f   :  { %589 = vadd.xlane.f32.xlu0 %v496_v31  ;;  %v505_v31 = vmul.f32 %v3121_v14, %v3768_v0 }
  0x82   :  { %403 = vadd.xlane.f32.xlu1 %v307_v34 }
  0x83   :  { %591 = vadd.xlane.f32.xlu0 %v497_v35 }
  0x86   :  { %405 = vadd.xlane.f32.xlu1 %v308_v40 }
  0x87   :  { %593 = vadd.xlane.f32.xlu0 %v498_v41 }
  0x8a   :  { %407 = vadd.xlane.f32.xlu1 %v309_v44  ;;  %v4017_v44 = vmul.f32 %v3002_v25, %v3768_v0  ;;  %v4069_v25 = vmul.f32 %v3133_v3, %v3768_v0 }
  0x8b   :  { %595 = vadd.xlane.f32.xlu0 %v499_v45  ;;  %v3223_v45 = vld [vmem:[%s6825_s0 + $0x1a8] sm:$0xff]  }
  0x8c   :  { %v3129_v56 = vunpack.c.l.bf16 %v3223_v45  ;;  %v3130_v61 = vunpack.c.h.bf16 %v3223_v45 }
  0x8e   :  { %409 = vadd.xlane.f32.xlu1 %v310_v50  ;;  %v4051_v14 = vmul.f32 %v3129_v56, %v3768_v0  ;;  %v4109_v56 = vld [vmem:[%s6825_s0 + $0x1c8] sm:$0xff]  }
  0x8f   :  { %597 = vadd.xlane.f32.xlu0 %v500_v51  ;;  %v4028_v51 = vmul.f32 %v3126_v33, %v3768_v0 }
  0x92   :  { %411 = vadd.xlane.f32.xlu1 %v311_v54 }
  0x93   :  { %599 = vadd.xlane.f32.xlu0 %v501_v55  ;;  %v3967_v4 = vpop.xlane.xlu1 %343 }
  0x94   :  { %v3969_v5 = vpop.xlane.xlu0 %339  ;;  %v661_v7 = vsub.f32 0.0, %v3967_v4 }
  0x95   :  { %v659_v8 = vsub.f32 0.0, %v3969_v5 }
  0x96   :  { %v725_v16 = vand.u32 2147483647, %v661_v7  ;;  %413 = vadd.xlane.f32.xlu1 %v312_v63  ;;  %v3194_v63 = vld [vmem:[%s6825_s0 + $0xc0] sm:$0xff]   ;;  %v4143_v19 = vmax.f32 %v661_v7, 0.0 }
  0x97   :  { %v723_v17 = vand.u32 2147483647, %v659_v8  ;;  %601 = vadd.xlane.f32.xlu0 %v502_v1  ;;  %v3986_v20 = vpop.xlane.xlu1 %531  ;;  %v3013_v15 = vunpack.c.l.bf16 %v3194_v63 }
  0x98   :  { %v3988_v21 = vpop.xlane.xlu0 %341  ;;  %v789_v26 = vsub.f32 0.0, %v725_v16  ;;  %v1683_v28 = vand.u32 2147483647, %v3986_v20  ;;  %v2515_v4 = vmax.f32 %v3986_v20, 0.0 }
  0x99   :  { %v787_v27 = vsub.f32 0.0, %v723_v17  ;;  %v660_v30 = vsub.f32 0.0, %v3988_v21  ;;  %v4054_v17 = vmul.f32 %v3006_v60, %v3768_v0 }
  0x9a   :  { %v855_v34 = vmul.f32 1.442695, %v789_v26  ;;  %v1747_v36 = vsub.f32 0.0, %v1683_v28  ;;  %415 = vadd.xlane.f32.xlu1 %v313_v12  ;;  %v3134_v12 = vunpack.c.h.bf16 %v3224_v53  ;;  %v4072_v26 = vmul.f32 %v3010_v6, %v3768_v0 }
  0x9b   :  { %v851_v35 = vmul.f32 1.442695, %v787_v27  ;;  %603 = vadd.xlane.f32.xlu0 %v503_v13  ;;  %v724_v39 = vand.u32 2147483647, %v660_v30  ;;  %v4006_v40 = vpop.xlane.xlu1 %345  ;;  %v3014_v27 = vunpack.c.h.bf16 %v3194_v63  ;;  %v4128_v6 = vmul.f32 %v3142_v52, %v3768_v0 }
  0x9c   :  { %v4008_v41 = vpop.xlane.xlu0 %533  ;;  %3236 = vpow2.f32 %v855_v34  ;;  %v1811_v46 = vmul.f32 1.442695, %v1747_v36  ;;  %v662_v47 = vsub.f32 0.0, %v4006_v40  ;;  %v4077_v33 = vmul.f32 %v3134_v12, %v3768_v0 }
  0x9d   :  { %v1684_v48 = vand.u32 2147483647, %v4008_v41  ;;  %3238 = vpow2.f32 %v851_v35  ;;  %v788_v50 = vsub.f32 0.0, %v724_v39  ;;  %v3138_v34 = vunpack.c.h.bf16 %v3225_v9  ;;  %v4082_v35 = vld [vmem:[%s6825_s0 + $0xd0] sm:$0xff]  }
  0x9e   :  { %3240 = vpow2.f32 %v1811_v46  ;;  %v726_v54 = vand.u32 2147483647, %v662_v47  ;;  %417 = vadd.xlane.f32.xlu1 %v314_v18  ;;  %v4057_v18 = vmul.f32 %v3130_v61, %v3768_v0  ;;  %v4091_v39 = vmul.f32 %v3013_v15, %v3768_v0 }
  0x9f   :  { %v1748_v55 = vsub.f32 0.0, %v1684_v48  ;;  %605 = vadd.xlane.f32.xlu0 %v504_v22  ;;  %v853_v57 = vmul.f32 1.442695, %v788_v50  ;;  %v4035_v58 = vpop.xlane.xlu1 %347  ;;  %v3195_v22 = vld [vmem:[%s6825_s0 + $0xc8] sm:$0xff]   ;;  %v3141_v46 = vunpack.c.l.bf16 %v3226_v23  ;;  %v4114_v61 = vmul.f32 %v3138_v34, %v3768_v0 }
  0xa0   :  { %v4037_v59 = vpop.xlane.xlu0 %535  ;;  %v790_v10 = vsub.f32 0.0, %v726_v54  ;;  %v663_v13 = vsub.f32 0.0, %v4035_v58  ;;  %v3017_v45 = vunpack.c.l.bf16 %v3195_v22  ;;  %v3018_v50 = vunpack.c.h.bf16 %v3195_v22 }
  0xa1   :  { %v1813_v1 = vmul.f32 1.442695, %v1748_v55  ;;  %v1685_v2 = vand.u32 2147483647, %v4037_v59  ;;  %3242 = vpow2.f32 %v853_v57  ;;  %v3021_v55 = vunpack.c.l.bf16 %v4082_v35 }
  0xa2   :  { %419 = vadd.xlane.f32.xlu1 %v315_v29  ;;  %v857_v28 = vmul.f32 1.442695, %v790_v10  ;;  %v727_v38 = vand.u32 2147483647, %v663_v13  ;;  %v4119_v63 = vmul.f32 %v3017_v45, %v3768_v0  ;;  %v4125_v3 = vmul.f32 %v3018_v50, %v3768_v0 }
  0xa3   :  { %3244 = vpow2.f32 %v1813_v1  ;;  %607 = vadd.xlane.f32.xlu0 %v505_v31  ;;  %v1749_v16 = vsub.f32 0.0, %v1685_v2  ;;  %v4074_v31 = vpop.xlane.xlu1 %349  ;;  %v4122_v1 = vmul.f32 %v3141_v46, %v3768_v0  ;;  %v3145_v9 = vunpack.c.l.bf16 %v4109_v56 }
  0xa4   :  { %v791_v62 = vsub.f32 0.0, %v727_v38  ;;  %v4136_v15 = vpop.xlane.xlu0 %537  ;;  %v4155_v7 = vmax.f32 %v660_v30, 0.0  ;;  %v2516_v50 = vmax.f32 %v4008_v41, 0.0 }
  0xa5   :  { %v1815_v29 = vmul.f32 1.442695, %v1749_v16  ;;  %v4139_v16 = vmul.f32 %v3021_v55, %v3768_v0  ;;  %v1686_v34 = vand.u32 2147483647, %v4136_v15 }
  0xa6   :  { %v4084_v36 = vpop.eup %3236  ;;  %421 = vadd.xlane.f32.xlu1 %v3996_v32  ;;  %v664_v32 = vsub.f32 0.0, %v4074_v31 }
  0xa7   :  { %609 = vadd.xlane.f32.xlu0 %v3999_v37  ;;  %v4093_v48 = vpop.eup %3238  ;;  %3246 = vpow2.f32 %v1815_v29  ;;  %v4103_v37 = vmul.f32 %v3014_v27, %v3768_v0  ;;  %v997_v57 = vadd.f32 1.0, %v4084_v36  ;;  %v1555_v27 = vmax.f32 %v659_v8, 0.0 }
  0xa8   :  { %v4098_v53 = vpop.eup %3240  ;;  %v979_v54 = vadd.f32 1.0, %v4093_v48  ;;  %3248 = vpow2.f32 %v857_v28  ;;  %v728_v12 = vand.u32 2147483647, %v664_v32  ;;  %v859_v29 = vmul.f32 1.442695, %v791_v62  ;;  %v4171_v62 = vpop.xlane.xlu1 %351 }
  0xa9   :  { %v1939_v60 = vadd.f32 1.0, %v4098_v53  ;;  %v1942_v22 = vmul.f32 -0.5, %v4098_v53  ;;  %v1000_v0 = vmul.f32 -0.5, %v4084_v36  ;;  %v985_v5 = vand.u32 2147483647, %v4093_v48 }
  0xaa   :  { %3250 = vlog2.f32 %v979_v54  ;;  %423 = vadd.xlane.f32.xlu1 %v4011_v42  ;;  %v982_v42 = vmul.f32 -0.5, %v4093_v48  ;;  %v792_v8 = vsub.f32 0.0, %v728_v12  ;;  %v1003_v55 = vand.u32 2147483647, %v4084_v36 }
  0xab   :  { %611 = vadd.xlane.f32.xlu0 %v4014_v43  ;;  %v3243_v2 = vpop.eup %3242  ;;  %3252 = vlog2.f32 %v1939_v60  ;;  %v1001_v54 = vadd.f32 1.0, %v1000_v0  ;;  %v1750_v60 = vsub.f32 0.0, %v1686_v34  ;;  %vm4174_vm0 = vcmp.lt.f32.partialorder %v985_v5, 0.0004427343 }
  0xac   :  { %v988_v43 = vadd.f32 1.0, %v3243_v2  ;;  %3254 = vlog2.f32 %v997_v57  ;;  %v991_v28 = vmul.f32 -0.5, %v3243_v2  ;;  %v983_v38 = vadd.f32 1.0, %v982_v42 }
  0xad   :  { %v4131_v10 = vpop.eup %3244  ;;  %v994_v46 = vand.u32 2147483647, %v3243_v2  ;;  %vm4222_vm5 = vcmp.lt.f32.partialorder %v1003_v55, 0.0004427343 }
  0xae   :  { %v1948_v23 = vadd.f32 1.0, %v4131_v10  ;;  %3256 = vlog2.f32 %v988_v43  ;;  %425 = vadd.xlane.f32.xlu1 %v4017_v44  ;;  %v1943_v44 = vadd.f32 1.0, %v1942_v22  ;;  %v992_v20 = vadd.f32 1.0, %v991_v28 }
  0xaf   :  { %613 = vadd.xlane.f32.xlu0 %v4028_v51  ;;  %v1945_v51 = vand.u32 2147483647, %v4098_v53  ;;  %v1951_v21 = vmul.f32 -0.5, %v4131_v10  ;;  %v1954_v57 = vand.u32 2147483647, %v4131_v10  ;;  %v984_v43 = vmul.f32 %v4093_v48, %v983_v38 }
  0xb0   :  { %3258 = vlog2.f32 %v1948_v23  ;;  %v1944_v28 = vmul.f32 %v4098_v53, %v1943_v44  ;;  %vm4185_vm2 = vcmp.lt.f32.partialorder %v994_v46, 0.0004427343  ;;  %v993_v34 = vmul.f32 %v3243_v2, %v992_v20 }
  0xb1   :  { %v4159_v45 = vpop.eup %3246  ;;  %3260 = vpow2.f32 %v859_v29  ;;  %vm4181_vm1 = vcmp.lt.f32.partialorder %v1945_v51, 0.0004427343  ;;  %v1952_v5 = vadd.f32 1.0, %v1951_v21  ;;  %vm4194_vm4 = vcmp.lt.f32.partialorder %v1954_v57, 0.0004427343  ;;  %v4203_v57 = vpop.xlane.xlu1 %353 }
  0xb2   :  { %v1957_v30 = vadd.f32 1.0, %v4159_v45  ;;  %427 = vadd.xlane.f32.xlu1 %v4047_v11  ;;  %v4167_v52 = vpop.eup %3248  ;;  %v861_v11 = vmul.f32 1.442695, %v792_v8  ;;  %v1960_v51 = vmul.f32 -0.5, %v4159_v45  ;;  %v1817_v46 = vmul.f32 1.442695, %v1750_v60 }
  0xb3   :  { %615 = vadd.xlane.f32.xlu0 %v4051_v14  ;;  %v4178_v14 = vpop.xlane.xlu0 %539  ;;  %v1006_v38 = vadd.f32 1.0, %v4167_v52 }
  0xb4   :  { %v3251_v42 = vpop.eup %3250  ;;  %3262 = vlog2.f32 %v1957_v30  ;;  %v1961_v29 = vadd.f32 1.0, %v1960_v51 }
  0xb5   :  { %v3253_v22 = vpop.eup %3252  ;;  %v981_v23 = vmul.f32 0.6931472, %v3251_v42  ;;  %3264 = vpow2.f32 %v861_v11 }
  0xb6   :  { %v1941_v48 = vmul.f32 0.6931472, %v3253_v22  ;;  %429 = vadd.xlane.f32.xlu1 %v4054_v17  ;;  %v3255_v8 = vpop.eup %3254  ;;  %v665_v17 = vsub.f32 0.0, %v4171_v62  ;;  %3266 = vpow2.f32 %v1817_v46  ;;  %v1953_v22 = vmul.f32 %v4131_v10, %v1952_v5 }
  0xb7   :  { %617 = vadd.xlane.f32.xlu0 %v4057_v18  ;;  %v987_v53 = vsel %vm4174_vm0, %v984_v43, %v981_v23  ;;  %v1687_v18 = vand.u32 2147483647, %v4178_v14  ;;  %v999_v12 = vmul.f32 0.6931472, %v3255_v8  ;;  %v1002_v10 = vmul.f32 %v4084_v36, %v1001_v54 }
  0xb8   :  { %v3257_v2 = vpop.eup %3256  ;;  %v1947_v20 = vsel %vm4181_vm1, %v1944_v28, %v1941_v48  ;;  %v1619_v21 = vadd.f32 %v1555_v27, %v987_v53  ;;  %v729_v60 = vand.u32 2147483647, %v665_v17  ;;  %v4208_v28 = vpop.xlane.xlu0 %541  ;;  %v1963_v5 = vand.u32 2147483647, %v4159_v45 }
  0xb9   :  { %v2579_v30 = vadd.f32 %v2515_v4, %v1947_v20  ;;  %v990_v42 = vmul.f32 0.6931472, %v3257_v2  ;;  %v1751_v23 = vsub.f32 0.0, %v1687_v18  ;;  %v666_v53 = vsub.f32 0.0, %v4203_v57  ;;  %v4238_v18 = vpop.xlane.xlu1 %355 }
  0xba   :  { %v3259_v43 = vpop.eup %3258  ;;  %431 = vadd.xlane.f32.xlu1 %v4066_v24  ;;  %3268 = vlog2.f32 %v1006_v38  ;;  %v1688_v46 = vand.u32 2147483647, %v4208_v28  ;;  %v1005_v54 = vsel %vm4222_vm5, %v1002_v10, %v999_v12  ;;  %v1962_v55 = vmul.f32 %v4159_v45, %v1961_v29 }
  0xbb   :  { %619 = vadd.xlane.f32.xlu0 %v4069_v25  ;;  %v2643_v27 = vadd.f32 %v2579_v30, %v1619_v21  ;;  %v996_v4 = vsel %vm4185_vm2, %v993_v34, %v990_v42  ;;  %v1950_v11 = vmul.f32 0.6931472, %v3259_v43  ;;  %v4214_v48 = vpop.eup %3260  ;;  %v1819_v8 = vmul.f32 1.442695, %v1751_v23 }
  0xbc   :  { %v793_v25 = vsub.f32 0.0, %v729_v60  ;;  %v1620_v51 = vadd.f32 %v4155_v7, %v996_v4  ;;  %v1015_v38 = vadd.f32 1.0, %v4214_v48  ;;  %vm1964_vm6 = vcmp.lt.f32.partialorder %v1963_v5, 0.0004427343 }
  0xbd   :  { %v1956_v24 = vsel %vm4194_vm4, %v1953_v22, %v1950_v11  ;;  %3270 = vpow2.f32 %v1819_v8  ;;  %v2517_v7 = vmax.f32 %v4037_v59, 0.0  ;;  %v730_v41 = vand.u32 2147483647, %v666_v53  ;;  %v4253_v59 = vld [vmem:[%s6825_s0 + $0xd8] sm:$0xff]   ;;  %v4260_v22 = vpop.xlane.xlu0 %543 }
  0xbe   :  { %v3263_v0 = vpop.eup %3262  ;;  %v2580_v36 = vadd.f32 %v2516_v50, %v1956_v24  ;;  %433 = vadd.xlane.f32.xlu1 %v4072_v26  ;;  %v863_v20 = vmul.f32 1.442695, %v793_v25  ;;  %v1752_v26 = vsub.f32 0.0, %v1688_v46  ;;  %v1621_v30 = vadd.f32 %v4143_v19, %v1005_v54 }
  0xbf   :  { %621 = vadd.xlane.f32.xlu0 %v4077_v33  ;;  %v1959_v44 = vmul.f32 0.6931472, %v3263_v0  ;;  %v4243_v33 = vld [vmem:[%s6826_s1] ss:$0 sm:$0xff]  ;;  %v4255_v21 = vpop.eup %3264  ;;  %v2708_v42 = vsel %vm2707_vm3, %v2643_v27, 0.0  ;;  %3272 = vlog2.f32 %v1015_v38  ;;  %v3022_v19 = vunpack.c.h.bf16 %v4082_v35  ;;  %v4285_v0 = vpop.xlane.xlu1 %357 }
  0xc0   :  { %v2644_v2 = vadd.f32 %v2580_v36, %v1620_v51  ;;  %v4248_v45 = vmul.f32 %v4243_v33, %v3145_v9  ;;  %v4267_v9 = vld [vmem:[%s6825_s0 + $0x1d0] sm:$0xff]   ;;  %v4269_v60 = vpop.eup %3266  ;;  %v3146_v27 = vunpack.c.h.bf16 %v4109_v56  ;;  %v794_v29 = vsub.f32 0.0, %v730_v41 }
  0xc1   :  { %v1965_v50 = vsel %vm1964_vm6, %v1962_v55, %v1959_v44  ;;  %v1966_v11 = vadd.f32 1.0, %v4269_v60  ;;  %3274 = vpow2.f32 %v863_v20  ;;  %v1821_v10 = vmul.f32 1.442695, %v1752_v26 }
  0xc2   :  { %v2709_v43 = vsel %vm2707_vm3, %v2644_v2, 0.0  ;;  %v2581_v12 = vadd.f32 %v2517_v7, %v1965_v50  ;;  %435 = vadd.xlane.f32.xlu1 %v4091_v39  ;;  %v3025_v39 = vunpack.c.l.bf16 %v4253_v59  ;;  %v3149_v5 = vunpack.c.l.bf16 %v4267_v9 }
  0xc3   :  { %623 = vadd.xlane.f32.xlu0 %v4096_v49  ;;  %v2710_v23 = vadd.f32 %v2709_v43, %v2708_v42  ;;  %v1009_v49 = vmul.f32 -0.5, %v4167_v52  ;;  %v1024_v24 = vadd.f32 1.0, %v4255_v21  ;;  %3276 = vlog2.f32 %v1966_v11 }
  0xc4   :  { %v2645_v4 = vadd.f32 %v2581_v12, %v1621_v30  ;;  %v667_v35 = vsub.f32 0.0, %v4238_v18  ;;  %v3269_v56 = vpop.eup %3268  ;;  %3278 = vpow2.f32 %v1821_v10  ;;  %v1689_v46 = vand.u32 2147483647, %v4260_v22 }
  0xc5   :  { %v4288_v34 = vmul.f32 %v4243_v33, %v3022_v19  ;;  %v1558_v36 = vmax.f32 %v662_v47, 0.0  ;;  %v865_v54 = vmul.f32 1.442695, %v794_v29  ;;  %v4300_v38 = vmul.f32 %v4243_v33, %v3025_v39 }
  0xc6   :  { %v2711_v8 = vsel %vm2707_vm3, %v2645_v4, 0.0  ;;  %437 = vadd.xlane.f32.xlu1 %v4103_v37  ;;  %v4294_v37 = vpop.xlane.xlu0 %545  ;;  %v1969_v44 = vmul.f32 -0.5, %v4269_v60  ;;  %v731_v2 = vand.u32 2147483647, %v667_v35  ;;  %v1753_v7 = vsub.f32 0.0, %v1689_v46 }
  0xc7   :  { %625 = vadd.xlane.f32.xlu0 %v4114_v61  ;;  %v4282_v25 = vadd.f32 %v2711_v8, %v2710_v23  ;;  %v4290_v51 = vpop.eup %3270  ;;  %v4297_v61 = vmul.f32 %v4243_v33, %v3146_v27  ;;  %v1010_v41 = vadd.f32 1.0, %v1009_v49  ;;  %v1018_v40 = vmul.f32 -0.5, %v4214_v48  ;;  %v4321_v27 = vpop.xlane.xlu1 %359 }
  0xc8   :  { %v1975_v55 = vadd.f32 1.0, %v4290_v51  ;;  %3280 = vlog2.f32 %v1024_v24  ;;  %v4310_v47 = vmul.f32 %v4243_v33, %v3149_v5  ;;  %v1012_v50 = vand.u32 2147483647, %v4167_v52 }
  0xc9   :  { %v1021_v20 = vand.u32 2147483647, %v4214_v48  ;;  %v1690_v26 = vand.u32 2147483647, %v4294_v37  ;;  %v1008_v30 = vmul.f32 0.6931472, %v3269_v56  ;;  %v1011_v4 = vmul.f32 %v4167_v52, %v1010_v41 }
  0xca   :  { %439 = vadd.xlane.f32.xlu1 %v4119_v63  ;;  %3282 = vlog2.f32 %v1975_v55  ;;  %v4317_v42 = vmax.f32 %v663_v13, 0.0  ;;  %v1972_v43 = vand.u32 2147483647, %v4269_v60  ;;  %v3273_v63 = vpop.eup %3272  ;;  %v1978_v12 = vmul.f32 -0.5, %v4290_v51  ;;  %v4372_v39 = vpop.xlane.xlu0 %547 }
  0xcb   :  { %627 = vadd.xlane.f32.xlu0 %v4122_v1  ;;  %3284 = vpow2.f32 %v865_v54  ;;  %v1970_v1 = vadd.f32 1.0, %v1969_v44  ;;  %v795_v23 = vsub.f32 0.0, %v731_v2  ;;  %v1823_v19 = vmul.f32 1.442695, %v1753_v7  ;;  %v4328_v13 = vpop.eup %3274 }
  0xcc   :  { %v1019_v11 = vadd.f32 1.0, %v1018_v40  ;;  %v2518_v29 = vmax.f32 %v4136_v15, 0.0  ;;  %v668_v58 = vsub.f32 0.0, %v4285_v0  ;;  %vm4330_vm7 = vcmp.lt.f32.partialorder %v1012_v50, 0.0004427343 }
  0xcd   :  { %vm4334_vm8 = vcmp.lt.f32.partialorder %v1021_v20, 0.0004427343  ;;  %3286 = vpow2.f32 %v1823_v19  ;;  %v1754_v52 = vsub.f32 0.0, %v1690_v26  ;;  %v3277_v10 = vpop.eup %3276  ;;  %v1014_v15 = vsel %vm4330_vm7, %v1011_v4, %v1008_v30 }
  0xce   :  { %441 = vadd.xlane.f32.xlu1 %v4125_v3  ;;  %v1017_v5 = vmul.f32 0.6931472, %v3273_v63  ;;  %vm4340_vm9 = vcmp.lt.f32.partialorder %v1972_v43, 0.0004427343  ;;  %v4345_v8 = vpop.eup %3278  ;;  %v1968_v24 = vmul.f32 0.6931472, %v3277_v10  ;;  %v1971_v56 = vmul.f32 %v4269_v60, %v1970_v1 }
  0xcf   :  { %629 = vadd.xlane.f32.xlu0 %v4128_v6  ;;  %v669_v6 = vsub.f32 0.0, %v4321_v27  ;;  %v1979_v46 = vadd.f32 1.0, %v1978_v12  ;;  %v867_v54 = vmul.f32 1.442695, %v795_v23  ;;  %v1020_v44 = vmul.f32 %v4214_v48, %v1019_v11 }
  0xd0   :  { %v1984_v55 = vadd.f32 1.0, %v4345_v8  ;;  %v732_v2 = vand.u32 2147483647, %v668_v58  ;;  %v1825_v7 = vmul.f32 1.442695, %v1754_v52  ;;  %v1622_v41 = vadd.f32 %v1558_v36, %v1014_v15 }
  0xd1   :  { %v1027_v40 = vmul.f32 -0.5, %v4255_v21  ;;  %v1974_v60 = vsel %vm4340_vm9, %v1971_v56, %v1968_v24  ;;  %v1981_v50 = vand.u32 2147483647, %v4290_v51  ;;  %v1033_v26 = vadd.f32 1.0, %v4328_v13 }
  0xd2   :  { %443 = vadd.xlane.f32.xlu1 %v4139_v16  ;;  %v3281_v20 = vpop.eup %3280  ;;  %v2582_v48 = vadd.f32 %v2518_v29, %v1974_v60  ;;  %3288 = vlog2.f32 %v1984_v55  ;;  %v733_v30 = vand.u32 2147483647, %v669_v6  ;;  %v1023_v16 = vsel %vm4334_vm8, %v1020_v44, %v1017_v5 }
  0xd3   :  { %631 = vadd.xlane.f32.xlu0 %v4248_v45  ;;  %v1980_v45 = vmul.f32 %v4290_v51, %v1979_v46  ;;  %v2519_v36 = vmax.f32 %v4178_v14, 0.0  ;;  %3290 = vpow2.f32 %v867_v54  ;;  %v796_v23 = vsub.f32 0.0, %v732_v2 }
  0xd4   :  { %v3283_v43 = vpop.eup %3282  ;;  %v2646_v1 = vadd.f32 %v2582_v48, %v1622_v41  ;;  %3292 = vpow2.f32 %v1825_v7  ;;  %v1030_v19 = vand.u32 2147483647, %v4255_v21  ;;  %vm1982_vm10 = vcmp.lt.f32.partialorder %v1981_v50, 0.0004427343  ;;  %v4405_v50 = vpop.xlane.xlu0 %549 }
  0xd5   :  { %v4365_v63 = vpop.eup %3284  ;;  %v1977_v12 = vmul.f32 0.6931472, %v3283_v43  ;;  %v1987_v4 = vmul.f32 -0.5, %v4345_v8  ;;  %v797_v11 = vsub.f32 0.0, %v733_v30  ;;  %v1028_v51 = vadd.f32 1.0, %v1027_v40 }
  0xd6   :  { %445 = vadd.xlane.f32.xlu1 %v4288_v34  ;;  %v2713_v14 = vsel %vm2707_vm3, %v2646_v1, 0.0  ;;  %3294 = vlog2.f32 %v1033_v26  ;;  %v1623_v52 = vadd.f32 %v4317_v42, %v1023_v16  ;;  %v1042_v10 = vadd.f32 1.0, %v4365_v63  ;;  %v4384_v42 = vpop.xlane.xlu1 %361 }
  0xd7   :  { %633 = vadd.xlane.f32.xlu0 %v4297_v61  ;;  %v1983_v29 = vsel %vm1982_vm10, %v1980_v45, %v1977_v12  ;;  %v4374_v49 = vpop.eup %3286  ;;  %v2714_v34 = vadd.f32 %v2713_v14, %v4282_v25  ;;  %v1026_v15 = vmul.f32 0.6931472, %v3281_v20  ;;  %v1560_v5 = vmax.f32 %v664_v32, 0.0 }
  0xd8   :  { %v2583_v61 = vadd.f32 %v2519_v36, %v1983_v29  ;;  %v869_v3 = vmul.f32 1.442695, %v796_v23  ;;  %v1988_v56 = vadd.f32 1.0, %v1987_v4  ;;  %v871_v46 = vmul.f32 1.442695, %v797_v11 }
  0xd9   :  { %v1691_v54 = vand.u32 2147483647, %v4372_v39  ;;  %v1029_v25 = vmul.f32 %v4255_v21, %v1028_v51  ;;  %v4389_v44 = vmax.f32 %v665_v17, 0.0  ;;  %v1990_v31 = vand.u32 2147483647, %v4345_v8 }
  0xda   :  { %447 = vadd.xlane.f32.xlu1 %v4300_v38  ;;  %v2647_v24 = vadd.f32 %v2583_v61, %v1623_v52  ;;  %v1993_v32 = vadd.f32 1.0, %v4374_v49  ;;  %vm4393_vm11 = vcmp.lt.f32.partialorder %v1030_v19, 0.0004427343  ;;  %3296 = vlog2.f32 %v1042_v10  ;;  %v4420_v19 = vpop.xlane.xlu1 %363  ;;  %v4432_v61 = vpop.xlane.xlu0 %551 }
  0xdb   :  { %635 = vadd.xlane.f32.xlu0 %v4310_v47  ;;  %v1036_v47 = vmul.f32 -0.5, %v4328_v13  ;;  %v1032_v21 = vsel %vm4393_vm11, %v1029_v25, %v1026_v15  ;;  %3298 = vpow2.f32 %v869_v3  ;;  %v670_v17 = vsub.f32 0.0, %v4384_v42 }
  0xdc   :  { %v2715_v55 = vsel %vm2707_vm3, %v2647_v24, 0.0  ;;  %v3289_v2 = vpop.eup %3288  ;;  %v1989_v40 = vmul.f32 %v4345_v8, %v1988_v56  ;;  %3300 = vpow2.f32 %v871_v46  ;;  %v1755_v60 = vsub.f32 0.0, %v1691_v54 }
  0xdd   :  { %v2716_v62 = vadd.f32 %v2715_v55, %v2714_v34  ;;  %v4402_v7 = vpop.eup %3290  ;;  %v1986_v41 = vmul.f32 0.6931472, %v3289_v2  ;;  %v1045_v48 = vmul.f32 -0.5, %v4365_v63  ;;  %vm1991_vm12 = vcmp.lt.f32.partialorder %v1990_v31, 0.0004427343 }
  0xde   :  { %v4407_v20 = vpop.eup %3292  ;;  %v2520_v26 = vmax.f32 %v4208_v28, 0.0  ;;  %3302 = vlog2.f32 %v1993_v32  ;;  %v1039_v30 = vand.u32 2147483647, %v4328_v13  ;;  %v4414_v43 = vmax.f32 %v666_v53, 0.0 }
  0xdf   :  { %v1992_v16 = vsel %vm1991_vm12, %v1989_v40, %v1986_v41  ;;  %v2002_v8 = vadd.f32 1.0, %v4407_v20  ;;  %v1624_v36 = vadd.f32 %v1560_v5, %v1032_v21  ;;  %v1051_v12 = vadd.f32 1.0, %v4402_v7 }
  0xe0   :  { %v3295_v45 = vpop.eup %3294  ;;  %v2584_v1 = vadd.f32 %v2520_v26, %v1992_v16  ;;  %v734_v23 = vand.u32 2147483647, %v670_v17  ;;  %v1037_v28 = vadd.f32 1.0, %v1036_v47  ;;  %v1048_v4 = vand.u32 2147483647, %v4365_v63  ;;  %v4463_v47 = vpop.xlane.xlu1 %365 }
  0xe1   :  { %v4425_v57 = vmax.f32 %v667_v35, 0.0  ;;  %v1827_v53 = vmul.f32 1.442695, %v1755_v60  ;;  %v1046_v11 = vadd.f32 1.0, %v1045_v48  ;;  %3304 = vlog2.f32 %v2002_v8  ;;  %v4476_v60 = vpop.xlane.xlu0 %553 }
  0xe2   :  { %v2648_v51 = vadd.f32 %v2584_v1, %v1624_v36  ;;  %v1692_v14 = vand.u32 2147483647, %v4405_v50  ;;  %v4428_v29 = vmul.f32 0.6931472, %v3295_v45  ;;  %v1996_v52 = vmul.f32 -0.5, %v4374_v49 }
  0xe3   :  { %3306 = vpow2.f32 %v1827_v53  ;;  %v671_v34 = vsub.f32 0.0, %v4420_v19  ;;  %v798_v18 = vsub.f32 0.0, %v734_v23  ;;  %v2521_v3 = vmax.f32 %v4260_v22, 0.0 }
  0xe4   :  { %v2717_v10 = vsel %vm2707_vm3, %v2648_v51, 0.0  ;;  %3308 = vlog2.f32 %v1051_v12  ;;  %v1756_v35 = vsub.f32 0.0, %v1692_v14  ;;  %v3297_v15 = vpop.eup %3296  ;;  %v4440_v24 = vmax.f32 %v668_v58, 0.0 }
  0xe5   :  { %v4435_v5 = vadd.f32 %v2717_v10, %v2716_v62  ;;  %v2522_v56 = vmax.f32 %v4294_v37, 0.0  ;;  %v4443_v46 = vpop.eup %3298  ;;  %v1038_v54 = vmul.f32 %v4328_v13, %v1037_v28  ;;  %vm4446_vm13 = vcmp.lt.f32.partialorder %v1039_v30, 0.0004427343 }
  0xe6   :  { %v4451_v31 = vmul.f32 %v4365_v63, %v1046_v11  ;;  %v735_v22 = vand.u32 2147483647, %v671_v34  ;;  %v4455_v32 = vpop.eup %3300  ;;  %v1054_v0 = vmul.f32 -0.5, %v4402_v7  ;;  %v4460_v58 = vmax.f32 %v669_v6, 0.0 }
  0xe7   :  { %v2523_v13 = vmax.f32 %v4372_v39, 0.0  ;;  %v1829_v38 = vmul.f32 1.442695, %v1756_v35  ;;  %v1041_v63 = vsel %vm4446_vm13, %v1038_v54, %v4428_v29  ;;  %vm4468_vm14 = vcmp.lt.f32.partialorder %v1048_v4, 0.0004427343  ;;  %v4496_v54 = vpop.xlane.xlu1 %367 }
  0xe8   :  { %v3303_v55 = vpop.eup %3302  ;;  %v1057_v21 = vand.u32 2147483647, %v4402_v7  ;;  %v1997_v62 = vadd.f32 1.0, %v1996_v52  ;;  %v873_v27 = vmul.f32 1.442695, %v798_v18  ;;  %v1060_v41 = vadd.f32 1.0, %v4443_v46 }
  0xe9   :  { %v1999_v6 = vand.u32 2147483647, %v4374_v49  ;;  %3310 = vpow2.f32 %v1829_v38  ;;  %v1693_v40 = vand.u32 2147483647, %v4432_v61  ;;  %v2005_v48 = vmul.f32 -0.5, %v4407_v20 }
  0xea   :  { %v1069_v26 = vadd.f32 1.0, %v4455_v32  ;;  %v799_v30 = vsub.f32 0.0, %v735_v22  ;;  %v672_v16 = vsub.f32 0.0, %v4463_v47  ;;  %v1044_v8 = vmul.f32 0.6931472, %v3297_v15 }
  0xeb   :  { %v1055_v45 = vadd.f32 1.0, %v1054_v0  ;;  %v1995_v36 = vmul.f32 0.6931472, %v3303_v55  ;;  %v1757_v1 = vsub.f32 0.0, %v1693_v40  ;;  %v3305_v12 = vpop.eup %3304  ;;  %v1998_v23 = vmul.f32 %v4374_v49, %v1997_v62 }
  0xec   :  { %3312 = vpow2.f32 %v873_v27  ;;  %v736_v28 = vand.u32 2147483647, %v672_v16  ;;  %v1694_v4 = vand.u32 2147483647, %v4476_v60  ;;  %vm4487_vm15 = vcmp.lt.f32.partialorder %v1999_v6, 0.0004427343 }
  0xed   :  { %v4485_v53 = vpop.eup %3306  ;;  %3314 = vlog2.f32 %v1060_v41  ;;  %v1063_v51 = vmul.f32 -0.5, %v4443_v46  ;;  %v1831_v14 = vmul.f32 1.442695, %v1757_v1  ;;  %v2006_v52 = vadd.f32 1.0, %v2005_v48 }
  0xee   :  { %v3309_v29 = vpop.eup %3308  ;;  %v2008_v49 = vand.u32 2147483647, %v4407_v20  ;;  %3316 = vlog2.f32 %v1069_v26  ;;  %v875_v10 = vmul.f32 1.442695, %v799_v30  ;;  %v2001_v18 = vsel %vm4487_vm15, %v1998_v23, %v1995_v36  ;;  %v4528_v36 = vpop.xlane.xlu0 %555 }
  0xef   :  { %v2011_v35 = vadd.f32 1.0, %v4485_v53  ;;  %3318 = vpow2.f32 %v1831_v14  ;;  %v800_v15 = vsub.f32 0.0, %v736_v28  ;;  %v1625_v25 = vadd.f32 %v4389_v44, %v1041_v63 }
  0xf0   :  { %v1056_v22 = vmul.f32 %v4402_v7, %v1055_v45  ;;  %v2004_v0 = vmul.f32 0.6931472, %v3305_v12  ;;  %v1758_v38 = vsub.f32 0.0, %v1694_v4  ;;  %v1050_v55 = vsel %vm4468_vm14, %v4451_v31, %v1044_v8 }
  0xf1   :  { %v1053_v62 = vmul.f32 0.6931472, %v3309_v29  ;;  %v1064_v27 = vadd.f32 1.0, %v1063_v51  ;;  %v1066_v6 = vand.u32 2147483647, %v4443_v46  ;;  %v2585_v41 = vadd.f32 %v2521_v3, %v2001_v18 }
  0xf2   :  { %v2007_v40 = vmul.f32 %v4407_v20, %v2006_v52  ;;  %3320 = vpow2.f32 %v875_v10  ;;  %v673_v48 = vsub.f32 0.0, %v4496_v54  ;;  %vm4508_vm0 = vcmp.lt.f32.partialorder %v2008_v49, 0.0004427343  ;;  %v4576_v44 = vpop.xlane.xlu0 %557 }
  0xf3   :  { %v4506_v26 = vpop.eup %3310  ;;  %v1072_v7 = vmul.f32 -0.5, %v4455_v32  ;;  %3322 = vlog2.f32 %v2011_v35  ;;  %v877_v31 = vmul.f32 1.442695, %v800_v15  ;;  %vm4513_vm1 = vcmp.lt.f32.partialorder %v1057_v21, 0.0004427343 }
  0xf4   :  { %v2010_v20 = vsel %vm4508_vm0, %v2007_v40, %v2004_v0  ;;  %v4521_v3 = vmax.f32 %v670_v17, 0.0  ;;  %v1833_v2 = vmul.f32 1.442695, %v1758_v38  ;;  %v1626_v30 = vadd.f32 %v4414_v43, %v1050_v55  ;;  %v4539_v43 = vpop.xlane.xlu1 %369 }
  0xf5   :  { %v1059_v8 = vsel %vm4513_vm1, %v1056_v22, %v1053_v62  ;;  %v1075_v45 = vand.u32 2147483647, %v4455_v32  ;;  %v2020_v21 = vadd.f32 1.0, %v4506_v26  ;;  %v2649_v12 = vadd.f32 %v2585_v41, %v1625_v25 }
  0xf6   :  { %v4530_v1 = vpop.eup %3312  ;;  %v1065_v23 = vmul.f32 %v4443_v46, %v1064_v27  ;;  %vm4533_vm2 = vcmp.lt.f32.partialorder %v1066_v6, 0.0004427343  ;;  %v737_v17 = vand.u32 2147483647, %v673_v48  ;;  %v2586_v4 = vadd.f32 %v2522_v56, %v2010_v20 }
  0xf7   :  { %v3315_v28 = vpop.eup %3314  ;;  %v1073_v11 = vadd.f32 1.0, %v1072_v7  ;;  %v2524_v51 = vmax.f32 %v4405_v50, 0.0  ;;  %3324 = vpow2.f32 %v877_v31  ;;  %v4545_v46 = vadd.f32 %v4425_v57, %v1059_v8 }
  0xf8   :  { %v3317_v14 = vpop.eup %3316  ;;  %v4549_v29 = vmax.f32 %v671_v34, 0.0  ;;  %3326 = vpow2.f32 %v1833_v2  ;;  %v1695_v52 = vand.u32 2147483647, %v4528_v36  ;;  %vm4554_vm4 = vcmp.lt.f32.partialorder %v1075_v45, 0.0004427343 }
  0xf9   :  { %v4552_v49 = vpop.eup %3318  ;;  %v1078_v56 = vadd.f32 1.0, %v4530_v1  ;;  %3328 = vlog2.f32 %v2020_v21  ;;  %v674_v10 = vsub.f32 0.0, %v4539_v43  ;;  %v2719_v57 = vsel %vm2707_vm3, %v2649_v12, 0.0 }
  0xfa   :  { %v1062_v18 = vmul.f32 0.6931472, %v3315_v28  ;;  %v2014_v19 = vmul.f32 -0.5, %v4485_v53  ;;  %v801_v34 = vsub.f32 0.0, %v737_v17  ;;  %v2650_v35 = vadd.f32 %v2586_v4, %v1626_v30 }
  0xfb   :  { %v1074_v15 = vmul.f32 %v4455_v32, %v1073_v11  ;;  %v1081_v25 = vmul.f32 -0.5, %v4530_v1  ;;  %v2525_v22 = vmax.f32 %v4432_v61, 0.0  ;;  %v1071_v38 = vmul.f32 0.6931472, %v3317_v14 }
  0xfc   :  { %v4565_v0 = vpop.eup %3320  ;;  %v2029_v55 = vadd.f32 1.0, %v4552_v49  ;;  %v2526_v62 = vmax.f32 %v4476_v60, 0.0  ;;  %v1759_v27 = vsub.f32 0.0, %v1695_v52  ;;  %v2720_v41 = vadd.f32 %v2719_v57, %v4435_v5  ;;  %v4608_v57 = vpop.xlane.xlu0 %559 }
  0xfd   :  { %v3323_v6 = vpop.eup %3322  ;;  %3330 = vlog2.f32 %v1078_v56  ;;  %v4572_v40 = vmax.f32 %v672_v16, 0.0  ;;  %v738_v32 = vand.u32 2147483647, %v674_v10  ;;  %v1068_v7 = vsel %vm4533_vm2, %v1065_v23, %v1062_v18 }
  0xfe   :  { %v2015_v31 = vadd.f32 1.0, %v2014_v19  ;;  %v2017_v63 = vand.u32 2147483647, %v4485_v53  ;;  %v879_v20 = vmul.f32 1.442695, %v801_v34  ;;  %v2721_v2 = vsel %vm2707_vm3, %v2650_v35, 0.0  ;;  %v4614_v34 = vpop.xlane.xlu1 %371 }
  0xff   :  { %v1082_v5 = vadd.f32 1.0, %v1081_v25  ;;  %v2023_v30 = vmul.f32 -0.5, %v4506_v26  ;;  %v1087_v47 = vadd.f32 1.0, %v4565_v0  ;;  %v1077_v16 = vsel %vm4554_vm4, %v1074_v15, %v1071_v38 }
 0x100   :  { %v2013_v8 = vmul.f32 0.6931472, %v3323_v6  ;;  %3332 = vlog2.f32 %v2029_v55  ;;  %v1835_v45 = vmul.f32 1.442695, %v1759_v27  ;;  %v4589_v12 = vadd.f32 %v4440_v24, %v1068_v7 }
 0x101   :  { %v4586_v21 = vpop.eup %3324  ;;  %v1084_v23 = vand.u32 2147483647, %v4530_v1  ;;  %v2026_v42 = vand.u32 2147483647, %v4506_v26  ;;  %v802_v17 = vsub.f32 0.0, %v738_v32  ;;  %v4595_v4 = vadd.f32 %v2721_v2, %v2720_v41 }
 0x102   :  { %v4593_v28 = vpop.eup %3326  ;;  %v2016_v11 = vmul.f32 %v4485_v53, %v2015_v31  ;;  %vm4598_vm5 = vcmp.lt.f32.partialorder %v2017_v63, 0.0004427343  ;;  %3334 = vpow2.f32 %v879_v20  ;;  %v4603_v24 = vadd.f32 %v4460_v58, %v1077_v16  ;;  %v4677_v58 = vpop.xlane.xlu0 %561 }
 0x103   :  { %v3329_v52 = vpop.eup %3328  ;;  %v4606_v37 = vmul.f32 %v4530_v1, %v1082_v5  ;;  %v2024_v56 = vadd.f32 1.0, %v2023_v30  ;;  %3336 = vlog2.f32 %v1087_v47  ;;  %v1096_v53 = vadd.f32 1.0, %v4586_v21 }
 0x104   :  { %v2019_v18 = vsel %vm4598_vm5, %v2016_v11, %v2013_v8  ;;  %3338 = vpow2.f32 %v1835_v45  ;;  %v1696_v19 = vand.u32 2147483647, %v4576_v44  ;;  %vm4616_vm6 = vcmp.lt.f32.partialorder %v1084_v23, 0.0004427343  ;;  %v4648_v23 = vpop.xlane.xlu1 %373 }
 0x105   :  { %vm4620_vm7 = vcmp.lt.f32.partialorder %v2026_v42, 0.0004427343  ;;  %v1090_v35 = vmul.f32 -0.5, %v4565_v0  ;;  %v2032_v15 = vmul.f32 -0.5, %v4552_v49  ;;  %v881_v25 = vmul.f32 1.442695, %v802_v17 }
 0x106   :  { %v2022_v38 = vmul.f32 0.6931472, %v3329_v52  ;;  %v2038_v55 = vadd.f32 1.0, %v4593_v28  ;;  %v1760_v27 = vsub.f32 0.0, %v1696_v19  ;;  %v1697_v6 = vand.u32 2147483647, %v4608_v57 }
 0x107   :  { %v3331_v41 = vpop.eup %3330  ;;  %v2587_v32 = vadd.f32 %v2523_v13, %v2019_v18  ;;  %v1093_v7 = vand.u32 2147483647, %v4565_v0  ;;  %v4633_v31 = vmax.f32 %v673_v48, 0.0  ;;  %v675_v63 = vsub.f32 0.0, %v4614_v34 }
 0x108   :  { %v2025_v20 = vmul.f32 %v4506_v26, %v2024_v56  ;;  %3340 = vlog2.f32 %v1096_v53  ;;  %v2527_v2 = vmax.f32 %v4528_v36, 0.0  ;;  %v1837_v5 = vmul.f32 1.442695, %v1760_v27 }
 0x109   :  { %v1091_v30 = vadd.f32 1.0, %v1090_v35  ;;  %v2033_v47 = vadd.f32 1.0, %v2032_v15  ;;  %v1099_v16 = vmul.f32 -0.5, %v4586_v21  ;;  %3342 = vpow2.f32 %v881_v25 }
 0x10a   :  { %v3333_v39 = vpop.eup %3332  ;;  %v1080_v13 = vmul.f32 0.6931472, %v3331_v41  ;;  %v2028_v54 = vsel %vm4620_vm7, %v2025_v20, %v2022_v38  ;;  %3344 = vlog2.f32 %v2038_v55  ;;  %v1761_v48 = vsub.f32 0.0, %v1697_v6 }
 0x10b   :  { %v2651_v8 = vadd.f32 %v2587_v32, %v4545_v46  ;;  %vm4642_vm8 = vcmp.lt.f32.partialorder %v1093_v7, 0.0004427343  ;;  %3346 = vpow2.f32 %v1837_v5  ;;  %v739_v45 = vand.u32 2147483647, %v675_v63 }
 0x10c   :  { %v4650_v42 = vpop.eup %3334  ;;  %v2035_v17 = vand.u32 2147483647, %v4552_v49  ;;  %v1102_v11 = vand.u32 2147483647, %v4586_v21  ;;  %v2041_v14 = vmul.f32 -0.5, %v4593_v28  ;;  %v4657_v46 = vmax.f32 %v674_v10, 0.0 }
 0x10d   :  { %v3337_v52 = vpop.eup %3336  ;;  %v2588_v56 = vadd.f32 %v2524_v51, %v2028_v54  ;;  %v2031_v18 = vmul.f32 0.6931472, %v3333_v39  ;;  %v2034_v53 = vmul.f32 %v4552_v49, %v2033_v47  ;;  %v1100_v19 = vadd.f32 1.0, %v1099_v16 }
 0x10e   :  { %v4662_v1 = vpop.eup %3338  ;;  %v1086_v35 = vsel %vm4616_vm6, %v4606_v37, %v1080_v13  ;;  %v2044_v15 = vand.u32 2147483647, %v4593_v28  ;;  %v1839_v25 = vmul.f32 1.442695, %v1761_v48  ;;  %v676_v43 = vsub.f32 0.0, %v4648_v23 }
 0x10f   :  { %v2723_v10 = vsel %vm2707_vm3, %v2651_v8, 0.0  ;;  %v1105_v50 = vadd.f32 1.0, %v4650_v42  ;;  %v2047_v51 = vadd.f32 1.0, %v4662_v1  ;;  %v803_v38 = vsub.f32 0.0, %v739_v45 }
 0x110   :  { %v1089_v49 = vmul.f32 0.6931472, %v3337_v52  ;;  %v1092_v55 = vmul.f32 %v4565_v0, %v1091_v30  ;;  %vm4673_vm9 = vcmp.lt.f32.partialorder %v2035_v17, 0.0004427343  ;;  %v2042_v37 = vadd.f32 1.0, %v2041_v14  ;;  %v4693_v30 = vpop.xlane.xlu1 %375 }
 0x111   :  { %v4680_v6 = vadd.f32 %v4521_v3, %v1086_v35  ;;  %v2652_v41 = vadd.f32 %v2588_v56, %v4589_v12  ;;  %v2037_v32 = vsel %vm4673_vm9, %v2034_v53, %v2031_v18  ;;  %vm4685_vm10 = vcmp.lt.f32.partialorder %v1102_v11, 0.0004427343 }
 0x112   :  { %3348 = vlog2.f32 %v2047_v51  ;;  %v3341_v0 = vpop.eup %3340  ;;  %v2724_v20 = vadd.f32 %v2723_v10, %v4595_v4  ;;  %v1101_v5 = vmul.f32 %v4586_v21, %v1100_v19  ;;  %v740_v3 = vand.u32 2147483647, %v676_v43 }
 0x113   :  { %3350 = vpow2.f32 %v1839_v25  ;;  %v4695_v12 = vpop.eup %3342  ;;  %vm4697_vm11 = vcmp.lt.f32.partialorder %v2044_v15, 0.0004427343  ;;  %v883_v16 = vmul.f32 1.442695, %v803_v38  ;;  %v1698_v39 = vand.u32 2147483647, %v4677_v58 }
 0x114   :  { %3352 = vlog2.f32 %v1105_v50  ;;  %v3345_v13 = vpop.eup %3344  ;;  %v1095_v21 = vsel %vm4642_vm8, %v1092_v55, %v1089_v49  ;;  %v2589_v4 = vadd.f32 %v2525_v22, %v2037_v32  ;;  %v2043_v54 = vmul.f32 %v4593_v28, %v2042_v37  ;;  %v4715_v22 = vpop.xlane.xlu0 %563 }
 0x115   :  { %v2528_v48 = vmax.f32 %v4576_v44, 0.0  ;;  %v4708_v8 = vpop.eup %3346  ;;  %v2725_v45 = vsel %vm2707_vm3, %v2652_v41, 0.0  ;;  %v1108_v17 = vmul.f32 -0.5, %v4650_v42  ;;  %v1762_v11 = vsub.f32 0.0, %v1698_v39 }
 0x116   :  { %v677_v14 = vsub.f32 0.0, %v4693_v30  ;;  %v1098_v52 = vmul.f32 0.6931472, %v3341_v0  ;;  %v1114_v26 = vadd.f32 1.0, %v4695_v12  ;;  %v2056_v56 = vadd.f32 1.0, %v4708_v8 }
 0x117   :  { %v804_v61 = vsub.f32 0.0, %v740_v3  ;;  %v2040_v28 = vmul.f32 0.6931472, %v3345_v13  ;;  %v2050_v18 = vmul.f32 -0.5, %v4662_v1  ;;  %3354 = vpow2.f32 %v883_v16 }
 0x118   :  { %v1841_v53 = vmul.f32 1.442695, %v1762_v11  ;;  %v2653_v19 = vadd.f32 %v2589_v4, %v4603_v24  ;;  %v1111_v35 = vand.u32 2147483647, %v4650_v42  ;;  %3356 = vlog2.f32 %v2056_v56 }
 0x119   :  { %v741_v15 = vand.u32 2147483647, %v677_v14  ;;  %v4723_v25 = vadd.f32 %v4549_v29, %v1095_v21  ;;  %v2529_v10 = vmax.f32 %v4608_v57, 0.0  ;;  %v1699_v50 = vand.u32 2147483647, %v4715_v22 }
 0x11a   :  { %3358 = vpow2.f32 %v1841_v53  ;;  %v2726_v51 = vadd.f32 %v2725_v45, %v2724_v20  ;;  %v1104_v38 = vsel %vm4685_vm10, %v1101_v5, %v1098_v52  ;;  %v885_v24 = vmul.f32 1.442695, %v804_v61 }
 0x11b   :  { %3360 = vlog2.f32 %v1114_v26  ;;  %v2046_v55 = vsel %vm4697_vm11, %v2043_v54, %v2040_v28  ;;  %v1109_v27 = vadd.f32 1.0, %v1108_v17  ;;  %v2051_v37 = vadd.f32 1.0, %v2050_v18 }
 0x11c   :  { %v3349_v49 = vpop.eup %3348  ;;  %v2059_v29 = vmul.f32 -0.5, %v4708_v8  ;;  %v2727_v32 = vsel %vm2707_vm3, %v2653_v19, 0.0  ;;  %vm4735_vm12 = vcmp.lt.f32.partialorder %v1111_v35, 0.0004427343  ;;  %v2053_v7 = vand.u32 2147483647, %v4662_v1 }
 0x11d   :  { %v4732_v41 = vpop.eup %3350  ;;  %v805_v20 = vsub.f32 0.0, %v741_v15  ;;  %v4741_v3 = vadd.f32 %v4572_v40, %v1104_v38  ;;  %v2049_v47 = vmul.f32 0.6931472, %v3349_v49  ;;  %v1763_v39 = vsub.f32 0.0, %v1699_v50  ;;  %v4750_v40 = vpop.xlane.xlu1 %377 }
 0x11e   :  { %v3353_v5 = vpop.eup %3352  ;;  %v2065_v16 = vadd.f32 1.0, %v4732_v41  ;;  %v2590_v13 = vadd.f32 %v2526_v62, %v2046_v55  ;;  %v1117_v21 = vmul.f32 -0.5, %v4695_v12  ;;  %v1120_v4 = vand.u32 2147483647, %v4695_v12  ;;  %v4773_v38 = vpop.xlane.xlu0 %565 }
 0x11f   :  { %3362 = vpow2.f32 %v885_v24  ;;  %v1110_v54 = vmul.f32 %v4650_v42, %v1109_v27  ;;  %v2052_v45 = vmul.f32 %v4662_v1, %v2051_v37  ;;  %v2060_v17 = vadd.f32 1.0, %v2059_v29  ;;  %v4845_v29 = vld [vmem:[%s6825_s0 + $0x1d8] sm:$0xff]  }
 0x120   :  { %3364 = vlog2.f32 %v2065_v16  ;;  %v4752_v11 = vadd.f32 %v2727_v32, %v2726_v51  ;;  %v1107_v52 = vmul.f32 0.6931472, %v3353_v5  ;;  %vm4754_vm13 = vcmp.lt.f32.partialorder %v2053_v7, 0.0004427343 }
 0x121   :  { %v887_v60 = vmul.f32 1.442695, %v805_v20  ;;  %v4758_v62 = vpop.eup %3354  ;;  %v2055_v56 = vsel %vm4754_vm13, %v2052_v45, %v2049_v47  ;;  %v2062_v42 = vand.u32 2147483647, %v4708_v8  ;;  %v2068_v1 = vmul.f32 -0.5, %v4732_v41 }
 0x122   :  { %v1843_v61 = vmul.f32 1.442695, %v1763_v39  ;;  %v3357_v28 = vpop.eup %3356  ;;  %v2654_v18 = vadd.f32 %v2590_v13, %v4680_v6  ;;  %v1118_v53 = vadd.f32 1.0, %v1117_v21  ;;  %vm4765_vm14 = vcmp.lt.f32.partialorder %v1120_v4, 0.0004427343 }
 0x123   :  { %v678_v35 = vsub.f32 0.0, %v4750_v40  ;;  %v2058_v50 = vmul.f32 0.6931472, %v3357_v28  ;;  %v2061_v51 = vmul.f32 %v4708_v8, %v2060_v17  ;;  %v3026_v24 = vunpack.c.h.bf16 %v4253_v59 }
 0x124   :  { %v4770_v15 = vpop.eup %3358  ;;  %3366 = vpow2.f32 %v1843_v61  ;;  %v2591_v6 = vadd.f32 %v2527_v2, %v2055_v56  ;;  %v1123_v55 = vadd.f32 1.0, %v4758_v62  ;;  %v1113_v37 = vsel %vm4735_vm12, %v1110_v54, %v1107_v52 }
 0x125   :  { %v3361_v49 = vpop.eup %3360  ;;  %v2074_v27 = vadd.f32 1.0, %v4770_v15  ;;  %3368 = vpow2.f32 %v887_v60  ;;  %vm4782_vm15 = vcmp.lt.f32.partialorder %v2062_v42, 0.0004427343  ;;  %v2069_v8 = vadd.f32 1.0, %v2068_v1 }
 0x126   :  { %v2530_v32 = vmax.f32 %v4677_v58, 0.0  ;;  %v2064_v59 = vsel %vm4782_vm15, %v2061_v51, %v2058_v50  ;;  %v742_v36 = vand.u32 2147483647, %v678_v35  ;;  %v1700_v2 = vand.u32 2147483647, %v4773_v38 }
 0x127   :  { %3370 = vlog2.f32 %v2074_v27  ;;  %v2729_v7 = vsel %vm2707_vm3, %v2654_v18, 0.0  ;;  %v1116_v0 = vmul.f32 0.6931472, %v3361_v49  ;;  %v2071_v20 = vand.u32 2147483647, %v4732_v41 }
 0x128   :  { %v330_v5 = vmul.f32 %v4243_v33, %v3026_v24  ;;  %v2655_v16 = vadd.f32 %v2591_v6, %v4723_v25  ;;  %3372 = vlog2.f32 %v1123_v55  ;;  %v1764_v39 = vsub.f32 0.0, %v1700_v2  ;;  %v4829_v55 = vpop.xlane.xlu1 %379 }
 0x129   :  { %v4795_v47 = vpop.eup %3362  ;;  %v3150_v13 = vunpack.c.h.bf16 %v4267_v9  ;;  %v1633_v4 = vadd.f32 %v4633_v31, %v1113_v37  ;;  %v1119_v54 = vmul.f32 %v4695_v12, %v1118_v53  ;;  %v2592_v45 = vadd.f32 %v2528_v48, %v2064_v59  ;;  %v4809_v12 = vpop.xlane.xlu0 %567 }
 0x12a   :  { %v3365_v21 = vpop.eup %3364  ;;  %v2077_v17 = vmul.f32 -0.5, %v4770_v15  ;;  %449 = vadd.xlane.f32.xlu1 %v330_v5  ;;  %v2070_v52 = vmul.f32 %v4732_v41, %v2069_v8  ;;  %v806_v26 = vsub.f32 0.0, %v742_v36  ;;  %v1845_v25 = vmul.f32 1.442695, %v1764_v39  ;;  %v4816_v41 = vld [vmem:[%s6826_s1] ss:$0 sm:$0xff] }
 0x12b   :  { %v2067_v33 = vmul.f32 0.6931472, %v3365_v21  ;;  %v1122_v60 = vsel %vm4765_vm14, %v1119_v54, %v1116_v0  ;;  %v1126_v9 = vmul.f32 -0.5, %v4758_v62  ;;  %vm2072_vm0 = vcmp.lt.f32.partialorder %v2071_v20, 0.0004427343 }
 0x12c   :  { %v1132_v31 = vadd.f32 1.0, %v4795_v47  ;;  %v2731_v44 = vsel %vm2707_vm3, %v2655_v16, 0.0  ;;  %v2080_v56 = vand.u32 2147483647, %v4770_v15  ;;  %v520_v42 = vmul.f32 %v4816_v41, %v3150_v13 }
 0x12d   :  { %v2073_v48 = vsel %vm2072_vm0, %v2070_v52, %v2067_v33  ;;  %v2656_v61 = vadd.f32 %v2592_v45, %v4741_v3  ;;  %v2078_v18 = vadd.f32 1.0, %v2077_v17  ;;  %3374 = vpow2.f32 %v1845_v25 }
 0x12e   :  { %v4819_v1 = vpop.eup %3366  ;;  %v2593_v28 = vadd.f32 %v2529_v10, %v2073_v48  ;;  %v2730_v19 = vadd.f32 %v2729_v7, %v4752_v11  ;;  %v1129_v50 = vand.u32 2147483647, %v4758_v62  ;;  %v889_v24 = vmul.f32 1.442695, %v806_v26  ;;  %637 = vadd.xlane.f32.xlu0 %v520_v42  ;;  %v4835_v10 = vld [vmem:[%s6825_s0 + $0xe0] sm:$0xff]   ;;  %v4850_v7 = vpop.xlane.xlu0 %569 }
 0x12f   :  { %v4824_v53 = vpop.eup %3368  ;;  %v2083_v51 = vadd.f32 1.0, %v4819_v1  ;;  %v1127_v49 = vadd.f32 1.0, %v1126_v9  ;;  %3376 = vlog2.f32 %v1132_v31  ;;  %v1701_v57 = vand.u32 2147483647, %v4809_v12 }
 0x130   :  { %v2657_v6 = vadd.f32 %v2593_v28, %v1633_v4  ;;  %v2732_v11 = vadd.f32 %v2731_v44, %v2730_v19  ;;  %v1634_v27 = vadd.f32 %v4657_v46, %v1122_v60  ;;  %vm4838_vm1 = vcmp.lt.f32.partialorder %v2080_v56, 0.0004427343 }
 0x131   :  { %v3371_v3 = vpop.eup %3370  ;;  %3378 = vlog2.f32 %v2083_v51  ;;  %v2733_v8 = vsel %vm2707_vm3, %v2656_v61, 0.0  ;;  %v2079_v36 = vmul.f32 %v4770_v15, %v2078_v18  ;;  %v1141_v2 = vadd.f32 1.0, %v4824_v53  ;;  %v4885_v51 = vpop.xlane.xlu1 %381 }
 0x132   :  { %v2076_v59 = vmul.f32 0.6931472, %v3371_v3  ;;  %v3373_v46 = vpop.eup %3372  ;;  %3380 = vpow2.f32 %v889_v24  ;;  %v679_v0 = vsub.f32 0.0, %v4829_v55  ;;  %v1765_v20 = vsub.f32 0.0, %v1701_v57 }
 0x133   :  { %v3029_v5 = vunpack.c.l.bf16 %v4835_v10  ;;  %v2735_v16 = vsel %vm2707_vm3, %v2657_v6, 0.0  ;;  %v2086_v13 = vmul.f32 -0.5, %v4819_v1  ;;  %v3153_v15 = vunpack.c.l.bf16 %v4845_v29 }
 0x134   :  { %v2082_v39 = vsel %vm4838_vm1, %v2079_v36, %v2076_v59  ;;  %v1847_v4 = vmul.f32 1.442695, %v1765_v20  ;;  %v1702_v45 = vand.u32 2147483647, %v4850_v7  ;;  %v2734_v17 = vadd.f32 %v2733_v8, %v2732_v11 }
 0x135   :  { %v2594_v21 = vadd.f32 %v2530_v32, %v2082_v39  ;;  %v331_v54 = vmul.f32 %v4816_v41, %v3029_v5  ;;  %v1125_v33 = vmul.f32 0.6931472, %v3373_v46  ;;  %vm4863_vm2 = vcmp.lt.f32.partialorder %v1129_v50, 0.0004427343  ;;  %v4916_v52 = vpop.xlane.xlu1 %383 }
 0x136   :  { %v521_v26 = vmul.f32 %v4816_v41, %v3153_v15  ;;  %v1128_v25 = vmul.f32 %v4758_v62, %v1127_v49  ;;  %v743_v58 = vand.u32 2147483647, %v679_v0  ;;  %3382 = vpow2.f32 %v1847_v4 }
 0x137   :  { %v2658_v60 = vadd.f32 %v2594_v21, %v1634_v27  ;;  %451 = vadd.xlane.f32.xlu1 %v331_v54  ;;  %v4871_v32 = vpop.eup %3374  ;;  %v2736_v9 = vadd.f32 %v2735_v16, %v2734_v17  ;;  %v1135_v31 = vmul.f32 -0.5, %v4795_v47  ;;  %v2087_v44 = vadd.f32 1.0, %v2086_v13 }
 0x138   :  { %639 = vadd.xlane.f32.xlu0 %v521_v26  ;;  %v1766_v48 = vsub.f32 0.0, %v1702_v45  ;;  %3384 = vlog2.f32 %v1141_v2  ;;  %v2089_v42 = vand.u32 2147483647, %v4819_v1  ;;  %v2092_v62 = vadd.f32 1.0, %v4871_v32 }
 0x139   :  { %v2737_v56 = vsel %vm2707_vm3, %v2658_v60, 0.0  ;;  %v3377_v61 = vpop.eup %3376  ;;  %v1131_v28 = vsel %vm4863_vm2, %v1128_v25, %v1125_v33  ;;  %v1571_v18 = vmax.f32 %v675_v63, 0.0  ;;  %v4883_v19 = vmax.f32 %v676_v43, 0.0  ;;  %v4890_v63 = vpop.xlane.xlu0 %571 }
 0x13a   :  { %v2738_v50 = vadd.f32 %v2737_v56, %v2736_v9  ;;  %v2531_v49 = vmax.f32 %v4715_v22, 0.0  ;;  %3386 = vlog2.f32 %v2092_v62  ;;  %v2532_v6 = vmax.f32 %v4773_v38, 0.0  ;;  %v4899_v22 = vld [vmem:[%s6825_s0 + $0xe8] sm:$0xff]  }
 0x13b   :  { %v3379_v24 = vpop.eup %3378  ;;  %v807_v57 = vsub.f32 0.0, %v743_v58  ;;  %v1136_v3 = vadd.f32 1.0, %v1135_v31  ;;  %v2088_v27 = vmul.f32 %v4819_v1, %v2087_v44  ;;  %v1849_v34 = vmul.f32 1.442695, %v1766_v48  ;;  %v4928_v48 = vld [vmem:[%s6825_s0 + $0x1e0] sm:$0xff]  }
 0x13c   :  { %v2085_v11 = vmul.f32 0.6931472, %v3379_v24  ;;  %v4892_v23 = vpop.eup %3380  ;;  %v1635_v43 = vadd.f32 %v1571_v18, %v1131_v28  ;;  %vm2090_vm4 = vcmp.lt.f32.partialorder %v2089_v42, 0.0004427343  ;;  %v680_v37 = vsub.f32 0.0, %v4885_v51 }
 0x13d   :  { %v3030_v8 = vunpack.c.h.bf16 %v4835_v10  ;;  %v2095_v36 = vmul.f32 -0.5, %v4871_v32  ;;  %3388 = vpow2.f32 %v1849_v34  ;;  %v3154_v1 = vunpack.c.h.bf16 %v4845_v29 }
 0x13e   :  { %v2091_v59 = vsel %vm2090_vm4, %v2088_v27, %v2085_v11  ;;  %v891_v46 = vmul.f32 1.442695, %v807_v57  ;;  %v1703_v5 = vand.u32 2147483647, %v4890_v63  ;;  %v1138_v16 = vand.u32 2147483647, %v4795_v47 }
 0x13f   :  { %v2595_v2 = vadd.f32 %v2531_v49, %v2091_v59  ;;  %v332_v20 = vmul.f32 %v4816_v41, %v3030_v8  ;;  %v1144_v10 = vmul.f32 -0.5, %v4824_v53  ;;  %v522_v39 = vmul.f32 %v4816_v41, %v3154_v1 }
 0x140   :  { %v3033_v13 = vunpack.c.l.bf16 %v4899_v22  ;;  %v4909_v15 = vpop.eup %3382  ;;  %v1134_v21 = vmul.f32 0.6931472, %v3377_v61  ;;  %v1150_v29 = vadd.f32 1.0, %v4892_v23  ;;  %v744_v54 = vand.u32 2147483647, %v680_v37 }
 0x141   :  { %v2659_v4 = vadd.f32 %v2595_v2, %v1635_v43  ;;  %453 = vadd.xlane.f32.xlu1 %v332_v20  ;;  %v1137_v45 = vmul.f32 %v4795_v47, %v1136_v3  ;;  %v2096_v17 = vadd.f32 1.0, %v2095_v36  ;;  %v2101_v33 = vadd.f32 1.0, %v4909_v15  ;;  %641 = vadd.xlane.f32.xlu0 %v522_v39 }
 0x142   :  { %v333_v26 = vmul.f32 %v4816_v41, %v3033_v13  ;;  %v3385_v25 = vpop.eup %3384  ;;  %v2098_v58 = vand.u32 2147483647, %v4871_v32  ;;  %3390 = vpow2.f32 %v891_v46  ;;  %v1767_v9 = vsub.f32 0.0, %v1703_v5  ;;  %v4954_v46 = vpop.xlane.xlu1 %385 }
 0x143   :  { %v2739_v60 = vsel %vm2707_vm3, %v2659_v4, 0.0  ;;  %vm4921_vm5 = vcmp.lt.f32.partialorder %v1138_v16, 0.0004427343  ;;  %v1145_v47 = vadd.f32 1.0, %v1144_v10  ;;  %3392 = vlog2.f32 %v2101_v33  ;;  %v4958_v5 = vpop.xlane.xlu0 %573 }
 0x144   :  { %v2740_v44 = vadd.f32 %v2739_v60, %v2738_v50  ;;  %v3387_v56 = vpop.eup %3386  ;;  %v1140_v42 = vsel %vm4921_vm5, %v1137_v45, %v1134_v21  ;;  %3394 = vlog2.f32 %v1150_v29  ;;  %v808_v62 = vsub.f32 0.0, %v744_v54 }
 0x145   :  { %v681_v61 = vsub.f32 0.0, %v4916_v52  ;;  %455 = vadd.xlane.f32.xlu1 %v333_v26  ;;  %v1143_v28 = vmul.f32 0.6931472, %v3385_v25  ;;  %v1147_v18 = vand.u32 2147483647, %v4824_v53  ;;  %v2097_v50 = vmul.f32 %v4871_v32, %v2096_v17 }
 0x146   :  { %v2094_v24 = vmul.f32 0.6931472, %v3387_v56  ;;  %vm2099_vm6 = vcmp.lt.f32.partialorder %v2098_v58, 0.0004427343  ;;  %v2104_v49 = vmul.f32 -0.5, %v4909_v15  ;;  %v3157_v3 = vunpack.c.l.bf16 %v4928_v48 }
 0x147   :  { %v1851_v57 = vmul.f32 1.442695, %v1767_v9  ;;  %v4937_v11 = vpop.eup %3388  ;;  %v1636_v27 = vadd.f32 %v4883_v19, %v1140_v42  ;;  %v1146_v34 = vmul.f32 %v4824_v53, %v1145_v47  ;;  %v893_v59 = vmul.f32 1.442695, %v808_v62  ;;  %v4973_v47 = vpop.xlane.xlu1 %387 }
 0x148   :  { %v2100_v43 = vsel %vm2099_vm6, %v2097_v50, %v2094_v24  ;;  %v2110_v36 = vadd.f32 1.0, %v4937_v11  ;;  %v745_v32 = vand.u32 2147483647, %v681_v61  ;;  %vm4946_vm7 = vcmp.lt.f32.partialorder %v1147_v18, 0.0004427343 }
 0x149   :  { %v2596_v8 = vadd.f32 %v2532_v6, %v2100_v43  ;;  %v1573_v2 = vmax.f32 %v677_v14, 0.0  ;;  %v1153_v19 = vmul.f32 -0.5, %v4892_v23  ;;  %v523_v53 = vmul.f32 %v4816_v41, %v3157_v3 }
 0x14a   :  { %v1149_v38 = vsel %vm4946_vm7, %v1146_v34, %v1143_v28  ;;  %v2105_v20 = vadd.f32 1.0, %v2104_v49  ;;  %3396 = vpow2.f32 %v1851_v57  ;;  %v1156_v16 = vand.u32 2147483647, %v4892_v23  ;;  %v4980_v49 = vpop.xlane.xlu0 %575 }
 0x14b   :  { %v2660_v6 = vadd.f32 %v2596_v8, %v1636_v27  ;;  %v2107_v10 = vand.u32 2147483647, %v4909_v15  ;;  %v2533_v30 = vmax.f32 %v4809_v12, 0.0  ;;  %3398 = vlog2.f32 %v2110_v36  ;;  %643 = vadd.xlane.f32.xlu0 %v523_v53 }
 0x14c   :  { %v4963_v14 = vpop.eup %3390  ;;  %3400 = vpow2.f32 %v893_v59  ;;  %v809_v13 = vsub.f32 0.0, %v745_v32  ;;  %v682_v21 = vsub.f32 0.0, %v4954_v46  ;;  %v1637_v29 = vadd.f32 %v1573_v2, %v1149_v38 }
 0x14d   :  { %v2741_v39 = vsel %vm2707_vm3, %v2660_v6, 0.0  ;;  %v3393_v4 = vpop.eup %3392  ;;  %v2113_v45 = vmul.f32 -0.5, %v4937_v11  ;;  %v1704_v17 = vand.u32 2147483647, %v4958_v5  ;;  %v1154_v26 = vadd.f32 1.0, %v1153_v19 }
 0x14e   :  { %v2742_v54 = vadd.f32 %v2741_v39, %v2740_v44  ;;  %v3395_v33 = vpop.eup %3394  ;;  %v2103_v12 = vmul.f32 0.6931472, %v3393_v4  ;;  %v2106_v25 = vmul.f32 %v4909_v15, %v2105_v20  ;;  %v3034_v60 = vunpack.c.h.bf16 %v4899_v22 }
 0x14f   :  { %v1159_v58 = vadd.f32 1.0, %v4963_v14  ;;  %vm2108_vm8 = vcmp.lt.f32.partialorder %v2107_v10, 0.0004427343  ;;  %v1768_v9 = vsub.f32 0.0, %v1704_v17  ;;  %v3158_v31 = vunpack.c.h.bf16 %v4928_v48 }
 0x150   :  { %v2109_v44 = vsel %vm2108_vm8, %v2106_v25, %v2103_v12  ;;  %v895_v56 = vmul.f32 1.442695, %v809_v13  ;;  %v746_v42 = vand.u32 2147483647, %v682_v21  ;;  %v334_v62 = vmul.f32 %v4816_v41, %v3034_v60 }
 0x151   :  { %v1152_v28 = vmul.f32 0.6931472, %v3395_v33  ;;  %v2597_v18 = vadd.f32 %v2533_v30, %v2109_v44  ;;  %v2114_v15 = vadd.f32 1.0, %v2113_v45  ;;  %v524_v22 = vmul.f32 %v4816_v41, %v3158_v31  ;;  %v3231_v30 = vld [vmem:[%s6825_s0 + $0x1e8] sm:$0xff]  }
 0x152   :  { %v1853_v24 = vmul.f32 1.442695, %v1768_v9  ;;  %457 = vadd.xlane.f32.xlu1 %v334_v62  ;;  %v683_v50 = vsub.f32 0.0, %v4973_v47  ;;  %v1155_v48 = vmul.f32 %v4892_v23, %v1154_v26  ;;  %3402 = vlog2.f32 %v1159_v58  ;;  %v5012_v26 = vpop.xlane.xlu0 %577  ;;  %v5016_v9 = vpop.xlane.xlu1 %389 }
 0x153   :  { %v2661_v57 = vadd.f32 %v2597_v18, %v1637_v29  ;;  %v2116_v3 = vand.u32 2147483647, %v4937_v11  ;;  %645 = vadd.xlane.f32.xlu0 %v524_v22  ;;  %vm4986_vm9 = vcmp.lt.f32.partialorder %v1156_v16, 0.0004427343  ;;  %v1574_v43 = vmax.f32 %v678_v35, 0.0  ;;  %v3200_v35 = vld [vmem:[%s6825_s0 + $0xf0] sm:$0xff]  }
 0x154   :  { %v4984_v27 = vpop.eup %3396  ;;  %3404 = vpow2.f32 %v895_v56  ;;  %v810_v8 = vsub.f32 0.0, %v746_v42  ;;  %v1158_v23 = vsel %vm4986_vm9, %v1155_v48, %v1152_v28  ;;  %v2115_v32 = vmul.f32 %v4937_v11, %v2114_v15 }
 0x155   :  { %v3399_v59 = vpop.eup %3398  ;;  %v2743_v36 = vsel %vm2707_vm3, %v2661_v57, 0.0  ;;  %v1705_v1 = vand.u32 2147483647, %v4980_v49  ;;  %3406 = vpow2.f32 %v1853_v24  ;;  %v747_v40 = vand.u32 2147483647, %v683_v50 }
 0x156   :  { %v4997_v2 = vpop.eup %3400  ;;  %v2744_v19 = vadd.f32 %v2743_v36, %v2742_v54  ;;  %v2112_v53 = vmul.f32 0.6931472, %v3399_v59  ;;  %vm2117_vm10 = vcmp.lt.f32.partialorder %v2116_v3, 0.0004427343  ;;  %v2534_v38 = vmax.f32 %v4850_v7, 0.0 }
 0x157   :  { %v2119_v6 = vadd.f32 1.0, %v4984_v27  ;;  %v1638_v11 = vadd.f32 %v1574_v43, %v1158_v23  ;;  %v1162_v20 = vmul.f32 -0.5, %v4963_v14  ;;  %v897_v10 = vmul.f32 1.442695, %v810_v8  ;;  %v5040_v23 = vpop.xlane.xlu0 %579 }
 0x158   :  { %v2118_v16 = vsel %vm2117_vm10, %v2115_v32, %v2112_v53  ;;  %v1168_v39 = vadd.f32 1.0, %v4997_v2  ;;  %v1769_v4 = vsub.f32 0.0, %v1705_v1  ;;  %v3037_v29 = vunpack.c.l.bf16 %v3200_v35 }
 0x159   :  { %v2598_v13 = vadd.f32 %v2534_v38, %v2118_v16  ;;  %v811_v54 = vsub.f32 0.0, %v747_v40  ;;  %3408 = vlog2.f32 %v2119_v6  ;;  %v3161_v17 = vunpack.c.l.bf16 %v3231_v30 }
 0x15a   :  { %v335_v7 = vmul.f32 %v4816_v41, %v3037_v29  ;;  %v1163_v33 = vadd.f32 1.0, %v1162_v20  ;;  %3410 = vpow2.f32 %v897_v10  ;;  %v1855_v60 = vmul.f32 1.442695, %v1769_v4  ;;  %v5077_v29 = vld [vmem:[%s6825_s0 + $0xf8] sm:$0xff]  }
 0x15b   :  { %v2662_v45 = vadd.f32 %v2598_v13, %v1638_v11  ;;  %3412 = vlog2.f32 %v1168_v39  ;;  %v525_v58 = vmul.f32 %v4816_v41, %v3161_v17  ;;  %v1171_v44 = vmul.f32 -0.5, %v4997_v2  ;;  %v5088_v17 = vld [vmem:[%s6825_s0 + $0x1f0] sm:$0xff]  }
 0x15c   :  { %v3403_v12 = vpop.eup %3402  ;;  %459 = vadd.xlane.f32.xlu1 %v335_v7  ;;  %v899_v42 = vmul.f32 1.442695, %v811_v54  ;;  %v1706_v62 = vand.u32 2147483647, %v5012_v26  ;;  %v3038_v28 = vunpack.c.h.bf16 %v3200_v35  ;;  %v1165_v15 = vand.u32 2147483647, %v4963_v14 }
 0x15d   :  { %v2745_v25 = vsel %vm2707_vm3, %v2662_v45, 0.0  ;;  %647 = vadd.xlane.f32.xlu0 %v525_v58  ;;  %v1575_v22 = vmax.f32 %v679_v0, 0.0  ;;  %v5031_v24 = vmax.f32 %v680_v37, 0.0  ;;  %v684_v48 = vsub.f32 0.0, %v5016_v9 }
 0x15e   :  { %v5018_v31 = vpop.eup %3404  ;;  %v5021_v56 = vadd.f32 %v2745_v25, %v2744_v19  ;;  %v1161_v57 = vmul.f32 0.6931472, %v3403_v12  ;;  %v1164_v3 = vmul.f32 %v4963_v14, %v1163_v33  ;;  %3414 = vpow2.f32 %v1855_v60  ;;  %v5053_v19 = vpop.xlane.xlu1 %391 }
 0x15f   :  { %v5024_v18 = vpop.eup %3406  ;;  %v1177_v34 = vadd.f32 1.0, %v5018_v31  ;;  %v1172_v43 = vadd.f32 1.0, %v1171_v44  ;;  %v1174_v8 = vand.u32 2147483647, %v4997_v2  ;;  %v2122_v59 = vmul.f32 -0.5, %v4984_v27  ;;  %v5097_v44 = vpop.xlane.xlu0 %581 }
 0x160   :  { %3416 = vpow2.f32 %v899_v42  ;;  %v2128_v55 = vadd.f32 1.0, %v5024_v18  ;;  %v1770_v0 = vsub.f32 0.0, %v1706_v62  ;;  %v336_v51 = vmul.f32 %v4816_v41, %v3038_v28 }
 0x161   :  { %v3162_v37 = vunpack.c.h.bf16 %v3231_v30  ;;  %vm5042_vm11 = vcmp.lt.f32.partialorder %v1165_v15, 0.0004427343  ;;  %v5048_v14 = vmax.f32 %v681_v61, 0.0  ;;  %v2535_v32 = vmax.f32 %v4890_v63, 0.0 }
 0x162   :  { %v748_v1 = vand.u32 2147483647, %v684_v48  ;;  %v1167_v40 = vsel %vm5042_vm11, %v1164_v3, %v1161_v57  ;;  %3418 = vlog2.f32 %v1177_v34  ;;  %v5059_v35 = vmax.f32 %v682_v21, 0.0  ;;  %461 = vadd.xlane.f32.xlu1 %v336_v51  ;;  %v5095_v58 = vpop.xlane.xlu1 %393 }
 0x163   :  { %v3409_v53 = vpop.eup %3408  ;;  %v526_v52 = vmul.f32 %v4816_v41, %v3162_v37  ;;  %vm5064_vm12 = vcmp.lt.f32.partialorder %v1174_v8, 0.0004427343  ;;  %v1180_v38 = vmul.f32 -0.5, %v5018_v31  ;;  %v2123_v6 = vadd.f32 1.0, %v2122_v59 }
 0x164   :  { %v5062_v61 = vpop.eup %3410  ;;  %v2125_v11 = vand.u32 2147483647, %v4984_v27  ;;  %v1707_v20 = vand.u32 2147483647, %v5040_v23  ;;  %v1173_v46 = vmul.f32 %v4997_v2, %v1172_v43  ;;  %3420 = vlog2.f32 %v2128_v55 }
 0x165   :  { %v3413_v16 = vpop.eup %3412  ;;  %v1857_v21 = vmul.f32 1.442695, %v1770_v0  ;;  %649 = vadd.xlane.f32.xlu0 %v526_v52  ;;  %v685_v10 = vsub.f32 0.0, %v5053_v19  ;;  %v1639_v30 = vadd.f32 %v1575_v22, %v1167_v40  ;;  %v2121_v39 = vmul.f32 0.6931472, %v3409_v53 }
 0x166   :  { %v2536_v13 = vmax.f32 %v4958_v5, 0.0  ;;  %v812_v4 = vsub.f32 0.0, %v748_v1  ;;  %v1183_v54 = vand.u32 2147483647, %v5018_v31  ;;  %v1186_v45 = vadd.f32 1.0, %v5062_v61 }
 0x167   :  { %v5083_v2 = vmax.f32 %v683_v50, 0.0  ;;  %v1771_v7 = vsub.f32 0.0, %v1707_v20  ;;  %v1170_v33 = vmul.f32 0.6931472, %v3413_v16  ;;  %v1181_v12 = vadd.f32 1.0, %v1180_v38 }
 0x168   :  { %v2124_v25 = vmul.f32 %v4984_v27, %v2123_v6  ;;  %vm5091_vm13 = vcmp.lt.f32.partialorder %v2125_v11, 0.0004427343  ;;  %v5099_v47 = vpop.eup %3414  ;;  %v1189_v50 = vmul.f32 -0.5, %v5062_v61  ;;  %3422 = vpow2.f32 %v1857_v21 }
 0x169   :  { %v749_v42 = vand.u32 2147483647, %v685_v10  ;;  %v1859_v62 = vmul.f32 1.442695, %v1771_v7  ;;  %v901_v15 = vmul.f32 1.442695, %v812_v4  ;;  %v3041_v22 = vunpack.c.l.bf16 %v5077_v29 }
 0x16a   :  { %v5104_v28 = vpop.eup %3416  ;;  %v2127_v27 = vsel %vm5091_vm13, %v2124_v25, %v2121_v39  ;;  %v3165_v57 = vunpack.c.l.bf16 %v5088_v17  ;;  %3424 = vlog2.f32 %v1186_v45  ;;  %v2131_v3 = vmul.f32 -0.5, %v5024_v18  ;;  %v5131_v45 = vpop.xlane.xlu1 %395 }
 0x16b   :  { %v686_v34 = vsub.f32 0.0, %v5095_v58  ;;  %v1708_v43 = vand.u32 2147483647, %v5097_v44  ;;  %v2137_v8 = vadd.f32 1.0, %v5099_v47  ;;  %3426 = vpow2.f32 %v1859_v62 }
 0x16c   :  { %v337_v59 = vmul.f32 %v4816_v41, %v3041_v22  ;;  %v527_v55 = vmul.f32 %v4816_v41, %v3165_v57  ;;  %v3419_v0 = vpop.eup %3418  ;;  %v1176_v51 = vsel %vm5064_vm12, %v1173_v46, %v1170_v33  ;;  %vm5118_vm14 = vcmp.lt.f32.partialorder %v1183_v54, 0.0004427343 }
 0x16d   :  { %v2599_v36 = vadd.f32 %v2535_v32, %v2127_v27  ;;  %v813_v1 = vsub.f32 0.0, %v749_v42  ;;  %v1190_v53 = vadd.f32 1.0, %v1189_v50  ;;  %v1195_v40 = vadd.f32 1.0, %v5104_v28 }
 0x16e   :  { %3428 = vpow2.f32 %v901_v15  ;;  %463 = vadd.xlane.f32.xlu1 %v337_v59  ;;  %651 = vadd.xlane.f32.xlu0 %v527_v55  ;;  %v1772_v52 = vsub.f32 0.0, %v1708_v43  ;;  %v3421_v38 = vpop.eup %3420  ;;  %v1192_v6 = vand.u32 2147483647, %v5062_v61  ;;  %v2134_v11 = vand.u32 2147483647, %v5024_v18 }
 0x16f   :  { %v750_v63 = vand.u32 2147483647, %v686_v34  ;;  %v3042_v20 = vunpack.c.h.bf16 %v5077_v29  ;;  %v1179_v16 = vmul.f32 0.6931472, %v3419_v0  ;;  %v1182_v32 = vmul.f32 %v5018_v31, %v1181_v12  ;;  %v5136_v29 = vpop.xlane.xlu0 %583 }
 0x170   :  { %v2132_v46 = vadd.f32 1.0, %v2131_v3  ;;  %3430 = vlog2.f32 %v2137_v8  ;;  %v1640_v21 = vadd.f32 %v5031_v24, %v1176_v51  ;;  %v2663_v39 = vadd.f32 %v2599_v36, %v1639_v30 }
 0x171   :  { %v2537_v4 = vmax.f32 %v4980_v49, 0.0  ;;  %v903_v54 = vmul.f32 1.442695, %v813_v1  ;;  %v5134_v7 = vmul.f32 %v5062_v61, %v1190_v53  ;;  %v2130_v33 = vmul.f32 0.6931472, %v3421_v38 }
 0x172   :  { %3432 = vlog2.f32 %v1195_v40  ;;  %v1861_v25 = vmul.f32 1.442695, %v1772_v52  ;;  %v5138_v60 = vpop.eup %3422  ;;  %vm5140_vm15 = vcmp.lt.f32.partialorder %v1192_v6, 0.0004427343  ;;  %vm5144_vm0 = vcmp.lt.f32.partialorder %v2134_v11, 0.0004427343 }
 0x173   :  { %v1198_v30 = vmul.f32 -0.5, %v5104_v28  ;;  %v814_v12 = vsub.f32 0.0, %v750_v63  ;;  %v338_v61 = vmul.f32 %v4816_v41, %v3042_v20  ;;  %v1185_v50 = vsel %vm5118_vm14, %v1182_v32, %v1179_v16  ;;  %v3233_v63 = vld [vmem:[%s6825_s0 + $0x1f8] sm:$0xff]  }
 0x174   :  { %v2133_v42 = vmul.f32 %v5024_v18, %v2132_v46  ;;  %v3166_v62 = vunpack.c.h.bf16 %v5088_v17  ;;  %v687_v27 = vsub.f32 0.0, %v5131_v45  ;;  %v3425_v15 = vpop.eup %3424  ;;  %v2747_v22 = vsel %vm2707_vm3, %v2663_v39, 0.0 }
 0x175   :  { %v1201_v57 = vand.u32 2147483647, %v5104_v28  ;;  %3434 = vpow2.f32 %v903_v54  ;;  %465 = vadd.xlane.f32.xlu1 %v338_v61  ;;  %v1709_v3 = vand.u32 2147483647, %v5136_v29  ;;  %v5158_v43 = vpop.eup %3426  ;;  %v2140_v18 = vmul.f32 -0.5, %v5099_v47 }
 0x176   :  { %v2136_v8 = vsel %vm5144_vm0, %v2133_v42, %v2130_v33  ;;  %v2146_v17 = vadd.f32 1.0, %v5138_v60  ;;  %3436 = vpow2.f32 %v1861_v25  ;;  %v1199_v59 = vadd.f32 1.0, %v1198_v30  ;;  %v5194_v33 = vpop.xlane.xlu1 %397 }
 0x177   :  { %v905_v55 = vmul.f32 1.442695, %v814_v12  ;;  %v528_v0 = vmul.f32 %v4816_v41, %v3166_v62  ;;  %v751_v51 = vand.u32 2147483647, %v687_v27  ;;  %v1188_v36 = vmul.f32 0.6931472, %v3425_v15 }
 0x178   :  { %v5167_v37 = vpop.eup %3428  ;;  %v5171_v1 = vmax.f32 %v684_v48, 0.0  ;;  %v2538_v53 = vmax.f32 %v5012_v26, 0.0  ;;  %v1773_v40 = vsub.f32 0.0, %v1709_v3  ;;  %v5175_v52 = vadd.f32 %v5048_v14, %v1185_v50 }
 0x179   :  { %v2600_v38 = vadd.f32 %v2536_v13, %v2136_v8  ;;  %v2155_v6 = vadd.f32 1.0, %v5158_v43  ;;  %653 = vadd.xlane.f32.xlu0 %v528_v0  ;;  %v815_v11 = vsub.f32 0.0, %v751_v51  ;;  %v2748_v48 = vadd.f32 %v2747_v22, %v5021_v56  ;;  %v5216_v22 = vpop.xlane.xlu0 %585 }
 0x17a   :  { %v3431_v9 = vpop.eup %3430  ;;  %vm5184_vm1 = vcmp.lt.f32.partialorder %v1201_v57, 0.0004427343  ;;  %v2141_v14 = vadd.f32 1.0, %v2140_v18  ;;  %3438 = vlog2.f32 %v2146_v17  ;;  %v1200_v5 = vmul.f32 %v5104_v28, %v1199_v59  ;;  %v5229_v17 = vpop.xlane.xlu1 %399 }
 0x17b   :  { %v2143_v13 = vand.u32 2147483647, %v5099_v47  ;;  %v1204_v16 = vadd.f32 1.0, %v5167_v37  ;;  %3440 = vpow2.f32 %v905_v55  ;;  %v1194_v46 = vsel %vm5140_vm15, %v5134_v7, %v1188_v36 }
 0x17c   :  { %v3433_v32 = vpop.eup %3432  ;;  %v907_v39 = vmul.f32 1.442695, %v815_v11  ;;  %v1863_v56 = vmul.f32 1.442695, %v1773_v40  ;;  %v3170_v54 = vunpack.c.h.bf16 %v3233_v63  ;;  %v2664_v25 = vadd.f32 %v2600_v38, %v1640_v21 }
 0x17d   :  { %v2139_v24 = vmul.f32 0.6931472, %v3431_v9  ;;  %3442 = vlog2.f32 %v2155_v6  ;;  %v3169_v30 = vunpack.c.l.bf16 %v3233_v63  ;;  %v2142_v28 = vmul.f32 %v5099_v47, %v2141_v14 }
 0x17e   :  { %v1207_v12 = vmul.f32 -0.5, %v5167_v37  ;;  %3444 = vpow2.f32 %v1863_v56  ;;  %v530_v61 = vmul.f32 %v4816_v41, %v3170_v54  ;;  %v1197_v31 = vmul.f32 0.6931472, %v3433_v32 }
 0x17f   :  { %v5199_v50 = vpop.eup %3434  ;;  %3446 = vlog2.f32 %v1204_v16  ;;  %v529_v7 = vmul.f32 %v4816_v41, %v3169_v30  ;;  %v688_v42 = vsub.f32 0.0, %v5194_v33  ;;  %v5206_v21 = vadd.f32 %v5059_v35, %v1194_v46 }
 0x180   :  { %v5203_v62 = vpop.eup %3436  ;;  %vm5208_vm2 = vcmp.lt.f32.partialorder %v2143_v13, 0.0004427343  ;;  %v5214_v15 = vmax.f32 %v685_v10, 0.0  ;;  %3448 = vpow2.f32 %v907_v39  ;;  %657 = vadd.xlane.f32.xlu1 %v530_v61  ;;  %v2749_v41 = vsel %vm2707_vm3, %v2664_v25, 0.0 }
 0x181   :  { %v2145_v57 = vsel %vm5208_vm2, %v2142_v28, %v2139_v24  ;;  %v2149_v35 = vmul.f32 -0.5, %v5138_v60  ;;  %v2539_v3 = vmax.f32 %v5040_v23, 0.0  ;;  %655 = vadd.xlane.f32.xlu0 %v529_v7  ;;  %v1208_v8 = vadd.f32 1.0, %v1207_v12 }
 0x182   :  { %v1213_v18 = vadd.f32 1.0, %v5199_v50  ;;  %v5226_v19 = vmax.f32 %v686_v34, 0.0  ;;  %v2540_v10 = vmax.f32 %v5097_v44, 0.0  ;;  %v1203_v59 = vsel %vm5184_vm1, %v1200_v5, %v1197_v31 }
 0x183   :  { %v2164_v55 = vadd.f32 1.0, %v5203_v62  ;;  %v752_v0 = vand.u32 2147483647, %v688_v42  ;;  %v1710_v51 = vand.u32 2147483647, %v5216_v22  ;;  %v2750_v40 = vadd.f32 %v2749_v41, %v2748_v48 }
 0x184   :  { %v3439_v36 = vpop.eup %3438  ;;  %v2601_v58 = vadd.f32 %v2537_v4, %v2145_v57  ;;  %v1210_v34 = vand.u32 2147483647, %v5167_v37  ;;  %v2152_v38 = vand.u32 2147483647, %v5138_v60  ;;  %v2150_v11 = vadd.f32 1.0, %v2149_v35  ;;  %v5252_v4 = vpop.xlane.xlu0 %587 }
 0x185   :  { %v5241_v6 = vpop.eup %3440  ;;  %v2158_v63 = vmul.f32 -0.5, %v5158_v43  ;;  %v1774_v9 = vsub.f32 0.0, %v1710_v51  ;;  %v689_v20 = vsub.f32 0.0, %v5229_v17  ;;  %v5246_v14 = vadd.f32 %v5083_v2, %v1203_v59 }
 0x186   :  { %v5249_v48 = vmul.f32 %v5167_v37, %v1208_v8  ;;  %3450 = vlog2.f32 %v1213_v18  ;;  %v2161_v49 = vand.u32 2147483647, %v5158_v43  ;;  %v2148_v13 = vmul.f32 0.6931472, %v3439_v36 }
 0x187   :  { %v3443_v5 = vpop.eup %3442  ;;  %3452 = vlog2.f32 %v2164_v55  ;;  %v816_v16 = vsub.f32 0.0, %v752_v0  ;;  %v753_v32 = vand.u32 2147483647, %v689_v20  ;;  %v2665_v2 = vadd.f32 %v2601_v58, %v5175_v52  ;;  %v5286_v55 = vpop.xlane.xlu1 %401 }
 0x188   :  { %v5256_v46 = vpop.eup %3444  ;;  %vm5259_vm4 = vcmp.lt.f32.partialorder %v1210_v34, 0.0004427343  ;;  %vm5263_vm5 = vcmp.lt.f32.partialorder %v2152_v38, 0.0004427343  ;;  %v1216_v56 = vmul.f32 -0.5, %v5199_v50  ;;  %v1222_v54 = vadd.f32 1.0, %v5241_v6  ;;  %v5288_v45 = vpop.xlane.xlu0 %589 }
 0x189   :  { %v3447_v25 = vpop.eup %3446  ;;  %v2151_v24 = vmul.f32 %v5138_v60, %v2150_v11  ;;  %v1219_v30 = vand.u32 2147483647, %v5199_v50  ;;  %v2159_v28 = vadd.f32 1.0, %v2158_v63  ;;  %v1865_v12 = vmul.f32 1.442695, %v1774_v9 }
 0x18a   :  { %v5271_v52 = vpop.eup %3448  ;;  %vm5273_vm6 = vcmp.lt.f32.partialorder %v2161_v49, 0.0004427343  ;;  %v5279_v31 = vmax.f32 %v687_v27, 0.0  ;;  %v2173_v7 = vadd.f32 1.0, %v5256_v46  ;;  %v1711_v47 = vand.u32 2147483647, %v5252_v4 }
 0x18b   :  { %v2154_v60 = vsel %vm5263_vm5, %v2151_v24, %v2148_v13  ;;  %v2157_v41 = vmul.f32 0.6931472, %v3443_v5  ;;  %v909_v57 = vmul.f32 1.442695, %v816_v16  ;;  %v817_v35 = vsub.f32 0.0, %v753_v32 }
 0x18c   :  { %v2751_v8 = vsel %vm2707_vm3, %v2665_v2, 0.0  ;;  %v1206_v18 = vmul.f32 0.6931472, %v3447_v25  ;;  %v1217_v59 = vadd.f32 1.0, %v1216_v56  ;;  %3454 = vlog2.f32 %v1222_v54  ;;  %v5312_v56 = vpop.xlane.xlu0 %591 }
 0x18d   :  { %v2160_v27 = vmul.f32 %v5158_v43, %v2159_v28  ;;  %v2167_v0 = vmul.f32 -0.5, %v5203_v62  ;;  %v1231_v51 = vadd.f32 1.0, %v5271_v52  ;;  %3456 = vpow2.f32 %v1865_v12 }
 0x18e   :  { %v2602_v36 = vadd.f32 %v2538_v53, %v2154_v60  ;;  %v1225_v58 = vmul.f32 -0.5, %v5241_v6  ;;  %3458 = vlog2.f32 %v2173_v7  ;;  %v1775_v34 = vsub.f32 0.0, %v1711_v47 }
 0x18f   :  { %v2163_v38 = vsel %vm5273_vm6, %v2160_v27, %v2157_v41  ;;  %3460 = vpow2.f32 %v909_v57  ;;  %v911_v11 = vmul.f32 1.442695, %v817_v35  ;;  %v690_v63 = vsub.f32 0.0, %v5286_v55 }
 0x190   :  { %v3451_v43 = vpop.eup %3450  ;;  %v2752_v9 = vadd.f32 %v2751_v8, %v2750_v40  ;;  %vm5299_vm7 = vcmp.lt.f32.partialorder %v1219_v30, 0.0004427343  ;;  %v1867_v5 = vmul.f32 1.442695, %v1775_v34  ;;  %v1712_v26 = vand.u32 2147483647, %v5288_v45 }
 0x191   :  { %v3453_v53 = vpop.eup %3452  ;;  %v1212_v13 = vsel %vm5259_vm4, %v5249_v48, %v1206_v18  ;;  %v1228_v16 = vand.u32 2147483647, %v5241_v6  ;;  %v2168_v32 = vadd.f32 1.0, %v2167_v0  ;;  %3462 = vlog2.f32 %v1231_v51 }
 0x192   :  { %v2603_v2 = vadd.f32 %v2539_v3, %v2163_v38  ;;  %3464 = vpow2.f32 %v1867_v5  ;;  %v754_v40 = vand.u32 2147483647, %v690_v63  ;;  %v1776_v37 = vsub.f32 0.0, %v1712_v26 }
 0x193   :  { %v2666_v54 = vadd.f32 %v2602_v36, %v5206_v21  ;;  %v1226_v25 = vadd.f32 1.0, %v1225_v58  ;;  %v2170_v39 = vand.u32 2147483647, %v5203_v62  ;;  %3466 = vpow2.f32 %v911_v11  ;;  %v5351_v36 = vpop.xlane.xlu0 %593 }
 0x194   :  { %v1215_v48 = vmul.f32 0.6931472, %v3451_v43  ;;  %v1218_v24 = vmul.f32 %v5199_v50, %v1217_v59  ;;  %v2166_v30 = vmul.f32 0.6931472, %v3453_v53  ;;  %v1869_v28 = vmul.f32 1.442695, %v1776_v37 }
 0x195   :  { %v1644_v23 = vadd.f32 %v5171_v1, %v1212_v13  ;;  %v2176_v3 = vmul.f32 -0.5, %v5256_v46  ;;  %v2541_v12 = vmax.f32 %v5136_v29, 0.0  ;;  %v1713_v61 = vand.u32 2147483647, %v5312_v56 }
 0x196   :  { %v3455_v7 = vpop.eup %3454  ;;  %v2667_v21 = vadd.f32 %v2603_v2, %v5246_v14  ;;  %vm5322_vm8 = vcmp.lt.f32.partialorder %v1228_v16, 0.0004427343  ;;  %v2169_v60 = vmul.f32 %v5203_v62, %v2168_v32  ;;  %v818_v50 = vsub.f32 0.0, %v754_v40 }
 0x197   :  { %3468 = vpow2.f32 %v1869_v28  ;;  %v5327_v41 = vpop.eup %3456  ;;  %v2753_v1 = vsel %vm2707_vm3, %v2666_v54, 0.0  ;;  %v1227_v57 = vmul.f32 %v5241_v6, %v1226_v25  ;;  %vm5331_vm9 = vcmp.lt.f32.partialorder %v2170_v39, 0.0004427343  ;;  %v5345_v6 = vpop.xlane.xlu1 %403 }
 0x198   :  { %v5337_v14 = vmax.f32 %v688_v42, 0.0  ;;  %v3459_v35 = vpop.eup %3458  ;;  %v1221_v62 = vsel %vm5299_vm7, %v1218_v24, %v1215_v48  ;;  %v2172_v8 = vsel %vm5331_vm9, %v2169_v60, %v2166_v30  ;;  %v1234_v18 = vmul.f32 -0.5, %v5271_v52 }
 0x199   :  { %v2542_v59 = vmax.f32 %v5216_v22, 0.0  ;;  %v5347_v27 = vpop.eup %3460  ;;  %v1237_v0 = vand.u32 2147483647, %v5271_v52  ;;  %v2177_v33 = vadd.f32 1.0, %v2176_v3  ;;  %v2182_v42 = vadd.f32 1.0, %v5327_v41 }
 0x19a   :  { %v1777_v51 = vsub.f32 0.0, %v1713_v61  ;;  %v2754_v58 = vadd.f32 %v2753_v1, %v2752_v9  ;;  %v2755_v34 = vsel %vm2707_vm3, %v2667_v21, 0.0  ;;  %v2179_v38 = vand.u32 2147483647, %v5256_v46 }
 0x19b   :  { %v913_v11 = vmul.f32 1.442695, %v818_v50  ;;  %v3463_v43 = vpop.eup %3462  ;;  %v1224_v49 = vmul.f32 0.6931472, %v3455_v7  ;;  %v2604_v5 = vadd.f32 %v2540_v10, %v2172_v8  ;;  %v2175_v26 = vmul.f32 0.6931472, %v3459_v35 }
 0x19c   :  { %v691_v53 = vsub.f32 0.0, %v5345_v6  ;;  %v5358_v13 = vpop.eup %3464  ;;  %v1645_v16 = vadd.f32 %v5214_v15, %v1221_v62  ;;  %v1235_v32 = vadd.f32 1.0, %v1234_v18  ;;  %v1240_v9 = vadd.f32 1.0, %v5347_v27 }
 0x19d   :  { %v1714_v2 = vand.u32 2147483647, %v5351_v36  ;;  %v5363_v40 = vpop.eup %3466  ;;  %vm5365_vm10 = vcmp.lt.f32.partialorder %v1237_v0, 0.0004427343  ;;  %v2178_v44 = vmul.f32 %v5256_v46, %v2177_v33  ;;  %3470 = vlog2.f32 %v2182_v42 }
 0x19e   :  { %v1871_v10 = vmul.f32 1.442695, %v1777_v51  ;;  %v2756_v54 = vadd.f32 %v2755_v34, %v2754_v58  ;;  %vm5370_vm11 = vcmp.lt.f32.partialorder %v2179_v38, 0.0004427343  ;;  %v2191_v15 = vadd.f32 1.0, %v5358_v13 }
 0x19f   :  { %3472 = vpow2.f32 %v913_v11  ;;  %v1230_v39 = vsel %vm5322_vm8, %v1227_v57, %v1224_v49  ;;  %v2668_v48 = vadd.f32 %v2604_v5, %v1644_v23  ;;  %v2181_v24 = vsel %vm5370_vm11, %v2178_v44, %v2175_v26  ;;  %v5387_v23 = vpop.xlane.xlu1 %405 }
 0x1a0   :  { %v755_v46 = vand.u32 2147483647, %v691_v53  ;;  %v1233_v28 = vmul.f32 0.6931472, %v3463_v43  ;;  %3474 = vlog2.f32 %v1240_v9  ;;  %v1249_v3 = vadd.f32 1.0, %v5363_v40  ;;  %v5412_v43 = vpop.xlane.xlu0 %595 }
 0x1a1   :  { %v5381_v30 = vpop.eup %3468  ;;  %v1778_v61 = vsub.f32 0.0, %v1714_v2  ;;  %v1236_v7 = vmul.f32 %v5271_v52, %v1235_v32  ;;  %v1243_v21 = vmul.f32 -0.5, %v5347_v27  ;;  %3476 = vpow2.f32 %v1871_v10 }
 0x1a2   :  { %v2200_v47 = vadd.f32 1.0, %v5381_v30  ;;  %v2605_v60 = vadd.f32 %v2541_v12, %v2181_v24  ;;  %v2185_v50 = vmul.f32 -0.5, %v5327_v41  ;;  %3478 = vlog2.f32 %v2191_v15 }
 0x1a3   :  { %v1873_v1 = vmul.f32 1.442695, %v1778_v61  ;;  %v5391_v57 = vadd.f32 %v5226_v19, %v1230_v39  ;;  %v5395_v29 = vmax.f32 %v689_v20, 0.0  ;;  %v2543_v52 = vmax.f32 %v5252_v4, 0.0  ;;  %v5410_v11 = vpop.xlane.xlu1 %407 }
 0x1a4   :  { %v819_v35 = vsub.f32 0.0, %v755_v46  ;;  %v2757_v62 = vsel %vm2707_vm3, %v2668_v48, 0.0  ;;  %v1239_v8 = vsel %vm5365_vm10, %v1236_v7, %v1233_v28  ;;  %3480 = vlog2.f32 %v1249_v3 }
 0x1a5   :  { %v692_v12 = vsub.f32 0.0, %v5387_v23  ;;  %v1244_v18 = vadd.f32 1.0, %v1243_v21  ;;  %v1246_v0 = vand.u32 2147483647, %v5347_v27  ;;  %v1252_v19 = vmul.f32 -0.5, %v5363_v40 }
 0x1a6   :  { %3482 = vlog2.f32 %v2200_v47  ;;  %v2669_v17 = vadd.f32 %v2605_v60, %v1645_v16  ;;  %v2186_v20 = vadd.f32 1.0, %v2185_v50  ;;  %v2544_v33 = vmax.f32 %v5288_v45, 0.0 }
 0x1a7   :  { %3484 = vpow2.f32 %v1873_v1  ;;  %v3471_v42 = vpop.eup %3470  ;;  %v2758_v51 = vadd.f32 %v2757_v62, %v2756_v54  ;;  %v5407_v58 = vmax.f32 %v690_v63, 0.0  ;;  %v915_v34 = vmul.f32 1.442695, %v819_v35  ;;  %v5449_v47 = vpop.xlane.xlu1 %409 }
 0x1a8   :  { %v2545_v38 = vmax.f32 %v5312_v56, 0.0  ;;  %v5417_v5 = vadd.f32 %v5279_v31, %v1239_v8  ;;  %v2188_v26 = vand.u32 2147483647, %v5327_v41  ;;  %v1255_v16 = vand.u32 2147483647, %v5363_v40 }
 0x1a9   :  { %v5414_v49 = vpop.eup %3472  ;;  %v756_v55 = vand.u32 2147483647, %v692_v12  ;;  %v1245_v63 = vmul.f32 %v5347_v27, %v1244_v18  ;;  %vm5424_vm12 = vcmp.lt.f32.partialorder %v1246_v0, 0.0004427343  ;;  %v1253_v9 = vadd.f32 1.0, %v1252_v19  ;;  %v5461_v19 = vpop.xlane.xlu0 %597 }
 0x1aa   :  { %v2194_v2 = vmul.f32 -0.5, %v5358_v13  ;;  %v3475_v37 = vpop.eup %3474  ;;  %v2759_v31 = vsel %vm2707_vm3, %v2669_v17, 0.0  ;;  %v2187_v44 = vmul.f32 %v5327_v41, %v2186_v20  ;;  %v2197_v10 = vand.u32 2147483647, %v5358_v13 }
 0x1ab   :  { %v1715_v54 = vand.u32 2147483647, %v5412_v43  ;;  %v5433_v25 = vpop.eup %3476  ;;  %v2184_v15 = vmul.f32 0.6931472, %v3471_v42  ;;  %v1258_v27 = vadd.f32 1.0, %v5414_v49  ;;  %3486 = vpow2.f32 %v915_v34 }
 0x1ac   :  { %v693_v39 = vsub.f32 0.0, %v5410_v11  ;;  %v3479_v48 = vpop.eup %3478  ;;  %vm5437_vm13 = vcmp.lt.f32.partialorder %v2188_v26, 0.0004427343  ;;  %vm5441_vm14 = vcmp.lt.f32.partialorder %v1255_v16, 0.0004427343  ;;  %v2203_v41 = vmul.f32 -0.5, %v5381_v30 }
 0x1ad   :  { %v820_v28 = vsub.f32 0.0, %v756_v55  ;;  %v5446_v3 = vadd.f32 %v2759_v31, %v2758_v51  ;;  %v1242_v61 = vmul.f32 0.6931472, %v3475_v37  ;;  %v1254_v7 = vmul.f32 %v5363_v40, %v1253_v9  ;;  %v5490_v24 = vpop.xlane.xlu0 %599 }
 0x1ae   :  { %v2195_v21 = vadd.f32 1.0, %v2194_v2  ;;  %v3481_v60 = vpop.eup %3480  ;;  %vm5451_vm15 = vcmp.lt.f32.partialorder %v2197_v10, 0.0004427343  ;;  %v2206_v1 = vand.u32 2147483647, %v5381_v30  ;;  %v2209_v35 = vadd.f32 1.0, %v5433_v25 }
 0x1af   :  { %v1779_v62 = vsub.f32 0.0, %v1715_v54  ;;  %v2190_v18 = vsel %vm5437_vm13, %v2187_v44, %v2184_v15  ;;  %v2193_v0 = vmul.f32 0.6931472, %v3479_v48  ;;  %3488 = vlog2.f32 %v1258_v27 }
 0x1b0   :  { %v3483_v8 = vpop.eup %3482  ;;  %v757_v40 = vand.u32 2147483647, %v693_v39  ;;  %v2204_v20 = vadd.f32 1.0, %v2203_v41  ;;  %3490 = vlog2.f32 %v2209_v35  ;;  %v917_v42 = vmul.f32 1.442695, %v820_v28  ;;  %v5497_v28 = vpop.xlane.xlu1 %411 }
 0x1b1   :  { %v5463_v17 = vpop.eup %3484  ;;  %v694_v51 = vsub.f32 0.0, %v5449_v47  ;;  %v1248_v34 = vsel %vm5424_vm12, %v1245_v63, %v1242_v61  ;;  %v1251_v26 = vmul.f32 0.6931472, %v3481_v60  ;;  %v2196_v16 = vmul.f32 %v5358_v13, %v2195_v21 }
 0x1b2   :  { %v2546_v55 = vmax.f32 %v5351_v36, 0.0  ;;  %v2606_v9 = vadd.f32 %v2542_v59, %v2190_v18  ;;  %v2202_v2 = vmul.f32 0.6931472, %v3483_v8  ;;  %vm5472_vm0 = vcmp.lt.f32.partialorder %v2206_v1, 0.0004427343 }
 0x1b3   :  { %v1875_v31 = vmul.f32 1.442695, %v1779_v62  ;;  %v2199_v44 = vsel %vm5451_vm15, %v2196_v16, %v2193_v0  ;;  %v2212_v32 = vmul.f32 -0.5, %v5433_v25  ;;  %v2218_v63 = vadd.f32 1.0, %v5463_v17 }
 0x1b4   :  { %v821_v10 = vsub.f32 0.0, %v757_v40  ;;  %v1648_v13 = vadd.f32 %v5337_v14, %v1248_v34  ;;  %v2205_v54 = vmul.f32 %v5381_v30, %v2204_v20  ;;  %3492 = vpow2.f32 %v917_v42 }
 0x1b5   :  { %v758_v22 = vand.u32 2147483647, %v694_v51  ;;  %v5484_v59 = vpop.eup %3486  ;;  %v1257_v15 = vsel %vm5441_vm14, %v1254_v7, %v1251_v26  ;;  %v1261_v27 = vmul.f32 -0.5, %v5414_v49  ;;  %v1264_v48 = vand.u32 2147483647, %v5414_v49 }
 0x1b6   :  { %3494 = vlog2.f32 %v2218_v63  ;;  %v2670_v14 = vadd.f32 %v2606_v9, %v5391_v57  ;;  %v2607_v30 = vadd.f32 %v2543_v52, %v2199_v44  ;;  %v2208_v41 = vsel %vm5472_vm0, %v2205_v54, %v2202_v2 }
 0x1b7   :  { %3496 = vpow2.f32 %v1875_v31  ;;  %v2213_v46 = vadd.f32 1.0, %v2212_v32  ;;  %v2221_v61 = vmul.f32 -0.5, %v5463_v17  ;;  %v919_v7 = vmul.f32 1.442695, %v821_v10 }
 0x1b8   :  { %v1716_v21 = vand.u32 2147483647, %v5461_v19  ;;  %v1649_v60 = vadd.f32 %v5395_v29, %v1257_v15  ;;  %v1267_v50 = vadd.f32 1.0, %v5484_v59  ;;  %v2215_v57 = vand.u32 2147483647, %v5433_v25 }
 0x1b9   :  { %v1717_v4 = vand.u32 2147483647, %v5490_v24  ;;  %v3489_v52 = vpop.eup %3488  ;;  %v1262_v1 = vadd.f32 1.0, %v1261_v27  ;;  %v2608_v35 = vadd.f32 %v2544_v33, %v2208_v41  ;;  %v695_v8 = vsub.f32 0.0, %v5497_v28 }
 0x1ba   :  { %v1780_v62 = vsub.f32 0.0, %v1716_v21  ;;  %v3491_v18 = vpop.eup %3490  ;;  %v2761_v0 = vsel %vm2707_vm3, %v2670_v14, 0.0  ;;  %v2671_v40 = vadd.f32 %v2607_v30, %v5417_v5  ;;  %vm5510_vm1 = vcmp.lt.f32.partialorder %v1264_v48, 0.0004427343  ;;  %v5534_v21 = vpop.xlane.xlu0 %601 }
 0x1bb   :  { %v1781_v20 = vsub.f32 0.0, %v1717_v4  ;;  %v2211_v42 = vmul.f32 0.6931472, %v3491_v18  ;;  %v2214_v34 = vmul.f32 %v5433_v25, %v2213_v46  ;;  %v2222_v26 = vadd.f32 1.0, %v2221_v61 }
 0x1bc   :  { %v1877_v16 = vmul.f32 1.442695, %v1780_v62  ;;  %v1260_v45 = vmul.f32 0.6931472, %v3489_v52  ;;  %3498 = vlog2.f32 %v1267_v50  ;;  %vm2216_vm2 = vcmp.lt.f32.partialorder %v2215_v57, 0.0004427343  ;;  %v5536_v57 = vpop.xlane.xlu1 %413 }
 0x1bd   :  { %v822_v33 = vsub.f32 0.0, %v758_v22  ;;  %v2672_v9 = vadd.f32 %v2608_v35, %v1648_v13  ;;  %v2217_v2 = vsel %vm2216_vm2, %v2214_v34, %v2211_v42  ;;  %v2224_v37 = vand.u32 2147483647, %v5463_v17 }
 0x1be   :  { %v759_v5 = vand.u32 2147483647, %v695_v8  ;;  %v5518_v31 = vpop.eup %3492  ;;  %v1263_v44 = vmul.f32 %v5414_v49, %v1262_v1  ;;  %v2609_v25 = vadd.f32 %v2545_v38, %v2217_v2  ;;  %3500 = vpow2.f32 %v919_v7  ;;  %v5546_v42 = vpop.xlane.xlu0 %603 }
 0x1bf   :  { %v1879_v32 = vmul.f32 1.442695, %v1781_v20  ;;  %v2762_v10 = vadd.f32 %v2761_v0, %v5446_v3  ;;  %v2763_v13 = vsel %vm2707_vm3, %v2671_v40, 0.0  ;;  %v2223_v54 = vmul.f32 %v5463_v17, %v2222_v26 }
 0x1c0   :  { %v3495_v63 = vpop.eup %3494  ;;  %3502 = vpow2.f32 %v1877_v16  ;;  %v1266_v15 = vsel %vm5510_vm1, %v1263_v44, %v1260_v45  ;;  %v2673_v27 = vadd.f32 %v2609_v25, %v1649_v60  ;;  %v921_v49 = vmul.f32 1.442695, %v822_v33  ;;  %v5550_v45 = vpop.xlane.xlu1 %415 }
 0x1c1   :  { %v3497_v22 = vpop.eup %3496  ;;  %v2220_v48 = vmul.f32 0.6931472, %v3495_v63  ;;  %v2765_v56 = vsel %vm2707_vm3, %v2672_v9, 0.0  ;;  %vm2225_vm4 = vcmp.lt.f32.partialorder %v2224_v37, 0.0004427343  ;;  %v823_v14 = vsub.f32 0.0, %v759_v5 }
 0x1c2   :  { %v2227_v38 = vadd.f32 1.0, %v3497_v22  ;;  %v2764_v30 = vadd.f32 %v2763_v13, %v2762_v10  ;;  %v1270_v3 = vmul.f32 -0.5, %v5484_v59  ;;  %3504 = vpow2.f32 %v1879_v32 }
 0x1c3   :  { %v2226_v41 = vsel %vm2225_vm4, %v2223_v54, %v2220_v48  ;;  %v1650_v17 = vadd.f32 %v5407_v58, %v1266_v15  ;;  %v2767_v46 = vsel %vm2707_vm3, %v2673_v27, 0.0  ;;  %v923_v50 = vmul.f32 1.442695, %v823_v14 }
 0x1c4   :  { %v2610_v61 = vadd.f32 %v2546_v55, %v2226_v41  ;;  %3506 = vlog2.f32 %v2227_v38  ;;  %v2766_v7 = vadd.f32 %v2765_v56, %v2764_v30  ;;  %v2230_v1 = vmul.f32 -0.5, %v3497_v22  ;;  %v5576_v30 = vpop.xlane.xlu1 %417 }
 0x1c5   :  { %3508 = vpow2.f32 %v921_v49  ;;  %v1271_v35 = vadd.f32 1.0, %v1270_v3  ;;  %v1276_v58 = vadd.f32 1.0, %v5518_v31  ;;  %v1273_v36 = vand.u32 2147483647, %v5484_v59  ;;  %v5571_v49 = vpop.xlane.xlu0 %605 }
 0x1c6   :  { %v2674_v60 = vadd.f32 %v2610_v61, %v1650_v17  ;;  %v3499_v4 = vpop.eup %3498  ;;  %v2768_v52 = vadd.f32 %v2767_v46, %v2766_v7  ;;  %3510 = vpow2.f32 %v923_v50  ;;  %v2231_v29 = vadd.f32 1.0, %v2230_v1 }
 0x1c7   :  { %v1269_v40 = vmul.f32 0.6931472, %v3499_v4  ;;  %v1718_v20 = vand.u32 2147483647, %v5534_v21  ;;  %v1272_v34 = vmul.f32 %v5484_v59, %v1271_v35  ;;  %3512 = vlog2.f32 %v1276_v58 }
 0x1c8   :  { %v2769_v62 = vsel %vm2707_vm3, %v2674_v60, 0.0  ;;  %v5540_v18 = vpop.eup %3500  ;;  %v1279_v26 = vmul.f32 -0.5, %v5518_v31  ;;  %v2233_v16 = vand.u32 2147483647, %v3497_v22  ;;  %vm5554_vm5 = vcmp.lt.f32.partialorder %v1273_v36, 0.0004427343  ;;  %v5610_v36 = vpop.xlane.xlu1 %419 }
 0x1c9   :  { %v2770_v55 = vadd.f32 %v2769_v62, %v2768_v52  ;;  %v1275_v5 = vsel %vm5554_vm5, %v1272_v34, %v1269_v40  ;;  %v1587_v59 = vmax.f32 %v691_v53, 0.0  ;;  %v696_v44 = vsub.f32 0.0, %v5536_v57 }
 0x1ca   :  { %v5543_v0 = vpop.eup %3502  ;;  %v1285_v32 = vadd.f32 1.0, %v5540_v18  ;;  %v2232_v10 = vmul.f32 %v3497_v22, %v2231_v29  ;;  %v1782_v13 = vsub.f32 0.0, %v1718_v20  ;;  %v1280_v54 = vadd.f32 1.0, %v1279_v26 }
 0x1cb   :  { %v2236_v2 = vadd.f32 1.0, %v5543_v0  ;;  %vm2234_vm6 = vcmp.lt.f32.partialorder %v2233_v16, 0.0004427343  ;;  %v2547_v15 = vmax.f32 %v5412_v43, 0.0  ;;  %v697_v27 = vsub.f32 0.0, %v5550_v45 }
 0x1cc   :  { %v5552_v33 = vpop.eup %3504  ;;  %v1719_v53 = vand.u32 2147483647, %v5546_v42  ;;  %v1651_v56 = vadd.f32 %v1587_v59, %v1275_v5  ;;  %v760_v22 = vand.u32 2147483647, %v696_v44  ;;  %v5580_v43 = vmax.f32 %v692_v12, 0.0 }
 0x1cd   :  { %3514 = vlog2.f32 %v2236_v2  ;;  %v2245_v6 = vadd.f32 1.0, %v5552_v33  ;;  %v5584_v3 = vmax.f32 %v693_v39, 0.0  ;;  %v1881_v41 = vmul.f32 1.442695, %v1782_v13 }
 0x1ce   :  { %v3507_v37 = vpop.eup %3506  ;;  %3516 = vlog2.f32 %v1285_v32  ;;  %v1282_v46 = vand.u32 2147483647, %v5518_v31  ;;  %v1783_v7 = vsub.f32 0.0, %v1719_v53  ;;  %v1720_v60 = vand.u32 2147483647, %v5571_v49 }
 0x1cf   :  { %v5564_v25 = vpop.eup %3508  ;;  %v2229_v63 = vmul.f32 0.6931472, %v3507_v37  ;;  %v5591_v50 = vmul.f32 %v5518_v31, %v1280_v54  ;;  %v5595_v23 = vmax.f32 %v694_v51, 0.0  ;;  %3518 = vlog2.f32 %v2245_v6 }
 0x1d0   :  { %v1294_v14 = vadd.f32 1.0, %v5564_v25  ;;  %v5586_v17 = vpop.eup %3510  ;;  %v761_v12 = vand.u32 2147483647, %v697_v27  ;;  %v1288_v39 = vmul.f32 -0.5, %v5540_v18  ;;  %v824_v52 = vsub.f32 0.0, %v760_v22 }
 0x1d1   :  { %v2235_v48 = vsel %vm2234_vm6, %v2232_v10, %v2229_v63  ;;  %v3513_v11 = vpop.eup %3512  ;;  %v1303_v31 = vadd.f32 1.0, %v5586_v17  ;;  %v698_v47 = vsub.f32 0.0, %v5576_v30  ;;  %vm5605_vm7 = vcmp.lt.f32.partialorder %v1282_v46, 0.0004427343 }
 0x1d2   :  { %v2611_v38 = vadd.f32 %v2547_v15, %v2235_v48  ;;  %3520 = vlog2.f32 %v1294_v14  ;;  %v2239_v35 = vmul.f32 -0.5, %v5543_v0  ;;  %v1883_v58 = vmul.f32 1.442695, %v1783_v7 }
 0x1d3   :  { %3522 = vpow2.f32 %v1881_v41  ;;  %v1784_v62 = vsub.f32 0.0, %v1720_v60  ;;  %v1278_v40 = vmul.f32 0.6931472, %v3513_v11  ;;  %v2548_v29 = vmax.f32 %v5461_v19, 0.0 }
 0x1d4   :  { %v2675_v61 = vadd.f32 %v2611_v38, %v1651_v56  ;;  %v825_v20 = vsub.f32 0.0, %v761_v12  ;;  %v1291_v34 = vand.u32 2147483647, %v5540_v18  ;;  %v5617_v26 = vmax.f32 %v695_v8, 0.0 }
 0x1d5   :  { %v925_v16 = vmul.f32 1.442695, %v824_v52  ;;  %v2550_v9 = vmax.f32 %v5534_v21, 0.0  ;;  %v1289_v37 = vadd.f32 1.0, %v1288_v39  ;;  %3524 = vlog2.f32 %v1303_v31 }
 0x1d6   :  { %v2771_v4 = vsel %vm2707_vm3, %v2675_v61, 0.0  ;;  %v762_v5 = vand.u32 2147483647, %v698_v47  ;;  %v699_v19 = vsub.f32 0.0, %v5610_v36  ;;  %v2240_v59 = vadd.f32 1.0, %v2239_v35 }
 0x1d7   :  { %v5601_v1 = vadd.f32 %v2771_v4, %v2770_v55  ;;  %v2549_v55 = vmax.f32 %v5490_v24, 0.0  ;;  %v3515_v2 = vpop.eup %3514  ;;  %v2248_v32 = vmul.f32 -0.5, %v5552_v33  ;;  %3526 = vpow2.f32 %v1883_v58 }
 0x1d8   :  { %v1885_v63 = vmul.f32 1.442695, %v1784_v62  ;;  %v3517_v10 = vpop.eup %3516  ;;  %v1284_v28 = vsel %vm5605_vm7, %v5591_v50, %v1278_v40  ;;  %v2242_v8 = vand.u32 2147483647, %v5543_v0  ;;  %v5630_v13 = vmax.f32 %v696_v44, 0.0  ;;  %v5641_v44 = vpop.xlane.xlu0 %607 }
 0x1d9   :  { %v927_v54 = vmul.f32 1.442695, %v825_v20  ;;  %vm5632_vm8 = vcmp.lt.f32.partialorder %v1291_v34, 0.0004427343  ;;  %v1297_v48 = vmul.f32 -0.5, %v5564_v25  ;;  %3528 = vpow2.f32 %v925_v16  ;;  %v3519_v53 = vpop.eup %3518 }
 0x1da   :  { %v2238_v6 = vmul.f32 0.6931472, %v3515_v2  ;;  %v1290_v56 = vmul.f32 %v5540_v18, %v1289_v37  ;;  %v1306_v38 = vmul.f32 -0.5, %v5586_v17  ;;  %v826_v14 = vsub.f32 0.0, %v762_v5  ;;  %v5669_v5 = vpop.xlane.xlu1 %421 }
 0x1db   :  { %v763_v57 = vand.u32 2147483647, %v699_v19  ;;  %v1287_v41 = vmul.f32 0.6931472, %v3517_v10  ;;  %v2241_v46 = vmul.f32 %v5543_v0, %v2240_v59  ;;  %v2249_v61 = vadd.f32 1.0, %v2248_v32 }
 0x1dc   :  { %v3521_v22 = vpop.eup %3520  ;;  %3530 = vpow2.f32 %v1885_v63  ;;  %v1300_v60 = vand.u32 2147483647, %v5564_v25  ;;  %vm5647_vm9 = vcmp.lt.f32.partialorder %v2242_v8, 0.0004427343  ;;  %v2251_v50 = vand.u32 2147483647, %v5552_v33  ;;  %v5677_v10 = vpop.xlane.xlu0 %609 }
 0x1dd   :  { %v5644_v7 = vpop.eup %3522  ;;  %3532 = vpow2.f32 %v927_v54  ;;  %v1298_v12 = vadd.f32 1.0, %v1297_v48  ;;  %v2244_v11 = vsel %vm5647_vm9, %v2241_v46, %v2238_v6  ;;  %v2247_v39 = vmul.f32 0.6931472, %v3519_v53 }
 0x1de   :  { %v1721_v0 = vand.u32 2147483647, %v5641_v44  ;;  %v1307_v4 = vadd.f32 1.0, %v1306_v38  ;;  %v1309_v52 = vand.u32 2147483647, %v5586_v17  ;;  %v827_v51 = vsub.f32 0.0, %v763_v57  ;;  %v5711_v45 = vpop.xlane.xlu1 %423 }
 0x1df   :  { %v929_v31 = vmul.f32 1.442695, %v826_v14  ;;  %v1293_v35 = vsel %vm5632_vm8, %v1290_v56, %v1287_v41  ;;  %v1296_v58 = vmul.f32 0.6931472, %v3521_v22  ;;  %v2250_v62 = vmul.f32 %v5552_v33, %v2249_v61  ;;  %v3525_v20 = vpop.eup %3524 }
 0x1e0   :  { %v2254_v40 = vadd.f32 1.0, %v5644_v7  ;;  %v1652_v34 = vadd.f32 %v5580_v43, %v1284_v28  ;;  %vm5661_vm10 = vcmp.lt.f32.partialorder %v1300_v60, 0.0004427343  ;;  %v2612_v2 = vadd.f32 %v2548_v29, %v2244_v11 }
 0x1e1   :  { %vm5665_vm11 = vcmp.lt.f32.partialorder %v2251_v50, 0.0004427343  ;;  %v5671_v59 = vpop.eup %3526  ;;  %v1299_v33 = vmul.f32 %v5564_v25, %v1298_v12  ;;  %v2551_v43 = vmax.f32 %v5546_v42, 0.0  ;;  %v1785_v63 = vsub.f32 0.0, %v1721_v0 }
 0x1e2   :  { %v2253_v32 = vsel %vm5665_vm11, %v2250_v62, %v2247_v39  ;;  %v1653_v29 = vadd.f32 %v5584_v3, %v1293_v35  ;;  %vm5680_vm12 = vcmp.lt.f32.partialorder %v1309_v52, 0.0004427343  ;;  %3534 = vpow2.f32 %v929_v31  ;;  %v5723_v39 = vpop.xlane.xlu0 %611 }
 0x1e3   :  { %v931_v8 = vmul.f32 1.442695, %v827_v51  ;;  %v5684_v54 = vpop.eup %3528  ;;  %v1302_v25 = vsel %vm5661_vm10, %v1299_v33, %v1296_v58  ;;  %v1305_v15 = vmul.f32 0.6931472, %v3525_v20  ;;  %v1308_v48 = vmul.f32 %v5586_v17, %v1307_v4 }
 0x1e4   :  { %3536 = vlog2.f32 %v2254_v40  ;;  %v2676_v6 = vadd.f32 %v2612_v2, %v1652_v34  ;;  %v2613_v53 = vadd.f32 %v2549_v55, %v2253_v32  ;;  %v2263_v3 = vadd.f32 1.0, %v5671_v59 }
 0x1e5   :  { %v1722_v56 = vand.u32 2147483647, %v5677_v10  ;;  %v5697_v14 = vmax.f32 %v697_v27, 0.0  ;;  %v5701_v57 = vmax.f32 %v698_v47, 0.0  ;;  %v1887_v17 = vmul.f32 1.442695, %v1785_v63 }
 0x1e6   :  { %v5693_v38 = vpop.eup %3530  ;;  %v700_v22 = vsub.f32 0.0, %v5669_v5  ;;  %v5707_v24 = vadd.f32 %v5595_v23, %v1302_v25  ;;  %v1312_v55 = vadd.f32 1.0, %v5684_v54  ;;  %v2552_v46 = vmax.f32 %v5571_v49, 0.0 }
 0x1e7   :  { %v5704_v41 = vpop.eup %3532  ;;  %3538 = vpow2.f32 %v931_v8  ;;  %v1311_v27 = vsel %vm5680_vm12, %v1308_v48, %v1305_v15  ;;  %v1315_v30 = vmul.f32 -0.5, %v5684_v54  ;;  %v2553_v47 = vmax.f32 %v5641_v44, 0.0  ;;  %v5755_v8 = vpop.xlane.xlu0 %613 }
 0x1e8   :  { %v1786_v61 = vsub.f32 0.0, %v1722_v56  ;;  %v2773_v60 = vsel %vm2707_vm3, %v2676_v6, 0.0  ;;  %v2677_v18 = vadd.f32 %v2613_v53, %v1653_v29  ;;  %3540 = vlog2.f32 %v2263_v3 }
 0x1e9   :  { %v2272_v23 = vadd.f32 1.0, %v5693_v38  ;;  %v1321_v50 = vadd.f32 1.0, %v5704_v41  ;;  %3542 = vpow2.f32 %v1887_v17  ;;  %v764_v12 = vand.u32 2147483647, %v700_v22 }
 0x1ea   :  { %v701_v11 = vsub.f32 0.0, %v5711_v45  ;;  %3544 = vlog2.f32 %v1312_v55  ;;  %v2257_v0 = vmul.f32 -0.5, %v5644_v7  ;;  %v1324_v4 = vmul.f32 -0.5, %v5704_v41 }
 0x1eb   :  { %v1889_v52 = vmul.f32 1.442695, %v1786_v61  ;;  %v1316_v31 = vadd.f32 1.0, %v1315_v30  ;;  %v1318_v51 = vand.u32 2147483647, %v5684_v54  ;;  %v5731_v58 = vmax.f32 %v699_v19, 0.0 }
 0x1ec   :  { %v2260_v35 = vand.u32 2147483647, %v5644_v7  ;;  %v5733_v62 = vpop.eup %3534  ;;  %v2774_v40 = vadd.f32 %v2773_v60, %v5601_v1  ;;  %v5737_v20 = vadd.f32 %v5617_v26, %v1311_v27  ;;  %v2775_v34 = vsel %vm2707_vm3, %v2677_v18, 0.0  ;;  %v5744_v1 = vpop.xlane.xlu1 %425 }
 0x1ed   :  { %3546 = vlog2.f32 %v2272_v23  ;;  %v828_v2 = vsub.f32 0.0, %v764_v12  ;;  %v765_v37 = vand.u32 2147483647, %v701_v11  ;;  %v1723_v36 = vand.u32 2147483647, %v5723_v39 }
 0x1ee   :  { %v3537_v16 = vpop.eup %3536  ;;  %3548 = vlog2.f32 %v1321_v50  ;;  %v2258_v19 = vadd.f32 1.0, %v2257_v0  ;;  %v1325_v33 = vadd.f32 1.0, %v1324_v4  ;;  %v2266_v32 = vmul.f32 -0.5, %v5671_v59 }
 0x1ef   :  { %3550 = vpow2.f32 %v1889_v52  ;;  %v5747_v26 = vmul.f32 %v5684_v54, %v1316_v31  ;;  %vm5749_vm13 = vcmp.lt.f32.partialorder %v2260_v35, 0.0004427343  ;;  %v2269_v29 = vand.u32 2147483647, %v5671_v59 }
 0x1f0   :  { %v1330_v28 = vadd.f32 1.0, %v5733_v62  ;;  %v5759_v15 = vadd.f32 %v2775_v34, %v2774_v40  ;;  %v2256_v48 = vmul.f32 0.6931472, %v3537_v16  ;;  %v1327_v6 = vand.u32 2147483647, %v5704_v41 }
 0x1f1   :  { %v5757_v25 = vpop.eup %3538  ;;  %v1787_v53 = vsub.f32 0.0, %v1723_v36  ;;  %v2275_v54 = vmul.f32 -0.5, %v5693_v38  ;;  %v933_v3 = vmul.f32 1.442695, %v828_v2  ;;  %v829_v56 = vsub.f32 0.0, %v765_v37  ;;  %v5793_v2 = vpop.xlane.xlu0 %615 }
 0x1f2   :  { %v702_v17 = vsub.f32 0.0, %v5744_v1  ;;  %v3541_v55 = vpop.eup %3540  ;;  %vm5764_vm14 = vcmp.lt.f32.partialorder %v1318_v51, 0.0004427343  ;;  %v2259_v30 = vmul.f32 %v5644_v7, %v2258_v19  ;;  %v5770_v61 = vmul.f32 %v5704_v41, %v1325_v33  ;;  %v5785_v51 = vpop.xlane.xlu1 %427 }
 0x1f3   :  { %v2267_v60 = vadd.f32 1.0, %v2266_v32  ;;  %v2278_v18 = vand.u32 2147483647, %v5693_v38  ;;  %v5773_v23 = vpop.eup %3542  ;;  %vm5775_vm15 = vcmp.lt.f32.partialorder %v2269_v29, 0.0004427343  ;;  %3552 = vlog2.f32 %v1330_v28 }
 0x1f4   :  { %v1333_v12 = vmul.f32 -0.5, %v5733_v62  ;;  %v1339_v0 = vadd.f32 1.0, %v5757_v25  ;;  %v3545_v4 = vpop.eup %3544  ;;  %v2262_v7 = vsel %vm5749_vm13, %v2259_v30, %v2256_v48  ;;  %v1336_v41 = vand.u32 2147483647, %v5733_v62 }
 0x1f5   :  { %v1891_v52 = vmul.f32 1.442695, %v1787_v53  ;;  %v1724_v31 = vand.u32 2147483647, %v5755_v8  ;;  %vm5787_vm0 = vcmp.lt.f32.partialorder %v1327_v6, 0.0004427343  ;;  %3554 = vpow2.f32 %v933_v3  ;;  %v5839_v42 = vpop.xlane.xlu0 %617 }
 0x1f6   :  { %v2276_v40 = vadd.f32 1.0, %v2275_v54  ;;  %v935_v34 = vmul.f32 1.442695, %v829_v56  ;;  %v766_v16 = vand.u32 2147483647, %v702_v17  ;;  %v2268_v19 = vmul.f32 %v5671_v59, %v2267_v60 }
 0x1f7   :  { %v3547_v37 = vpop.eup %3546  ;;  %v2265_v36 = vmul.f32 0.6931472, %v3541_v55  ;;  %vm5796_vm1 = vcmp.lt.f32.partialorder %v2278_v18, 0.0004427343  ;;  %v2281_v32 = vadd.f32 1.0, %v5773_v23  ;;  %v2614_v28 = vadd.f32 %v2550_v9, %v2262_v7 }
 0x1f8   :  { %v3549_v63 = vpop.eup %3548  ;;  %v1314_v29 = vmul.f32 0.6931472, %v3545_v4  ;;  %3556 = vlog2.f32 %v1339_v0  ;;  %v703_v48 = vsub.f32 0.0, %v5785_v51  ;;  %v1334_v53 = vadd.f32 1.0, %v1333_v12 }
 0x1f9   :  { %v5804_v6 = vpop.eup %3550  ;;  %3558 = vpow2.f32 %v1891_v52  ;;  %v1788_v54 = vsub.f32 0.0, %v1724_v31  ;;  %v1725_v59 = vand.u32 2147483647, %v5793_v2  ;;  %v2274_v3 = vmul.f32 0.6931472, %v3547_v37 }
 0x1fa   :  { %v2277_v56 = vmul.f32 %v5693_v38, %v2276_v40  ;;  %3560 = vpow2.f32 %v935_v34  ;;  %v830_v55 = vsub.f32 0.0, %v766_v16  ;;  %v1323_v30 = vmul.f32 0.6931472, %v3549_v63  ;;  %v5829_v40 = vpop.xlane.xlu1 %429 }
 0x1fb   :  { %v2271_v21 = vsel %vm5775_vm15, %v2268_v19, %v2265_v36  ;;  %v1342_v9 = vmul.f32 -0.5, %v5757_v25  ;;  %3562 = vlog2.f32 %v2281_v32  ;;  %v1320_v60 = vsel %vm5764_vm14, %v5747_v26, %v1314_v29 }
 0x1fc   :  { %v2678_v18 = vadd.f32 %v2614_v28, %v5707_v24  ;;  %vm5815_vm2 = vcmp.lt.f32.partialorder %v1336_v41, 0.0004427343  ;;  %v2290_v38 = vadd.f32 1.0, %v5804_v6  ;;  %v767_v0 = vand.u32 2147483647, %v703_v48 }
 0x1fd   :  { %v1335_v50 = vmul.f32 %v5733_v62, %v1334_v53  ;;  %v2554_v4 = vmax.f32 %v5677_v10, 0.0  ;;  %v1893_v7 = vmul.f32 1.442695, %v1788_v54  ;;  %v1789_v52 = vsub.f32 0.0, %v1725_v59  ;;  %v3553_v31 = vpop.eup %3552 }
 0x1fe   :  { %v2615_v26 = vadd.f32 %v2551_v43, %v2271_v21  ;;  %v2280_v24 = vsel %vm5796_vm1, %v2277_v56, %v2274_v3  ;;  %v1345_v27 = vand.u32 2147483647, %v5757_v25  ;;  %v937_v41 = vmul.f32 1.442695, %v830_v55 }
 0x1ff   :  { %v1656_v34 = vadd.f32 %v5630_v13, %v1320_v60  ;;  %v1329_v62 = vsel %vm5787_vm0, %v5770_v61, %v1323_v30  ;;  %v1343_v16 = vadd.f32 1.0, %v1342_v9  ;;  %v5837_v37 = vmax.f32 %v700_v22, 0.0  ;;  %v5841_v43 = vpop.eup %3554 }
 0x200   :  { %v2777_v36 = vsel %vm2707_vm3, %v2678_v18, 0.0  ;;  %3564 = vlog2.f32 %v2290_v38  ;;  %v831_v19 = vsub.f32 0.0, %v767_v0  ;;  %v1895_v33 = vmul.f32 1.442695, %v1789_v52 }
 0x201   :  { %v1332_v32 = vmul.f32 0.6931472, %v3553_v31  ;;  %v2616_v13 = vadd.f32 %v2552_v46, %v2280_v24  ;;  %3566 = vpow2.f32 %v1893_v7  ;;  %v704_v61 = vsub.f32 0.0, %v5829_v40 }
 0x202   :  { %v3557_v35 = vpop.eup %3556  ;;  %v2679_v5 = vadd.f32 %v2615_v26, %v5737_v20  ;;  %vm5848_vm4 = vcmp.lt.f32.partialorder %v1345_v27, 0.0004427343  ;;  %v2284_v63 = vmul.f32 -0.5, %v5773_v23  ;;  %3568 = vpow2.f32 %v937_v41 }
 0x203   :  { %v1726_v29 = vand.u32 2147483647, %v5839_v42  ;;  %v5854_v28 = vpop.eup %3558  ;;  %v5857_v49 = vadd.f32 %v5697_v14, %v1329_v62  ;;  %v1344_v46 = vmul.f32 %v5757_v25, %v1343_v16  ;;  %v1348_v53 = vadd.f32 1.0, %v5841_v43 }
 0x204   :  { %3570 = vpow2.f32 %v1895_v33  ;;  %v5861_v20 = vpop.eup %3560  ;;  %v2778_v54 = vadd.f32 %v2777_v36, %v5759_v15  ;;  %v5866_v59 = vmax.f32 %v701_v11, 0.0  ;;  %v939_v3 = vmul.f32 1.442695, %v831_v19  ;;  %v5904_v33 = vpop.xlane.xlu0 %619 }
 0x205   :  { %v1790_v56 = vsub.f32 0.0, %v1726_v29  ;;  %v3563_v55 = vpop.eup %3562  ;;  %v1338_v14 = vsel %vm5815_vm2, %v1335_v50, %v1332_v32  ;;  %v2680_v30 = vadd.f32 %v2616_v13, %v1656_v34  ;;  %v2555_v25 = vmax.f32 %v5723_v39, 0.0 }
 0x206   :  { %v768_v21 = vand.u32 2147483647, %v704_v61  ;;  %v2779_v9 = vsel %vm2707_vm3, %v2679_v5, 0.0  ;;  %v2285_v60 = vadd.f32 1.0, %v2284_v63  ;;  %v2287_v15 = vand.u32 2147483647, %v5773_v23 }
 0x207   :  { %v2299_v45 = vadd.f32 1.0, %v5854_v28  ;;  %v1341_v11 = vmul.f32 0.6931472, %v3557_v35  ;;  %3572 = vlog2.f32 %v1348_v53  ;;  %v1357_v18 = vadd.f32 1.0, %v5861_v20 }
 0x208   :  { %v1897_v38 = vmul.f32 1.442695, %v1790_v56  ;;  %v5878_v12 = vadd.f32 %v5701_v57, %v1338_v14  ;;  %v2283_v0 = vmul.f32 0.6931472, %v3563_v55  ;;  %v2293_v50 = vmul.f32 -0.5, %v5804_v6 }
 0x209   :  { %3574 = vpow2.f32 %v939_v3  ;;  %v2781_v7 = vsel %vm2707_vm3, %v2680_v30, 0.0  ;;  %v1351_v52 = vmul.f32 -0.5, %v5841_v43  ;;  %v832_v31 = vsub.f32 0.0, %v768_v21 }
 0x20a   :  { %3576 = vpow2.f32 %v1897_v38  ;;  %v3565_v26 = vpop.eup %3564  ;;  %v2780_v24 = vadd.f32 %v2779_v9, %v2778_v54  ;;  %v2286_v27 = vmul.f32 %v5773_v23, %v2285_v60  ;;  %v5886_v41 = vmax.f32 %v702_v17, 0.0 }
 0x20b   :  { %3578 = vlog2.f32 %v2299_v45  ;;  %v5888_v57 = vpop.eup %3566  ;;  %v1347_v34 = vsel %vm5848_vm4, %v1344_v46, %v1341_v11  ;;  %vm5892_vm5 = vcmp.lt.f32.partialorder %v2287_v15, 0.0004427343  ;;  %v1354_v16 = vand.u32 2147483647, %v5841_v43 }
 0x20c   :  { %3580 = vlog2.f32 %v1357_v18  ;;  %v5897_v36 = vpop.eup %3568  ;;  %v5899_v23 = vadd.f32 %v2781_v7, %v2780_v24  ;;  %v2289_v1 = vsel %vm5892_vm5, %v2286_v27, %v2283_v0  ;;  %v2294_v17 = vadd.f32 1.0, %v2293_v50  ;;  %v5940_v18 = vpop.xlane.xlu1 %431 }
 0x20d   :  { %v2296_v19 = vand.u32 2147483647, %v5804_v6  ;;  %v1352_v13 = vadd.f32 1.0, %v1351_v52  ;;  %v1360_v35 = vmul.f32 -0.5, %v5861_v20  ;;  %v2556_v5 = vmax.f32 %v5755_v8, 0.0 }
 0x20e   :  { %v5906_v32 = vpop.eup %3570  ;;  %v941_v22 = vmul.f32 1.442695, %v832_v31  ;;  %v5911_v63 = vadd.f32 %v5731_v58, %v1347_v34  ;;  %v2292_v29 = vmul.f32 0.6931472, %v3565_v26  ;;  %v2302_v46 = vmul.f32 -0.5, %v5854_v28  ;;  %v5956_v34 = vpop.xlane.xlu0 %621 }
 0x20f   :  { %v2308_v53 = vadd.f32 1.0, %v5888_v57  ;;  %v2617_v54 = vadd.f32 %v2553_v47, %v2289_v1  ;;  %vm5917_vm6 = vcmp.lt.f32.partialorder %v1354_v16, 0.0004427343  ;;  %v1366_v56 = vadd.f32 1.0, %v5897_v36 }
 0x210   :  { %v1727_v55 = vand.u32 2147483647, %v5904_v33  ;;  %v2295_v14 = vmul.f32 %v5804_v6, %v2294_v17  ;;  %vm5924_vm7 = vcmp.lt.f32.partialorder %v2296_v19, 0.0004427343  ;;  %v1363_v30 = vand.u32 2147483647, %v5861_v20 }
 0x211   :  { %v2317_v21 = vadd.f32 1.0, %v5906_v32  ;;  %v3573_v44 = vpop.eup %3572  ;;  %v1353_v47 = vmul.f32 %v5841_v43, %v1352_v13  ;;  %v1361_v9 = vadd.f32 1.0, %v1360_v35  ;;  %v5933_v60 = vmax.f32 %v703_v48, 0.0 }
 0x212   :  { %3582 = vpow2.f32 %v941_v22  ;;  %v2298_v6 = vsel %vm5924_vm7, %v2295_v14, %v2292_v29  ;;  %v2303_v45 = vadd.f32 1.0, %v2302_v46  ;;  %v2305_v11 = vand.u32 2147483647, %v5854_v28 }
 0x213   :  { %v5935_v15 = vpop.eup %3574  ;;  %3584 = vlog2.f32 %v2308_v53  ;;  %v2681_v43 = vadd.f32 %v2617_v54, %v5857_v49  ;;  %v1369_v51 = vmul.f32 -0.5, %v5897_v36  ;;  %v1791_v48 = vsub.f32 0.0, %v1727_v55 }
 0x214   :  { %v5942_v38 = vpop.eup %3576  ;;  %3586 = vlog2.f32 %v1366_v56  ;;  %v1350_v50 = vmul.f32 0.6931472, %v3573_v44  ;;  %vm5946_vm8 = vcmp.lt.f32.partialorder %v1363_v30, 0.0004427343  ;;  %v2618_v26 = vadd.f32 %v2554_v4, %v2298_v6 }
 0x215   :  { %v3579_v0 = vpop.eup %3578  ;;  %3588 = vlog2.f32 %v2317_v21  ;;  %v2326_v52 = vadd.f32 1.0, %v5942_v38  ;;  %v1362_v24 = vmul.f32 %v5861_v20, %v1361_v9  ;;  %v2557_v49 = vmax.f32 %v5793_v2, 0.0 }
 0x216   :  { %v3581_v31 = vpop.eup %3580  ;;  %v705_v27 = vsub.f32 0.0, %v5940_v18  ;;  %v2304_v62 = vmul.f32 %v5854_v28, %v2303_v45  ;;  %vm5959_vm9 = vcmp.lt.f32.partialorder %v2305_v11, 0.0004427343  ;;  %v1372_v1 = vand.u32 2147483647, %v5897_v36 }
 0x217   :  { %v1375_v17 = vadd.f32 1.0, %v5935_v15  ;;  %v2783_v10 = vsel %vm2707_vm3, %v2681_v43, 0.0  ;;  %v2301_v4 = vmul.f32 0.6931472, %v3579_v0  ;;  %v1370_v20 = vadd.f32 1.0, %v1369_v51 }
 0x218   :  { %v1899_v19 = vmul.f32 1.442695, %v1791_v48  ;;  %v1356_v13 = vsel %vm5917_vm6, %v1353_v47, %v1350_v50  ;;  %v1359_v35 = vmul.f32 0.6931472, %v3581_v31  ;;  %3590 = vlog2.f32 %v2326_v52 }
 0x219   :  { %v1728_v28 = vand.u32 2147483647, %v5956_v34  ;;  %v2682_v22 = vadd.f32 %v2618_v26, %v5878_v12  ;;  %v2311_v29 = vmul.f32 -0.5, %v5888_v57  ;;  %v769_v46 = vand.u32 2147483647, %v705_v27 }
 0x21a   :  { %3592 = vpow2.f32 %v1899_v19  ;;  %v1378_v53 = vmul.f32 -0.5, %v5935_v15  ;;  %v2320_v54 = vmul.f32 -0.5, %v5906_v32  ;;  %v2784_v55 = vadd.f32 %v2783_v10, %v5899_v23  ;;  %v5997_v23 = vpop.xlane.xlu1 %433 }
 0x21b   :  { %3594 = vlog2.f32 %v1375_v17  ;;  %v1792_v56 = vsub.f32 0.0, %v1728_v28  ;;  %v5979_v14 = vadd.f32 %v5837_v37, %v1356_v13  ;;  %v2307_v12 = vsel %vm5959_vm9, %v2304_v62, %v2301_v4 }
 0x21c   :  { %v5975_v3 = vpop.eup %3582  ;;  %v5985_v58 = vmax.f32 %v704_v61, 0.0  ;;  %v1365_v21 = vsel %vm5946_vm8, %v1362_v24, %v1359_v35  ;;  %v5990_v44 = vmul.f32 %v5897_v36, %v1370_v20  ;;  %vm5992_vm10 = vcmp.lt.f32.partialorder %v1372_v1, 0.0004427343 }
 0x21d   :  { %v3585_v30 = vpop.eup %3584  ;;  %v2314_v37 = vand.u32 2147483647, %v5888_v57  ;;  %v1901_v9 = vmul.f32 1.442695, %v1792_v56  ;;  %v2785_v40 = vsel %vm2707_vm3, %v2682_v22, 0.0  ;;  %v2312_v61 = vadd.f32 1.0, %v2311_v29 }
 0x21e   :  { %v3587_v6 = vpop.eup %3586  ;;  %v1381_v45 = vand.u32 2147483647, %v5935_v15  ;;  %v833_v11 = vsub.f32 0.0, %v769_v46  ;;  %v2619_v36 = vadd.f32 %v2555_v25, %v2307_v12  ;;  %v1379_v51 = vadd.f32 1.0, %v1378_v53  ;;  %v6012_v25 = vpop.xlane.xlu0 %623 }
 0x21f   :  { %v3589_v43 = vpop.eup %3588  ;;  %v2321_v48 = vadd.f32 1.0, %v2320_v54  ;;  %3596 = vpow2.f32 %v1901_v9  ;;  %v2310_v0 = vmul.f32 0.6931472, %v3585_v30  ;;  %v1384_v50 = vadd.f32 1.0, %v5975_v3  ;;  %v6023_v13 = vpop.xlane.xlu1 %435 }
 0x220   :  { %v2329_v7 = vmul.f32 -0.5, %v5942_v38  ;;  %v2558_v52 = vmax.f32 %v5839_v42, 0.0  ;;  %v2786_v31 = vadd.f32 %v2785_v40, %v2784_v55  ;;  %v1661_v26 = vadd.f32 %v5866_v59, %v1365_v21 }
 0x221   :  { %vm6007_vm11 = vcmp.lt.f32.partialorder %v2314_v37, 0.0004427343  ;;  %v2323_v39 = vand.u32 2147483647, %v5906_v32  ;;  %v1368_v62 = vmul.f32 0.6931472, %v3587_v6  ;;  %v2313_v16 = vmul.f32 %v5888_v57, %v2312_v61 }
 0x222   :  { %v2319_v1 = vmul.f32 0.6931472, %v3589_v43  ;;  %v943_v17 = vmul.f32 1.442695, %v833_v11  ;;  %v3591_v10 = vpop.eup %3590  ;;  %v2683_v4 = vadd.f32 %v2619_v36, %v5911_v63  ;;  %v1380_v42 = vmul.f32 %v5935_v15, %v1379_v51  ;;  %v6047_v21 = vpop.xlane.xlu0 %625 }
 0x223   :  { %vm6017_vm12 = vcmp.lt.f32.partialorder %v1381_v45, 0.0004427343  ;;  %v2322_v20 = vmul.f32 %v5906_v32, %v2321_v48  ;;  %v706_v19 = vsub.f32 0.0, %v5997_v23  ;;  %v2316_v57 = vsel %vm6007_vm11, %v2313_v16, %v2310_v0  ;;  %v6060_v45 = vpop.xlane.xlu1 %437 }
 0x224   :  { %v6025_v35 = vpop.eup %3592  ;;  %3598 = vlog2.f32 %v1384_v50  ;;  %v2330_v28 = vadd.f32 1.0, %v2329_v7  ;;  %v1729_v63 = vand.u32 2147483647, %v6012_v25  ;;  %vm6030_vm13 = vcmp.lt.f32.partialorder %v2323_v39, 0.0004427343 }
 0x225   :  { %v3595_v15 = vpop.eup %3594  ;;  %v1387_v32 = vmul.f32 -0.5, %v5975_v3  ;;  %v2332_v29 = vand.u32 2147483647, %v5942_v38  ;;  %v2335_v46 = vadd.f32 1.0, %v6025_v35  ;;  %v1374_v53 = vsel %vm5992_vm10, %v5990_v44, %v1368_v62 }
 0x226   :  { %v2325_v54 = vsel %vm6030_vm13, %v2322_v20, %v2319_v1  ;;  %v2328_v56 = vmul.f32 0.6931472, %v3591_v10  ;;  %3600 = vpow2.f32 %v943_v17  ;;  %v2787_v55 = vsel %vm2707_vm3, %v2683_v4, 0.0  ;;  %v6075_v1 = vpop.xlane.xlu0 %627 }
 0x227   :  { %v2620_v12 = vadd.f32 %v2556_v5, %v2316_v57  ;;  %3602 = vlog2.f32 %v2335_v46  ;;  %v770_v30 = vand.u32 2147483647, %v706_v19  ;;  %v1377_v37 = vmul.f32 0.6931472, %v3595_v15 }
 0x228   :  { %v2331_v47 = vmul.f32 %v5942_v38, %v2330_v28  ;;  %v707_v44 = vsub.f32 0.0, %v6023_v13  ;;  %v1793_v9 = vsub.f32 0.0, %v1729_v63  ;;  %v2621_v40 = vadd.f32 %v2557_v49, %v2325_v54 }
 0x229   :  { %v6051_v6 = vpop.eup %3596  ;;  %v1388_v61 = vadd.f32 1.0, %v1387_v32  ;;  %v1390_v8 = vand.u32 2147483647, %v5975_v3  ;;  %vm6056_vm14 = vcmp.lt.f32.partialorder %v2332_v29, 0.0004427343  ;;  %v2338_v11 = vmul.f32 -0.5, %v6025_v35 }
 0x22a   :  { %v2334_v38 = vsel %vm6056_vm14, %v2331_v47, %v2328_v56  ;;  %v2344_v43 = vadd.f32 1.0, %v6051_v6  ;;  %v1730_v36 = vand.u32 2147483647, %v6047_v21  ;;  %v1662_v2 = vadd.f32 %v5886_v41, %v1374_v53 }
 0x22b   :  { %v2684_v49 = vadd.f32 %v2620_v12, %v5979_v14  ;;  %v2559_v51 = vmax.f32 %v5904_v33, 0.0  ;;  %v834_v48 = vsub.f32 0.0, %v770_v30  ;;  %v1383_v0 = vsel %vm6017_vm12, %v1380_v42, %v1377_v37 }
 0x22c   :  { %3604 = vlog2.f32 %v2344_v43  ;;  %v771_v50 = vand.u32 2147483647, %v707_v44  ;;  %v1903_v7 = vmul.f32 1.442695, %v1793_v9  ;;  %v2788_v24 = vadd.f32 %v2787_v55, %v2786_v31 }
 0x22d   :  { %v2685_v39 = vadd.f32 %v2621_v40, %v1661_v26  ;;  %v2622_v62 = vadd.f32 %v2558_v52, %v2334_v38  ;;  %v708_v16 = vsub.f32 0.0, %v6060_v45  ;;  %v1389_v14 = vmul.f32 %v5975_v3, %v1388_v61  ;;  %v6085_v26 = vpop.xlane.xlu1 %439 }
 0x22e   :  { %v3599_v41 = vpop.eup %3598  ;;  %vm6078_vm15 = vcmp.lt.f32.partialorder %v1390_v8, 0.0004427343  ;;  %v2339_v17 = vadd.f32 1.0, %v2338_v11  ;;  %v1794_v10 = vsub.f32 0.0, %v1730_v36  ;;  %v1663_v4 = vadd.f32 %v5933_v60, %v1383_v0 }
 0x22f   :  { %v2341_v42 = vand.u32 2147483647, %v6025_v35  ;;  %v945_v31 = vmul.f32 1.442695, %v834_v48  ;;  %v2347_v52 = vmul.f32 -0.5, %v6051_v6  ;;  %v2789_v20 = vsel %vm2707_vm3, %v2684_v49, 0.0 }
 0x230   :  { %v6087_v59 = vpop.eup %3600  ;;  %v835_v3 = vsub.f32 0.0, %v771_v50  ;;  %3606 = vpow2.f32 %v1903_v7  ;;  %v1731_v57 = vand.u32 2147483647, %v6075_v1  ;;  %v2791_v63 = vsel %vm2707_vm3, %v2685_v39, 0.0 }
 0x231   :  { %v3603_v28 = vpop.eup %3602  ;;  %v1386_v15 = vmul.f32 0.6931472, %v3599_v41  ;;  %v2686_v60 = vadd.f32 %v2622_v62, %v1662_v2  ;;  %v772_v22 = vand.u32 2147483647, %v708_v16  ;;  %v2340_v29 = vmul.f32 %v6025_v35, %v2339_v17  ;;  %v6114_v17 = vpop.xlane.xlu1 %441 }
 0x232   :  { %v2337_v32 = vmul.f32 0.6931472, %v3603_v28  ;;  %v1905_v46 = vmul.f32 1.442695, %v1794_v10  ;;  %v709_v53 = vsub.f32 0.0, %v6085_v26  ;;  %v2790_v54 = vadd.f32 %v2789_v20, %v2788_v24 }
 0x233   :  { %vm2342_vm0 = vcmp.lt.f32.partialorder %v2341_v42, 0.0004427343  ;;  %3608 = vpow2.f32 %v945_v31  ;;  %v2348_v56 = vadd.f32 1.0, %v2347_v52  ;;  %v2350_v12 = vand.u32 2147483647, %v6051_v6 }
 0x234   :  { %v2343_v55 = vsel %vm2342_vm0, %v2340_v29, %v2337_v32  ;;  %v947_v30 = vmul.f32 1.442695, %v835_v3  ;;  %v1795_v37 = vsub.f32 0.0, %v1731_v57  ;;  %v2792_v47 = vadd.f32 %v2791_v63, %v2790_v54 }
 0x235   :  { %v2793_v9 = vsel %vm2707_vm3, %v2686_v60, 0.0  ;;  %v1393_v40 = vadd.f32 1.0, %v6087_v59  ;;  %v2623_v61 = vadd.f32 %v2559_v51, %v2343_v55  ;;  %v1392_v35 = vsel %vm6078_vm15, %v1389_v14, %v1386_v15  ;;  %v6130_v60 = vpop.xlane.xlu1 %443 }
 0x236   :  { %v3605_v8 = vpop.eup %3604  ;;  %v836_v5 = vsub.f32 0.0, %v772_v22  ;;  %3610 = vpow2.f32 %v1905_v46  ;;  %v773_v38 = vand.u32 2147483647, %v709_v53  ;;  %v2349_v36 = vmul.f32 %v6051_v6, %v2348_v56  ;;  %v6109_v6 = vpop.xlane.xlu0 %629 }
 0x237   :  { %v2687_v11 = vadd.f32 %v2623_v61, %v1663_v4  ;;  %v2346_v43 = vmul.f32 0.6931472, %v3605_v8  ;;  %v2560_v2 = vmax.f32 %v5956_v34, 0.0  ;;  %v2794_v49 = vadd.f32 %v2793_v9, %v2792_v47 }
 0x238   :  { %vm2351_vm1 = vcmp.lt.f32.partialorder %v2350_v12, 0.0004427343  ;;  %3612 = vpow2.f32 %v947_v30  ;;  %v1907_v48 = vmul.f32 1.442695, %v1795_v37  ;;  %v1664_v51 = vadd.f32 %v5985_v58, %v1392_v35 }
 0x239   :  { %3614 = vlog2.f32 %v1393_v40  ;;  %v2795_v0 = vsel %vm2707_vm3, %v2687_v11, 0.0  ;;  %v2352_v50 = vsel %vm2351_vm1, %v2349_v36, %v2346_v43  ;;  %v949_v62 = vmul.f32 1.442695, %v836_v5 }
 0x23a   :  { %v6107_v7 = vpop.eup %3606  ;;  %v2796_v24 = vadd.f32 %v2795_v0, %v2794_v49  ;;  %v2624_v39 = vadd.f32 %v2560_v2, %v2352_v50  ;;  %v837_v41 = vsub.f32 0.0, %v773_v38  ;;  %3616 = vpow2.f32 %v1907_v48  ;;  %v6127_v28 = vpop.xlane.xlu0 %631 }
 0x23b   :  { %v2353_v33 = vadd.f32 1.0, %v6107_v7  ;;  %3618 = vpow2.f32 %v949_v62  ;;  %v1396_v31 = vmul.f32 -0.5, %v6087_v59  ;;  %v710_v52 = vsub.f32 0.0, %v6114_v17  ;;  %v6169_v38 = vpop.xlane.xlu1 %445 }
 0x23c   :  { %v2688_v14 = vadd.f32 %v2624_v39, %v1664_v51  ;;  %v951_v10 = vmul.f32 1.442695, %v837_v41  ;;  %v1732_v20 = vand.u32 2147483647, %v6109_v6  ;;  %v1399_v32 = vand.u32 2147483647, %v6087_v59 }
 0x23d   :  { %v6111_v34 = vpop.eup %3608  ;;  %3620 = vlog2.f32 %v2353_v33  ;;  %v1397_v22 = vadd.f32 1.0, %v1396_v31  ;;  %v774_v29 = vand.u32 2147483647, %v710_v52  ;;  %v1601_v54 = vmax.f32 %v705_v27, 0.0 }
 0x23e   :  { %v2797_v58 = vsel %vm2707_vm3, %v2688_v14, 0.0  ;;  %v1402_v3 = vadd.f32 1.0, %v6111_v34  ;;  %3622 = vpow2.f32 %v951_v10  ;;  %v1796_v46 = vsub.f32 0.0, %v1732_v20  ;;  %v6163_v8 = vpop.xlane.xlu0 %633 }
 0x23f   :  { %v6117_v4 = vadd.f32 %v2797_v58, %v2796_v24  ;;  %v6139_v56 = vmax.f32 %v706_v19, 0.0  ;;  %v6143_v55 = vmax.f32 %v707_v44, 0.0  ;;  %v1405_v30 = vmul.f32 -0.5, %v6111_v34 }
 0x240   :  { %v6119_v42 = vpop.eup %3610  ;;  %3624 = vlog2.f32 %v1402_v3  ;;  %v2561_v47 = vmax.f32 %v6012_v25, 0.0  ;;  %v1733_v18 = vand.u32 2147483647, %v6127_v28  ;;  %v6154_v23 = vmax.f32 %v708_v16, 0.0 }
 0x241   :  { %v2362_v15 = vadd.f32 1.0, %v6119_v42  ;;  %v1398_v13 = vmul.f32 %v6087_v59, %v1397_v22  ;;  %vm6159_vm2 = vcmp.lt.f32.partialorder %v1399_v32, 0.0004427343  ;;  %v838_v40 = vsub.f32 0.0, %v774_v29  ;;  %v6198_v22 = vpop.xlane.xlu1 %447 }
 0x242   :  { %v6125_v57 = vpop.eup %3612  ;;  %v1909_v61 = vmul.f32 1.442695, %v1796_v46  ;;  %v2356_v35 = vmul.f32 -0.5, %v6107_v7  ;;  %v2562_v5 = vmax.f32 %v6047_v21, 0.0  ;;  %v711_v16 = vsub.f32 0.0, %v6130_v60  ;;  %v6194_v31 = vpop.xlane.xlu0 %635 }
 0x243   :  { %v3615_v63 = vpop.eup %3614  ;;  %v1411_v37 = vadd.f32 1.0, %v6125_v57  ;;  %v1414_v9 = vmul.f32 -0.5, %v6125_v57  ;;  %3626 = vlog2.f32 %v2362_v15  ;;  %v1406_v11 = vadd.f32 1.0, %v1405_v30 }
 0x244   :  { %v6145_v12 = vpop.eup %3616  ;;  %v1395_v27 = vmul.f32 0.6931472, %v3615_v63  ;;  %v1408_v59 = vand.u32 2147483647, %v6111_v34  ;;  %v1797_v43 = vsub.f32 0.0, %v1733_v18  ;;  %v6177_v51 = vmax.f32 %v709_v53, 0.0 }
 0x245   :  { %v6156_v19 = vpop.eup %3618  ;;  %v2371_v45 = vadd.f32 1.0, %v6145_v12  ;;  %3628 = vlog2.f32 %v1411_v37  ;;  %v1415_v49 = vadd.f32 1.0, %v1414_v9  ;;  %v2359_v50 = vand.u32 2147483647, %v6107_v7 }
 0x246   :  { %v1401_v2 = vsel %vm6159_vm2, %v1398_v13, %v1395_v27  ;;  %v1420_v48 = vadd.f32 1.0, %v6156_v19  ;;  %v953_v24 = vmul.f32 1.442695, %v838_v40  ;;  %3630 = vpow2.f32 %v1909_v61 }
 0x247   :  { %v3621_v36 = vpop.eup %3620  ;;  %v1734_v39 = vand.u32 2147483647, %v6163_v8  ;;  %v1417_v62 = vand.u32 2147483647, %v6125_v57  ;;  %v2357_v41 = vadd.f32 1.0, %v2356_v35  ;;  %3632 = vlog2.f32 %v2371_v45 }
 0x248   :  { %v6179_v0 = vpop.eup %3622  ;;  %v775_v14 = vand.u32 2147483647, %v711_v16  ;;  %v1665_v33 = vadd.f32 %v1601_v54, %v1401_v2  ;;  %v6187_v26 = vmul.f32 %v6111_v34, %v1406_v11  ;;  %vm6189_vm4 = vcmp.lt.f32.partialorder %v1408_v59, 0.0004427343 }
 0x249   :  { %v2365_v58 = vmul.f32 -0.5, %v6119_v42  ;;  %v1911_v10 = vmul.f32 1.442695, %v1797_v43  ;;  %v2355_v3 = vmul.f32 0.6931472, %v3621_v36  ;;  %3634 = vlog2.f32 %v1420_v48 }
 0x24a   :  { %v3625_v20 = vpop.eup %3624  ;;  %v1429_v63 = vadd.f32 1.0, %v6179_v0  ;;  %v712_v15 = vsub.f32 0.0, %v6169_v38  ;;  %v6201_v34 = vmul.f32 %v6125_v57, %v1415_v49  ;;  %vm6203_vm5 = vcmp.lt.f32.partialorder %v2359_v50, 0.0004427343 }
 0x24b   :  { %3636 = vpow2.f32 %v953_v24  ;;  %v1798_v29 = vsub.f32 0.0, %v1734_v39  ;;  %v2358_v54 = vmul.f32 %v6107_v7, %v2357_v41  ;;  %v1423_v30 = vmul.f32 -0.5, %v6156_v19 }
 0x24c   :  { %v839_v37 = vsub.f32 0.0, %v775_v14  ;;  %v1735_v18 = vand.u32 2147483647, %v6194_v31  ;;  %v1404_v27 = vmul.f32 0.6931472, %v3625_v20  ;;  %v2366_v9 = vadd.f32 1.0, %v2365_v58 }
 0x24d   :  { %v3627_v46 = vpop.eup %3626  ;;  %3638 = vpow2.f32 %v1911_v10  ;;  %v713_v57 = vsub.f32 0.0, %v6198_v22  ;;  %vm6211_vm6 = vcmp.lt.f32.partialorder %v1417_v62, 0.0004427343  ;;  %v2361_v44 = vsel %vm6203_vm5, %v2358_v54, %v2355_v3 }
 0x24e   :  { %v2368_v40 = vand.u32 2147483647, %v6119_v42  ;;  %3640 = vlog2.f32 %v1429_v63  ;;  %v776_v7 = vand.u32 2147483647, %v712_v15  ;;  %v2364_v35 = vmul.f32 0.6931472, %v3627_v46 }
 0x24f   :  { %v3629_v61 = vpop.eup %3628  ;;  %v2374_v45 = vmul.f32 -0.5, %v6145_v12  ;;  %v2563_v11 = vmax.f32 %v6075_v1, 0.0  ;;  %v1913_v59 = vmul.f32 1.442695, %v1798_v29  ;;  %v6224_v43 = vmax.f32 %v710_v52, 0.0 }
 0x250   :  { %v2564_v36 = vmax.f32 %v6109_v6, 0.0  ;;  %v955_v2 = vmul.f32 1.442695, %v839_v37  ;;  %v1799_v49 = vsub.f32 0.0, %v1735_v18  ;;  %v6227_v48 = vpop.eup %3630  ;;  %v2625_v50 = vadd.f32 %v2561_v47, %v2361_v44  ;;  %v6253_v18 = vpop.xlane.xlu0 %637 }
 0x251   :  { %v1424_v24 = vadd.f32 1.0, %v1423_v30  ;;  %v2367_v39 = vmul.f32 %v6119_v42, %v2366_v9  ;;  %v777_v1 = vand.u32 2147483647, %v713_v57  ;;  %v3633_v62 = vpop.eup %3632  ;;  %v1410_v17 = vsel %vm6189_vm4, %v6187_v26, %v1404_v27 }
 0x252   :  { %v1413_v52 = vmul.f32 0.6931472, %v3629_v61  ;;  %vm6237_vm7 = vcmp.lt.f32.partialorder %v2368_v40, 0.0004427343  ;;  %v840_v14 = vsub.f32 0.0, %v776_v7  ;;  %v1432_v47 = vmul.f32 -0.5, %v6179_v0 }
 0x253   :  { %v2370_v25 = vsel %vm6237_vm7, %v2367_v39, %v2364_v35  ;;  %v2375_v42 = vadd.f32 1.0, %v2374_v45  ;;  %3642 = vpow2.f32 %v1913_v59  ;;  %v3635_v58 = vpop.eup %3634  ;;  %v1426_v10 = vand.u32 2147483647, %v6156_v19 }
 0x254   :  { %v2377_v20 = vand.u32 2147483647, %v6145_v12  ;;  %3644 = vpow2.f32 %v955_v2  ;;  %v1915_v26 = vmul.f32 1.442695, %v1799_v49  ;;  %v2689_v3 = vadd.f32 %v2625_v50, %v1665_v33 }
 0x255   :  { %v6246_v53 = vpop.eup %3636  ;;  %v2373_v63 = vmul.f32 0.6931472, %v3633_v62  ;;  %v2380_v32 = vadd.f32 1.0, %v6227_v48  ;;  %v841_v29 = vsub.f32 0.0, %v777_v1  ;;  %v1666_v46 = vadd.f32 %v6139_v56, %v1410_v17  ;;  %v6284_v1 = vpop.xlane.xlu1 %449 }
 0x256   :  { %v1425_v54 = vmul.f32 %v6156_v19, %v1424_v24  ;;  %v2626_v30 = vadd.f32 %v2562_v5, %v2370_v25  ;;  %v957_v37 = vmul.f32 1.442695, %v840_v14  ;;  %v1419_v33 = vsel %vm6211_vm6, %v6201_v34, %v1413_v52  ;;  %v6286_v62 = vpop.xlane.xlu0 %639 }
 0x257   :  { %v6255_v27 = vpop.eup %3638  ;;  %v1433_v9 = vadd.f32 1.0, %v1432_v47  ;;  %v1435_v44 = vand.u32 2147483647, %v6179_v0  ;;  %v2376_v40 = vmul.f32 %v6145_v12, %v2375_v42  ;;  %v1422_v7 = vmul.f32 0.6931472, %v3635_v58 }
 0x258   :  { %v3641_v56 = vpop.eup %3640  ;;  %vm6262_vm8 = vcmp.lt.f32.partialorder %v2377_v20, 0.0004427343  ;;  %v1438_v21 = vadd.f32 1.0, %v6246_v53  ;;  %3646 = vpow2.f32 %v1915_v26  ;;  %v2799_v5 = vsel %vm2707_vm3, %v2689_v3, 0.0 }
 0x259   :  { %v2379_v13 = vsel %vm6262_vm8, %v2376_v40, %v2373_v63  ;;  %3648 = vlog2.f32 %v2380_v32  ;;  %v959_v34 = vmul.f32 1.442695, %v841_v29  ;;  %v2690_v61 = vadd.f32 %v2626_v30, %v1666_v46 }
 0x25a   :  { %v1441_v35 = vmul.f32 -0.5, %v6246_v53  ;;  %v2389_v12 = vadd.f32 1.0, %v6255_v27  ;;  %3650 = vpow2.f32 %v957_v37  ;;  %v1667_v45 = vadd.f32 %v6143_v55, %v1419_v33  ;;  %v6330_v30 = vpop.xlane.xlu0 %641 }
 0x25b   :  { %vm6273_vm9 = vcmp.lt.f32.partialorder %v1426_v10, 0.0004427343  ;;  %v1431_v2 = vmul.f32 0.6931472, %v3641_v56  ;;  %v2383_v49 = vmul.f32 -0.5, %v6227_v48  ;;  %v2627_v39 = vadd.f32 %v2563_v11, %v2379_v13 }
 0x25c   :  { %v1428_v50 = vsel %vm6273_vm9, %v1425_v54, %v1422_v7  ;;  %vm6280_vm10 = vcmp.lt.f32.partialorder %v1435_v44, 0.0004427343  ;;  %3652 = vlog2.f32 %v1438_v21  ;;  %v2800_v17 = vadd.f32 %v2799_v5, %v6117_v4  ;;  %v6328_v54 = vpop.xlane.xlu1 %451 }
 0x25d   :  { %v6288_v55 = vpop.eup %3642  ;;  %v1434_v52 = vmul.f32 %v6179_v0, %v1433_v9  ;;  %v6294_v41 = vmax.f32 %v711_v16, 0.0  ;;  %3654 = vpow2.f32 %v959_v34  ;;  %v2801_v11 = vsel %vm2707_vm3, %v2690_v61, 0.0 }
 0x25e   :  { %v6296_v14 = vpop.eup %3644  ;;  %v1442_v25 = vadd.f32 1.0, %v1441_v35  ;;  %3656 = vlog2.f32 %v2389_v12  ;;  %v2565_v47 = vmax.f32 %v6127_v28, 0.0  ;;  %v6301_v42 = vadd.f32 %v6154_v23, %v1428_v50 }
 0x25f   :  { %v1437_v4 = vsel %vm6280_vm10, %v1434_v52, %v1431_v2  ;;  %v2384_v0 = vadd.f32 1.0, %v2383_v49  ;;  %v6307_v60 = vmax.f32 %v712_v15, 0.0  ;;  %v2691_v16 = vadd.f32 %v2627_v39, %v1667_v45 }
 0x260   :  { %v2398_v58 = vadd.f32 1.0, %v6288_v55  ;;  %v2566_v10 = vmax.f32 %v6163_v8, 0.0  ;;  %v714_v20 = vsub.f32 0.0, %v6284_v1  ;;  %v2802_v26 = vadd.f32 %v2801_v11, %v2800_v17  ;;  %v6362_v17 = vpop.xlane.xlu1 %453 }
 0x261   :  { %v1444_v3 = vand.u32 2147483647, %v6246_v53  ;;  %v1447_v23 = vadd.f32 1.0, %v6296_v14  ;;  %v1736_v63 = vand.u32 2147483647, %v6253_v18  ;;  %v6318_v38 = vadd.f32 %v6177_v51, %v1437_v4 }
 0x262   :  { %v6315_v32 = vpop.eup %3646  ;;  %v6321_v15 = vmul.f32 %v6246_v53, %v1442_v25  ;;  %v2386_v29 = vand.u32 2147483647, %v6227_v48  ;;  %v6326_v46 = vmax.f32 %v713_v57, 0.0  ;;  %v2385_v33 = vmul.f32 %v6227_v48, %v2384_v0 }
 0x263   :  { %v3649_v37 = vpop.eup %3648  ;;  %v1450_v9 = vmul.f32 -0.5, %v6296_v14  ;;  %v2392_v51 = vmul.f32 -0.5, %v6255_v27  ;;  %v1737_v53 = vand.u32 2147483647, %v6286_v62  ;;  %v2803_v40 = vsel %vm2707_vm3, %v2691_v16, 0.0 }
 0x264   :  { %v6336_v44 = vpop.eup %3650  ;;  %v2395_v22 = vand.u32 2147483647, %v6255_v27  ;;  %3658 = vlog2.f32 %v2398_v58  ;;  %v778_v57 = vand.u32 2147483647, %v714_v20  ;;  %vm6340_vm11 = vcmp.lt.f32.partialorder %v1444_v3, 0.0004427343 }
 0x265   :  { %3660 = vlog2.f32 %v1447_v23  ;;  %v2407_v48 = vadd.f32 1.0, %v6315_v32  ;;  %v1800_v7 = vsub.f32 0.0, %v1736_v63  ;;  %v1738_v19 = vand.u32 2147483647, %v6330_v30 }
 0x266   :  { %v3653_v21 = vpop.eup %3652  ;;  %v2382_v5 = vmul.f32 0.6931472, %v3649_v37  ;;  %vm6346_vm12 = vcmp.lt.f32.partialorder %v2386_v29, 0.0004427343  ;;  %v2567_v34 = vmax.f32 %v6194_v31, 0.0  ;;  %v715_v61 = vsub.f32 0.0, %v6328_v54 }
 0x267   :  { %v6352_v35 = vpop.eup %3654  ;;  %v1451_v12 = vadd.f32 1.0, %v1450_v9  ;;  %v1453_v45 = vand.u32 2147483647, %v6296_v14  ;;  %v1456_v59 = vadd.f32 1.0, %v6336_v44  ;;  %v1801_v2 = vsub.f32 0.0, %v1737_v53 }
 0x268   :  { %v3657_v49 = vpop.eup %3656  ;;  %v6356_v50 = vadd.f32 %v2803_v40, %v2802_v26  ;;  %v2393_v24 = vadd.f32 1.0, %v2392_v51  ;;  %vm6358_vm13 = vcmp.lt.f32.partialorder %v2395_v22, 0.0004427343  ;;  %v842_v1 = vsub.f32 0.0, %v778_v57 }
 0x269   :  { %v1440_v52 = vmul.f32 0.6931472, %v3653_v21  ;;  %3662 = vlog2.f32 %v2407_v48  ;;  %v1917_v11 = vmul.f32 1.442695, %v1800_v7  ;;  %v1802_v25 = vsub.f32 0.0, %v1738_v19 }
 0x26a   :  { %v2388_v4 = vsel %vm6346_vm12, %v2385_v33, %v2382_v5  ;;  %v2401_v0 = vmul.f32 -0.5, %v6288_v55  ;;  %v1465_v16 = vadd.f32 1.0, %v6352_v35  ;;  %v779_v58 = vand.u32 2147483647, %v715_v61 }
 0x26b   :  { %v2391_v26 = vmul.f32 0.6931472, %v3657_v49  ;;  %3664 = vlog2.f32 %v1456_v59  ;;  %v1919_v3 = vmul.f32 1.442695, %v1801_v2  ;;  %v716_v23 = vsub.f32 0.0, %v6362_v17  ;;  %v6400_v2 = vpop.xlane.xlu1 %455 }
 0x26c   :  { %v6372_v63 = vmul.f32 %v6296_v14, %v1451_v12  ;;  %v2394_v29 = vmul.f32 %v6255_v27, %v2393_v24  ;;  %v961_v37 = vmul.f32 1.442695, %v842_v1  ;;  %v6375_v9 = vmax.f32 %v714_v20, 0.0 }
 0x26d   :  { %v2628_v33 = vadd.f32 %v2564_v36, %v2388_v4  ;;  %vm6379_vm14 = vcmp.lt.f32.partialorder %v1453_v45, 0.0004427343  ;;  %3666 = vpow2.f32 %v1917_v11  ;;  %v2568_v53 = vmax.f32 %v6253_v18, 0.0 }
 0x26e   :  { %v1921_v40 = vmul.f32 1.442695, %v1802_v25  ;;  %v3659_v22 = vpop.eup %3658  ;;  %v1446_v14 = vsel %vm6340_vm11, %v6321_v15, %v1440_v52  ;;  %v1459_v27 = vmul.f32 -0.5, %v6336_v44  ;;  %3668 = vlog2.f32 %v1465_v16  ;;  %v6413_v25 = vpop.xlane.xlu0 %643 }
 0x26f   :  { %v843_v20 = vsub.f32 0.0, %v779_v58  ;;  %v3661_v57 = vpop.eup %3660  ;;  %v2397_v6 = vsel %vm6358_vm13, %v2394_v29, %v2391_v26  ;;  %v2402_v36 = vadd.f32 1.0, %v2401_v0  ;;  %3670 = vpow2.f32 %v1919_v3 }
 0x270   :  { %v780_v48 = vand.u32 2147483647, %v716_v23  ;;  %v1462_v7 = vand.u32 2147483647, %v6336_v44  ;;  %v2404_v19 = vand.u32 2147483647, %v6288_v55  ;;  %3672 = vpow2.f32 %v961_v37 }
 0x271   :  { %v2410_v56 = vmul.f32 -0.5, %v6315_v32  ;;  %v2692_v15 = vadd.f32 %v2628_v33, %v6301_v42  ;;  %v2400_v21 = vmul.f32 0.6931472, %v3659_v22  ;;  %v1468_v5 = vmul.f32 -0.5, %v6352_v35 }
 0x272   :  { %3674 = vpow2.f32 %v1921_v40  ;;  %v1449_v13 = vmul.f32 0.6931472, %v3661_v57  ;;  %v2629_v12 = vadd.f32 %v2565_v47, %v2397_v6  ;;  %v963_v45 = vmul.f32 1.442695, %v843_v20  ;;  %v6435_v20 = vpop.xlane.xlu1 %457 }
 0x273   :  { %v2569_v59 = vmax.f32 %v6286_v62, 0.0  ;;  %v3663_v49 = vpop.eup %3662  ;;  %v1460_v24 = vadd.f32 1.0, %v1459_v27  ;;  %v2403_v39 = vmul.f32 %v6288_v55, %v2402_v36  ;;  %v1471_v1 = vand.u32 2147483647, %v6352_v35 }
 0x274   :  { %v844_v42 = vsub.f32 0.0, %v780_v48  ;;  %v1670_v52 = vadd.f32 %v6224_v43, %v1446_v14  ;;  %vm6405_vm15 = vcmp.lt.f32.partialorder %v1462_v7, 0.0004427343  ;;  %vm6409_vm0 = vcmp.lt.f32.partialorder %v2404_v19, 0.0004427343 }
 0x275   :  { %v2411_v47 = vadd.f32 1.0, %v2410_v56  ;;  %v3665_v4 = vpop.eup %3664  ;;  %v2805_v0 = vsel %vm2707_vm3, %v2692_v15, 0.0  ;;  %v2406_v55 = vsel %vm6409_vm0, %v2403_v39, %v2400_v21  ;;  %v1469_v16 = vadd.f32 1.0, %v1468_v5 }
 0x276   :  { %v2413_v43 = vand.u32 2147483647, %v6315_v32  ;;  %v1455_v58 = vsel %vm6379_vm14, %v6372_v63, %v1449_v13  ;;  %v2693_v26 = vadd.f32 %v2629_v12, %v6318_v38  ;;  %v2409_v3 = vmul.f32 0.6931472, %v3663_v49 }
 0x277   :  { %3676 = vpow2.f32 %v963_v45  ;;  %v6423_v29 = vpop.eup %3666  ;;  %v1461_v37 = vmul.f32 %v6336_v44, %v1460_v24  ;;  %vm6426_vm1 = vcmp.lt.f32.partialorder %v1471_v1, 0.0004427343  ;;  %v965_v40 = vmul.f32 1.442695, %v844_v42  ;;  %v6474_v24 = vpop.xlane.xlu1 %459 }
 0x278   :  { %v1739_v22 = vand.u32 2147483647, %v6413_v25  ;;  %v3669_v14 = vpop.eup %3668  ;;  %v2806_v27 = vadd.f32 %v2805_v0, %v6356_v50  ;;  %v1458_v51 = vmul.f32 0.6931472, %v3665_v4  ;;  %v2630_v38 = vadd.f32 %v2566_v10, %v2406_v55 }
 0x279   :  { %v2412_v63 = vmul.f32 %v6315_v32, %v2411_v47  ;;  %v6437_v57 = vpop.eup %3670  ;;  %v1671_v44 = vadd.f32 %v6294_v41, %v1455_v58  ;;  %v1470_v6 = vmul.f32 %v6352_v35, %v1469_v16  ;;  %vm6441_vm2 = vcmp.lt.f32.partialorder %v2413_v43, 0.0004427343  ;;  %v6456_v35 = vpop.xlane.xlu0 %645 }
 0x27a   :  { %v717_v50 = vsub.f32 0.0, %v6400_v2  ;;  %v6446_v48 = vpop.eup %3672  ;;  %v2807_v8 = vsel %vm2707_vm3, %v2693_v26, 0.0  ;;  %v2416_v32 = vadd.f32 1.0, %v6423_v29  ;;  %v6454_v41 = vmax.f32 %v715_v61, 0.0 }
 0x27b   :  { %v2415_v10 = vsel %vm6441_vm2, %v2412_v63, %v2409_v3  ;;  %3678 = vpow2.f32 %v965_v40  ;;  %v6462_v19 = vmax.f32 %v716_v23, 0.0  ;;  %v1803_v56 = vsub.f32 0.0, %v1739_v22 }
 0x27c   :  { %v6458_v7 = vpop.eup %3674  ;;  %v718_v15 = vsub.f32 0.0, %v6435_v20  ;;  %v1464_v21 = vsel %vm6405_vm15, %v1461_v37, %v1458_v51  ;;  %v2694_v5 = vadd.f32 %v2630_v38, %v1670_v52  ;;  %v1467_v13 = vmul.f32 0.6931472, %v3669_v14  ;;  %v6501_v14 = vpop.xlane.xlu1 %461 }
 0x27d   :  { %v2425_v54 = vadd.f32 1.0, %v6437_v57  ;;  %v2631_v61 = vadd.f32 %v2567_v34, %v2415_v10  ;;  %v1474_v12 = vadd.f32 1.0, %v6446_v48  ;;  %v1477_v45 = vmul.f32 -0.5, %v6446_v48  ;;  %v6488_v47 = vpop.xlane.xlu0 %647 }
 0x27e   :  { %v781_v17 = vand.u32 2147483647, %v717_v50  ;;  %v2808_v23 = vadd.f32 %v2807_v8, %v2806_v27  ;;  %3680 = vlog2.f32 %v2416_v32  ;;  %v2434_v2 = vadd.f32 1.0, %v6458_v7 }
 0x27f   :  { %v1740_v49 = vand.u32 2147483647, %v6456_v35  ;;  %v6477_v39 = vadd.f32 %v6307_v60, %v1464_v21  ;;  %v2570_v1 = vmax.f32 %v6330_v30, 0.0  ;;  %v1923_v31 = vmul.f32 1.442695, %v1803_v56 }
 0x280   :  { %v782_v34 = vand.u32 2147483647, %v718_v15  ;;  %v2809_v52 = vsel %vm2707_vm3, %v2694_v5, 0.0  ;;  %v1473_v11 = vsel %vm6426_vm1, %v1470_v6, %v1467_v13  ;;  %3682 = vlog2.f32 %v2425_v54 }
 0x281   :  { %v6482_v42 = vpop.eup %3676  ;;  %v2571_v28 = vmax.f32 %v6413_v25, 0.0  ;;  %v2695_v60 = vadd.f32 %v2631_v61, %v1671_v44  ;;  %3684 = vlog2.f32 %v1474_v12  ;;  %v1478_v4 = vadd.f32 1.0, %v1477_v45  ;;  %v6515_v56 = vpop.xlane.xlu0 %649 }
 0x282   :  { %v845_v0 = vsub.f32 0.0, %v781_v17  ;;  %v2419_v55 = vmul.f32 -0.5, %v6423_v29  ;;  %v2422_v16 = vand.u32 2147483647, %v6423_v29  ;;  %3686 = vlog2.f32 %v2434_v2 }
 0x283   :  { %v1804_v43 = vsub.f32 0.0, %v1740_v49  ;;  %v1483_v58 = vadd.f32 1.0, %v6482_v42  ;;  %3688 = vpow2.f32 %v1923_v31  ;;  %v846_v26 = vsub.f32 0.0, %v782_v34  ;;  %v6531_v34 = vpop.xlane.xlu1 %463 }
 0x284   :  { %v1741_v3 = vand.u32 2147483647, %v6488_v47  ;;  %v6495_v37 = vadd.f32 %v6326_v46, %v1473_v11  ;;  %v1480_v33 = vand.u32 2147483647, %v6446_v48  ;;  %v1486_v40 = vmul.f32 -0.5, %v6482_v42 }
 0x285   :  { %v6499_v22 = vmax.f32 %v717_v50, 0.0  ;;  %v6503_v27 = vpop.eup %3678  ;;  %v2810_v51 = vadd.f32 %v2809_v52, %v2808_v23  ;;  %v6506_v38 = vmul.f32 %v6446_v48, %v1478_v4  ;;  %v967_v63 = vmul.f32 1.442695, %v845_v0 }
 0x286   :  { %v719_v44 = vsub.f32 0.0, %v6474_v24  ;;  %v2811_v46 = vsel %vm2707_vm3, %v2695_v60, 0.0  ;;  %v2420_v6 = vadd.f32 1.0, %v2419_v55  ;;  %v2428_v36 = vmul.f32 -0.5, %v6437_v57 }
 0x287   :  { %v1925_v8 = vmul.f32 1.442695, %v1804_v43  ;;  %vm6511_vm4 = vcmp.lt.f32.partialorder %v2422_v16, 0.0004427343  ;;  %3690 = vlog2.f32 %v1483_v58  ;;  %v969_v10 = vmul.f32 1.442695, %v846_v26  ;;  %v6564_v50 = vpop.xlane.xlu1 %465 }
 0x288   :  { %v1805_v32 = vsub.f32 0.0, %v1741_v3  ;;  %v3681_v48 = vpop.eup %3680  ;;  %v1487_v21 = vadd.f32 1.0, %v1486_v40  ;;  %v2431_v5 = vand.u32 2147483647, %v6437_v57  ;;  %v1492_v13 = vadd.f32 1.0, %v6503_v27  ;;  %v6545_v40 = vpop.xlane.xlu0 %651 }
 0x289   :  { %v1495_v54 = vmul.f32 -0.5, %v6503_v27  ;;  %v6520_v61 = vadd.f32 %v2811_v46, %v2810_v51  ;;  %v1489_v12 = vand.u32 2147483647, %v6482_v42  ;;  %3692 = vpow2.f32 %v967_v63 }
 0x28a   :  { %v783_v45 = vand.u32 2147483647, %v719_v44  ;;  %v3683_v17 = vpop.eup %3682  ;;  %vm6525_vm5 = vcmp.lt.f32.partialorder %v1480_v33, 0.0004427343  ;;  %v2421_v2 = vmul.f32 %v6423_v29, %v2420_v6  ;;  %v2429_v49 = vadd.f32 1.0, %v2428_v36 }
 0x28b   :  { %v2437_v31 = vmul.f32 -0.5, %v6458_v7  ;;  %3694 = vpow2.f32 %v1925_v8  ;;  %v3685_v52 = vpop.eup %3684  ;;  %v2418_v11 = vmul.f32 0.6931472, %v3681_v48  ;;  %v2440_v60 = vand.u32 2147483647, %v6458_v7 }
 0x28c   :  { %3696 = vpow2.f32 %v969_v10  ;;  %v1927_v4 = vmul.f32 1.442695, %v1805_v32  ;;  %v3687_v0 = vpop.eup %3686  ;;  %v6535_v55 = vmul.f32 %v6482_v42, %v1487_v21  ;;  %vm6537_vm6 = vcmp.lt.f32.partialorder %v2431_v5, 0.0004427343 }
 0x28d   :  { %3698 = vlog2.f32 %v1492_v13  ;;  %v1496_v29 = vadd.f32 1.0, %v1495_v54  ;;  %v6541_v43 = vpop.eup %3688  ;;  %v2427_v58 = vmul.f32 0.6931472, %v3683_v17  ;;  %v847_v26 = vsub.f32 0.0, %v783_v45 }
 0x28e   :  { %v720_v3 = vsub.f32 0.0, %v6501_v14  ;;  %v1742_v33 = vand.u32 2147483647, %v6515_v56  ;;  %v1476_v51 = vmul.f32 0.6931472, %v3685_v52  ;;  %v2430_v42 = vmul.f32 %v6437_v57, %v2429_v49 }
 0x28f   :  { %v1498_v63 = vand.u32 2147483647, %v6503_v27  ;;  %v2438_v46 = vadd.f32 1.0, %v2437_v31  ;;  %v2424_v6 = vsel %vm6511_vm4, %v2421_v2, %v2418_v11  ;;  %vm6551_vm7 = vcmp.lt.f32.partialorder %v1489_v12, 0.0004427343 }
 0x290   :  { %vm6555_vm8 = vcmp.lt.f32.partialorder %v2440_v60, 0.0004427343  ;;  %3700 = vpow2.f32 %v1927_v4  ;;  %v1806_v14 = vsub.f32 0.0, %v1742_v33  ;;  %v6560_v10 = vmul.f32 %v6503_v27, %v1496_v29 }
 0x291   :  { %v2436_v57 = vmul.f32 0.6931472, %v3687_v0  ;;  %v2443_v32 = vadd.f32 1.0, %v6541_v43  ;;  %v1743_v48 = vand.u32 2147483647, %v6545_v40  ;;  %v3691_v21 = vpop.eup %3690  ;;  %v2433_v5 = vsel %vm6537_vm6, %v2430_v42, %v2427_v58 }
 0x292   :  { %v971_v13 = vmul.f32 1.442695, %v847_v26  ;;  %v784_v54 = vand.u32 2147483647, %v720_v3  ;;  %v721_v12 = vsub.f32 0.0, %v6531_v34  ;;  %v2632_v45 = vadd.f32 %v2568_v53, %v2424_v6 }
 0x293   :  { %v2439_v27 = vmul.f32 %v6458_v7, %v2438_v46  ;;  %v1929_v17 = vmul.f32 1.442695, %v1806_v14  ;;  %v1807_v2 = vsub.f32 0.0, %v1743_v48  ;;  %v6572_v49 = vpop.eup %3692  ;;  %v1482_v31 = vsel %vm6525_vm5, %v6506_v38, %v1476_v51 }
 0x294   :  { %v6579_v52 = vmax.f32 %v718_v15, 0.0  ;;  %v2572_v11 = vmax.f32 %v6456_v35, 0.0  ;;  %v722_v60 = vsub.f32 0.0, %v6564_v50  ;;  %v1485_v53 = vmul.f32 0.6931472, %v3691_v21 }
 0x295   :  { %v6583_v18 = vpop.eup %3694  ;;  %v2633_v7 = vadd.f32 %v2569_v59, %v2433_v5  ;;  %v2442_v4 = vsel %vm6555_vm8, %v2439_v27, %v2436_v57  ;;  %3702 = vlog2.f32 %v2443_v32  ;;  %vm6591_vm9 = vcmp.lt.f32.partialorder %v1498_v63, 0.0004427343  ;;  %v6627_v57 = vpop.xlane.xlu1 %657 }
 0x296   :  { %v6589_v23 = vpop.eup %3696  ;;  %3704 = vpow2.f32 %v971_v13  ;;  %v848_v15 = vsub.f32 0.0, %v784_v54  ;;  %v785_v38 = vand.u32 2147483647, %v721_v12  ;;  %v1931_v0 = vmul.f32 1.442695, %v1807_v2 }
 0x297   :  { %v3699_v16 = vpop.eup %3698  ;;  %v1674_v62 = vadd.f32 %v6375_v9, %v1482_v31  ;;  %v2696_v59 = vadd.f32 %v2632_v45, %v6477_v39  ;;  %v1501_v29 = vadd.f32 1.0, %v6572_v49  ;;  %3706 = vpow2.f32 %v1929_v17 }
 0x298   :  { %v2452_v58 = vadd.f32 1.0, %v6583_v18  ;;  %v6603_v26 = vmax.f32 %v719_v44, 0.0  ;;  %v2573_v33 = vmax.f32 %v6488_v47, 0.0  ;;  %v786_v51 = vand.u32 2147483647, %v722_v60 }
 0x299   :  { %v1491_v9 = vsel %vm6551_vm7, %v6535_v55, %v1485_v53  ;;  %v2697_v39 = vadd.f32 %v2633_v7, %v6495_v37  ;;  %v2634_v42 = vadd.f32 %v2570_v1, %v2442_v4  ;;  %v1510_v63 = vadd.f32 1.0, %v6589_v23  ;;  %v6625_v37 = vpop.xlane.xlu0 %653 }
 0x29a   :  { %v6615_v46 = vpop.eup %3700  ;;  %v973_v24 = vmul.f32 1.442695, %v848_v15  ;;  %v6617_v44 = vmax.f32 %v720_v3, 0.0  ;;  %v849_v6 = vsub.f32 0.0, %v785_v38  ;;  %3708 = vpow2.f32 %v1931_v0 }
 0x29b   :  { %v2813_v8 = vsel %vm2707_vm3, %v2696_v59, 0.0  ;;  %v1494_v14 = vmul.f32 0.6931472, %v3699_v16  ;;  %3710 = vlog2.f32 %v1501_v29  ;;  %v850_v36 = vsub.f32 0.0, %v786_v51 }
 0x29c   :  { %v6621_v55 = vadd.f32 %v6454_v41, %v1491_v9  ;;  %v1504_v30 = vmul.f32 -0.5, %v6572_v49  ;;  %v2446_v1 = vmul.f32 -0.5, %v6541_v43  ;;  %3712 = vlog2.f32 %v2452_v58 }
 0x29d   :  { %v2815_v3 = vsel %vm2707_vm3, %v2697_v39, 0.0  ;;  %v2698_v32 = vadd.f32 %v2634_v42, %v1674_v62  ;;  %3714 = vlog2.f32 %v1510_v63  ;;  %v2461_v48 = vadd.f32 1.0, %v6615_v46 }
 0x29e   :  { %v2814_v21 = vadd.f32 %v2813_v8, %v6520_v61  ;;  %v1513_v41 = vmul.f32 -0.5, %v6589_v23  ;;  %3716 = vpow2.f32 %v973_v24  ;;  %v975_v5 = vmul.f32 1.442695, %v849_v6 }
 0x29f   :  { %v3703_v13 = vpop.eup %3702  ;;  %v1500_v54 = vsel %vm6591_vm9, %v6560_v10, %v1494_v14  ;;  %v977_v45 = vmul.f32 1.442695, %v850_v36  ;;  %v1744_v27 = vand.u32 2147483647, %v6625_v37  ;;  %v1746_v17 = vand.u32 2147483647, %v6627_v57  ;;  %v6667_v14 = vpop.xlane.xlu0 %655 }
 0x2a0   :  { %v6638_v2 = vpop.eup %3704  ;;  %v2816_v31 = vadd.f32 %v2815_v3, %v2814_v21  ;;  %v1505_v53 = vadd.f32 1.0, %v1504_v30  ;;  %v1507_v61 = vand.u32 2147483647, %v6572_v49  ;;  %v2447_v7 = vadd.f32 1.0, %v2446_v1 }
 0x2a1   :  { %v6641_v4 = vpop.eup %3706  ;;  %v2817_v15 = vsel %vm2707_vm3, %v2698_v32, 0.0  ;;  %v2449_v38 = vand.u32 2147483647, %v6541_v43  ;;  %v1516_v10 = vand.u32 2147483647, %v6589_v23  ;;  %3718 = vlog2.f32 %v2461_v48 }
 0x2a2   :  { %v2445_v20 = vmul.f32 0.6931472, %v3703_v13  ;;  %v1514_v0 = vadd.f32 1.0, %v1513_v41  ;;  %v2455_v16 = vmul.f32 -0.5, %v6583_v18  ;;  %3720 = vpow2.f32 %v975_v5 }
 0x2a3   :  { %v1519_v62 = vadd.f32 1.0, %v6638_v2  ;;  %3722 = vpow2.f32 %v977_v45  ;;  %v1808_v59 = vsub.f32 0.0, %v1744_v27  ;;  %v1810_v29 = vsub.f32 0.0, %v1746_v17 }
 0x2a4   :  { %v6648_v58 = vpop.eup %3708  ;;  %v6651_v51 = vadd.f32 %v6462_v19, %v1500_v54  ;;  %vm6653_vm10 = vcmp.lt.f32.partialorder %v1507_v61, 0.0004427343  ;;  %v2448_v39 = vmul.f32 %v6541_v43, %v2447_v7  ;;  %v2470_v42 = vadd.f32 1.0, %v6641_v4 }
 0x2a5   :  { %v3711_v63 = vpop.eup %3710  ;;  %v6659_v24 = vadd.f32 %v2817_v15, %v2816_v31  ;;  %v1506_v6 = vmul.f32 %v6572_v49, %v1505_v53  ;;  %vm6662_vm11 = vcmp.lt.f32.partialorder %v2449_v38, 0.0004427343  ;;  %v2458_v19 = vand.u32 2147483647, %v6583_v18 }
 0x2a6   :  { %v3713_v36 = vpop.eup %3712  ;;  %v2451_v30 = vsel %vm6662_vm11, %v2448_v39, %v2445_v20  ;;  %v1515_v43 = vmul.f32 %v6589_v23, %v1514_v0  ;;  %vm6672_vm12 = vcmp.lt.f32.partialorder %v1516_v10, 0.0004427343  ;;  %v2456_v3 = vadd.f32 1.0, %v2455_v16 }
 0x2a7   :  { %v3715_v49 = vpop.eup %3714  ;;  %3724 = vlog2.f32 %v1519_v62  ;;  %v2479_v32 = vadd.f32 1.0, %v6648_v58  ;;  %v1933_v48 = vmul.f32 1.442695, %v1808_v59  ;;  %v1937_v21 = vmul.f32 1.442695, %v1810_v29 }
 0x2a8   :  { %v6677_v41 = vpop.eup %3716  ;;  %v2464_v5 = vmul.f32 -0.5, %v6615_v46  ;;  %v2467_v13 = vand.u32 2147483647, %v6615_v46  ;;  %3726 = vlog2.f32 %v2470_v42  ;;  %v1745_v23 = vand.u32 2147483647, %v6667_v14 }
 0x2a9   :  { %v1503_v54 = vmul.f32 0.6931472, %v3711_v63  ;;  %v2454_v45 = vmul.f32 0.6931472, %v3713_v36  ;;  %vm6682_vm13 = vcmp.lt.f32.partialorder %v2458_v19, 0.0004427343  ;;  %3728 = vpow2.f32 %v1933_v48 }
 0x2aa   :  { %v2635_v17 = vadd.f32 %v2571_v28, %v2451_v30  ;;  %v1522_v31 = vmul.f32 -0.5, %v6638_v2  ;;  %3730 = vpow2.f32 %v1937_v21  ;;  %v1809_v53 = vsub.f32 0.0, %v1745_v23 }
 0x2ab   :  { %v3719_v61 = vpop.eup %3718  ;;  %v1512_v7 = vmul.f32 0.6931472, %v3715_v49  ;;  %v2457_v15 = vmul.f32 %v6583_v18, %v2456_v3  ;;  %v1528_v38 = vadd.f32 1.0, %v6677_v41  ;;  %3732 = vlog2.f32 %v2479_v32 }
 0x2ac   :  { %v6691_v10 = vpop.eup %3720  ;;  %v2465_v20 = vadd.f32 1.0, %v2464_v5  ;;  %vm6693_vm14 = vcmp.lt.f32.partialorder %v2467_v13, 0.0004427343  ;;  %v2574_v25 = vmax.f32 %v6515_v56, 0.0  ;;  %v1935_v28 = vmul.f32 1.442695, %v1809_v53 }
 0x2ad   :  { %v6698_v16 = vpop.eup %3722  ;;  %v1509_v62 = vsel %vm6653_vm10, %v1506_v6, %v1503_v54  ;;  %v2460_v18 = vsel %vm6682_vm13, %v2457_v15, %v2454_v45  ;;  %v1525_v59 = vand.u32 2147483647, %v6638_v2  ;;  %v2575_v29 = vmax.f32 %v6545_v40, 0.0 }
 0x2ae   :  { %v2699_v39 = vadd.f32 %v2635_v17, %v6621_v55  ;;  %v1523_v42 = vadd.f32 1.0, %v1522_v31  ;;  %v2463_v63 = vmul.f32 0.6931472, %v3719_v61  ;;  %3734 = vpow2.f32 %v1935_v28 }
 0x2af   :  { %v1518_v8 = vsel %vm6672_vm12, %v1515_v43, %v1512_v7  ;;  %3736 = vlog2.f32 %v1528_v38  ;;  %v1531_v19 = vmul.f32 -0.5, %v6677_v41  ;;  %v1537_v9 = vadd.f32 1.0, %v6691_v10 }
 0x2b0   :  { %v2636_v6 = vadd.f32 %v2572_v11, %v2460_v18  ;;  %v2466_v36 = vmul.f32 %v6615_v46, %v2465_v20  ;;  %v2473_v30 = vmul.f32 -0.5, %v6641_v4  ;;  %v1546_v55 = vadd.f32 1.0, %v6698_v16 }
 0x2b1   :  { %v3725_v3 = vpop.eup %3724  ;;  %v1677_v49 = vadd.f32 %v6499_v22, %v1509_v62  ;;  %vm6717_vm15 = vcmp.lt.f32.partialorder %v1525_v59, 0.0004427343  ;;  %v6723_v43 = vmax.f32 %v721_v12, 0.0  ;;  %v6727_v35 = vmax.f32 %v722_v60, 0.0 }
 0x2b2   :  { %v3727_v11 = vpop.eup %3726  ;;  %v2819_v46 = vsel %vm2707_vm3, %v2699_v39, 0.0  ;;  %v6731_v32 = vadd.f32 %v6579_v52, %v1518_v8  ;;  %v2469_v22 = vsel %vm6693_vm14, %v2466_v36, %v2463_v63  ;;  %v2482_v48 = vmul.f32 -0.5, %v6648_v58 }
 0x2b3   :  { %v6736_v21 = vpop.eup %3728  ;;  %v1524_v34 = vmul.f32 %v6638_v2, %v1523_v42  ;;  %v1532_v12 = vadd.f32 1.0, %v1531_v19  ;;  %v1534_v50 = vand.u32 2147483647, %v6677_v41  ;;  %3738 = vlog2.f32 %v1537_v9 }
 0x2b4   :  { %v6740_v60 = vpop.eup %3730  ;;  %v2700_v5 = vadd.f32 %v2636_v6, %v6651_v51  ;;  %v2474_v13 = vadd.f32 1.0, %v2473_v30  ;;  %3740 = vlog2.f32 %v1546_v55  ;;  %v2488_v52 = vadd.f32 1.0, %v6736_v21 }
 0x2b5   :  { %v3733_v23 = vpop.eup %3732  ;;  %v2820_v54 = vadd.f32 %v2819_v46, %v6659_v24  ;;  %v2637_v45 = vadd.f32 %v2573_v33, %v2469_v22  ;;  %v2476_v2 = vand.u32 2147483647, %v6641_v4  ;;  %v2506_v27 = vadd.f32 1.0, %v6740_v60 }
 0x2b6   :  { %v1521_v17 = vmul.f32 0.6931472, %v3725_v3  ;;  %v2472_v31 = vmul.f32 0.6931472, %v3727_v11  ;;  %v2483_v53 = vadd.f32 1.0, %v2482_v48  ;;  %3742 = vlog2.f32 %v2488_v52 }
 0x2b7   :  { %vm6749_vm0 = vcmp.lt.f32.partialorder %v1534_v50, 0.0004427343  ;;  %v1540_v61 = vmul.f32 -0.5, %v6691_v10  ;;  %v2485_v7 = vand.u32 2147483647, %v6648_v58  ;;  %v2576_v24 = vmax.f32 %v6625_v37, 0.0 }
 0x2b8   :  { %3744 = vlog2.f32 %v2506_v27  ;;  %v6756_v47 = vpop.eup %3734  ;;  %v2821_v33 = vsel %vm2707_vm3, %v2700_v5, 0.0  ;;  %v1533_v15 = vmul.f32 %v6677_v41, %v1532_v12  ;;  %v2475_v38 = vmul.f32 %v6641_v4, %v2474_v13 }
 0x2b9   :  { %v2481_v20 = vmul.f32 0.6931472, %v3733_v23  ;;  %v3737_v0 = vpop.eup %3736  ;;  %v2701_v28 = vadd.f32 %v2637_v45, %v1677_v49  ;;  %vm6761_vm1 = vcmp.lt.f32.partialorder %v2476_v2, 0.0004427343  ;;  %v2491_v18 = vmul.f32 -0.5, %v6736_v21 }
 0x2ba   :  { %v2497_v37 = vadd.f32 1.0, %v6756_v47  ;;  %v1527_v59 = vsel %vm6717_vm15, %v1524_v34, %v1521_v17  ;;  %v2478_v39 = vsel %vm6761_vm1, %v2475_v38, %v2472_v31  ;;  %v2484_v41 = vmul.f32 %v6648_v58, %v2483_v53 }
 0x2bb   :  { %v2509_v4 = vmul.f32 -0.5, %v6740_v60  ;;  %v1541_v42 = vadd.f32 1.0, %v1540_v61  ;;  %v1543_v63 = vand.u32 2147483647, %v6691_v10  ;;  %vm6774_vm2 = vcmp.lt.f32.partialorder %v2485_v7, 0.0004427343 }
 0x2bc   :  { %3746 = vlog2.f32 %v2497_v37  ;;  %v1530_v19 = vmul.f32 0.6931472, %v3737_v0  ;;  %v2487_v9 = vsel %vm6774_vm2, %v2484_v41, %v2481_v20  ;;  %v1549_v6 = vmul.f32 -0.5, %v6698_v16 }
 0x2bd   :  { %v2578_v36 = vmax.f32 %v6627_v57, 0.0  ;;  %v3739_v30 = vpop.eup %3738  ;;  %v2822_v58 = vadd.f32 %v2821_v33, %v2820_v54  ;;  %v2823_v55 = vsel %vm2707_vm3, %v2701_v28, 0.0  ;;  %v2638_v3 = vadd.f32 %v2574_v25, %v2478_v39 }
 0x2be   :  { %v2492_v49 = vadd.f32 1.0, %v2491_v18  ;;  %v3741_v1 = vpop.eup %3740  ;;  %v1679_v11 = vadd.f32 %v6603_v26, %v1527_v59  ;;  %v2494_v46 = vand.u32 2147483647, %v6736_v21  ;;  %v2510_v22 = vadd.f32 1.0, %v2509_v4 }
 0x2bf   :  { %v2500_v48 = vmul.f32 -0.5, %v6756_v47  ;;  %v1542_v34 = vmul.f32 %v6691_v10, %v1541_v42  ;;  %vm6789_vm4 = vcmp.lt.f32.partialorder %v1543_v63, 0.0004427343  ;;  %v2639_v12 = vadd.f32 %v2575_v29, %v2487_v9 }
 0x2c0   :  { %v2512_v56 = vand.u32 2147483647, %v6740_v60  ;;  %v3743_v25 = vpop.eup %3742  ;;  %v1536_v26 = vsel %vm6749_vm0, %v1533_v15, %v1530_v19  ;;  %v1539_v50 = vmul.f32 0.6931472, %v3739_v30  ;;  %v1550_v5 = vadd.f32 1.0, %v1549_v6 }
 0x2c1   :  { %v1552_v13 = vand.u32 2147483647, %v6698_v16  ;;  %v2702_v10 = vadd.f32 %v2638_v3, %v6731_v32  ;;  %v1548_v23 = vmul.f32 0.6931472, %v3741_v1  ;;  %v2490_v54 = vmul.f32 0.6931472, %v3743_v25 }
 0x2c2   :  { %v3745_v52 = vpop.eup %3744  ;;  %v2493_v45 = vmul.f32 %v6736_v21, %v2492_v49  ;;  %vm2495_vm5 = vcmp.lt.f32.partialorder %v2494_v46, 0.0004427343  ;;  %v2511_v29 = vmul.f32 %v6740_v60, %v2510_v22  ;;  %v2501_v2 = vadd.f32 1.0, %v2500_v48 }
 0x2c3   :  { %v2508_v40 = vmul.f32 0.6931472, %v3745_v52  ;;  %v2703_v27 = vadd.f32 %v2639_v12, %v1679_v11  ;;  %vm6802_vm6 = vcmp.lt.f32.partialorder %v2512_v56, 0.0004427343  ;;  %v2503_v53 = vand.u32 2147483647, %v6756_v47 }
 0x2c4   :  { %v2496_v17 = vsel %vm2495_vm5, %v2493_v45, %v2490_v54  ;;  %v1680_v51 = vadd.f32 %v6617_v44, %v1536_v26  ;;  %v1551_v32 = vmul.f32 %v6698_v16, %v1550_v5  ;;  %v2824_v33 = vadd.f32 %v2823_v55, %v2822_v58 }
 0x2c5   :  { %v2640_v61 = vadd.f32 %v2576_v24, %v2496_v17  ;;  %v2514_v21 = vsel %vm6802_vm6, %v2511_v29, %v2508_v40  ;;  %v2825_v60 = vsel %vm2707_vm3, %v2702_v10, 0.0  ;;  %v1545_v15 = vsel %vm6789_vm4, %v1542_v34, %v1539_v50 }
 0x2c6   :  { %v3747_v7 = vpop.eup %3746  ;;  %vm1553_vm7 = vcmp.lt.f32.partialorder %v1552_v13, 0.0004427343  ;;  %v2502_v28 = vmul.f32 %v6756_v47, %v2501_v2  ;;  %v2827_v44 = vsel %vm2707_vm3, %v2703_v27, 0.0  ;;  %v2642_v16 = vadd.f32 %v2578_v36, %v2514_v21 }
 0x2c7   :  { %v1554_v38 = vsel %vm1553_vm7, %v1551_v32, %v1548_v23  ;;  %v2704_v20 = vadd.f32 %v2640_v61, %v1680_v51  ;;  %v2499_v0 = vmul.f32 0.6931472, %v3747_v7  ;;  %vm2504_vm8 = vcmp.lt.f32.partialorder %v2503_v53, 0.0004427343 }
 0x2c8   :  { %v2577_v24 = vmax.f32 %v6667_v14, 0.0  ;;  %v2826_v62 = vadd.f32 %v2825_v60, %v2824_v33  ;;  %v1681_v37 = vadd.f32 %v6723_v43, %v1545_v15  ;;  %v1682_v59 = vadd.f32 %v6727_v35, %v1554_v38 }
 0x2c9   :  { %v2505_v18 = vsel %vm2504_vm8, %v2502_v28, %v2499_v0  ;;  %v2829_v39 = vsel %vm2707_vm3, %v2704_v20, 0.0 }
 0x2ca   :  { %v2641_v41 = vadd.f32 %v2577_v24, %v2505_v18  ;;  %v2828_v4 = vadd.f32 %v2827_v44, %v2826_v62  ;;  %v2706_v42 = vadd.f32 %v2642_v16, %v1682_v59 }
 0x2cc   :  { %v2705_v63 = vadd.f32 %v2641_v41, %v1681_v37  ;;  %v2830_v8 = vadd.f32 %v2829_v39, %v2828_v4  ;;  %v2833_v9 = vsel %vm2707_vm3, %v2706_v42, 0.0 }
 0x2ce   :  { %v2831_v47 = vsel %vm2707_vm3, %v2705_v63, 0.0 }
 0x2cf   :  { %v2832_v19 = vadd.f32 %v2831_v47, %v2830_v8 }
 0x2d1   :  { %v2834_v6 = vadd.f32 %v2833_v9, %v2832_v19 }
 0x2d3   :  { %2835 = vadd.xlane.f32.xlu0 %v2834_v6 }
 0x360   :  { %v2836_v14 = vpop.xlane.xlu0 %2835 }
 0x361   :  { %v2837_v36 = vrot.slane %v2836_v14, 4 }
 0x363   :  { %v2838_v30 = vadd.f32 %v2837_v36, %v2836_v14 }
 0x365   :  { %v2839_v43 = vrot.slane %v2838_v30, 2 }
 0x367   :  { %v2840_v58 = vadd.f32 %v2839_v43, %v2838_v30 }
 0x369   :  { %v2841_v35 = vrot.slane %v2840_v58, 1 }
 0x36b   :  { %v2842_v55 = vadd.f32 %v2841_v35, %v2840_v58 }
 0x36d   :  { %3234 = vpush %v2842_v55 }
 0x39e   :  { %s3235_s0 = spop %3234 }
 0x39f   :  { %v2844_v3 = vstv %s3235_s0 }
 0x3a0   :  { %2845 = vst [vmem:[%s6827_s2] sm:$0xff] %v2844_v3 }

// kernel: embedding_method_forward.3
= control target key start
LH: loop header
LB: loop body
LE: loop exit
PB: predicated region body
PF: predicated region fallthrough
CT: control target
= control target key end

     0   :  { %v2008_v0 = vmov 0   ;;  %s2392_s1 = inlined_call_operand.vmem [shape: bf16[256,128], index: 1, kind: input, shape index: {}]   ;;  %s2393_s0 = inlined_call_operand.vmem [shape: bf16[512,256], index: 0, kind: input, shape index: {}]   ;;  %s2394_s2 = inlined_call_operand.vmem [shape: bf16[512,128], index: 2, kind: output, shape index: {}]  }
   0x1   :  { %656 = vmatprep.subr.bf16.mxu0 %v2008_v0  ;;  %1863 = vmatprep.subr.bf16.mxu1 %v2008_v0  ;;  %v1896_v1 = vld [vmem:[%s2392_s1] sm:$0xff]   ;;  %v1897_v2 = vld [vmem:[%s2392_s1 + $0x8] sm:$0xff]   ;;  %v1898_v3 = vld [vmem:[%s2392_s1 + $0x10] sm:$0xff]  }
   0x2   :  { %657 = vmatpush1.bf16.msra.mxu0 %v1896_v1  ;;  %1879 = vmatpush1.bf16.msra.mxu1 %v1896_v1  ;;  %v1899_v4 = vld [vmem:[%s2392_s1 + $0x18] sm:$0xff]   ;;  %v1900_v5 = vld [vmem:[%s2392_s1 + $0x20] sm:$0xff]   ;;  %v1901_v7 = vld [vmem:[%s2392_s1 + $0x28] sm:$0xff]  }
   0x3   :  { %658 = vmatprep.subr.bf16.mxu0 %v2008_v0  ;;  %1864 = vmatprep.subr.bf16.mxu1 %v2008_v0  ;;  %v1914_v6 = vld [vmem:[%s2393_s0 + $0x4] ss:$8 sps:$4 sm:$0xff]   ;;  %v1902_v9 = vld [vmem:[%s2392_s1 + $0x30] sm:$0xff]   ;;  %v1903_v10 = vld [vmem:[%s2392_s1 + $0x38] sm:$0xff]  }
   0x4   :  { %v1917_v8 = vld [vmem:[%s2393_s0 + $0x104] ss:$8 sps:$4 sm:$0xff]   ;;  %688 = vmatprep.mubr.bf16.mxu0 %v1914_v6  ;;  %v1906_v13 = vld [vmem:[%s2392_s1 + $0x50] sm:$0xff]   ;;  %v1907_v14 = vld [vmem:[%s2392_s1 + $0x58] sm:$0xff]  }
   0x5   :  { %816 = vmatprep.mubr.bf16.mxu1 %v1917_v8  ;;  %v1904_v11 = vld [vmem:[%s2392_s1 + $0x40] sm:$0xff]   ;;  %v1905_v12 = vld [vmem:[%s2392_s1 + $0x48] sm:$0xff]   ;;  %v1910_v17 = vld [vmem:[%s2392_s1 + $0x70] sm:$0xff]  }
   0x6   :  { %659 = vmatpush1.bf16.msra.mxu0 %v1897_v2  ;;  %1880 = vmatpush1.bf16.msra.mxu1 %v1897_v2  ;;  %v1908_v15 = vld [vmem:[%s2392_s1 + $0x60] sm:$0xff]   ;;  %v1909_v16 = vld [vmem:[%s2392_s1 + $0x68] sm:$0xff]   ;;  %v1911_v18 = vld [vmem:[%s2392_s1 + $0x78] sm:$0xff]  }
   0x7   :  { %660 = vmatprep.subr.bf16.mxu0 %v2008_v0  ;;  %1865 = vmatprep.subr.bf16.mxu1 %v2008_v0  ;;  %v1912_v19 = vld [vmem:[%s2393_s0] ss:$8 sps:$4 sm:$0xff]   ;;  %v1918_v21 = vld [vmem:[%s2393_s0 + $0x14] ss:$8 sps:$4 sm:$0xff]   ;;  %v1922_v23 = vld [vmem:[%s2393_s0 + $0x10] ss:$8 sps:$4 sm:$0xff]  }
   0x8   :  { %v1915_v20 = vld [vmem:[%s2393_s0 + $0x100] ss:$8 sps:$4 sm:$0xff]   ;;  %v1920_v22 = vld [vmem:[%s2393_s0 + $0x114] ss:$8 sps:$4 sm:$0xff]   ;;  %v1923_v24 = vld [vmem:[%s2393_s0 + $0x110] ss:$8 sps:$4 sm:$0xff]  }
   0x9   :  { %v1924_v25 = vld [vmem:[%s2393_s0 + $0x24] ss:$8 sps:$4 sm:$0xff]   ;;  %v1928_v27 = vld [vmem:[%s2393_s0 + $0x20] ss:$8 sps:$4 sm:$0xff]   ;;  %v1930_v29 = vld [vmem:[%s2393_s0 + $0x34] ss:$8 sps:$4 sm:$0xff]  }
   0xa   :  { %661 = vmatpush1.bf16.msra.mxu0 %v1898_v3  ;;  %1881 = vmatpush1.bf16.msra.mxu1 %v1898_v3  ;;  %v1926_v26 = vld [vmem:[%s2393_s0 + $0x124] ss:$8 sps:$4 sm:$0xff]   ;;  %v1929_v28 = vld [vmem:[%s2393_s0 + $0x120] ss:$8 sps:$4 sm:$0xff]   ;;  %v1932_v30 = vld [vmem:[%s2393_s0 + $0x134] ss:$8 sps:$4 sm:$0xff]  }
   0xb   :  { %662 = vmatprep.subr.bf16.mxu0 %v2008_v0  ;;  %1866 = vmatprep.subr.bf16.mxu1 %v2008_v0  ;;  %v1934_v31 = vld [vmem:[%s2393_s0 + $0x30] ss:$8 sps:$4 sm:$0xff]   ;;  %v1936_v33 = vld [vmem:[%s2393_s0 + $0x44] ss:$8 sps:$4 sm:$0xff]   ;;  %v1940_v35 = vld [vmem:[%s2393_s0 + $0x40] ss:$8 sps:$4 sm:$0xff]  }
   0xc   :  { %v1935_v32 = vld [vmem:[%s2393_s0 + $0x130] ss:$8 sps:$4 sm:$0xff]   ;;  %v1938_v34 = vld [vmem:[%s2393_s0 + $0x144] ss:$8 sps:$4 sm:$0xff]   ;;  %v1941_v36 = vld [vmem:[%s2393_s0 + $0x140] ss:$8 sps:$4 sm:$0xff]  }
   0xd   :  { %v1942_v37 = vld [vmem:[%s2393_s0 + $0x54] ss:$8 sps:$4 sm:$0xff]   ;;  %v1946_v39 = vld [vmem:[%s2393_s0 + $0x50] ss:$8 sps:$4 sm:$0xff]   ;;  %v1948_v41 = vld [vmem:[%s2393_s0 + $0x64] ss:$8 sps:$4 sm:$0xff]  }
   0xe   :  { %663 = vmatpush1.bf16.msra.mxu0 %v1899_v4  ;;  %1882 = vmatpush1.bf16.msra.mxu1 %v1899_v4  ;;  %v1944_v38 = vld [vmem:[%s2393_s0 + $0x154] ss:$8 sps:$4 sm:$0xff]   ;;  %v1947_v40 = vld [vmem:[%s2393_s0 + $0x150] ss:$8 sps:$4 sm:$0xff]   ;;  %v1950_v42 = vld [vmem:[%s2393_s0 + $0x164] ss:$8 sps:$4 sm:$0xff]  }
   0xf   :  { %664 = vmatprep.subr.bf16.mxu0 %v2008_v0  ;;  %1867 = vmatprep.subr.bf16.mxu1 %v2008_v0  ;;  %v1952_v43 = vld [vmem:[%s2393_s0 + $0x60] ss:$8 sps:$4 sm:$0xff]   ;;  %v1954_v45 = vld [vmem:[%s2393_s0 + $0x74] ss:$8 sps:$4 sm:$0xff]   ;;  %v1958_v47 = vld [vmem:[%s2393_s0 + $0x70] ss:$8 sps:$4 sm:$0xff]  }
  0x10   :  { %v1953_v44 = vld [vmem:[%s2393_s0 + $0x160] ss:$8 sps:$4 sm:$0xff]   ;;  %v1956_v46 = vld [vmem:[%s2393_s0 + $0x174] ss:$8 sps:$4 sm:$0xff]   ;;  %v1959_v48 = vld [vmem:[%s2393_s0 + $0x170] ss:$8 sps:$4 sm:$0xff]  }
  0x11   :  { %v1960_v49 = vld [vmem:[%s2393_s0 + $0x84] ss:$8 sps:$4 sm:$0xff]   ;;  %v1964_v51 = vld [vmem:[%s2393_s0 + $0x80] ss:$8 sps:$4 sm:$0xff]   ;;  %v1966_v53 = vld [vmem:[%s2393_s0 + $0x94] ss:$8 sps:$4 sm:$0xff]  }
  0x12   :  { %665 = vmatpush1.bf16.msra.mxu0 %v1900_v5  ;;  %1883 = vmatpush1.bf16.msra.mxu1 %v1900_v5  ;;  %v1962_v50 = vld [vmem:[%s2393_s0 + $0x184] ss:$8 sps:$4 sm:$0xff]   ;;  %v1965_v52 = vld [vmem:[%s2393_s0 + $0x180] ss:$8 sps:$4 sm:$0xff]   ;;  %v1968_v54 = vld [vmem:[%s2393_s0 + $0x194] ss:$8 sps:$4 sm:$0xff]  }
  0x13   :  { %666 = vmatprep.subr.bf16.mxu0 %v2008_v0  ;;  %1868 = vmatprep.subr.bf16.mxu1 %v2008_v0  ;;  %v1970_v55 = vld [vmem:[%s2393_s0 + $0x90] ss:$8 sps:$4 sm:$0xff]   ;;  %v1972_v57 = vld [vmem:[%s2393_s0 + $0xa4] ss:$8 sps:$4 sm:$0xff]   ;;  %v1976_v59 = vld [vmem:[%s2393_s0 + $0xa0] ss:$8 sps:$4 sm:$0xff]  }
  0x14   :  { %v1971_v56 = vld [vmem:[%s2393_s0 + $0x190] ss:$8 sps:$4 sm:$0xff]   ;;  %v1974_v58 = vld [vmem:[%s2393_s0 + $0x1a4] ss:$8 sps:$4 sm:$0xff]   ;;  %v1977_v60 = vld [vmem:[%s2393_s0 + $0x1a0] ss:$8 sps:$4 sm:$0xff]  }
  0x15   :  { %v1978_v61 = vld [vmem:[%s2393_s0 + $0xb4] ss:$8 sps:$4 sm:$0xff]   ;;  %v1982_v63 = vld [vmem:[%s2393_s0 + $0xb0] ss:$8 sps:$4 sm:$0xff]   ;;  %v1984_v1 = vld [vmem:[%s2393_s0 + $0xc4] ss:$8 sps:$4 sm:$0xff]  }
  0x16   :  { %667 = vmatpush1.bf16.msra.mxu0 %v1901_v7  ;;  %1884 = vmatpush1.bf16.msra.mxu1 %v1901_v7  ;;  %v1980_v62 = vld [vmem:[%s2393_s0 + $0x1b4] ss:$8 sps:$4 sm:$0xff]   ;;  %v1986_v2 = vld [vmem:[%s2393_s0 + $0x1c4] ss:$8 sps:$4 sm:$0xff]   ;;  %v1988_v3 = vld [vmem:[%s2393_s0 + $0xc0] ss:$8 sps:$4 sm:$0xff]  }
  0x17   :  { %668 = vmatprep.subr.bf16.mxu0 %v2008_v0  ;;  %1869 = vmatprep.subr.bf16.mxu1 %v2008_v0  ;;  %v1989_v4 = vld [vmem:[%s2393_s0 + $0x1c0] ss:$8 sps:$4 sm:$0xff]   ;;  %v1990_v5 = vld [vmem:[%s2393_s0 + $0xd4] ss:$8 sps:$4 sm:$0xff]   ;;  %v1994_v7 = vld [vmem:[%s2393_s0 + $0xd0] ss:$8 sps:$4 sm:$0xff]  }
  0x18   :  { %v1992_v6 = vld [vmem:[%s2393_s0 + $0x1d4] ss:$8 sps:$4 sm:$0xff]   ;;  %v1995_v8 = vld [vmem:[%s2393_s0 + $0x1d0] ss:$8 sps:$4 sm:$0xff]  }
  0x1a   :  { %669 = vmatpush1.bf16.msra.mxu0 %v1902_v9  ;;  %1885 = vmatpush1.bf16.msra.mxu1 %v1902_v9  ;;  %v1996_v9 = vld [vmem:[%s2393_s0 + $0xe4] ss:$8 sps:$4 sm:$0xff]  }
  0x1b   :  { %670 = vmatprep.subr.bf16.mxu0 %v2008_v0  ;;  %1870 = vmatprep.subr.bf16.mxu1 %v2008_v0 }
  0x1e   :  { %671 = vmatpush1.bf16.msra.mxu0 %v1903_v10  ;;  %1886 = vmatpush1.bf16.msra.mxu1 %v1903_v10  ;;  %v1998_v10 = vld [vmem:[%s2393_s0 + $0x1e4] ss:$8 sps:$4 sm:$0xff]  }
  0x1f   :  { %672 = vmatprep.subr.bf16.mxu0 %v2008_v0  ;;  %1871 = vmatprep.subr.bf16.mxu1 %v2008_v0 }
  0x22   :  { %673 = vmatpush1.bf16.msra.mxu0 %v1904_v11  ;;  %1887 = vmatpush1.bf16.msra.mxu1 %v1904_v11  ;;  %v2000_v11 = vld [vmem:[%s2393_s0 + $0xe0] ss:$8 sps:$4 sm:$0xff]  }
  0x23   :  { %674 = vmatprep.subr.bf16.mxu0 %v2008_v0  ;;  %1872 = vmatprep.subr.bf16.mxu1 %v2008_v0 }
  0x26   :  { %675 = vmatpush1.bf16.msra.mxu0 %v1905_v12  ;;  %1888 = vmatpush1.bf16.msra.mxu1 %v1905_v12  ;;  %v2001_v12 = vld [vmem:[%s2393_s0 + $0x1e0] ss:$8 sps:$4 sm:$0xff]  }
  0x27   :  { %676 = vmatprep.subr.bf16.mxu0 %v2008_v0  ;;  %1873 = vmatprep.subr.bf16.mxu1 %v2008_v0 }
  0x2a   :  { %677 = vmatpush1.bf16.msra.mxu0 %v1906_v13  ;;  %1889 = vmatpush1.bf16.msra.mxu1 %v1906_v13  ;;  %v2002_v13 = vld [vmem:[%s2393_s0 + $0xf4] ss:$8 sps:$4 sm:$0xff]  }
  0x2b   :  { %678 = vmatprep.subr.bf16.mxu0 %v2008_v0  ;;  %1874 = vmatprep.subr.bf16.mxu1 %v2008_v0 }
  0x2e   :  { %679 = vmatpush1.bf16.msra.mxu0 %v1907_v14  ;;  %1890 = vmatpush1.bf16.msra.mxu1 %v1907_v14  ;;  %v2004_v14 = vld [vmem:[%s2393_s0 + $0x1f4] ss:$8 sps:$4 sm:$0xff]  }
  0x2f   :  { %680 = vmatprep.subr.bf16.mxu0 %v2008_v0  ;;  %1875 = vmatprep.subr.bf16.mxu1 %v2008_v0 }
  0x32   :  { %681 = vmatpush1.bf16.msra.mxu0 %v1908_v15  ;;  %1891 = vmatpush1.bf16.msra.mxu1 %v1908_v15  ;;  %v2006_v15 = vld [vmem:[%s2393_s0 + $0xf0] ss:$8 sps:$4 sm:$0xff]  }
  0x33   :  { %682 = vmatprep.subr.bf16.mxu0 %v2008_v0  ;;  %1876 = vmatprep.subr.bf16.mxu1 %v2008_v0 }
  0x36   :  { %683 = vmatpush1.bf16.msra.mxu0 %v1909_v16  ;;  %1892 = vmatpush1.bf16.msra.mxu1 %v1909_v16  ;;  %v2007_v16 = vld [vmem:[%s2393_s0 + $0x1f0] ss:$8 sps:$4 sm:$0xff]  }
  0x37   :  { %684 = vmatprep.subr.bf16.mxu0 %v2008_v0  ;;  %1877 = vmatprep.subr.bf16.mxu1 %v2008_v0 }
  0x3a   :  { %685 = vmatpush1.bf16.msra.mxu0 %v1910_v17  ;;  %1893 = vmatpush1.bf16.msra.mxu1 %v1910_v17 }
  0x3b   :  { %686 = vmatprep.subr.bf16.mxu0 %v2008_v0  ;;  %1878 = vmatprep.subr.bf16.mxu1 %v2008_v0  ;;  %v1983_v0 = vld [vmem:[%s2393_s0 + $0x1b0] ss:$8 sps:$4 sm:$0xff]  }
  0x3e   :  { %687 = vmatpush1.bf16.msra.mxu0 %v1911_v18  ;;  %1894 = vmatpush1.bf16.msra.mxu1 %v1911_v18 }
  0x41   :  { %689 = vmatmul.mubr.bf16.vlgmr.msra.gmra.mrb[0].mxu0 %v1912_v19  ;;  %817 = vmatmul.mubr.bf16.vlgmr.msra.gmra.mrb[0].mxu1 %v1915_v20 }
  0x42   :  { %696 = vmatprep.mubr.bf16.mxu0 %v1918_v21  ;;  %824 = vmatprep.mubr.bf16.mxu1 %v1920_v22 }
  0x49   :  { %697 = vmatmul.mubr.bf16.gmra.mrb[4].mxu0 %v1922_v23  ;;  %825 = vmatmul.mubr.bf16.gmra.mrb[4].mxu1 %v1923_v24 }
  0x4a   :  { %704 = vmatprep.mubr.bf16.mxu0 %v1924_v25  ;;  %832 = vmatprep.mubr.bf16.mxu1 %v1926_v26 }
  0x51   :  { %705 = vmatmul.mubr.bf16.gmra.mrb[8].mxu0 %v1928_v27  ;;  %833 = vmatmul.mubr.bf16.gmra.mrb[8].mxu1 %v1929_v28 }
  0x52   :  { %712 = vmatprep.mubr.bf16.mxu0 %v1930_v29  ;;  %840 = vmatprep.mubr.bf16.mxu1 %v1932_v30 }
  0x59   :  { %713 = vmatmul.mubr.bf16.gmra.mrb[12].mxu0 %v1934_v31  ;;  %841 = vmatmul.mubr.bf16.gmra.mrb[12].mxu1 %v1935_v32 }
  0x5a   :  { %720 = vmatprep.mubr.bf16.mxu0 %v1936_v33  ;;  %848 = vmatprep.mubr.bf16.mxu1 %v1938_v34 }
  0x61   :  { %721 = vmatmul.mubr.bf16.gmra.mrb[16].mxu0 %v1940_v35  ;;  %849 = vmatmul.mubr.bf16.gmra.mrb[16].mxu1 %v1941_v36 }
  0x62   :  { %728 = vmatprep.mubr.bf16.mxu0 %v1942_v37  ;;  %856 = vmatprep.mubr.bf16.mxu1 %v1944_v38 }
  0x69   :  { %729 = vmatmul.mubr.bf16.gmra.mrb[20].mxu0 %v1946_v39  ;;  %857 = vmatmul.mubr.bf16.gmra.mrb[20].mxu1 %v1947_v40 }
  0x6a   :  { %736 = vmatprep.mubr.bf16.mxu0 %v1948_v41  ;;  %864 = vmatprep.mubr.bf16.mxu1 %v1950_v42 }
  0x71   :  { %737 = vmatmul.mubr.bf16.gmra.mrb[24].mxu0 %v1952_v43  ;;  %865 = vmatmul.mubr.bf16.gmra.mrb[24].mxu1 %v1953_v44 }
  0x72   :  { %744 = vmatprep.mubr.bf16.mxu0 %v1954_v45  ;;  %872 = vmatprep.mubr.bf16.mxu1 %v1956_v46 }
  0x79   :  { %745 = vmatmul.mubr.bf16.gmra.mrb[28].mxu0 %v1958_v47  ;;  %873 = vmatmul.mubr.bf16.gmra.mrb[28].mxu1 %v1959_v48 }
  0x7a   :  { %752 = vmatprep.mubr.bf16.mxu0 %v1960_v49  ;;  %880 = vmatprep.mubr.bf16.mxu1 %v1962_v50 }
  0x81   :  { %753 = vmatmul.mubr.bf16.gmra.mrb[32].mxu0 %v1964_v51  ;;  %881 = vmatmul.mubr.bf16.gmra.mrb[32].mxu1 %v1965_v52 }
  0x82   :  { %760 = vmatprep.mubr.bf16.mxu0 %v1966_v53  ;;  %888 = vmatprep.mubr.bf16.mxu1 %v1968_v54 }
  0x89   :  { %761 = vmatmul.mubr.bf16.gmra.mrb[36].mxu0 %v1970_v55  ;;  %889 = vmatmul.mubr.bf16.gmra.mrb[36].mxu1 %v1971_v56 }
  0x8a   :  { %768 = vmatprep.mubr.bf16.mxu0 %v1972_v57  ;;  %896 = vmatprep.mubr.bf16.mxu1 %v1974_v58 }
  0x91   :  { %769 = vmatmul.mubr.bf16.gmra.mrb[40].mxu0 %v1976_v59  ;;  %897 = vmatmul.mubr.bf16.gmra.mrb[40].mxu1 %v1977_v60 }
  0x92   :  { %776 = vmatprep.mubr.bf16.mxu0 %v1978_v61  ;;  %904 = vmatprep.mubr.bf16.mxu1 %v1980_v62 }
  0x99   :  { %777 = vmatmul.mubr.bf16.gmra.mrb[44].mxu0 %v1982_v63  ;;  %905 = vmatmul.mubr.bf16.gmra.mrb[44].mxu1 %v1983_v0 }
  0x9a   :  { %784 = vmatprep.mubr.bf16.mxu0 %v1984_v1  ;;  %912 = vmatprep.mubr.bf16.mxu1 %v1986_v2 }
  0xa1   :  { %785 = vmatmul.mubr.bf16.gmra.mrb[48].mxu0 %v1988_v3  ;;  %913 = vmatmul.mubr.bf16.gmra.mrb[48].mxu1 %v1989_v4 }
  0xa2   :  { %792 = vmatprep.mubr.bf16.mxu0 %v1990_v5  ;;  %920 = vmatprep.mubr.bf16.mxu1 %v1992_v6 }
  0xa9   :  { %793 = vmatmul.mubr.bf16.gmra.mrb[52].mxu0 %v1994_v7  ;;  %921 = vmatmul.mubr.bf16.gmra.mrb[52].mxu1 %v1995_v8 }
  0xaa   :  { %800 = vmatprep.mubr.bf16.mxu0 %v1996_v9  ;;  %928 = vmatprep.mubr.bf16.mxu1 %v1998_v10 }
  0xb1   :  { %801 = vmatmul.mubr.bf16.gmra.mrb[56].mxu0 %v2000_v11  ;;  %929 = vmatmul.mubr.bf16.gmra.mrb[56].mxu1 %v2001_v12 }
  0xb2   :  { %808 = vmatprep.mubr.bf16.mxu0 %v2002_v13  ;;  %936 = vmatprep.mubr.bf16.mxu1 %v2004_v14 }
  0xb9   :  { %809 = vmatmul.mubr.bf16.gmra.mrb[60].mxu0 %v2006_v15  ;;  %937 = vmatmul.mubr.bf16.gmra.mrb[60].mxu1 %v2007_v16 }
 0x114   :  { %v690_v17 = vpop.f32.mrb[0].mxu0  ;;  %v818_v18 = vpop.f32.mrb[0].mxu1 }
 0x115   :  { %v692_v19 = vpop.f32.mrb[1].mxu0  ;;  %v820_v20 = vpop.f32.mrb[1].mxu1 }
 0x116   :  { %v693_v21 = vpop.f32.mrb[2].mxu0  ;;  %v821_v22 = vpop.f32.mrb[2].mxu1 }
 0x117   :  { %v1675_v23 = vpack.c.bf16 %v693_v21, %v690_v17  ;;  %v1755_v24 = vpack.c.bf16 %v821_v22, %v818_v18  ;;  %v695_v25 = vpop.f32.mrb[3].mxu0  ;;  %v823_v26 = vpop.f32.mrb[3].mxu1 }
 0x119   :  { %1676 = vst [vmem:[%s2394_s2] sm:$0xff] %v1675_v23   ;;  %1847 = vst [vmem:[%s2394_s2 + $0x80] sm:$0xff] %v1755_v24  }
 0x11c   :  { %v698_v27 = vpop.f32.mrb[4].mxu0  ;;  %v826_v28 = vpop.f32.mrb[4].mxu1 }
 0x11d   :  { %v700_v29 = vpop.f32.mrb[5].mxu0  ;;  %v828_v30 = vpop.f32.mrb[5].mxu1 }
 0x11e   :  { %v701_v31 = vpop.f32.mrb[6].mxu0  ;;  %v829_v32 = vpop.f32.mrb[6].mxu1 }
 0x11f   :  { %v1680_v33 = vpack.c.bf16 %v701_v31, %v698_v27  ;;  %v1760_v34 = vpack.c.bf16 %v829_v32, %v826_v28  ;;  %v703_v35 = vpop.f32.mrb[7].mxu0  ;;  %v831_v36 = vpop.f32.mrb[7].mxu1 }
 0x121   :  { %1832 = vst [vmem:[%s2394_s2 + $0x8] sm:$0xff] %v1680_v33   ;;  %1848 = vst [vmem:[%s2394_s2 + $0x88] sm:$0xff] %v1760_v34  }
 0x124   :  { %v706_v37 = vpop.f32.mrb[8].mxu0  ;;  %v834_v38 = vpop.f32.mrb[8].mxu1 }
 0x125   :  { %v708_v39 = vpop.f32.mrb[9].mxu0  ;;  %v836_v40 = vpop.f32.mrb[9].mxu1 }
 0x126   :  { %v709_v41 = vpop.f32.mrb[10].mxu0  ;;  %v837_v42 = vpop.f32.mrb[10].mxu1 }
 0x127   :  { %v1685_v43 = vpack.c.bf16 %v709_v41, %v706_v37  ;;  %v1765_v44 = vpack.c.bf16 %v837_v42, %v834_v38  ;;  %v711_v45 = vpop.f32.mrb[11].mxu0  ;;  %v839_v46 = vpop.f32.mrb[11].mxu1 }
 0x129   :  { %1833 = vst [vmem:[%s2394_s2 + $0x10] sm:$0xff] %v1685_v43   ;;  %1849 = vst [vmem:[%s2394_s2 + $0x90] sm:$0xff] %v1765_v44  }
 0x12c   :  { %v714_v47 = vpop.f32.mrb[12].mxu0  ;;  %v842_v48 = vpop.f32.mrb[12].mxu1 }
 0x12d   :  { %v716_v49 = vpop.f32.mrb[13].mxu0  ;;  %v844_v50 = vpop.f32.mrb[13].mxu1 }
 0x12e   :  { %v717_v51 = vpop.f32.mrb[14].mxu0  ;;  %v845_v52 = vpop.f32.mrb[14].mxu1 }
 0x12f   :  { %v1690_v53 = vpack.c.bf16 %v717_v51, %v714_v47  ;;  %v1770_v54 = vpack.c.bf16 %v845_v52, %v842_v48  ;;  %v719_v55 = vpop.f32.mrb[15].mxu0  ;;  %v847_v56 = vpop.f32.mrb[15].mxu1 }
 0x131   :  { %1834 = vst [vmem:[%s2394_s2 + $0x18] sm:$0xff] %v1690_v53   ;;  %1850 = vst [vmem:[%s2394_s2 + $0x98] sm:$0xff] %v1770_v54  }
 0x134   :  { %v722_v57 = vpop.f32.mrb[16].mxu0  ;;  %v850_v58 = vpop.f32.mrb[16].mxu1 }
 0x135   :  { %v724_v59 = vpop.f32.mrb[17].mxu0  ;;  %v852_v60 = vpop.f32.mrb[17].mxu1 }
 0x136   :  { %v725_v61 = vpop.f32.mrb[18].mxu0  ;;  %v853_v62 = vpop.f32.mrb[18].mxu1 }
 0x137   :  { %v1695_v63 = vpack.c.bf16 %v725_v61, %v722_v57  ;;  %v1775_v0 = vpack.c.bf16 %v853_v62, %v850_v58  ;;  %v727_v1 = vpop.f32.mrb[19].mxu0  ;;  %v855_v2 = vpop.f32.mrb[19].mxu1 }
 0x139   :  { %1835 = vst [vmem:[%s2394_s2 + $0x20] sm:$0xff] %v1695_v63   ;;  %1851 = vst [vmem:[%s2394_s2 + $0xa0] sm:$0xff] %v1775_v0  }
 0x13c   :  { %v730_v3 = vpop.f32.mrb[20].mxu0  ;;  %v858_v4 = vpop.f32.mrb[20].mxu1 }
 0x13d   :  { %v732_v5 = vpop.f32.mrb[21].mxu0  ;;  %v860_v6 = vpop.f32.mrb[21].mxu1 }
 0x13e   :  { %v733_v7 = vpop.f32.mrb[22].mxu0  ;;  %v861_v8 = vpop.f32.mrb[22].mxu1 }
 0x13f   :  { %v1700_v9 = vpack.c.bf16 %v733_v7, %v730_v3  ;;  %v1780_v10 = vpack.c.bf16 %v861_v8, %v858_v4  ;;  %v735_v11 = vpop.f32.mrb[23].mxu0  ;;  %v863_v12 = vpop.f32.mrb[23].mxu1 }
 0x141   :  { %1836 = vst [vmem:[%s2394_s2 + $0x28] sm:$0xff] %v1700_v9   ;;  %1852 = vst [vmem:[%s2394_s2 + $0xa8] sm:$0xff] %v1780_v10  }
 0x144   :  { %v738_v13 = vpop.f32.mrb[24].mxu0  ;;  %v866_v14 = vpop.f32.mrb[24].mxu1 }
 0x145   :  { %v740_v15 = vpop.f32.mrb[25].mxu0  ;;  %v868_v16 = vpop.f32.mrb[25].mxu1 }
 0x146   :  { %v741_v17 = vpop.f32.mrb[26].mxu0  ;;  %v869_v18 = vpop.f32.mrb[26].mxu1 }
 0x147   :  { %v1705_v19 = vpack.c.bf16 %v741_v17, %v738_v13  ;;  %v1785_v20 = vpack.c.bf16 %v869_v18, %v866_v14  ;;  %v743_v21 = vpop.f32.mrb[27].mxu0  ;;  %v871_v22 = vpop.f32.mrb[27].mxu1 }
 0x149   :  { %1837 = vst [vmem:[%s2394_s2 + $0x30] sm:$0xff] %v1705_v19   ;;  %1853 = vst [vmem:[%s2394_s2 + $0xb0] sm:$0xff] %v1785_v20  }
 0x14c   :  { %v746_v23 = vpop.f32.mrb[28].mxu0  ;;  %v874_v24 = vpop.f32.mrb[28].mxu1 }
 0x14d   :  { %v748_v25 = vpop.f32.mrb[29].mxu0  ;;  %v876_v26 = vpop.f32.mrb[29].mxu1 }
 0x14e   :  { %v749_v27 = vpop.f32.mrb[30].mxu0  ;;  %v877_v28 = vpop.f32.mrb[30].mxu1 }
 0x14f   :  { %v1710_v29 = vpack.c.bf16 %v749_v27, %v746_v23  ;;  %v1790_v30 = vpack.c.bf16 %v877_v28, %v874_v24  ;;  %v751_v31 = vpop.f32.mrb[31].mxu0  ;;  %v879_v32 = vpop.f32.mrb[31].mxu1 }
 0x151   :  { %1838 = vst [vmem:[%s2394_s2 + $0x38] sm:$0xff] %v1710_v29   ;;  %1854 = vst [vmem:[%s2394_s2 + $0xb8] sm:$0xff] %v1790_v30  }
 0x154   :  { %v754_v33 = vpop.f32.mrb[32].mxu0  ;;  %v882_v34 = vpop.f32.mrb[32].mxu1 }
 0x155   :  { %v756_v35 = vpop.f32.mrb[33].mxu0  ;;  %v884_v36 = vpop.f32.mrb[33].mxu1 }
 0x156   :  { %v757_v37 = vpop.f32.mrb[34].mxu0  ;;  %v885_v38 = vpop.f32.mrb[34].mxu1 }
 0x157   :  { %v1715_v39 = vpack.c.bf16 %v757_v37, %v754_v33  ;;  %v1795_v40 = vpack.c.bf16 %v885_v38, %v882_v34  ;;  %v759_v41 = vpop.f32.mrb[35].mxu0  ;;  %v887_v42 = vpop.f32.mrb[35].mxu1 }
 0x159   :  { %1839 = vst [vmem:[%s2394_s2 + $0x40] sm:$0xff] %v1715_v39   ;;  %1855 = vst [vmem:[%s2394_s2 + $0xc0] sm:$0xff] %v1795_v40  }
 0x15c   :  { %v762_v43 = vpop.f32.mrb[36].mxu0  ;;  %v890_v44 = vpop.f32.mrb[36].mxu1 }
 0x15d   :  { %v764_v45 = vpop.f32.mrb[37].mxu0  ;;  %v892_v46 = vpop.f32.mrb[37].mxu1 }
 0x15e   :  { %v765_v47 = vpop.f32.mrb[38].mxu0  ;;  %v893_v48 = vpop.f32.mrb[38].mxu1 }
 0x15f   :  { %v1720_v49 = vpack.c.bf16 %v765_v47, %v762_v43  ;;  %v1800_v50 = vpack.c.bf16 %v893_v48, %v890_v44  ;;  %v767_v51 = vpop.f32.mrb[39].mxu0  ;;  %v895_v52 = vpop.f32.mrb[39].mxu1 }
 0x161   :  { %1840 = vst [vmem:[%s2394_s2 + $0x48] sm:$0xff] %v1720_v49   ;;  %1856 = vst [vmem:[%s2394_s2 + $0xc8] sm:$0xff] %v1800_v50  }
 0x164   :  { %v770_v53 = vpop.f32.mrb[40].mxu0  ;;  %v898_v54 = vpop.f32.mrb[40].mxu1 }
 0x165   :  { %v772_v55 = vpop.f32.mrb[41].mxu0  ;;  %v900_v56 = vpop.f32.mrb[41].mxu1 }
 0x166   :  { %v773_v57 = vpop.f32.mrb[42].mxu0  ;;  %v901_v58 = vpop.f32.mrb[42].mxu1 }
 0x167   :  { %v1725_v59 = vpack.c.bf16 %v773_v57, %v770_v53  ;;  %v1805_v60 = vpack.c.bf16 %v901_v58, %v898_v54  ;;  %v775_v61 = vpop.f32.mrb[43].mxu0  ;;  %v903_v62 = vpop.f32.mrb[43].mxu1 }
 0x169   :  { %1841 = vst [vmem:[%s2394_s2 + $0x50] sm:$0xff] %v1725_v59   ;;  %1857 = vst [vmem:[%s2394_s2 + $0xd0] sm:$0xff] %v1805_v60  }
 0x16c   :  { %v778_v63 = vpop.f32.mrb[44].mxu0  ;;  %v906_v0 = vpop.f32.mrb[44].mxu1 }
 0x16d   :  { %v780_v1 = vpop.f32.mrb[45].mxu0  ;;  %v908_v2 = vpop.f32.mrb[45].mxu1 }
 0x16e   :  { %v781_v3 = vpop.f32.mrb[46].mxu0  ;;  %v909_v4 = vpop.f32.mrb[46].mxu1 }
 0x16f   :  { %v1730_v5 = vpack.c.bf16 %v781_v3, %v778_v63  ;;  %v1810_v6 = vpack.c.bf16 %v909_v4, %v906_v0  ;;  %v783_v7 = vpop.f32.mrb[47].mxu0  ;;  %v911_v8 = vpop.f32.mrb[47].mxu1 }
 0x171   :  { %1842 = vst [vmem:[%s2394_s2 + $0x58] sm:$0xff] %v1730_v5   ;;  %1858 = vst [vmem:[%s2394_s2 + $0xd8] sm:$0xff] %v1810_v6  }
 0x174   :  { %v786_v9 = vpop.f32.mrb[48].mxu0  ;;  %v914_v10 = vpop.f32.mrb[48].mxu1 }
 0x175   :  { %v788_v11 = vpop.f32.mrb[49].mxu0  ;;  %v916_v12 = vpop.f32.mrb[49].mxu1 }
 0x176   :  { %v789_v13 = vpop.f32.mrb[50].mxu0  ;;  %v917_v14 = vpop.f32.mrb[50].mxu1 }
 0x177   :  { %v1735_v15 = vpack.c.bf16 %v789_v13, %v786_v9  ;;  %v1815_v16 = vpack.c.bf16 %v917_v14, %v914_v10  ;;  %v791_v17 = vpop.f32.mrb[51].mxu0  ;;  %v919_v18 = vpop.f32.mrb[51].mxu1 }
 0x179   :  { %1843 = vst [vmem:[%s2394_s2 + $0x60] sm:$0xff] %v1735_v15   ;;  %1859 = vst [vmem:[%s2394_s2 + $0xe0] sm:$0xff] %v1815_v16  }
 0x17c   :  { %v794_v19 = vpop.f32.mrb[52].mxu0  ;;  %v922_v20 = vpop.f32.mrb[52].mxu1 }
 0x17d   :  { %v796_v21 = vpop.f32.mrb[53].mxu0  ;;  %v924_v22 = vpop.f32.mrb[53].mxu1 }
 0x17e   :  { %v797_v23 = vpop.f32.mrb[54].mxu0  ;;  %v925_v24 = vpop.f32.mrb[54].mxu1 }
 0x17f   :  { %v1740_v25 = vpack.c.bf16 %v797_v23, %v794_v19  ;;  %v1820_v26 = vpack.c.bf16 %v925_v24, %v922_v20  ;;  %v799_v27 = vpop.f32.mrb[55].mxu0  ;;  %v927_v28 = vpop.f32.mrb[55].mxu1 }
 0x181   :  { %1844 = vst [vmem:[%s2394_s2 + $0x68] sm:$0xff] %v1740_v25   ;;  %1860 = vst [vmem:[%s2394_s2 + $0xe8] sm:$0xff] %v1820_v26  }
 0x184   :  { %v802_v29 = vpop.f32.mrb[56].mxu0  ;;  %v930_v30 = vpop.f32.mrb[56].mxu1 }
 0x185   :  { %v804_v31 = vpop.f32.mrb[57].mxu0  ;;  %v932_v32 = vpop.f32.mrb[57].mxu1 }
 0x186   :  { %v805_v33 = vpop.f32.mrb[58].mxu0  ;;  %v933_v34 = vpop.f32.mrb[58].mxu1 }
 0x187   :  { %v1745_v35 = vpack.c.bf16 %v805_v33, %v802_v29  ;;  %v1825_v36 = vpack.c.bf16 %v933_v34, %v930_v30  ;;  %v807_v37 = vpop.f32.mrb[59].mxu0  ;;  %v935_v38 = vpop.f32.mrb[59].mxu1 }
 0x189   :  { %1845 = vst [vmem:[%s2394_s2 + $0x70] sm:$0xff] %v1745_v35   ;;  %1861 = vst [vmem:[%s2394_s2 + $0xf0] sm:$0xff] %v1825_v36  }
 0x18c   :  { %v810_v39 = vpop.f32.mrb[60].mxu0  ;;  %v938_v40 = vpop.f32.mrb[60].mxu1 }
 0x18d   :  { %v812_v41 = vpop.f32.mrb[61].mxu0  ;;  %v940_v42 = vpop.f32.mrb[61].mxu1 }
 0x18e   :  { %v813_v43 = vpop.f32.mrb[62].mxu0  ;;  %v941_v44 = vpop.f32.mrb[62].mxu1 }
 0x18f   :  { %v1750_v45 = vpack.c.bf16 %v813_v43, %v810_v39  ;;  %v1830_v46 = vpack.c.bf16 %v941_v44, %v938_v40  ;;  %v815_v47 = vpop.f32.mrb[63].mxu0  ;;  %v943_v48 = vpop.f32.mrb[63].mxu1 }
 0x191   :  { %1846 = vst [vmem:[%s2394_s2 + $0x78] sm:$0xff] %v1750_v45   ;;  %1862 = vst [vmem:[%s2394_s2 + $0xf8] sm:$0xff] %v1830_v46  }

// kernel: embedding_method_forward.4
= control target key start
LH: loop header
LB: loop body
LE: loop exit
PB: predicated region body
PF: predicated region fallthrough
CT: control target
= control target key end

     0   :  { %s3739_s15 = smov 0   ;;  %s3741_s16 = smov 0   ;;  %s4150_s0 = inlined_call_operand.vmem [shape: bf16[2,512,512], index: 0, kind: input, shape index: {}]   ;;  %s4151_s1 = inlined_call_operand.vmem [shape: bf16[512,128], index: 1, kind: input, shape index: {}]   ;;  %s4152_s2 = inlined_call_operand.vmem [shape: f32[1,128], index: 2, kind: input, shape index: {}]   ;;  %s4153_s3 = inlined_call_operand.vmem [shape: bf16[2,512,128], index: 3, kind: output, shape index: {0}]   ;;  %s4154_s4 = inlined_call_operand.vmem [shape: f32[2,1,8,128], index: 4, kind: output, shape index: {1}]  }
   0x1   :  { %s3743_s17 = smov 0  }
   0x2 LB: > { %s34_s18 = sadd.s32 1, %s3707_s16  ;;  %p2949_p0 = scmp.ge.s32.totalorder %s3711_s17, 1  ;;  %s3711_s17 = sphi %s3743_s17, %s15_s17   ;;  %s3707_s16 = sphi %s3741_s16, %s4156_s16   ;;  %s3703_s15 = sphi %s3739_s15, %s4155_s15  }
   0x3   : > { %p36_p1 = scmp.ge.s32.totalorder %s34_s18, 2  ;;  %p203_p2 = scmp.lt.s32.totalorder %s3711_s17, 3 }
   0x5   : > { %s4158_s18 = smov (%p36_p1, %s34_s18), 0  ;;  %p204_p3 = pnand %p2949_p0, %p203_p2 }
   0x6   : > { %v3464_v0 = vld [vmem:[%s4151_s1] sm:$0xff] (!%p204_p3)   ;;  %v3713_v1 = vmov (!%p204_p3), 0   ;;  %v3466_v3 = vld [vmem:[%s4151_s1 + $0x8] sm:$0xff] (!%p204_p3)   ;;  %v3468_v5 = vld [vmem:[%s4151_s1 + $0x10] sm:$0xff] (!%p204_p3)   ;;  %p251_p4 = scmp.lt.s32.totalorder (!%p204_p3), %s3703_s15, 1 }
   0x7   : > { %207 = sbr.rel (%p204_p3) target bundleno = 560 (0x230), region = 32  ;;  %1444 = vmatprep.subr.bf16.mxu0 (!%p204_p3), %v3713_v1  ;;  %1733 = vmatprep.subr.bf16.mxu1 (!%p204_p3), %v3713_v1  ;;  %v3465_v2 = vld [vmem:[%s4151_s1 + $0x80] sm:$0xff] (!%p204_p3)   ;;  %v3467_v4 = vld [vmem:[%s4151_s1 + $0x88] sm:$0xff] (!%p204_p3)   ;;  %v3469_v6 = vld [vmem:[%s4151_s1 + $0x90] sm:$0xff] (!%p204_p3)  }
   0x8   : > { %1445 = vmatpush1.bf16.msra.mxu0 (!%p204_p3), %v3464_v0  ;;  %1734 = vmatpush1.bf16.msra.mxu1 (!%p204_p3), %v3465_v2  ;;  %v3470_v7 = vld [vmem:[%s4151_s1 + $0x18] sm:$0xff] (!%p204_p3)   ;;  %v3472_v9 = vld [vmem:[%s4151_s1 + $0x20] sm:$0xff] (!%p204_p3)   ;;  %v3474_v11 = vld [vmem:[%s4151_s1 + $0x28] sm:$0xff] (!%p204_p3)  }
   0x9   : > { %1446 = vmatprep.subr.bf16.mxu0 (!%p204_p3), %v3713_v1  ;;  %1735 = vmatprep.subr.bf16.mxu1 (!%p204_p3), %v3713_v1  ;;  %v3471_v8 = vld [vmem:[%s4151_s1 + $0x98] sm:$0xff] (!%p204_p3)   ;;  %v3473_v10 = vld [vmem:[%s4151_s1 + $0xa0] sm:$0xff] (!%p204_p3)   ;;  %v3475_v12 = vld [vmem:[%s4151_s1 + $0xa8] sm:$0xff] (!%p204_p3)  }
   0xa   : > { %v3476_v13 = vld [vmem:[%s4151_s1 + $0x30] sm:$0xff] (!%p204_p3)   ;;  %v3478_v15 = vld [vmem:[%s4151_s1 + $0x38] sm:$0xff] (!%p204_p3)   ;;  %v3480_v17 = vld [vmem:[%s4151_s1 + $0x40] sm:$0xff] (!%p204_p3)  }
   0xb   : > { %v3477_v14 = vld [vmem:[%s4151_s1 + $0xb0] sm:$0xff] (!%p204_p3)   ;;  %v3479_v16 = vld [vmem:[%s4151_s1 + $0xb8] sm:$0xff] (!%p204_p3)   ;;  %v3481_v18 = vld [vmem:[%s4151_s1 + $0xc0] sm:$0xff] (!%p204_p3)  }
   0xc   : > { %1447 = vmatpush1.bf16.msra.mxu0 (!%p204_p3), %v3466_v3  ;;  %1736 = vmatpush1.bf16.msra.mxu1 (!%p204_p3), %v3467_v4  ;;  %v3482_v20 = vld [vmem:[%s4151_s1 + $0x48] sm:$0xff] (!%p204_p3)   ;;  %v3484_v23 = vld [vmem:[%s4151_s1 + $0x50] sm:$0xff] (!%p204_p3)   ;;  %v3486_v25 = vld [vmem:[%s4151_s1 + $0x58] sm:$0xff] (!%p204_p3)  }
   0xd   : > { %1448 = vmatprep.subr.bf16.mxu0 (!%p204_p3), %v3713_v1  ;;  %1737 = vmatprep.subr.bf16.mxu1 (!%p204_p3), %v3713_v1  ;;  %v3483_v22 = vld [vmem:[%s4151_s1 + $0xc8] sm:$0xff] (!%p204_p3)   ;;  %v3485_v24 = vld [vmem:[%s4151_s1 + $0xd0] sm:$0xff] (!%p204_p3)   ;;  %v3487_v26 = vld [vmem:[%s4151_s1 + $0xd8] sm:$0xff] (!%p204_p3)  }
   0xe   : > { %s4160_s15 = smov (!%p251_p4, %s3703_s15), 1  ;;  %v3488_v27 = vld [vmem:[%s4151_s1 + $0x60] sm:$0xff]   ;;  %v3490_v29 = vld [vmem:[%s4151_s1 + $0x68] sm:$0xff]   ;;  %v3492_v31 = vld [vmem:[%s4151_s1 + $0x70] sm:$0xff]  }
   0xf   : > { %s3182_s29 = sshll.u32 %s4160_s15, 10  ;;  %v3489_v28 = vld [vmem:[%s4151_s1 + $0xe0] sm:$0xff]   ;;  %v3491_v30 = vld [vmem:[%s4151_s1 + $0xe8] sm:$0xff]   ;;  %v3493_v32 = vld [vmem:[%s4151_s1 + $0xf0] sm:$0xff]   ;;  %s3183_s24 = sshll.u32 %s4160_s15, 8 }
  0x10   : > { %1449 = vmatpush1.bf16.msra.mxu0 %v3468_v5  ;;  %1738 = vmatpush1.bf16.msra.mxu1 %v3469_v6  ;;  %s3834_s8 = scalar_lea.vmem %s4150_s0, %s3182_s29  ;;  %v3494_v33 = vld [vmem:[%s4151_s1 + $0x78] sm:$0xff]   ;;  %s4022_s27 = scalar_lea.vmem %s4153_s3, %s3183_s24 }
  0x11   : > { %1450 = vmatprep.subr.bf16.mxu0 %v3713_v1  ;;  %1739 = vmatprep.subr.bf16.mxu1 %v3713_v1  ;;  %v3498_v19 = vld [vmem:[%s3834_s8 + $0x4] ss:$16 sps:$4 sm:$0xff]   ;;  %v3501_v21 = vld [vmem:[%s3834_s8 + $0xc] ss:$16 sps:$4 sm:$0xff]   ;;  %v3496_v35 = vld [vmem:[%s3834_s8] ss:$16 sps:$4 sm:$0xff]  }
  0x12   : > { %1476 = vmatprep.mubr.bf16.mxu0 %v3498_v19  ;;  %1765 = vmatprep.mubr.bf16.mxu1 %v3501_v21  ;;  %v3495_v34 = vld [vmem:[%s4151_s1 + $0xf8] sm:$0xff]   ;;  %v3502_v37 = vld [vmem:[%s3834_s8 + $0x24] ss:$16 sps:$4 sm:$0xff]   ;;  %v3506_v39 = vld [vmem:[%s3834_s8 + $0x20] ss:$16 sps:$4 sm:$0xff]   ;;  %s2954_s29 = sshll.u32 %s4160_s15, 3 }
  0x13   : > { %v3499_v36 = vld [vmem:[%s3834_s8 + $0x8] ss:$16 sps:$4 sm:$0xff]   ;;  %v3504_v38 = vld [vmem:[%s3834_s8 + $0x2c] ss:$16 sps:$4 sm:$0xff]   ;;  %v3508_v41 = vld [vmem:[%s3834_s8 + $0x44] ss:$16 sps:$4 sm:$0xff]   ;;  %s281_s6 = scalar_lea.vmem %s4154_s4, %s2954_s29 }
  0x14   : > { %1451 = vmatpush1.bf16.msra.mxu0 %v3470_v7  ;;  %1740 = vmatpush1.bf16.msra.mxu1 %v3471_v8  ;;  %v3507_v40 = vld [vmem:[%s3834_s8 + $0x28] ss:$16 sps:$4 sm:$0xff]   ;;  %v3510_v42 = vld [vmem:[%s3834_s8 + $0x4c] ss:$16 sps:$4 sm:$0xff]   ;;  %v3512_v43 = vld [vmem:[%s3834_s8 + $0x40] ss:$16 sps:$4 sm:$0xff]  }
  0x15   : > { %1452 = vmatprep.subr.bf16.mxu0 %v3713_v1  ;;  %1741 = vmatprep.subr.bf16.mxu1 %v3713_v1  ;;  %v3513_v44 = vld [vmem:[%s3834_s8 + $0x48] ss:$16 sps:$4 sm:$0xff]   ;;  %v3514_v45 = vld [vmem:[%s3834_s8 + $0x64] ss:$16 sps:$4 sm:$0xff]   ;;  %v3516_v46 = vld [vmem:[%s3834_s8 + $0x6c] ss:$16 sps:$4 sm:$0xff]  }
  0x16   : > { %v3518_v47 = vld [vmem:[%s3834_s8 + $0x60] ss:$16 sps:$4 sm:$0xff]   ;;  %v3519_v48 = vld [vmem:[%s3834_s8 + $0x68] ss:$16 sps:$4 sm:$0xff]   ;;  %v3520_v49 = vld [vmem:[%s3834_s8 + $0x84] ss:$16 sps:$4 sm:$0xff]  }
  0x17   : > { %v3522_v50 = vld [vmem:[%s3834_s8 + $0x8c] ss:$16 sps:$4 sm:$0xff]   ;;  %v3524_v51 = vld [vmem:[%s3834_s8 + $0x80] ss:$16 sps:$4 sm:$0xff]   ;;  %v3525_v52 = vld [vmem:[%s3834_s8 + $0x88] ss:$16 sps:$4 sm:$0xff]  }
  0x18   : > { %1453 = vmatpush1.bf16.msra.mxu0 %v3472_v9  ;;  %1742 = vmatpush1.bf16.msra.mxu1 %v3473_v10  ;;  %v3526_v53 = vld [vmem:[%s3834_s8 + $0xa4] ss:$16 sps:$4 sm:$0xff]   ;;  %v3528_v54 = vld [vmem:[%s3834_s8 + $0xac] ss:$16 sps:$4 sm:$0xff]   ;;  %v3530_v55 = vld [vmem:[%s3834_s8 + $0xa0] ss:$16 sps:$4 sm:$0xff]  }
  0x19   : > { %1454 = vmatprep.subr.bf16.mxu0 %v3713_v1  ;;  %1743 = vmatprep.subr.bf16.mxu1 %v3713_v1  ;;  %v3531_v56 = vld [vmem:[%s3834_s8 + $0xa8] ss:$16 sps:$4 sm:$0xff]   ;;  %v3532_v57 = vld [vmem:[%s3834_s8 + $0xc4] ss:$16 sps:$4 sm:$0xff]   ;;  %v3534_v58 = vld [vmem:[%s3834_s8 + $0xcc] ss:$16 sps:$4 sm:$0xff]  }
  0x1a   : > { %v3536_v59 = vld [vmem:[%s3834_s8 + $0xc0] ss:$16 sps:$4 sm:$0xff]   ;;  %v3537_v60 = vld [vmem:[%s3834_s8 + $0xc8] ss:$16 sps:$4 sm:$0xff]   ;;  %v3538_v61 = vld [vmem:[%s3834_s8 + $0xe4] ss:$16 sps:$4 sm:$0xff]  }
  0x1b   : > { %v3540_v62 = vld [vmem:[%s3834_s8 + $0xec] ss:$16 sps:$4 sm:$0xff]   ;;  %v3542_v63 = vld [vmem:[%s3834_s8 + $0xe0] ss:$16 sps:$4 sm:$0xff]   ;;  %v3543_v0 = vld [vmem:[%s3834_s8 + $0xe8] ss:$16 sps:$4 sm:$0xff]  }
  0x1c   : > { %1455 = vmatpush1.bf16.msra.mxu0 %v3474_v11  ;;  %1744 = vmatpush1.bf16.msra.mxu1 %v3475_v12  ;;  %v3546_v2 = vld [vmem:[%s3834_s8 + $0x10c] ss:$16 sps:$4 sm:$0xff]   ;;  %v3548_v3 = vld [vmem:[%s3834_s8 + $0x100] ss:$16 sps:$4 sm:$0xff]   ;;  %v3549_v4 = vld [vmem:[%s3834_s8 + $0x108] ss:$16 sps:$4 sm:$0xff]  }
  0x1d   : > { %1456 = vmatprep.subr.bf16.mxu0 %v3713_v1  ;;  %1745 = vmatprep.subr.bf16.mxu1 %v3713_v1  ;;  %v3550_v5 = vld [vmem:[%s3834_s8 + $0x124] ss:$16 sps:$4 sm:$0xff]   ;;  %v3552_v6 = vld [vmem:[%s3834_s8 + $0x12c] ss:$16 sps:$4 sm:$0xff]   ;;  %v3554_v7 = vld [vmem:[%s3834_s8 + $0x120] ss:$16 sps:$4 sm:$0xff]  }
  0x1e   : > { %v3555_v8 = vld [vmem:[%s3834_s8 + $0x128] ss:$16 sps:$4 sm:$0xff]   ;;  %v3556_v9 = vld [vmem:[%s3834_s8 + $0x144] ss:$16 sps:$4 sm:$0xff]   ;;  %v3558_v10 = vld [vmem:[%s3834_s8 + $0x14c] ss:$16 sps:$4 sm:$0xff]  }
  0x1f   : > { %v3560_v11 = vld [vmem:[%s3834_s8 + $0x140] ss:$16 sps:$4 sm:$0xff]   ;;  %v3561_v12 = vld [vmem:[%s3834_s8 + $0x148] ss:$16 sps:$4 sm:$0xff]   ;;  %v3574_v21 = vld [vmem:[%s3834_s8 + $0x1a4] ss:$16 sps:$4 sm:$0xff]  }
  0x20   : > { %1457 = vmatpush1.bf16.msra.mxu0 %v3476_v13  ;;  %1746 = vmatpush1.bf16.msra.mxu1 %v3477_v14  ;;  %v3562_v13 = vld [vmem:[%s3834_s8 + $0x164] ss:$16 sps:$4 sm:$0xff]   ;;  %v3564_v14 = vld [vmem:[%s3834_s8 + $0x16c] ss:$16 sps:$4 sm:$0xff]   ;;  %v3572_v19 = vld [vmem:[%s3834_s8 + $0x180] ss:$16 sps:$4 sm:$0xff]  }
  0x21   : > { %1458 = vmatprep.subr.bf16.mxu0 %v3713_v1  ;;  %1747 = vmatprep.subr.bf16.mxu1 %v3713_v1 }
  0x24   : > { %1459 = vmatpush1.bf16.msra.mxu0 %v3478_v15  ;;  %1748 = vmatpush1.bf16.msra.mxu1 %v3479_v16  ;;  %v3566_v15 = vld [vmem:[%s3834_s8 + $0x160] ss:$16 sps:$4 sm:$0xff]   ;;  %v3567_v16 = vld [vmem:[%s3834_s8 + $0x168] ss:$16 sps:$4 sm:$0xff]  }
  0x25   : > { %1460 = vmatprep.subr.bf16.mxu0 %v3713_v1  ;;  %1749 = vmatprep.subr.bf16.mxu1 %v3713_v1 }
  0x28   : > { %1461 = vmatpush1.bf16.msra.mxu0 %v3480_v17  ;;  %1750 = vmatpush1.bf16.msra.mxu1 %v3481_v18  ;;  %v3568_v17 = vld [vmem:[%s3834_s8 + $0x184] ss:$16 sps:$4 sm:$0xff]   ;;  %v3570_v18 = vld [vmem:[%s3834_s8 + $0x18c] ss:$16 sps:$4 sm:$0xff]  }
  0x29   : > { %1462 = vmatprep.subr.bf16.mxu0 %v3713_v1  ;;  %1751 = vmatprep.subr.bf16.mxu1 %v3713_v1 }
  0x2c   : > { %1463 = vmatpush1.bf16.msra.mxu0 %v3482_v20  ;;  %1752 = vmatpush1.bf16.msra.mxu1 %v3483_v22  ;;  %v3573_v20 = vld [vmem:[%s3834_s8 + $0x188] ss:$16 sps:$4 sm:$0xff]   ;;  %v3576_v22 = vld [vmem:[%s3834_s8 + $0x1ac] ss:$16 sps:$4 sm:$0xff]  }
  0x2d   : > { %1464 = vmatprep.subr.bf16.mxu0 %v3713_v1  ;;  %1753 = vmatprep.subr.bf16.mxu1 %v3713_v1 }
  0x30   : > { %1465 = vmatpush1.bf16.msra.mxu0 %v3484_v23  ;;  %1754 = vmatpush1.bf16.msra.mxu1 %v3485_v24  ;;  %v3578_v23 = vld [vmem:[%s3834_s8 + $0x1a0] ss:$16 sps:$4 sm:$0xff]   ;;  %v3579_v24 = vld [vmem:[%s3834_s8 + $0x1a8] ss:$16 sps:$4 sm:$0xff]  }
  0x31   : > { %1466 = vmatprep.subr.bf16.mxu0 %v3713_v1  ;;  %1755 = vmatprep.subr.bf16.mxu1 %v3713_v1 }
  0x34   : > { %1467 = vmatpush1.bf16.msra.mxu0 %v3486_v25  ;;  %1756 = vmatpush1.bf16.msra.mxu1 %v3487_v26  ;;  %v3580_v25 = vld [vmem:[%s3834_s8 + $0x1c4] ss:$16 sps:$4 sm:$0xff]   ;;  %v3582_v26 = vld [vmem:[%s3834_s8 + $0x1cc] ss:$16 sps:$4 sm:$0xff]  }
  0x35   : > { %1468 = vmatprep.subr.bf16.mxu0 %v3713_v1  ;;  %1757 = vmatprep.subr.bf16.mxu1 %v3713_v1 }
  0x38   : > { %1469 = vmatpush1.bf16.msra.mxu0 %v3488_v27  ;;  %1758 = vmatpush1.bf16.msra.mxu1 %v3489_v28  ;;  %v3584_v27 = vld [vmem:[%s3834_s8 + $0x1c0] ss:$16 sps:$4 sm:$0xff]   ;;  %v3585_v28 = vld [vmem:[%s3834_s8 + $0x1c8] ss:$16 sps:$4 sm:$0xff]  }
  0x39   : > { %1470 = vmatprep.subr.bf16.mxu0 %v3713_v1  ;;  %1759 = vmatprep.subr.bf16.mxu1 %v3713_v1 }
  0x3c   : > { %1471 = vmatpush1.bf16.msra.mxu0 %v3490_v29  ;;  %1760 = vmatpush1.bf16.msra.mxu1 %v3491_v30  ;;  %v3586_v29 = vld [vmem:[%s3834_s8 + $0x1e4] ss:$16 sps:$4 sm:$0xff]   ;;  %v3588_v30 = vld [vmem:[%s3834_s8 + $0x1ec] ss:$16 sps:$4 sm:$0xff]  }
  0x3d   : > { %1472 = vmatprep.subr.bf16.mxu0 %v3713_v1  ;;  %1761 = vmatprep.subr.bf16.mxu1 %v3713_v1 }
  0x40   : > { %1473 = vmatpush1.bf16.msra.mxu0 %v3492_v31  ;;  %1762 = vmatpush1.bf16.msra.mxu1 %v3493_v32  ;;  %v3590_v31 = vld [vmem:[%s3834_s8 + $0x1e0] ss:$16 sps:$4 sm:$0xff]   ;;  %v3591_v32 = vld [vmem:[%s3834_s8 + $0x1e8] ss:$16 sps:$4 sm:$0xff]  }
  0x41   : > { %1474 = vmatprep.subr.bf16.mxu0 %v3713_v1  ;;  %1763 = vmatprep.subr.bf16.mxu1 %v3713_v1  ;;  %v3544_v1 = vld [vmem:[%s3834_s8 + $0x104] ss:$16 sps:$4 sm:$0xff]  }
  0x44   : > { %1475 = vmatpush1.bf16.msra.mxu0 %v3494_v33  ;;  %1764 = vmatpush1.bf16.msra.mxu1 %v3495_v34  ;;  %v3592_v33 = vld [vmem:[%s3834_s8 + $0x204] ss:$16 sps:$4 sm:$0xff]   ;;  %v3594_v34 = vld [vmem:[%s3834_s8 + $0x20c] ss:$16 sps:$4 sm:$0xff]  }
  0x47   : > { %1477 = vmatmul.mubr.bf16.vlgmr.msra.gmra.mrb[0].mxu0 %v3496_v35  ;;  %1766 = vmatmul.mubr.bf16.vlgmr.msra.gmra.mrb[0].mxu1 %v3499_v36  ;;  %v3596_v35 = vld [vmem:[%s3834_s8 + $0x200] ss:$16 sps:$4 sm:$0xff]   ;;  %v3597_v36 = vld [vmem:[%s3834_s8 + $0x208] ss:$16 sps:$4 sm:$0xff]  }
  0x48   : > { %1484 = vmatprep.mubr.bf16.mxu0 %v3502_v37  ;;  %1773 = vmatprep.mubr.bf16.mxu1 %v3504_v38  ;;  %v3598_v37 = vld [vmem:[%s3834_s8 + $0x224] ss:$16 sps:$4 sm:$0xff]   ;;  %v3600_v38 = vld [vmem:[%s3834_s8 + $0x22c] ss:$16 sps:$4 sm:$0xff]  }
  0x4f   : > { %1485 = vmatmul.mubr.bf16.gmra.mrb[4].mxu0 %v3506_v39  ;;  %1774 = vmatmul.mubr.bf16.gmra.mrb[4].mxu1 %v3507_v40  ;;  %v3602_v39 = vld [vmem:[%s3834_s8 + $0x220] ss:$16 sps:$4 sm:$0xff]   ;;  %v3603_v40 = vld [vmem:[%s3834_s8 + $0x228] ss:$16 sps:$4 sm:$0xff]  }
  0x50   : > { %1492 = vmatprep.mubr.bf16.mxu0 %v3508_v41  ;;  %1781 = vmatprep.mubr.bf16.mxu1 %v3510_v42  ;;  %v3604_v41 = vld [vmem:[%s3834_s8 + $0x244] ss:$16 sps:$4 sm:$0xff]   ;;  %v3606_v42 = vld [vmem:[%s3834_s8 + $0x24c] ss:$16 sps:$4 sm:$0xff]  }
  0x57   : > { %1493 = vmatmul.mubr.bf16.gmra.mrb[8].mxu0 %v3512_v43  ;;  %1782 = vmatmul.mubr.bf16.gmra.mrb[8].mxu1 %v3513_v44  ;;  %v3608_v43 = vld [vmem:[%s3834_s8 + $0x240] ss:$16 sps:$4 sm:$0xff]   ;;  %v3609_v44 = vld [vmem:[%s3834_s8 + $0x248] ss:$16 sps:$4 sm:$0xff]  }
  0x58   : > { %1500 = vmatprep.mubr.bf16.mxu0 %v3514_v45  ;;  %1789 = vmatprep.mubr.bf16.mxu1 %v3516_v46  ;;  %v3610_v45 = vld [vmem:[%s3834_s8 + $0x264] ss:$16 sps:$4 sm:$0xff]   ;;  %v3612_v46 = vld [vmem:[%s3834_s8 + $0x26c] ss:$16 sps:$4 sm:$0xff]  }
  0x5f   : > { %1501 = vmatmul.mubr.bf16.gmra.mrb[12].mxu0 %v3518_v47  ;;  %1790 = vmatmul.mubr.bf16.gmra.mrb[12].mxu1 %v3519_v48  ;;  %v3614_v47 = vld [vmem:[%s3834_s8 + $0x260] ss:$16 sps:$4 sm:$0xff]   ;;  %v3615_v48 = vld [vmem:[%s3834_s8 + $0x268] ss:$16 sps:$4 sm:$0xff]  }
  0x60   : > { %1508 = vmatprep.mubr.bf16.mxu0 %v3520_v49  ;;  %1797 = vmatprep.mubr.bf16.mxu1 %v3522_v50  ;;  %v3616_v49 = vld [vmem:[%s3834_s8 + $0x284] ss:$16 sps:$4 sm:$0xff]   ;;  %v3618_v50 = vld [vmem:[%s3834_s8 + $0x28c] ss:$16 sps:$4 sm:$0xff]  }
  0x67   : > { %1509 = vmatmul.mubr.bf16.gmra.mrb[16].mxu0 %v3524_v51  ;;  %1798 = vmatmul.mubr.bf16.gmra.mrb[16].mxu1 %v3525_v52  ;;  %v3620_v51 = vld [vmem:[%s3834_s8 + $0x280] ss:$16 sps:$4 sm:$0xff]   ;;  %v3621_v52 = vld [vmem:[%s3834_s8 + $0x288] ss:$16 sps:$4 sm:$0xff]  }
  0x68   : > { %1516 = vmatprep.mubr.bf16.mxu0 %v3526_v53  ;;  %1805 = vmatprep.mubr.bf16.mxu1 %v3528_v54  ;;  %v3622_v53 = vld [vmem:[%s3834_s8 + $0x2a4] ss:$16 sps:$4 sm:$0xff]   ;;  %v3624_v54 = vld [vmem:[%s3834_s8 + $0x2ac] ss:$16 sps:$4 sm:$0xff]  }
  0x6f   : > { %1517 = vmatmul.mubr.bf16.gmra.mrb[20].mxu0 %v3530_v55  ;;  %1806 = vmatmul.mubr.bf16.gmra.mrb[20].mxu1 %v3531_v56  ;;  %v3626_v55 = vld [vmem:[%s3834_s8 + $0x2a0] ss:$16 sps:$4 sm:$0xff]   ;;  %v3627_v56 = vld [vmem:[%s3834_s8 + $0x2a8] ss:$16 sps:$4 sm:$0xff]  }
  0x70   : > { %1524 = vmatprep.mubr.bf16.mxu0 %v3532_v57  ;;  %1813 = vmatprep.mubr.bf16.mxu1 %v3534_v58  ;;  %v3628_v57 = vld [vmem:[%s3834_s8 + $0x2c4] ss:$16 sps:$4 sm:$0xff]   ;;  %v3630_v58 = vld [vmem:[%s3834_s8 + $0x2cc] ss:$16 sps:$4 sm:$0xff]  }
  0x77   : > { %1525 = vmatmul.mubr.bf16.gmra.mrb[24].mxu0 %v3536_v59  ;;  %1814 = vmatmul.mubr.bf16.gmra.mrb[24].mxu1 %v3537_v60  ;;  %v3632_v59 = vld [vmem:[%s3834_s8 + $0x2c0] ss:$16 sps:$4 sm:$0xff]   ;;  %v3633_v60 = vld [vmem:[%s3834_s8 + $0x2c8] ss:$16 sps:$4 sm:$0xff]  }
  0x78   : > { %1532 = vmatprep.mubr.bf16.mxu0 %v3538_v61  ;;  %1821 = vmatprep.mubr.bf16.mxu1 %v3540_v62  ;;  %v3634_v61 = vld [vmem:[%s3834_s8 + $0x2e4] ss:$16 sps:$4 sm:$0xff]   ;;  %v3636_v62 = vld [vmem:[%s3834_s8 + $0x2ec] ss:$16 sps:$4 sm:$0xff]  }
  0x7f   : > { %1533 = vmatmul.mubr.bf16.gmra.mrb[28].mxu0 %v3542_v63  ;;  %1822 = vmatmul.mubr.bf16.gmra.mrb[28].mxu1 %v3543_v0  ;;  %v3638_v63 = vld [vmem:[%s3834_s8 + $0x2e0] ss:$16 sps:$4 sm:$0xff]   ;;  %v3639_v0 = vld [vmem:[%s3834_s8 + $0x2e8] ss:$16 sps:$4 sm:$0xff]  }
  0x80   : > { %1540 = vmatprep.mubr.bf16.mxu0 %v3544_v1  ;;  %1829 = vmatprep.mubr.bf16.mxu1 %v3546_v2  ;;  %v3640_v1 = vld [vmem:[%s3834_s8 + $0x304] ss:$16 sps:$4 sm:$0xff]   ;;  %v3642_v2 = vld [vmem:[%s3834_s8 + $0x30c] ss:$16 sps:$4 sm:$0xff]  }
  0x87   : > { %1541 = vmatmul.mubr.bf16.gmra.mrb[32].mxu0 %v3548_v3  ;;  %1830 = vmatmul.mubr.bf16.gmra.mrb[32].mxu1 %v3549_v4  ;;  %v3644_v3 = vld [vmem:[%s3834_s8 + $0x300] ss:$16 sps:$4 sm:$0xff]   ;;  %v3645_v4 = vld [vmem:[%s3834_s8 + $0x308] ss:$16 sps:$4 sm:$0xff]  }
  0x88   : > { %1548 = vmatprep.mubr.bf16.mxu0 %v3550_v5  ;;  %1837 = vmatprep.mubr.bf16.mxu1 %v3552_v6  ;;  %v3646_v5 = vld [vmem:[%s3834_s8 + $0x324] ss:$16 sps:$4 sm:$0xff]   ;;  %v3648_v6 = vld [vmem:[%s3834_s8 + $0x32c] ss:$16 sps:$4 sm:$0xff]  }
  0x8f   : > { %1549 = vmatmul.mubr.bf16.gmra.mrb[36].mxu0 %v3554_v7  ;;  %1838 = vmatmul.mubr.bf16.gmra.mrb[36].mxu1 %v3555_v8  ;;  %v3650_v7 = vld [vmem:[%s3834_s8 + $0x320] ss:$16 sps:$4 sm:$0xff]   ;;  %v3651_v8 = vld [vmem:[%s3834_s8 + $0x328] ss:$16 sps:$4 sm:$0xff]  }
  0x90   : > { %1556 = vmatprep.mubr.bf16.mxu0 %v3556_v9  ;;  %1845 = vmatprep.mubr.bf16.mxu1 %v3558_v10  ;;  %v3652_v9 = vld [vmem:[%s3834_s8 + $0x344] ss:$16 sps:$4 sm:$0xff]   ;;  %v3654_v10 = vld [vmem:[%s3834_s8 + $0x34c] ss:$16 sps:$4 sm:$0xff]  }
  0x97   : > { %1557 = vmatmul.mubr.bf16.gmra.mrb[40].mxu0 %v3560_v11  ;;  %1846 = vmatmul.mubr.bf16.gmra.mrb[40].mxu1 %v3561_v12  ;;  %v3656_v11 = vld [vmem:[%s3834_s8 + $0x340] ss:$16 sps:$4 sm:$0xff]   ;;  %v3657_v12 = vld [vmem:[%s3834_s8 + $0x348] ss:$16 sps:$4 sm:$0xff]  }
  0x98   : > { %1564 = vmatprep.mubr.bf16.mxu0 %v3562_v13  ;;  %1853 = vmatprep.mubr.bf16.mxu1 %v3564_v14  ;;  %v3658_v13 = vld [vmem:[%s3834_s8 + $0x364] ss:$16 sps:$4 sm:$0xff]   ;;  %v3660_v14 = vld [vmem:[%s3834_s8 + $0x36c] ss:$16 sps:$4 sm:$0xff]  }
  0x9f   : > { %1565 = vmatmul.mubr.bf16.gmra.mrb[44].mxu0 %v3566_v15  ;;  %1854 = vmatmul.mubr.bf16.gmra.mrb[44].mxu1 %v3567_v16 }
  0xa0   : > { %1572 = vmatprep.mubr.bf16.mxu0 %v3568_v17  ;;  %1861 = vmatprep.mubr.bf16.mxu1 %v3570_v18  ;;  %v4010_v17 = vld [vmem:[%s4152_s2] ss:$0 sm:$0xff] }
  0xa7   : > { %1573 = vmatmul.mubr.bf16.gmra.mrb[48].mxu0 %v3572_v19  ;;  %1862 = vmatmul.mubr.bf16.gmra.mrb[48].mxu1 %v3573_v20  ;;  %v3662_v19 = vld [vmem:[%s3834_s8 + $0x360] ss:$16 sps:$4 sm:$0xff]  }
  0xa8   : > { %1580 = vmatprep.mubr.bf16.mxu0 %v3574_v21  ;;  %1869 = vmatprep.mubr.bf16.mxu1 %v3576_v22 }
  0xaf   : > { %1581 = vmatmul.mubr.bf16.gmra.mrb[52].mxu0 %v3578_v23  ;;  %1870 = vmatmul.mubr.bf16.gmra.mrb[52].mxu1 %v3579_v24  ;;  %v3663_v23 = vld [vmem:[%s3834_s8 + $0x368] ss:$16 sps:$4 sm:$0xff]   ;;  %v3664_v24 = vld [vmem:[%s3834_s8 + $0x384] ss:$16 sps:$4 sm:$0xff]  }
  0xb0   : > { %1588 = vmatprep.mubr.bf16.mxu0 %v3580_v25  ;;  %1877 = vmatprep.mubr.bf16.mxu1 %v3582_v26 }
  0xb7   : > { %1589 = vmatmul.mubr.bf16.gmra.mrb[56].mxu0 %v3584_v27  ;;  %1878 = vmatmul.mubr.bf16.gmra.mrb[56].mxu1 %v3585_v28  ;;  %v3666_v27 = vld [vmem:[%s3834_s8 + $0x38c] ss:$16 sps:$4 sm:$0xff]  }
  0xb8   : > { %1596 = vmatprep.mubr.bf16.mxu0 %v3586_v29  ;;  %1885 = vmatprep.mubr.bf16.mxu1 %v3588_v30 }
  0xbf   : > { %1597 = vmatmul.mubr.bf16.gmra.mrb[60].mxu0 %v3590_v31  ;;  %1886 = vmatmul.mubr.bf16.gmra.mrb[60].mxu1 %v3591_v32 }
  0xc0   : > { %1604 = vmatprep.mubr.bf16.mxu0 %v3592_v33  ;;  %1893 = vmatprep.mubr.bf16.mxu1 %v3594_v34 }
  0xc7   : > { %1605 = vmatmul.mubr.bf16.gmra.mrb[64].mxu0 %v3596_v35  ;;  %1894 = vmatmul.mubr.bf16.gmra.mrb[64].mxu1 %v3597_v36 }
  0xc8   : > { %1612 = vmatprep.mubr.bf16.mxu0 %v3598_v37  ;;  %1901 = vmatprep.mubr.bf16.mxu1 %v3600_v38  ;;  %v3668_v37 = vld [vmem:[%s3834_s8 + $0x380] ss:$16 sps:$4 sm:$0xff]  }
  0xcf   : > { %1613 = vmatmul.mubr.bf16.gmra.mrb[68].mxu0 %v3602_v39  ;;  %1902 = vmatmul.mubr.bf16.gmra.mrb[68].mxu1 %v3603_v40 }
  0xd0   : > { %1620 = vmatprep.mubr.bf16.mxu0 %v3604_v41  ;;  %1909 = vmatprep.mubr.bf16.mxu1 %v3606_v42  ;;  %v3669_v42 = vld [vmem:[%s3834_s8 + $0x388] ss:$16 sps:$4 sm:$0xff]  }
  0xd7   : > { %1621 = vmatmul.mubr.bf16.gmra.mrb[72].mxu0 %v3608_v43  ;;  %1910 = vmatmul.mubr.bf16.gmra.mrb[72].mxu1 %v3609_v44  ;;  %v3670_v43 = vld [vmem:[%s3834_s8 + $0x3a4] ss:$16 sps:$4 sm:$0xff]  }
  0xd8   : > { %1628 = vmatprep.mubr.bf16.mxu0 %v3610_v45  ;;  %1917 = vmatprep.mubr.bf16.mxu1 %v3612_v46  ;;  %v3672_v46 = vld [vmem:[%s3834_s8 + $0x3ac] ss:$16 sps:$4 sm:$0xff]  }
  0xdf   : > { %1629 = vmatmul.mubr.bf16.gmra.mrb[76].mxu0 %v3614_v47  ;;  %1918 = vmatmul.mubr.bf16.gmra.mrb[76].mxu1 %v3615_v48 }
  0xe0   : > { %1636 = vmatprep.mubr.bf16.mxu0 %v3616_v49  ;;  %1925 = vmatprep.mubr.bf16.mxu1 %v3618_v50 }
  0xe7   : > { %1637 = vmatmul.mubr.bf16.gmra.mrb[80].mxu0 %v3620_v51  ;;  %1926 = vmatmul.mubr.bf16.gmra.mrb[80].mxu1 %v3621_v52 }
  0xe8   : > { %1644 = vmatprep.mubr.bf16.mxu0 %v3622_v53  ;;  %1933 = vmatprep.mubr.bf16.mxu1 %v3624_v54 }
  0xef   : > { %1645 = vmatmul.mubr.bf16.gmra.mrb[84].mxu0 %v3626_v55  ;;  %1934 = vmatmul.mubr.bf16.gmra.mrb[84].mxu1 %v3627_v56 }
  0xf0   : > { %1652 = vmatprep.mubr.bf16.mxu0 %v3628_v57  ;;  %1941 = vmatprep.mubr.bf16.mxu1 %v3630_v58  ;;  %v3674_v58 = vld [vmem:[%s3834_s8 + $0x3a0] ss:$16 sps:$4 sm:$0xff]  }
  0xf7   : > { %1653 = vmatmul.mubr.bf16.gmra.mrb[88].mxu0 %v3632_v59  ;;  %1942 = vmatmul.mubr.bf16.gmra.mrb[88].mxu1 %v3633_v60 }
  0xf8   : > { %1660 = vmatprep.mubr.bf16.mxu0 %v3634_v61  ;;  %1949 = vmatprep.mubr.bf16.mxu1 %v3636_v62 }
  0xff   : > { %1661 = vmatmul.mubr.bf16.gmra.mrb[92].mxu0 %v3638_v63  ;;  %1950 = vmatmul.mubr.bf16.gmra.mrb[92].mxu1 %v3639_v0  ;;  %v3675_v63 = vld [vmem:[%s3834_s8 + $0x3a8] ss:$16 sps:$4 sm:$0xff]   ;;  %v3676_v0 = vld [vmem:[%s3834_s8 + $0x3c4] ss:$16 sps:$4 sm:$0xff]  }
 0x100   : > { %1668 = vmatprep.mubr.bf16.mxu0 %v3640_v1  ;;  %1957 = vmatprep.mubr.bf16.mxu1 %v3642_v2 }
 0x107   : > { %1669 = vmatmul.mubr.bf16.gmra.mrb[96].mxu0 %v3644_v3  ;;  %1958 = vmatmul.mubr.bf16.gmra.mrb[96].mxu1 %v3645_v4  ;;  %v3678_v3 = vld [vmem:[%s3834_s8 + $0x3cc] ss:$16 sps:$4 sm:$0xff]  }
 0x108   : > { %1676 = vmatprep.mubr.bf16.mxu0 %v3646_v5  ;;  %1965 = vmatprep.mubr.bf16.mxu1 %v3648_v6 }
 0x10f   : > { %1677 = vmatmul.mubr.bf16.gmra.mrb[100].mxu0 %v3650_v7  ;;  %1966 = vmatmul.mubr.bf16.gmra.mrb[100].mxu1 %v3651_v8 }
 0x110   : > { %1684 = vmatprep.mubr.bf16.mxu0 %v3652_v9  ;;  %1973 = vmatprep.mubr.bf16.mxu1 %v3654_v10 }
 0x117   : > { %1685 = vmatmul.mubr.bf16.gmra.mrb[104].mxu0 %v3656_v11  ;;  %1974 = vmatmul.mubr.bf16.gmra.mrb[104].mxu1 %v3657_v12 }
 0x118   : > { %1692 = vmatprep.mubr.bf16.mxu0 %v3658_v13  ;;  %1981 = vmatprep.mubr.bf16.mxu1 %v3660_v14 }
 0x11a   : > { %v1478_v15 = vpop.f32.mrb[0].mxu0  ;;  %v1767_v16 = vpop.f32.mrb[0].mxu1 }
 0x11b   : > { %v1480_v18 = vpop.f32.mrb[1].mxu0  ;;  %v1768_v20 = vadd.f32 %v1767_v16, %v1478_v15  ;;  %v1769_v21 = vpop.f32.mrb[1].mxu1 }
 0x11c   : > { %v1481_v22 = vpop.f32.mrb[2].mxu0  ;;  %v1770_v25 = vpop.f32.mrb[2].mxu1 }
 0x11d   : > { %v1483_v26 = vpop.f32.mrb[3].mxu0  ;;  %v2224_v28 = vadd.f32 %v4010_v17, %v1768_v20  ;;  %v1771_v29 = vadd.f32 %v1770_v25, %v1481_v22  ;;  %v1772_v30 = vpop.f32.mrb[3].mxu1  ;;  %v3682_v25 = vld [vmem:[%s3834_s8 + $0x3e4] ss:$16 sps:$4 sm:$0xff]  }
 0x11f   : > { %1693 = vmatmul.mubr.bf16.gmra.mrb[108].mxu0 %v3662_v19  ;;  %v2225_v31 = vadd.f32 %v4010_v17, %v1771_v29  ;;  %1982 = vmatmul.mubr.bf16.gmra.mrb[108].mxu1 %v3663_v23  ;;  %v2288_v32 = vmax.f32 %v2224_v28, 0.0  ;;  %v3680_v19 = vld [vmem:[%s3834_s8 + $0x3c0] ss:$16 sps:$4 sm:$0xff]   ;;  %v3684_v28 = vld [vmem:[%s3834_s8 + $0x3ec] ss:$16 sps:$4 sm:$0xff]  }
 0x120   : > { %1700 = vmatprep.mubr.bf16.mxu0 %v3664_v24  ;;  %1989 = vmatprep.mubr.bf16.mxu1 %v3666_v27  ;;  %v3681_v24 = vld [vmem:[%s3834_s8 + $0x3c8] ss:$16 sps:$4 sm:$0xff]  }
 0x121   : > { %v2289_v33 = vmax.f32 %v2225_v31, 0.0 }
 0x122   : > { %v1486_v34 = vpop.f32.mrb[4].mxu0  ;;  %v1775_v35 = vpop.f32.mrb[4].mxu1 }
 0x123   : > { %v1488_v36 = vpop.f32.mrb[5].mxu0  ;;  %v2352_v38 = vpack.c.bf16 %v2289_v33, %v2288_v32  ;;  %v1776_v39 = vadd.f32 %v1775_v35, %v1486_v34  ;;  %v1777_v40 = vpop.f32.mrb[5].mxu1 }
 0x124   : > { %v1489_v41 = vpop.f32.mrb[6].mxu0  ;;  %v1778_v44 = vpop.f32.mrb[6].mxu1 }
 0x125   : > { %v1491_v45 = vpop.f32.mrb[7].mxu0  ;;  %3252 = vst [vmem:[%s4022_s27] sm:$0xff] %v2352_v38   ;;  %v2226_v47 = vadd.f32 %v4010_v17, %v1776_v39  ;;  %v1779_v48 = vadd.f32 %v1778_v44, %v1489_v41  ;;  %v1780_v49 = vpop.f32.mrb[7].mxu1  ;;  %v2672_v51 = vunpack.c.l.bf16 %v2352_v38  ;;  %v2673_v52 = vunpack.c.h.bf16 %v2352_v38 }
 0x127   : > { %1701 = vmatmul.mubr.bf16.gmra.mrb[112].mxu0 %v3668_v37  ;;  %v2227_v50 = vadd.f32 %v4010_v17, %v1779_v48  ;;  %1990 = vmatmul.mubr.bf16.gmra.mrb[112].mxu1 %v3669_v42  ;;  %v2290_v53 = vmax.f32 %v2226_v47, 0.0  ;;  %v2736_v4 = vadd.f32 %v2673_v52, %v2672_v51  ;;  %v3686_v42 = vld [vmem:[%s3834_s8 + $0x3e0] ss:$16 sps:$4 sm:$0xff]   ;;  %v3687_v47 = vld [vmem:[%s3834_s8 + $0x3e8] ss:$16 sps:$4 sm:$0xff]  }
 0x128   : > { %1708 = vmatprep.mubr.bf16.mxu0 %v3670_v43  ;;  %1997 = vmatprep.mubr.bf16.mxu1 %v3672_v46 }
 0x129   : > { %v2291_v54 = vmax.f32 %v2227_v50, 0.0 }
 0x12a   : > { %v1494_v55 = vpop.f32.mrb[8].mxu0  ;;  %v1783_v56 = vpop.f32.mrb[8].mxu1 }
 0x12b   : > { %v1496_v57 = vpop.f32.mrb[9].mxu0  ;;  %v2353_v59 = vpack.c.bf16 %v2291_v54, %v2290_v53  ;;  %v1784_v60 = vadd.f32 %v1783_v56, %v1494_v55  ;;  %v1785_v61 = vpop.f32.mrb[9].mxu1 }
 0x12c   : > { %v1497_v62 = vpop.f32.mrb[10].mxu0  ;;  %v1786_v1 = vpop.f32.mrb[10].mxu1 }
 0x12d   : > { %v1499_v2 = vpop.f32.mrb[11].mxu0  ;;  %3408 = vst [vmem:[%s4022_s27 + $0x8] sm:$0xff] %v2353_v59   ;;  %v2674_v5 = vunpack.c.l.bf16 %v2353_v59  ;;  %v2228_v6 = vadd.f32 %v4010_v17, %v1784_v60  ;;  %v1787_v7 = vadd.f32 %v1786_v1, %v1497_v62  ;;  %v1788_v8 = vpop.f32.mrb[11].mxu1  ;;  %v2675_v9 = vunpack.c.h.bf16 %v2353_v59 }
 0x12f   : > { %1709 = vmatmul.mubr.bf16.gmra.mrb[116].mxu0 %v3674_v58  ;;  %v2737_v10 = vadd.f32 %v2736_v4, %v2674_v5  ;;  %v2229_v11 = vadd.f32 %v4010_v17, %v1787_v7  ;;  %1998 = vmatmul.mubr.bf16.gmra.mrb[116].mxu1 %v3675_v63  ;;  %v2292_v13 = vmax.f32 %v2228_v6, 0.0 }
 0x130   : > { %1716 = vmatprep.mubr.bf16.mxu0 %v3676_v0  ;;  %2005 = vmatprep.mubr.bf16.mxu1 %v3678_v3 }
 0x131   : > { %v2738_v12 = vadd.f32 %v2737_v10, %v2675_v9  ;;  %v2293_v14 = vmax.f32 %v2229_v11, 0.0 }
 0x132   : > { %v1502_v15 = vpop.f32.mrb[12].mxu0  ;;  %v1791_v16 = vpop.f32.mrb[12].mxu1 }
 0x133   : > { %v1504_v18 = vpop.f32.mrb[13].mxu0  ;;  %v2354_v20 = vpack.c.bf16 %v2293_v14, %v2292_v13  ;;  %v1792_v21 = vadd.f32 %v1791_v16, %v1502_v15  ;;  %v1793_v22 = vpop.f32.mrb[13].mxu1 }
 0x134   : > { %v1505_v23 = vpop.f32.mrb[14].mxu0  ;;  %v1794_v26 = vpop.f32.mrb[14].mxu1 }
 0x135   : > { %v1507_v27 = vpop.f32.mrb[15].mxu0  ;;  %3409 = vst [vmem:[%s4022_s27 + $0x10] sm:$0xff] %v2354_v20   ;;  %v2676_v29 = vunpack.c.l.bf16 %v2354_v20  ;;  %v2230_v30 = vadd.f32 %v4010_v17, %v1792_v21  ;;  %v1795_v31 = vadd.f32 %v1794_v26, %v1505_v23  ;;  %v1796_v32 = vpop.f32.mrb[15].mxu1  ;;  %v2677_v33 = vunpack.c.h.bf16 %v2354_v20 }
 0x137   : > { %1717 = vmatmul.mubr.bf16.gmra.mrb[120].mxu0 %v3680_v19  ;;  %v2739_v34 = vadd.f32 %v2738_v12, %v2676_v29  ;;  %v2231_v35 = vadd.f32 %v4010_v17, %v1795_v31  ;;  %2006 = vmatmul.mubr.bf16.gmra.mrb[120].mxu1 %v3681_v24  ;;  %v2294_v37 = vmax.f32 %v2230_v30, 0.0 }
 0x138   : > { %1724 = vmatprep.mubr.bf16.mxu0 %v3682_v25  ;;  %2013 = vmatprep.mubr.bf16.mxu1 %v3684_v28 }
 0x139   : > { %v2740_v36 = vadd.f32 %v2739_v34, %v2677_v33  ;;  %v2295_v38 = vmax.f32 %v2231_v35, 0.0 }
 0x13a   : > { %v1510_v39 = vpop.f32.mrb[16].mxu0  ;;  %v1799_v40 = vpop.f32.mrb[16].mxu1 }
 0x13b   : > { %v1512_v41 = vpop.f32.mrb[17].mxu0  ;;  %v2355_v43 = vpack.c.bf16 %v2295_v38, %v2294_v37  ;;  %v1800_v44 = vadd.f32 %v1799_v40, %v1510_v39  ;;  %v1801_v45 = vpop.f32.mrb[17].mxu1 }
 0x13c   : > { %v1513_v46 = vpop.f32.mrb[18].mxu0  ;;  %v1802_v48 = vpop.f32.mrb[18].mxu1 }
 0x13d   : > { %v1515_v49 = vpop.f32.mrb[19].mxu0  ;;  %3410 = vst [vmem:[%s4022_s27 + $0x18] sm:$0xff] %v2355_v43   ;;  %v2678_v50 = vunpack.c.l.bf16 %v2355_v43  ;;  %v2232_v51 = vadd.f32 %v4010_v17, %v1800_v44  ;;  %v1803_v52 = vadd.f32 %v1802_v48, %v1513_v46  ;;  %v1804_v53 = vpop.f32.mrb[19].mxu1  ;;  %v2679_v54 = vunpack.c.h.bf16 %v2355_v43 }
 0x13f   : > { %1725 = vmatmul.mubr.bf16.gmra.mrb[124].mxu0 %v3686_v42  ;;  %v2741_v55 = vadd.f32 %v2740_v36, %v2678_v50  ;;  %v2233_v56 = vadd.f32 %v4010_v17, %v1803_v52  ;;  %2014 = vmatmul.mubr.bf16.gmra.mrb[124].mxu1 %v3687_v47  ;;  %v2296_v58 = vmax.f32 %v2232_v51, 0.0 }
 0x141   : > { %v2742_v57 = vadd.f32 %v2741_v55, %v2679_v54  ;;  %v2297_v59 = vmax.f32 %v2233_v56, 0.0 }
 0x142   : > { %v1518_v60 = vpop.f32.mrb[20].mxu0  ;;  %v1807_v61 = vpop.f32.mrb[20].mxu1 }
 0x143   : > { %v1520_v62 = vpop.f32.mrb[21].mxu0  ;;  %v2356_v63 = vpack.c.bf16 %v2297_v59, %v2296_v58  ;;  %v1808_v0 = vadd.f32 %v1807_v61, %v1518_v60  ;;  %v1809_v1 = vpop.f32.mrb[21].mxu1 }
 0x144   : > { %v1521_v2 = vpop.f32.mrb[22].mxu0  ;;  %v1810_v3 = vpop.f32.mrb[22].mxu1 }
 0x145   : > { %v1523_v4 = vpop.f32.mrb[23].mxu0  ;;  %3411 = vst [vmem:[%s4022_s27 + $0x20] sm:$0xff] %v2356_v63   ;;  %v2680_v5 = vunpack.c.l.bf16 %v2356_v63  ;;  %v2234_v6 = vadd.f32 %v4010_v17, %v1808_v0  ;;  %v1811_v7 = vadd.f32 %v1810_v3, %v1521_v2  ;;  %v1812_v8 = vpop.f32.mrb[23].mxu1  ;;  %v2681_v9 = vunpack.c.h.bf16 %v2356_v63 }
 0x147   : > { %v2743_v10 = vadd.f32 %v2742_v57, %v2680_v5  ;;  %v2235_v11 = vadd.f32 %v4010_v17, %v1811_v7  ;;  %v2298_v13 = vmax.f32 %v2234_v6, 0.0 }
 0x149   : > { %v2744_v12 = vadd.f32 %v2743_v10, %v2681_v9  ;;  %v2299_v14 = vmax.f32 %v2235_v11, 0.0 }
 0x14a   : > { %v1526_v15 = vpop.f32.mrb[24].mxu0  ;;  %v1815_v16 = vpop.f32.mrb[24].mxu1 }
 0x14b   : > { %v1528_v18 = vpop.f32.mrb[25].mxu0  ;;  %v2357_v19 = vpack.c.bf16 %v2299_v14, %v2298_v13  ;;  %v1816_v20 = vadd.f32 %v1815_v16, %v1526_v15  ;;  %v1817_v21 = vpop.f32.mrb[25].mxu1 }
 0x14c   : > { %v1529_v22 = vpop.f32.mrb[26].mxu0  ;;  %v1818_v23 = vpop.f32.mrb[26].mxu1 }
 0x14d   : > { %v1531_v24 = vpop.f32.mrb[27].mxu0  ;;  %3412 = vst [vmem:[%s4022_s27 + $0x28] sm:$0xff] %v2357_v19   ;;  %v2682_v25 = vunpack.c.l.bf16 %v2357_v19  ;;  %v2236_v26 = vadd.f32 %v4010_v17, %v1816_v20  ;;  %v1819_v27 = vadd.f32 %v1818_v23, %v1529_v22  ;;  %v1820_v28 = vpop.f32.mrb[27].mxu1  ;;  %v2683_v29 = vunpack.c.h.bf16 %v2357_v19 }
 0x14f   : > { %v2745_v30 = vadd.f32 %v2744_v12, %v2682_v25  ;;  %v2237_v31 = vadd.f32 %v4010_v17, %v1819_v27  ;;  %v2300_v33 = vmax.f32 %v2236_v26, 0.0 }
 0x151   : > { %v2746_v32 = vadd.f32 %v2745_v30, %v2683_v29  ;;  %v2301_v34 = vmax.f32 %v2237_v31, 0.0 }
 0x152   : > { %v1534_v35 = vpop.f32.mrb[28].mxu0  ;;  %v1823_v36 = vpop.f32.mrb[28].mxu1 }
 0x153   : > { %v1536_v37 = vpop.f32.mrb[29].mxu0  ;;  %v2358_v38 = vpack.c.bf16 %v2301_v34, %v2300_v33  ;;  %v1824_v39 = vadd.f32 %v1823_v36, %v1534_v35  ;;  %v1825_v40 = vpop.f32.mrb[29].mxu1 }
 0x154   : > { %v1537_v41 = vpop.f32.mrb[30].mxu0  ;;  %v1826_v42 = vpop.f32.mrb[30].mxu1 }
 0x155   : > { %v1539_v43 = vpop.f32.mrb[31].mxu0  ;;  %3413 = vst [vmem:[%s4022_s27 + $0x30] sm:$0xff] %v2358_v38   ;;  %v2684_v44 = vunpack.c.l.bf16 %v2358_v38  ;;  %v2238_v45 = vadd.f32 %v4010_v17, %v1824_v39  ;;  %v1827_v46 = vadd.f32 %v1826_v42, %v1537_v41  ;;  %v1828_v47 = vpop.f32.mrb[31].mxu1  ;;  %v2685_v48 = vunpack.c.h.bf16 %v2358_v38 }
 0x157   : > { %v2747_v49 = vadd.f32 %v2746_v32, %v2684_v44  ;;  %v2239_v50 = vadd.f32 %v4010_v17, %v1827_v46  ;;  %v2302_v52 = vmax.f32 %v2238_v45, 0.0 }
 0x159   : > { %v2748_v51 = vadd.f32 %v2747_v49, %v2685_v48  ;;  %v2303_v53 = vmax.f32 %v2239_v50, 0.0 }
 0x15a   : > { %v1542_v54 = vpop.f32.mrb[32].mxu0  ;;  %v1831_v55 = vpop.f32.mrb[32].mxu1 }
 0x15b   : > { %v1544_v56 = vpop.f32.mrb[33].mxu0  ;;  %v2359_v57 = vpack.c.bf16 %v2303_v53, %v2302_v52  ;;  %v1832_v58 = vadd.f32 %v1831_v55, %v1542_v54  ;;  %v1833_v59 = vpop.f32.mrb[33].mxu1 }
 0x15c   : > { %v1545_v60 = vpop.f32.mrb[34].mxu0  ;;  %v1834_v61 = vpop.f32.mrb[34].mxu1 }
 0x15d   : > { %v1547_v62 = vpop.f32.mrb[35].mxu0  ;;  %3414 = vst [vmem:[%s4022_s27 + $0x38] sm:$0xff] %v2359_v57   ;;  %v2686_v63 = vunpack.c.l.bf16 %v2359_v57  ;;  %v2240_v0 = vadd.f32 %v4010_v17, %v1832_v58  ;;  %v1835_v1 = vadd.f32 %v1834_v61, %v1545_v60  ;;  %v1836_v2 = vpop.f32.mrb[35].mxu1  ;;  %v2687_v3 = vunpack.c.h.bf16 %v2359_v57 }
 0x15f   : > { %v2749_v4 = vadd.f32 %v2748_v51, %v2686_v63  ;;  %v2241_v5 = vadd.f32 %v4010_v17, %v1835_v1  ;;  %v2304_v7 = vmax.f32 %v2240_v0, 0.0 }
 0x161   : > { %v2750_v6 = vadd.f32 %v2749_v4, %v2687_v3  ;;  %v2305_v8 = vmax.f32 %v2241_v5, 0.0 }
 0x162   : > { %v1550_v9 = vpop.f32.mrb[36].mxu0  ;;  %v1839_v10 = vpop.f32.mrb[36].mxu1 }
 0x163   : > { %v1552_v11 = vpop.f32.mrb[37].mxu0  ;;  %v2360_v12 = vpack.c.bf16 %v2305_v8, %v2304_v7  ;;  %v1840_v13 = vadd.f32 %v1839_v10, %v1550_v9  ;;  %v1841_v14 = vpop.f32.mrb[37].mxu1 }
 0x164   : > { %v1553_v15 = vpop.f32.mrb[38].mxu0  ;;  %v1842_v16 = vpop.f32.mrb[38].mxu1 }
 0x165   : > { %v1555_v18 = vpop.f32.mrb[39].mxu0  ;;  %3415 = vst [vmem:[%s4022_s27 + $0x40] sm:$0xff] %v2360_v12   ;;  %v2688_v19 = vunpack.c.l.bf16 %v2360_v12  ;;  %v2242_v20 = vadd.f32 %v4010_v17, %v1840_v13  ;;  %v1843_v21 = vadd.f32 %v1842_v16, %v1553_v15  ;;  %v1844_v22 = vpop.f32.mrb[39].mxu1  ;;  %v2689_v23 = vunpack.c.h.bf16 %v2360_v12 }
 0x167   : > { %v2751_v24 = vadd.f32 %v2750_v6, %v2688_v19  ;;  %v2243_v25 = vadd.f32 %v4010_v17, %v1843_v21  ;;  %v2306_v27 = vmax.f32 %v2242_v20, 0.0 }
 0x169   : > { %v2752_v26 = vadd.f32 %v2751_v24, %v2689_v23  ;;  %v2307_v28 = vmax.f32 %v2243_v25, 0.0 }
 0x16a   : > { %v1558_v29 = vpop.f32.mrb[40].mxu0  ;;  %v1847_v30 = vpop.f32.mrb[40].mxu1 }
 0x16b   : > { %v1560_v31 = vpop.f32.mrb[41].mxu0  ;;  %v2361_v32 = vpack.c.bf16 %v2307_v28, %v2306_v27  ;;  %v1848_v33 = vadd.f32 %v1847_v30, %v1558_v29  ;;  %v1849_v34 = vpop.f32.mrb[41].mxu1 }
 0x16c   : > { %v1561_v35 = vpop.f32.mrb[42].mxu0  ;;  %v1850_v36 = vpop.f32.mrb[42].mxu1 }
 0x16d   : > { %v1563_v37 = vpop.f32.mrb[43].mxu0  ;;  %3416 = vst [vmem:[%s4022_s27 + $0x48] sm:$0xff] %v2361_v32   ;;  %v2690_v38 = vunpack.c.l.bf16 %v2361_v32  ;;  %v2244_v39 = vadd.f32 %v4010_v17, %v1848_v33  ;;  %v1851_v40 = vadd.f32 %v1850_v36, %v1561_v35  ;;  %v1852_v41 = vpop.f32.mrb[43].mxu1  ;;  %v2691_v42 = vunpack.c.h.bf16 %v2361_v32 }
 0x16f   : > { %v2753_v43 = vadd.f32 %v2752_v26, %v2690_v38  ;;  %v2245_v44 = vadd.f32 %v4010_v17, %v1851_v40  ;;  %v2308_v46 = vmax.f32 %v2244_v39, 0.0 }
 0x171   : > { %v2754_v45 = vadd.f32 %v2753_v43, %v2691_v42  ;;  %v2309_v47 = vmax.f32 %v2245_v44, 0.0 }
 0x172   : > { %v1566_v48 = vpop.f32.mrb[44].mxu0  ;;  %v1855_v49 = vpop.f32.mrb[44].mxu1 }
 0x173   : > { %v1568_v50 = vpop.f32.mrb[45].mxu0  ;;  %v2362_v51 = vpack.c.bf16 %v2309_v47, %v2308_v46  ;;  %v1856_v52 = vadd.f32 %v1855_v49, %v1566_v48  ;;  %v1857_v53 = vpop.f32.mrb[45].mxu1 }
 0x174   : > { %v1569_v54 = vpop.f32.mrb[46].mxu0  ;;  %v1858_v55 = vpop.f32.mrb[46].mxu1 }
 0x175   : > { %v1571_v56 = vpop.f32.mrb[47].mxu0  ;;  %3417 = vst [vmem:[%s4022_s27 + $0x50] sm:$0xff] %v2362_v51   ;;  %v2692_v57 = vunpack.c.l.bf16 %v2362_v51  ;;  %v2246_v58 = vadd.f32 %v4010_v17, %v1856_v52  ;;  %v1859_v59 = vadd.f32 %v1858_v55, %v1569_v54  ;;  %v1860_v60 = vpop.f32.mrb[47].mxu1  ;;  %v2693_v61 = vunpack.c.h.bf16 %v2362_v51 }
 0x177   : > { %v2755_v62 = vadd.f32 %v2754_v45, %v2692_v57  ;;  %v2247_v63 = vadd.f32 %v4010_v17, %v1859_v59  ;;  %v2310_v1 = vmax.f32 %v2246_v58, 0.0 }
 0x179   : > { %v2756_v0 = vadd.f32 %v2755_v62, %v2693_v61  ;;  %v2311_v2 = vmax.f32 %v2247_v63, 0.0 }
 0x17a   : > { %v1574_v3 = vpop.f32.mrb[48].mxu0  ;;  %v1863_v4 = vpop.f32.mrb[48].mxu1 }
 0x17b   : > { %v1576_v5 = vpop.f32.mrb[49].mxu0  ;;  %v2363_v6 = vpack.c.bf16 %v2311_v2, %v2310_v1  ;;  %v1864_v7 = vadd.f32 %v1863_v4, %v1574_v3  ;;  %v1865_v8 = vpop.f32.mrb[49].mxu1 }
 0x17c   : > { %v1577_v9 = vpop.f32.mrb[50].mxu0  ;;  %v1866_v10 = vpop.f32.mrb[50].mxu1 }
 0x17d   : > { %v1579_v11 = vpop.f32.mrb[51].mxu0  ;;  %3418 = vst [vmem:[%s4022_s27 + $0x58] sm:$0xff] %v2363_v6   ;;  %v2694_v12 = vunpack.c.l.bf16 %v2363_v6  ;;  %v2248_v13 = vadd.f32 %v4010_v17, %v1864_v7  ;;  %v1867_v14 = vadd.f32 %v1866_v10, %v1577_v9  ;;  %v1868_v15 = vpop.f32.mrb[51].mxu1  ;;  %v2695_v16 = vunpack.c.h.bf16 %v2363_v6 }
 0x17f   : > { %v2757_v18 = vadd.f32 %v2756_v0, %v2694_v12  ;;  %v2249_v19 = vadd.f32 %v4010_v17, %v1867_v14  ;;  %v2312_v21 = vmax.f32 %v2248_v13, 0.0 }
 0x181   : > { %v2758_v20 = vadd.f32 %v2757_v18, %v2695_v16  ;;  %v2313_v22 = vmax.f32 %v2249_v19, 0.0 }
 0x182   : > { %v1582_v23 = vpop.f32.mrb[52].mxu0  ;;  %v1871_v24 = vpop.f32.mrb[52].mxu1 }
 0x183   : > { %v1584_v25 = vpop.f32.mrb[53].mxu0  ;;  %v2364_v26 = vpack.c.bf16 %v2313_v22, %v2312_v21  ;;  %v1872_v27 = vadd.f32 %v1871_v24, %v1582_v23  ;;  %v1873_v28 = vpop.f32.mrb[53].mxu1 }
 0x184   : > { %v1585_v29 = vpop.f32.mrb[54].mxu0  ;;  %v1874_v30 = vpop.f32.mrb[54].mxu1 }
 0x185   : > { %v1587_v31 = vpop.f32.mrb[55].mxu0  ;;  %3419 = vst [vmem:[%s4022_s27 + $0x60] sm:$0xff] %v2364_v26   ;;  %v2696_v32 = vunpack.c.l.bf16 %v2364_v26  ;;  %v2250_v33 = vadd.f32 %v4010_v17, %v1872_v27  ;;  %v1875_v34 = vadd.f32 %v1874_v30, %v1585_v29  ;;  %v1876_v35 = vpop.f32.mrb[55].mxu1  ;;  %v2697_v36 = vunpack.c.h.bf16 %v2364_v26 }
 0x187   : > { %v2759_v37 = vadd.f32 %v2758_v20, %v2696_v32  ;;  %v2251_v38 = vadd.f32 %v4010_v17, %v1875_v34  ;;  %v2314_v40 = vmax.f32 %v2250_v33, 0.0 }
 0x189   : > { %v2760_v39 = vadd.f32 %v2759_v37, %v2697_v36  ;;  %v2315_v41 = vmax.f32 %v2251_v38, 0.0 }
 0x18a   : > { %v1590_v42 = vpop.f32.mrb[56].mxu0  ;;  %v1879_v43 = vpop.f32.mrb[56].mxu1 }
 0x18b   : > { %v1592_v44 = vpop.f32.mrb[57].mxu0  ;;  %v2365_v45 = vpack.c.bf16 %v2315_v41, %v2314_v40  ;;  %v1880_v46 = vadd.f32 %v1879_v43, %v1590_v42  ;;  %v1881_v47 = vpop.f32.mrb[57].mxu1 }
 0x18c   : > { %v1593_v48 = vpop.f32.mrb[58].mxu0  ;;  %v1882_v49 = vpop.f32.mrb[58].mxu1 }
 0x18d   : > { %v1595_v50 = vpop.f32.mrb[59].mxu0  ;;  %3420 = vst [vmem:[%s4022_s27 + $0x68] sm:$0xff] %v2365_v45   ;;  %v2698_v51 = vunpack.c.l.bf16 %v2365_v45  ;;  %v2252_v52 = vadd.f32 %v4010_v17, %v1880_v46  ;;  %v1883_v53 = vadd.f32 %v1882_v49, %v1593_v48  ;;  %v1884_v54 = vpop.f32.mrb[59].mxu1  ;;  %v2699_v55 = vunpack.c.h.bf16 %v2365_v45 }
 0x18f   : > { %v2761_v56 = vadd.f32 %v2760_v39, %v2698_v51  ;;  %v2253_v57 = vadd.f32 %v4010_v17, %v1883_v53  ;;  %v2316_v59 = vmax.f32 %v2252_v52, 0.0 }
 0x191   : > { %v2762_v58 = vadd.f32 %v2761_v56, %v2699_v55  ;;  %v2317_v60 = vmax.f32 %v2253_v57, 0.0 }
 0x192   : > { %v1598_v61 = vpop.f32.mrb[60].mxu0  ;;  %v1887_v62 = vpop.f32.mrb[60].mxu1 }
 0x193   : > { %v1600_v63 = vpop.f32.mrb[61].mxu0  ;;  %v2366_v0 = vpack.c.bf16 %v2317_v60, %v2316_v59  ;;  %v1888_v1 = vadd.f32 %v1887_v62, %v1598_v61  ;;  %v1889_v2 = vpop.f32.mrb[61].mxu1 }
 0x194   : > { %v1601_v3 = vpop.f32.mrb[62].mxu0  ;;  %v1890_v4 = vpop.f32.mrb[62].mxu1 }
 0x195   : > { %v1603_v5 = vpop.f32.mrb[63].mxu0  ;;  %3421 = vst [vmem:[%s4022_s27 + $0x70] sm:$0xff] %v2366_v0   ;;  %v2700_v6 = vunpack.c.l.bf16 %v2366_v0  ;;  %v2254_v7 = vadd.f32 %v4010_v17, %v1888_v1  ;;  %v1891_v8 = vadd.f32 %v1890_v4, %v1601_v3  ;;  %v1892_v9 = vpop.f32.mrb[63].mxu1  ;;  %v2701_v10 = vunpack.c.h.bf16 %v2366_v0 }
 0x197   : > { %v2763_v11 = vadd.f32 %v2762_v58, %v2700_v6  ;;  %v2255_v12 = vadd.f32 %v4010_v17, %v1891_v8  ;;  %v2318_v14 = vmax.f32 %v2254_v7, 0.0 }
 0x199   : > { %v2764_v13 = vadd.f32 %v2763_v11, %v2701_v10  ;;  %v2319_v15 = vmax.f32 %v2255_v12, 0.0 }
 0x19a   : > { %v1606_v16 = vpop.f32.mrb[64].mxu0  ;;  %v1895_v18 = vpop.f32.mrb[64].mxu1 }
 0x19b   : > { %v1608_v19 = vpop.f32.mrb[65].mxu0  ;;  %v2367_v20 = vpack.c.bf16 %v2319_v15, %v2318_v14  ;;  %v1896_v21 = vadd.f32 %v1895_v18, %v1606_v16  ;;  %v1897_v22 = vpop.f32.mrb[65].mxu1 }
 0x19c   : > { %v1609_v23 = vpop.f32.mrb[66].mxu0  ;;  %v1898_v24 = vpop.f32.mrb[66].mxu1 }
 0x19d   : > { %v1611_v25 = vpop.f32.mrb[67].mxu0  ;;  %3422 = vst [vmem:[%s4022_s27 + $0x78] sm:$0xff] %v2367_v20   ;;  %v2702_v26 = vunpack.c.l.bf16 %v2367_v20  ;;  %v2256_v27 = vadd.f32 %v4010_v17, %v1896_v21  ;;  %v1899_v28 = vadd.f32 %v1898_v24, %v1609_v23  ;;  %v1900_v29 = vpop.f32.mrb[67].mxu1  ;;  %v2703_v30 = vunpack.c.h.bf16 %v2367_v20 }
 0x19f   : > { %v2765_v31 = vadd.f32 %v2764_v13, %v2702_v26  ;;  %v2257_v32 = vadd.f32 %v4010_v17, %v1899_v28  ;;  %v2320_v34 = vmax.f32 %v2256_v27, 0.0 }
 0x1a1   : > { %v2766_v33 = vadd.f32 %v2765_v31, %v2703_v30  ;;  %v2321_v35 = vmax.f32 %v2257_v32, 0.0 }
 0x1a2   : > { %v1614_v36 = vpop.f32.mrb[68].mxu0  ;;  %v1903_v37 = vpop.f32.mrb[68].mxu1 }
 0x1a3   : > { %v1616_v38 = vpop.f32.mrb[69].mxu0  ;;  %v2368_v39 = vpack.c.bf16 %v2321_v35, %v2320_v34  ;;  %v1904_v40 = vadd.f32 %v1903_v37, %v1614_v36  ;;  %v1905_v41 = vpop.f32.mrb[69].mxu1 }
 0x1a4   : > { %v1617_v42 = vpop.f32.mrb[70].mxu0  ;;  %v1906_v43 = vpop.f32.mrb[70].mxu1 }
 0x1a5   : > { %v1619_v44 = vpop.f32.mrb[71].mxu0  ;;  %3423 = vst [vmem:[%s4022_s27 + $0x80] sm:$0xff] %v2368_v39   ;;  %v2704_v45 = vunpack.c.l.bf16 %v2368_v39  ;;  %v2258_v46 = vadd.f32 %v4010_v17, %v1904_v40  ;;  %v1907_v47 = vadd.f32 %v1906_v43, %v1617_v42  ;;  %v1908_v48 = vpop.f32.mrb[71].mxu1  ;;  %v2705_v49 = vunpack.c.h.bf16 %v2368_v39 }
 0x1a7   : > { %v2767_v50 = vadd.f32 %v2766_v33, %v2704_v45  ;;  %v2259_v51 = vadd.f32 %v4010_v17, %v1907_v47  ;;  %v2322_v53 = vmax.f32 %v2258_v46, 0.0 }
 0x1a9   : > { %v2768_v52 = vadd.f32 %v2767_v50, %v2705_v49  ;;  %v2323_v54 = vmax.f32 %v2259_v51, 0.0 }
 0x1aa   : > { %v1622_v55 = vpop.f32.mrb[72].mxu0  ;;  %v1911_v56 = vpop.f32.mrb[72].mxu1 }
 0x1ab   : > { %v1624_v57 = vpop.f32.mrb[73].mxu0  ;;  %v2369_v58 = vpack.c.bf16 %v2323_v54, %v2322_v53  ;;  %v1912_v59 = vadd.f32 %v1911_v56, %v1622_v55  ;;  %v1913_v60 = vpop.f32.mrb[73].mxu1 }
 0x1ac   : > { %v1625_v61 = vpop.f32.mrb[74].mxu0  ;;  %v1914_v62 = vpop.f32.mrb[74].mxu1 }
 0x1ad   : > { %v1627_v63 = vpop.f32.mrb[75].mxu0  ;;  %3424 = vst [vmem:[%s4022_s27 + $0x88] sm:$0xff] %v2369_v58   ;;  %v2706_v0 = vunpack.c.l.bf16 %v2369_v58  ;;  %v2260_v1 = vadd.f32 %v4010_v17, %v1912_v59  ;;  %v1915_v2 = vadd.f32 %v1914_v62, %v1625_v61  ;;  %v1916_v3 = vpop.f32.mrb[75].mxu1  ;;  %v2707_v4 = vunpack.c.h.bf16 %v2369_v58 }
 0x1af   : > { %v2769_v5 = vadd.f32 %v2768_v52, %v2706_v0  ;;  %v2261_v6 = vadd.f32 %v4010_v17, %v1915_v2  ;;  %v2324_v8 = vmax.f32 %v2260_v1, 0.0 }
 0x1b1   : > { %v2770_v7 = vadd.f32 %v2769_v5, %v2707_v4  ;;  %v2325_v9 = vmax.f32 %v2261_v6, 0.0 }
 0x1b2   : > { %v1630_v10 = vpop.f32.mrb[76].mxu0  ;;  %v1919_v11 = vpop.f32.mrb[76].mxu1 }
 0x1b3   : > { %v1632_v12 = vpop.f32.mrb[77].mxu0  ;;  %v2370_v13 = vpack.c.bf16 %v2325_v9, %v2324_v8  ;;  %v1920_v14 = vadd.f32 %v1919_v11, %v1630_v10  ;;  %v1921_v15 = vpop.f32.mrb[77].mxu1 }
 0x1b4   : > { %v1633_v16 = vpop.f32.mrb[78].mxu0  ;;  %v1922_v18 = vpop.f32.mrb[78].mxu1 }
 0x1b5   : > { %v1635_v19 = vpop.f32.mrb[79].mxu0  ;;  %3425 = vst [vmem:[%s4022_s27 + $0x90] sm:$0xff] %v2370_v13   ;;  %v2708_v20 = vunpack.c.l.bf16 %v2370_v13  ;;  %v2262_v21 = vadd.f32 %v4010_v17, %v1920_v14  ;;  %v1923_v22 = vadd.f32 %v1922_v18, %v1633_v16  ;;  %v1924_v23 = vpop.f32.mrb[79].mxu1  ;;  %v2709_v24 = vunpack.c.h.bf16 %v2370_v13 }
 0x1b7   : > { %v2771_v25 = vadd.f32 %v2770_v7, %v2708_v20  ;;  %v2263_v26 = vadd.f32 %v4010_v17, %v1923_v22  ;;  %v2326_v28 = vmax.f32 %v2262_v21, 0.0 }
 0x1b9   : > { %v2772_v27 = vadd.f32 %v2771_v25, %v2709_v24  ;;  %v2327_v29 = vmax.f32 %v2263_v26, 0.0 }
 0x1ba   : > { %v1638_v30 = vpop.f32.mrb[80].mxu0  ;;  %v1927_v31 = vpop.f32.mrb[80].mxu1 }
 0x1bb   : > { %v1640_v32 = vpop.f32.mrb[81].mxu0  ;;  %v2371_v33 = vpack.c.bf16 %v2327_v29, %v2326_v28  ;;  %v1928_v34 = vadd.f32 %v1927_v31, %v1638_v30  ;;  %v1929_v35 = vpop.f32.mrb[81].mxu1 }
 0x1bc   : > { %v1641_v36 = vpop.f32.mrb[82].mxu0  ;;  %v1930_v37 = vpop.f32.mrb[82].mxu1 }
 0x1bd   : > { %v1643_v38 = vpop.f32.mrb[83].mxu0  ;;  %3426 = vst [vmem:[%s4022_s27 + $0x98] sm:$0xff] %v2371_v33   ;;  %v2710_v39 = vunpack.c.l.bf16 %v2371_v33  ;;  %v2264_v40 = vadd.f32 %v4010_v17, %v1928_v34  ;;  %v1931_v41 = vadd.f32 %v1930_v37, %v1641_v36  ;;  %v1932_v42 = vpop.f32.mrb[83].mxu1  ;;  %v2711_v43 = vunpack.c.h.bf16 %v2371_v33 }
 0x1bf   : > { %v2773_v44 = vadd.f32 %v2772_v27, %v2710_v39  ;;  %v2265_v45 = vadd.f32 %v4010_v17, %v1931_v41  ;;  %v2328_v47 = vmax.f32 %v2264_v40, 0.0 }
 0x1c1   : > { %v2774_v46 = vadd.f32 %v2773_v44, %v2711_v43  ;;  %v2329_v48 = vmax.f32 %v2265_v45, 0.0 }
 0x1c2   : > { %v1646_v49 = vpop.f32.mrb[84].mxu0  ;;  %v1935_v50 = vpop.f32.mrb[84].mxu1 }
 0x1c3   : > { %v1648_v51 = vpop.f32.mrb[85].mxu0  ;;  %v2372_v52 = vpack.c.bf16 %v2329_v48, %v2328_v47  ;;  %v1936_v53 = vadd.f32 %v1935_v50, %v1646_v49  ;;  %v1937_v54 = vpop.f32.mrb[85].mxu1 }
 0x1c4   : > { %v1649_v55 = vpop.f32.mrb[86].mxu0  ;;  %v1938_v56 = vpop.f32.mrb[86].mxu1 }
 0x1c5   : > { %v1651_v57 = vpop.f32.mrb[87].mxu0  ;;  %3427 = vst [vmem:[%s4022_s27 + $0xa0] sm:$0xff] %v2372_v52   ;;  %v2712_v58 = vunpack.c.l.bf16 %v2372_v52  ;;  %v2266_v59 = vadd.f32 %v4010_v17, %v1936_v53  ;;  %v1939_v60 = vadd.f32 %v1938_v56, %v1649_v55  ;;  %v1940_v61 = vpop.f32.mrb[87].mxu1  ;;  %v2713_v62 = vunpack.c.h.bf16 %v2372_v52  ;;  %v4111_v53 = vld [vmem:[%s4152_s2] ss:$0 sm:$0xff] }
 0x1c7   : > { %v2775_v63 = vadd.f32 %v2774_v46, %v2712_v58  ;;  %v2267_v0 = vadd.f32 %v4010_v17, %v1939_v60  ;;  %v2330_v2 = vmax.f32 %v2266_v59, 0.0 }
 0x1c9   : > { %v2776_v1 = vadd.f32 %v2775_v63, %v2713_v62  ;;  %v2331_v3 = vmax.f32 %v2267_v0, 0.0 }
 0x1ca   : > { %v1654_v4 = vpop.f32.mrb[88].mxu0  ;;  %v1943_v5 = vpop.f32.mrb[88].mxu1 }
 0x1cb   : > { %v1656_v6 = vpop.f32.mrb[89].mxu0  ;;  %v2373_v7 = vpack.c.bf16 %v2331_v3, %v2330_v2  ;;  %v1944_v8 = vadd.f32 %v1943_v5, %v1654_v4  ;;  %v1945_v9 = vpop.f32.mrb[89].mxu1 }
 0x1cc   : > { %v1657_v10 = vpop.f32.mrb[90].mxu0  ;;  %v1946_v11 = vpop.f32.mrb[90].mxu1 }
 0x1cd   : > { %v1659_v12 = vpop.f32.mrb[91].mxu0  ;;  %3428 = vst [vmem:[%s4022_s27 + $0xa8] sm:$0xff] %v2373_v7   ;;  %v2714_v13 = vunpack.c.l.bf16 %v2373_v7  ;;  %v2268_v14 = vadd.f32 %v4010_v17, %v1944_v8  ;;  %v1947_v15 = vadd.f32 %v1946_v11, %v1657_v10  ;;  %v1948_v16 = vpop.f32.mrb[91].mxu1  ;;  %v2715_v18 = vunpack.c.h.bf16 %v2373_v7 }
 0x1cf   : > { %v2777_v19 = vadd.f32 %v2776_v1, %v2714_v13  ;;  %v2269_v20 = vadd.f32 %v4010_v17, %v1947_v15  ;;  %v2332_v22 = vmax.f32 %v2268_v14, 0.0 }
 0x1d1   : > { %v2778_v21 = vadd.f32 %v2777_v19, %v2715_v18  ;;  %v2333_v23 = vmax.f32 %v2269_v20, 0.0 }
 0x1d2   : > { %v1662_v24 = vpop.f32.mrb[92].mxu0  ;;  %v1951_v25 = vpop.f32.mrb[92].mxu1 }
 0x1d3   : > { %v1664_v26 = vpop.f32.mrb[93].mxu0  ;;  %v2374_v27 = vpack.c.bf16 %v2333_v23, %v2332_v22  ;;  %v1952_v28 = vadd.f32 %v1951_v25, %v1662_v24  ;;  %v1953_v29 = vpop.f32.mrb[93].mxu1 }
 0x1d4   : > { %v1665_v30 = vpop.f32.mrb[94].mxu0  ;;  %v1954_v31 = vpop.f32.mrb[94].mxu1 }
 0x1d5   : > { %v1667_v32 = vpop.f32.mrb[95].mxu0  ;;  %3429 = vst [vmem:[%s4022_s27 + $0xb0] sm:$0xff] %v2374_v27   ;;  %v2716_v33 = vunpack.c.l.bf16 %v2374_v27  ;;  %v2270_v34 = vadd.f32 %v4010_v17, %v1952_v28  ;;  %v1955_v35 = vadd.f32 %v1954_v31, %v1665_v30  ;;  %v1956_v36 = vpop.f32.mrb[95].mxu1  ;;  %v2717_v37 = vunpack.c.h.bf16 %v2374_v27 }
 0x1d7   : > { %v2779_v38 = vadd.f32 %v2778_v21, %v2716_v33  ;;  %v2271_v39 = vadd.f32 %v4010_v17, %v1955_v35  ;;  %v2334_v41 = vmax.f32 %v2270_v34, 0.0 }
 0x1d9   : > { %v2780_v40 = vadd.f32 %v2779_v38, %v2717_v37  ;;  %v2335_v42 = vmax.f32 %v2271_v39, 0.0 }
 0x1da   : > { %v1670_v43 = vpop.f32.mrb[96].mxu0  ;;  %v1959_v44 = vpop.f32.mrb[96].mxu1 }
 0x1db   : > { %v1672_v45 = vpop.f32.mrb[97].mxu0  ;;  %v2375_v46 = vpack.c.bf16 %v2335_v42, %v2334_v41  ;;  %v1960_v47 = vadd.f32 %v1959_v44, %v1670_v43  ;;  %v1961_v48 = vpop.f32.mrb[97].mxu1 }
 0x1dc   : > { %v1673_v49 = vpop.f32.mrb[98].mxu0  ;;  %v1962_v50 = vpop.f32.mrb[98].mxu1 }
 0x1dd   : > { %v1675_v51 = vpop.f32.mrb[99].mxu0  ;;  %3430 = vst [vmem:[%s4022_s27 + $0xb8] sm:$0xff] %v2375_v46   ;;  %v2718_v52 = vunpack.c.l.bf16 %v2375_v46  ;;  %v2272_v17 = vadd.f32 %v4111_v53, %v1960_v47  ;;  %v1963_v54 = vadd.f32 %v1962_v50, %v1673_v49  ;;  %v1964_v55 = vpop.f32.mrb[99].mxu1  ;;  %v2719_v56 = vunpack.c.h.bf16 %v2375_v46 }
 0x1df   : > { %v2781_v57 = vadd.f32 %v2780_v40, %v2718_v52  ;;  %v2273_v58 = vadd.f32 %v4111_v53, %v1963_v54  ;;  %v2336_v60 = vmax.f32 %v2272_v17, 0.0 }
 0x1e1   : > { %v2782_v59 = vadd.f32 %v2781_v57, %v2719_v56  ;;  %v2337_v61 = vmax.f32 %v2273_v58, 0.0 }
 0x1e2   : > { %v1678_v62 = vpop.f32.mrb[100].mxu0  ;;  %v1967_v63 = vpop.f32.mrb[100].mxu1 }
 0x1e3   : > { %v1680_v0 = vpop.f32.mrb[101].mxu0  ;;  %v2376_v1 = vpack.c.bf16 %v2337_v61, %v2336_v60  ;;  %v1968_v2 = vadd.f32 %v1967_v63, %v1678_v62  ;;  %v1969_v3 = vpop.f32.mrb[101].mxu1 }
 0x1e4   : > { %v1681_v4 = vpop.f32.mrb[102].mxu0  ;;  %v1970_v5 = vpop.f32.mrb[102].mxu1 }
 0x1e5   : > { %v1683_v6 = vpop.f32.mrb[103].mxu0  ;;  %3431 = vst [vmem:[%s4022_s27 + $0xc0] sm:$0xff] %v2376_v1   ;;  %v2720_v7 = vunpack.c.l.bf16 %v2376_v1  ;;  %v2274_v8 = vadd.f32 %v4111_v53, %v1968_v2  ;;  %v1971_v9 = vadd.f32 %v1970_v5, %v1681_v4  ;;  %v1972_v10 = vpop.f32.mrb[103].mxu1  ;;  %v2721_v11 = vunpack.c.h.bf16 %v2376_v1 }
 0x1e7   : > { %v2783_v12 = vadd.f32 %v2782_v59, %v2720_v7  ;;  %v2275_v13 = vadd.f32 %v4111_v53, %v1971_v9  ;;  %v2338_v15 = vmax.f32 %v2274_v8, 0.0 }
 0x1e9   : > { %v2784_v14 = vadd.f32 %v2783_v12, %v2721_v11  ;;  %v2339_v16 = vmax.f32 %v2275_v13, 0.0 }
 0x1ea   : > { %v1686_v18 = vpop.f32.mrb[104].mxu0  ;;  %v1975_v19 = vpop.f32.mrb[104].mxu1 }
 0x1eb   : > { %v1688_v20 = vpop.f32.mrb[105].mxu0  ;;  %v2377_v21 = vpack.c.bf16 %v2339_v16, %v2338_v15  ;;  %v1976_v22 = vadd.f32 %v1975_v19, %v1686_v18  ;;  %v1977_v23 = vpop.f32.mrb[105].mxu1 }
 0x1ec   : > { %v1689_v24 = vpop.f32.mrb[106].mxu0  ;;  %v1978_v25 = vpop.f32.mrb[106].mxu1 }
 0x1ed   : > { %v1691_v26 = vpop.f32.mrb[107].mxu0  ;;  %3432 = vst [vmem:[%s4022_s27 + $0xc8] sm:$0xff] %v2377_v21   ;;  %v2722_v27 = vunpack.c.l.bf16 %v2377_v21  ;;  %v2276_v28 = vadd.f32 %v4111_v53, %v1976_v22  ;;  %v1979_v29 = vadd.f32 %v1978_v25, %v1689_v24  ;;  %v1980_v30 = vpop.f32.mrb[107].mxu1  ;;  %v2723_v31 = vunpack.c.h.bf16 %v2377_v21 }
 0x1ef   : > { %v2785_v32 = vadd.f32 %v2784_v14, %v2722_v27  ;;  %v2277_v33 = vadd.f32 %v4111_v53, %v1979_v29  ;;  %v2340_v35 = vmax.f32 %v2276_v28, 0.0 }
 0x1f1   : > { %v2786_v34 = vadd.f32 %v2785_v32, %v2723_v31  ;;  %v2341_v36 = vmax.f32 %v2277_v33, 0.0 }
 0x1f2   : > { %v1694_v37 = vpop.f32.mrb[108].mxu0  ;;  %v1983_v38 = vpop.f32.mrb[108].mxu1 }
 0x1f3   : > { %v1696_v39 = vpop.f32.mrb[109].mxu0  ;;  %v2378_v40 = vpack.c.bf16 %v2341_v36, %v2340_v35  ;;  %v1984_v41 = vadd.f32 %v1983_v38, %v1694_v37  ;;  %v1985_v42 = vpop.f32.mrb[109].mxu1 }
 0x1f4   : > { %v1697_v43 = vpop.f32.mrb[110].mxu0  ;;  %v1986_v44 = vpop.f32.mrb[110].mxu1 }
 0x1f5   : > { %v1699_v45 = vpop.f32.mrb[111].mxu0  ;;  %3433 = vst [vmem:[%s4022_s27 + $0xd0] sm:$0xff] %v2378_v40   ;;  %v2724_v46 = vunpack.c.l.bf16 %v2378_v40  ;;  %v2278_v47 = vadd.f32 %v4111_v53, %v1984_v41  ;;  %v1987_v48 = vadd.f32 %v1986_v44, %v1697_v43  ;;  %v1988_v49 = vpop.f32.mrb[111].mxu1  ;;  %v2725_v50 = vunpack.c.h.bf16 %v2378_v40 }
 0x1f7   : > { %v2787_v51 = vadd.f32 %v2786_v34, %v2724_v46  ;;  %v2279_v52 = vadd.f32 %v4111_v53, %v1987_v48  ;;  %v2342_v54 = vmax.f32 %v2278_v47, 0.0 }
 0x1f9   : > { %v2788_v17 = vadd.f32 %v2787_v51, %v2725_v50  ;;  %v2343_v55 = vmax.f32 %v2279_v52, 0.0 }
 0x1fa   : > { %v1702_v56 = vpop.f32.mrb[112].mxu0  ;;  %v1991_v57 = vpop.f32.mrb[112].mxu1 }
 0x1fb   : > { %v1704_v58 = vpop.f32.mrb[113].mxu0  ;;  %v2379_v59 = vpack.c.bf16 %v2343_v55, %v2342_v54  ;;  %v1992_v60 = vadd.f32 %v1991_v57, %v1702_v56  ;;  %v1993_v61 = vpop.f32.mrb[113].mxu1 }
 0x1fc   : > { %v1705_v62 = vpop.f32.mrb[114].mxu0  ;;  %v1994_v63 = vpop.f32.mrb[114].mxu1 }
 0x1fd   : > { %v1707_v0 = vpop.f32.mrb[115].mxu0  ;;  %3434 = vst [vmem:[%s4022_s27 + $0xd8] sm:$0xff] %v2379_v59   ;;  %v2726_v1 = vunpack.c.l.bf16 %v2379_v59  ;;  %v2280_v2 = vadd.f32 %v4111_v53, %v1992_v60  ;;  %v1995_v3 = vadd.f32 %v1994_v63, %v1705_v62  ;;  %v1996_v4 = vpop.f32.mrb[115].mxu1  ;;  %v2727_v5 = vunpack.c.h.bf16 %v2379_v59 }
 0x1ff   : > { %v2789_v6 = vadd.f32 %v2788_v17, %v2726_v1  ;;  %v2281_v7 = vadd.f32 %v4111_v53, %v1995_v3  ;;  %v2344_v9 = vmax.f32 %v2280_v2, 0.0 }
 0x201   : > { %v2790_v8 = vadd.f32 %v2789_v6, %v2727_v5  ;;  %v2345_v10 = vmax.f32 %v2281_v7, 0.0 }
 0x202   : > { %v1710_v11 = vpop.f32.mrb[116].mxu0  ;;  %v1999_v12 = vpop.f32.mrb[116].mxu1 }
 0x203   : > { %v1712_v13 = vpop.f32.mrb[117].mxu0  ;;  %v2380_v14 = vpack.c.bf16 %v2345_v10, %v2344_v9  ;;  %v2000_v15 = vadd.f32 %v1999_v12, %v1710_v11  ;;  %v2001_v16 = vpop.f32.mrb[117].mxu1 }
 0x204   : > { %v1713_v18 = vpop.f32.mrb[118].mxu0  ;;  %v2002_v19 = vpop.f32.mrb[118].mxu1 }
 0x205   : > { %v1715_v20 = vpop.f32.mrb[119].mxu0  ;;  %3435 = vst [vmem:[%s4022_s27 + $0xe0] sm:$0xff] %v2380_v14   ;;  %v2728_v21 = vunpack.c.l.bf16 %v2380_v14  ;;  %v2282_v22 = vadd.f32 %v4111_v53, %v2000_v15  ;;  %v2003_v23 = vadd.f32 %v2002_v19, %v1713_v18  ;;  %v2004_v24 = vpop.f32.mrb[119].mxu1  ;;  %v2729_v25 = vunpack.c.h.bf16 %v2380_v14 }
 0x207   : > { %v2791_v26 = vadd.f32 %v2790_v8, %v2728_v21  ;;  %v2283_v27 = vadd.f32 %v4111_v53, %v2003_v23  ;;  %v2346_v29 = vmax.f32 %v2282_v22, 0.0 }
 0x209   : > { %v2792_v28 = vadd.f32 %v2791_v26, %v2729_v25  ;;  %v2347_v30 = vmax.f32 %v2283_v27, 0.0 }
 0x20a   : > { %v1718_v31 = vpop.f32.mrb[120].mxu0  ;;  %v2007_v32 = vpop.f32.mrb[120].mxu1 }
 0x20b   : > { %v1720_v33 = vpop.f32.mrb[121].mxu0  ;;  %v2381_v34 = vpack.c.bf16 %v2347_v30, %v2346_v29  ;;  %v2008_v35 = vadd.f32 %v2007_v32, %v1718_v31  ;;  %v2009_v36 = vpop.f32.mrb[121].mxu1 }
 0x20c   : > { %v1721_v37 = vpop.f32.mrb[122].mxu0  ;;  %v2010_v38 = vpop.f32.mrb[122].mxu1 }
 0x20d   : > { %v1723_v39 = vpop.f32.mrb[123].mxu0  ;;  %3436 = vst [vmem:[%s4022_s27 + $0xe8] sm:$0xff] %v2381_v34   ;;  %v2730_v40 = vunpack.c.l.bf16 %v2381_v34  ;;  %v2284_v41 = vadd.f32 %v4111_v53, %v2008_v35  ;;  %v2011_v42 = vadd.f32 %v2010_v38, %v1721_v37  ;;  %v2012_v43 = vpop.f32.mrb[123].mxu1  ;;  %v2731_v44 = vunpack.c.h.bf16 %v2381_v34 }
 0x20f   : > { %v2793_v45 = vadd.f32 %v2792_v28, %v2730_v40  ;;  %v2285_v46 = vadd.f32 %v4111_v53, %v2011_v42  ;;  %v2348_v48 = vmax.f32 %v2284_v41, 0.0 }
 0x211   : > { %v2794_v47 = vadd.f32 %v2793_v45, %v2731_v44  ;;  %v2349_v49 = vmax.f32 %v2285_v46, 0.0 }
 0x212   : > { %v1726_v50 = vpop.f32.mrb[124].mxu0  ;;  %v2015_v51 = vpop.f32.mrb[124].mxu1 }
 0x213   : > { %v1728_v52 = vpop.f32.mrb[125].mxu0  ;;  %v2382_v17 = vpack.c.bf16 %v2349_v49, %v2348_v48  ;;  %v2016_v54 = vadd.f32 %v2015_v51, %v1726_v50  ;;  %v2017_v55 = vpop.f32.mrb[125].mxu1 }
 0x214   : > { %v1729_v56 = vpop.f32.mrb[126].mxu0  ;;  %v2018_v57 = vpop.f32.mrb[126].mxu1 }
 0x215   : > { %v1731_v58 = vpop.f32.mrb[127].mxu0  ;;  %3437 = vst [vmem:[%s4022_s27 + $0xf0] sm:$0xff] %v2382_v17   ;;  %v2732_v59 = vunpack.c.l.bf16 %v2382_v17  ;;  %v2286_v60 = vadd.f32 %v4111_v53, %v2016_v54  ;;  %v2019_v61 = vadd.f32 %v2018_v57, %v1729_v56  ;;  %v2020_v62 = vpop.f32.mrb[127].mxu1  ;;  %v2733_v63 = vunpack.c.h.bf16 %v2382_v17 }
 0x217   : > { %v2795_v0 = vadd.f32 %v2794_v47, %v2732_v59  ;;  %v2287_v1 = vadd.f32 %v4111_v53, %v2019_v61  ;;  %v2350_v3 = vmax.f32 %v2286_v60, 0.0 }
 0x219   : > { %v2796_v2 = vadd.f32 %v2795_v0, %v2733_v63  ;;  %v2351_v4 = vmax.f32 %v2287_v1, 0.0 }
 0x21b   : > { %v2383_v5 = vpack.c.bf16 %v2351_v4, %v2350_v3 }
 0x21d   : > { %3438 = vst [vmem:[%s4022_s27 + $0xf8] sm:$0xff] %v2383_v5   ;;  %v2734_v6 = vunpack.c.l.bf16 %v2383_v5  ;;  %v2735_v7 = vunpack.c.h.bf16 %v2383_v5 }
 0x21f   : > { %v2797_v8 = vadd.f32 %v2796_v2, %v2734_v6 }
 0x221   : > { %v2798_v9 = vadd.f32 %v2797_v8, %v2735_v7 }
 0x223   : > { %v2799_v10 = vrot.slane %v2798_v9, 4 }
 0x225   : > { %v2800_v11 = vadd.f32 %v2799_v10, %v2798_v9 }
 0x227   : > { %v2801_v12 = vrot.slane %v2800_v11, 2 }
 0x229   : > { %v2802_v13 = vadd.f32 %v2801_v12, %v2800_v11 }
 0x22b   : > { %v2803_v14 = vrot.slane %v2802_v13, 1 }
 0x22d   : > { %v2804_v53 = vadd.f32 %v2803_v14, %v2802_v13 }
 0x22f   : > { %2805 = vst [vmem:[%s281_s6] sm:$0xff] %v2804_v53 }
 0x230 PF: > { %s15_s17 = sadd.s32 1, %s3711_s17   ;;  %s4155_s15 = smov %s3707_s16 }
 0x231   : > { %p12_p5 = scmp.ge.s32.totalorder %s15_s17, 4   ;;  %s4156_s16 = smov %s4158_s18 }
 0x233   :  { %14 = sbr.rel (!%p12_p5) target bundleno = 2 (0x2), region = 83 }

</bundles_post_ra>
